<compile_context>
chip_gen: v7x
topology: tpu7x:2x2x1
jax: 0.10.0
libtpu: 0.0.40
codegen_flags: <defaults>
</compile_context>

<pallas_src>
import functools

import numpy as np
import jax
import jax.numpy as jnp
from jax import lax
from jax.experimental import pallas as pl
from jax.experimental.pallas import tpu as pltpu


# ----------------------------------------------------------------------------
# physics helpers (parameter init only -- plain numpy)
# ----------------------------------------------------------------------------
def get_beta2(D, Fc):
    c_kms = 299792458.0 / 1e3
    lamb = c_kms / Fc
    return -(D * lamb ** 2) / (2.0 * np.pi * c_kms)


def get_beta1(D, Fc, Fi):
    return 2.0 * np.pi * (Fc - Fi) * get_beta2(D, Fc)


def dispersion_kernel_np(dz, dtaps, Fs, beta2, beta1, domain="time"):
    omega = 2.0 * np.pi * np.fft.fftfreq(dtaps, 1.0 / Fs)
    k = np.exp(-1j * beta1 * omega * dz - 1j * (beta2 / 2.0) * omega ** 2 * dz)
    if domain == "freq":
        return k
    return np.fft.fftshift(np.fft.ifft(k))


# ----------------------------------------------------------------------------
# Fused Pallas kernel: all DBP steps (dispersion conv + SNSE nonlinear phase)
# for one lane-dense time tile.  Row layout (sublanes), R = 2*nmodes*b_pad:
#   r = half*(nmodes*b_pad) + mode*b_pad + batch,  half 0 = re, half 1 = im.
# ----------------------------------------------------------------------------
def _snse_dbp_kernel(hdr_ref, hdi_ref, hn_ref, p_ref, x_hbm,
                     y_ref, u_ref, t_ref, sem,
                     *, nsteps, nmodes, b_pad, tile_in, tile_out, dtaps, ntaps):
    rows = nmodes * b_pad                      # size of one (re or im) half
    R = 2 * rows

    # fetch this tile's halo'd input window (lane-aligned offset) into VMEM
    start = pl.multiple_of(pl.program_id(0) * tile_out, 128)
    cp = pltpu.make_async_copy(x_hbm.at[:, pl.ds(start, tile_in)], u_ref, sem.at[0])
    cp.start()
    cp.wait()

    # -1 on the re half, +1 on the im half (complex combine / rotation signs)
    sgn = jnp.where(lax.broadcasted_iota(jnp.int32, (R, 1), 0) < rows,
                    -1.0, 1.0).astype(jnp.float32)
    p_vec = p_ref[...]                         # [R, 1] per-row launch power

    t = tile_in
    for s in range(nsteps):                    # static: fully unrolled over steps
        # ---- complex "valid" convolution with per-step dispersion taps -----
        l1 = t - dtaps + 1
        w0 = u_ref[:, 0:l1]                    # window loads come from VMEM
        acc_a = w0 * hdr_ref[s * dtaps]        # sum_k s_k * hr_k   (re|im stacked)
        acc_b = w0 * hdi_ref[s * dtaps]        # sum_k s_k * hi_k
        for k in range(1, dtaps):
            wk = u_ref[:, k:k + l1]            # one load feeds both MACs
            acc_a = acc_a + wk * hdr_ref[s * dtaps + k]
            acc_b = acc_b + wk * hdi_ref[s * dtaps + k]
        # re' = A_re - B_im ; im' = A_im + B_re  -> one half-swap roll + FMA
        u_c = acc_a + sgn * pltpu.roll(acc_b, rows, axis=0)       # [R, l1]

        # ---- SNSE nonlinear phase: phi = P_b * (h_nl (x) sum_m |u_m|^2) ----
        sq = u_c * u_c
        mag = sq + pltpu.roll(sq, rows, axis=0)   # |u_{b,m}|^2, same in both halves
        tot = mag
        for j in range(1, nmodes):                # sum over the batch's modes:
            # mode-major layout => a cyclic roll by j*b_pad stays in the same
            # batch and just steps the mode index (no masks, direction-agnostic)
            tot = tot + pltpu.roll(mag, j * b_pad, axis=0)
        t_ref[:, 0:l1] = tot                      # tap windows read back as loads

        mo = l1 - ntaps + 1
        phi = t_ref[:, 0:mo] * hn_ref[s * ntaps]
        for k in range(1, ntaps):
            phi = phi + t_ref[:, k:k + mo] * hn_ref[s * ntaps + k]
        phi = phi * p_vec                          # scale by launch power

        c = jnp.cos(phi)                           # EUP transcendentals
        sn = jnp.sin(phi)
        half = ntaps // 2
        uc = u_c[:, half:half + mo]
        # u * exp(1j*phi): re' = re*c - im*sn ; im' = im*c + re*sn
        u_new = uc * c + (sgn * pltpu.roll(uc, rows, axis=0)) * sn
        u_ref[:, 0:mo] = u_new                     # carry signal to next step
        t = mo

    # after nsteps the remaining valid length equals the output tile exactly
    y_ref[...] = u_ref[:, 0:tile_out]


def snse_dbp_pallas(xr, xi, hd_r, hd_i, hn, P, *, tile_out_hint=4096):
    """xr/xi: [Nmodes, B, T] f32 (mode-major); hd_*: [step, dtaps]; hn: [step, ntaps]; P: [B]."""
    nmodes, B, T = xr.shape
    step, dtaps = hd_r.shape
    ntaps = hn.shape[1]
    shrink = (dtaps - 1) + (ntaps - 1)
    halo = step * shrink
    mout = T - halo
    assert mout > 0, "signal too short for the requested DBP configuration"

    # pad the batch so the stacked row count (2*Nmodes*B_pad) fills 8 sublanes
    b_pad = B
    while (2 * nmodes * b_pad) % 8 != 0:
        b_pad += 1
    rows = nmodes * b_pad
    R = 2 * rows

    def rup128(v):
        return ((int(v) + 127) // 128) * 128

    # lane-dense output tile: >= 4*halo (bounds redundant halo recompute),
    # >= hint, never more than needed, capped to keep live values small.
    mout_r = rup128(mout)
    tile_out = rup128(max(tile_out_hint, 4 * halo))
    tile_out = max(128, min(tile_out, mout_r, 16384))
    n_tiles = int(pl.cdiv(mout, tile_out))
    tile_in = tile_out + halo
    l1_max = tile_in - dtaps + 1

    # pack rows: re half on top of im half, mode-major within each half
    if b_pad > B:
        xr = jnp.pad(xr, ((0, 0), (0, b_pad - B), (0, 0)))
        xi = jnp.pad(xi, ((0, 0), (0, b_pad - B), (0, 0)))
        P = jnp.pad(P, (0, b_pad - B))
    x_pack = jnp.concatenate([xr.reshape(rows, T), xi.reshape(rows, T)], axis=0)
    t_pad = (n_tiles - 1) * tile_out + tile_in
    if t_pad > T:
        x_pack = jnp.pad(x_pack, ((0, 0), (0, t_pad - T)))
    # per-row launch power: row r -> P[r % b_pad]
    p_rows = jnp.tile(P.astype(jnp.float32), 2 * nmodes).reshape(R, 1)

    kernel = functools.partial(
        _snse_dbp_kernel, nsteps=step, nmodes=nmodes, b_pad=b_pad,
        tile_in=tile_in, tile_out=tile_out, dtaps=dtaps, ntaps=ntaps)

    smem = pl.BlockSpec(memory_space=pltpu.MemorySpace.SMEM)
    y_pack = pl.pallas_call(
        kernel,
        out_shape=jax.ShapeDtypeStruct((R, n_tiles * tile_out), jnp.float32),
        grid_spec=pltpu.PrefetchScalarGridSpec(
            num_scalar_prefetch=0,
            grid=(n_tiles,),
            in_specs=[
                smem,                                        # hd_r (flat, SMEM)
                smem,                                        # hd_i (flat, SMEM)
                smem,                                        # hn   (flat, SMEM)
                pl.BlockSpec((R, 1), lambda i: (0, 0)),      # per-row power
                pl.BlockSpec(memory_space=pl.ANY),           # packed signal (HBM)
            ],
            out_specs=pl.BlockSpec((R, tile_out), lambda i: (0, i)),
            scratch_shapes=[
                pltpu.VMEM((R, tile_in), jnp.float32),       # signal buffer
                pltpu.VMEM((R, l1_max), jnp.float32),        # filtered-power buffer
                pltpu.SemaphoreType.DMA((1,)),
            ],
        ),
        compiler_params=pltpu.CompilerParams(
            dimension_semantics=("parallel",)),
    )(hd_r.reshape(-1), hd_i.reshape(-1), hn.reshape(-1), p_rows, x_pack)

    y = y_pack[:, :mout]
    yr = y[:rows].reshape(nmodes, b_pad, mout)[:, :B]
    yi = y[rows:].reshape(nmodes, b_pad, mout)[:, :B]
    return yr, yi                                   # each [Nmodes, B, mout]


# ----------------------------------------------------------------------------
# Module wrapper (parameter init + glue)
# ----------------------------------------------------------------------------
class EqSNSEDBPPallas:
    def __init__(self, Nmodes, step, dtaps=33, ntaps=17, d_share=False,
                 n_share=False, Fs=80e9, D=16.5,
                 Fc=299792458 / 1.55e-06, Fi=299792458 / 1.55e-06,
                 L=2000000.0, gamma=0.0016567):
        self.Nmodes, self.step = Nmodes, step
        self.Fs, self.D, self.Fc, self.Fi, self.L, self.gamma = Fs, D, Fc, Fi, L, gamma
        self.dtaps, self.ntaps = dtaps, ntaps
        self.d_share, self.n_share = d_share, n_share
        self.overlaps = ((dtaps - 1) * 2 + ntaps - 1) * step
        self.beta2 = get_beta2(D, Fc) / 1000.0
        self.beta1 = get_beta1(D, Fc, Fi) / 1000.0

        dz = L / step
        d_num = 1 if d_share else step
        n_num = 1 if n_share else step

        # per-step time-domain dispersion filter init (learnable in torch).
        # TODO(synk): tap orientation matches the in-file jnp reference; verify
        #             against torch conv1d (correlation) flipping if exact
        #             end-to-end parity with the PyTorch weights is required.
        hd = dispersion_kernel_np(-dz, dtaps, Fs, self.beta2, self.beta1,
                                  "time").astype(np.complex64)
        self.hd_r = jnp.asarray(np.tile(hd.real[None, :], (d_num, 1)), jnp.float32)
        self.hd_i = jnp.asarray(np.tile(hd.imag[None, :], (d_num, 1)), jnp.float32)

        # per-step SNSE nonlinear filter init: Hamming window normalized so that
        # sum(h_nl) = (8/9)*gamma*dz*1e-3 ; small deterministic per-step skew.
        win = np.hamming(ntaps)
        base = win / win.sum() * (8.0 / 9.0) * gamma * dz * 1e-3
        self.hn = jnp.asarray(
            np.stack([base * (1.0 + 0.05 * i) for i in range(n_num)]), jnp.float32)

    # frequency-domain full-link dispersion compensation (plain JAX glue)
    def _disp_freq(self, x):
        M = x.shape[1]
        omega = 2.0 * np.pi * np.fft.fftfreq(M, 1.0 / self.Fs)
        kern = np.exp(-1j * self.beta1 * omega * self.L
                      - 1j * (self.beta2 / 2.0) * omega ** 2 * self.L)
        kern = jnp.asarray(kern.astype(np.complex64))
        x = jnp.fft.ifft(jnp.fft.fft(x, axis=1) * kern[None, :, None], axis=1)
        d = ((self.dtaps - 1) * self.step + 1) // 2
        return x[:, d:-d, :]

    def _power(self, task_info):
        # get_power: 10^(P_dBm/10) / Nmodes
        return (10.0 ** (task_info[:, 0] / 10.0) / self.Nmodes).astype(jnp.float32)

    def _expanded_filters(self):
        hd_r, hd_i, hn = self.hd_r, self.hd_i, self.hn
        if hd_r.shape[0] != self.step:     # d_share
            hd_r = jnp.broadcast_to(hd_r, (self.step, self.dtaps))
            hd_i = jnp.broadcast_to(hd_i, (self.step, self.dtaps))
        if hn.shape[0] != self.step:       # n_share
            hn = jnp.broadcast_to(hn, (self.step, self.ntaps))
        return hd_r, hd_i, hn

    def __call__(self, x, task_info):
        x = self._disp_freq(x)                                 # [B, M', Nmodes] c64
        P = self._power(task_info)
        # mode-major packing: [Nmodes, B, T]
        xr = jnp.transpose(jnp.real(x), (2, 0, 1)).astype(jnp.float32)
        xi = jnp.transpose(jnp.imag(x), (2, 0, 1)).astype(jnp.float32)
        hd_r, hd_i, hn = self._expanded_filters()
        yr, yi = snse_dbp_pallas(xr, xi, hd_r, hd_i, hn, P)    # [Nmodes, B, Mout]
        y = (yr + 1j * yi).astype(jnp.complex64)
        return jnp.transpose(y, (1, 2, 0))                     # [B, Mout, Nmodes]

    # pure-jnp reference of the fused pipeline (same op ordering) for self-check
    def reference(self, x, task_info):
        x = self._disp_freq(x)
        P = self._power(task_info)
        xr = jnp.transpose(jnp.real(x), (0, 2, 1)).astype(jnp.float32)
        xi = jnp.transpose(jnp.imag(x), (0, 2, 1)).astype(jnp.float32)
        hd_r_all, hd_i_all, hn_all = self._expanded_filters()
        for i in range(self.step):
            hdr, hdi, hn = hd_r_all[i], hd_i_all[i], hn_all[i]
            T = xr.shape[-1]
            L1 = T - self.dtaps + 1
            Mout = L1 - self.ntaps + 1
            ur = jnp.zeros(xr.shape[:-1] + (L1,), jnp.float32)
            ui = jnp.zeros_like(ur)
            for k in range(self.dtaps):
                ur = ur + xr[..., k:k + L1] * hdr[k] - xi[..., k:k + L1] * hdi[k]
                ui = ui + xr[..., k:k + L1] * hdi[k] + xi[..., k:k + L1] * hdr[k]
            pw = jnp.sum(ur * ur + ui * ui, axis=1)            # [B, L1]
            phi = jnp.zeros((xr.shape[0], Mout), jnp.float32)
            for k in range(self.ntaps):
                phi = phi + hn[k] * pw[:, k:k + Mout]
            phi = phi * P[:, None]
            c, s = jnp.cos(phi)[:, None, :], jnp.sin(phi)[:, None, :]
            half = self.ntaps // 2
            ucr, uci = ur[..., half:half + Mout], ui[..., half:half + Mout]
            xr, xi = ucr * c - uci * s, ucr * s + uci * c
        y = (xr + 1j * xi).astype(jnp.complex64)
        return jnp.transpose(y, (0, 2, 1))


# ----------------------------------------------------------------------------
if __name__ == "__main__":
    B, M, Nmodes = 2, 384, 2
    step, dtaps, ntaps = 2, 33, 17

    key = jax.random.PRNGKey(0)
    k1, k2 = jax.random.split(key)
    x = ((jax.random.normal(k1, (B, M, Nmodes), jnp.float32)
          + 1j * jax.random.normal(k2, (B, M, Nmodes), jnp.float32))
         / np.sqrt(2.0)).astype(jnp.complex64)
    task_info = jnp.array([[0.0, 0.0, 80e9, 1.0],
                           [2.0, 0.0, 80e9, 1.0]], jnp.float32)

    model = EqSNSEDBPPallas(Nmodes=Nmodes, step=step, dtaps=dtaps, ntaps=ntaps)

    y = jax.block_until_ready(model(x, task_info))
    assert y.shape == (B, M - model.overlaps, Nmodes), y.shape

    y_ref = jax.block_until_ready(model.reference(x, task_info))
    np.testing.assert_allclose(np.asarray(y), np.asarray(y_ref),
                               rtol=2e-3, atol=2e-3)
    print("KERNEL_OK")
</pallas_src>

<mosaic_0001>
module attributes {stable_mosaic.version = 11 : i64} {
  func.func @_snse_dbp_kernel(%arg0: i32, %arg1: memref<66xf32, #tpu.memory_space<smem>>, %arg2: memref<66xf32, #tpu.memory_space<smem>>, %arg3: memref<34xf32, #tpu.memory_space<smem>>, %arg4: memref<8x1xf32, #tpu.memory_space<vmem>>, %arg5: memref<8x352xf32, #tpu.memory_space<any>>, %arg6: memref<8x256xf32, #tpu.memory_space<vmem>>, %arg7: memref<8x352xf32, #tpu.memory_space<vmem>>, %arg8: memref<8x320xf32, #tpu.memory_space<vmem>>, %arg9: memref<1x!tpu.dma_semaphore, #tpu.memory_space<semaphore_mem>>) attributes {dimension_semantics = [#tpu.dimension_semantics<parallel>], iteration_bounds = array<i64: 1>, scalar_prefetch = 0 : i64, scratch_operands = 3 : i64, tpu.core_type = #tpu.core_type<tc>, window_params = [{transform_indices = @transform_0, window_bounds = array<i64: 66>}, {transform_indices = @transform_1, window_bounds = array<i64: 66>}, {transform_indices = @transform_2, window_bounds = array<i64: 34>}, {pipeline_mode = #tpu.pipeline_mode<synchronous>, transform_indices = @transform_3, window_bounds = array<i64: 8, 1>}, {}, {transform_indices = @transform_5, window_bounds = array<i64: 8, 256>}]} {
    %c256_i32 = arith.constant 256 : i32
    %0 = arith.muli %arg0, %c256_i32 : i32
    %1 = tpu.assume_multiple %0, 128 : i32
    %c0_i32 = arith.constant 0 : i32
    %c0_i32_0 = arith.constant 0 : i32
    %2 = tpu.memref_slice %arg5[%c0_i32_0, %1] : memref<8x352xf32, #tpu.memory_space<any>> -> memref<8x352xf32, #tpu.memory_space<any>>
    %3 = tpu.memref_slice %arg9[%c0_i32] : memref<1x!tpu.dma_semaphore, #tpu.memory_space<semaphore_mem>> -> memref<1x!tpu.dma_semaphore, #tpu.memory_space<semaphore_mem>>
    %4 = tpu.memref_squeeze %3 : memref<1x!tpu.dma_semaphore, #tpu.memory_space<semaphore_mem>> -> memref<!tpu.dma_semaphore, #tpu.memory_space<semaphore_mem>>
    tpu.enqueue_dma source(%2 : memref<8x352xf32, #tpu.memory_space<any>>) target(%arg7 : memref<8x352xf32, #tpu.memory_space<vmem>>) target_semaphore(%4 : memref<!tpu.dma_semaphore, #tpu.memory_space<semaphore_mem>>)
    %c0_i32_1 = arith.constant 0 : i32
    %c0_i32_2 = arith.constant 0 : i32
    %5 = tpu.memref_slice %arg5[%c0_i32_2, %1] : memref<8x352xf32, #tpu.memory_space<any>> -> memref<8x352xf32, #tpu.memory_space<any>>
    %6 = tpu.memref_slice %arg9[%c0_i32_1] : memref<1x!tpu.dma_semaphore, #tpu.memory_space<semaphore_mem>> -> memref<1x!tpu.dma_semaphore, #tpu.memory_space<semaphore_mem>>
    %7 = tpu.memref_squeeze %6 : memref<1x!tpu.dma_semaphore, #tpu.memory_space<semaphore_mem>> -> memref<!tpu.dma_semaphore, #tpu.memory_space<semaphore_mem>>
    tpu.wait_dma2 semaphore(%7 : memref<!tpu.dma_semaphore, #tpu.memory_space<semaphore_mem>>) src(%5 : memref<8x352xf32, #tpu.memory_space<any>>) dst(%arg7 : memref<8x352xf32, #tpu.memory_space<vmem>>)
    %8 = tpu.iota {dimensions = array<i32: 0>} : vector<8x1xi32>
    %c4_i32 = arith.constant 4 : i32
    %9 = vector.broadcast %c4_i32 : i32 to vector<8x1xi32>
    %10 = arith.cmpi slt, %8, %9 : vector<8x1xi32>
    %cst = arith.constant -1.000000e+00 : f32
    %cst_3 = arith.constant 1.000000e+00 : f32
    %11 = vector.broadcast %cst : f32 to vector<8x1xf32>
    %12 = vector.broadcast %cst_3 : f32 to vector<8x1xf32>
    %13 = arith.select %10, %11, %12 : vector<8x1xi1>, vector<8x1xf32>
    %c0 = arith.constant 0 : index
    %c0_4 = arith.constant 0 : index
    %14 = vector.load %arg4[%c0, %c0_4] : memref<8x1xf32, #tpu.memory_space<vmem>>, vector<8x1xf32>
    %c0_5 = arith.constant 0 : index
    %c0_6 = arith.constant 0 : index
    %15 = vector.load %arg7[%c0_5, %c0_6] : memref<8x352xf32, #tpu.memory_space<vmem>>, vector<8x320xf32>
    %c0_7 = arith.constant 0 : index
    %16 = memref.load %arg1[%c0_7] : memref<66xf32, #tpu.memory_space<smem>>
    %17 = vector.broadcast %16 : f32 to vector<8x320xf32>
    %18 = arith.mulf %15, %17 : vector<8x320xf32>
    %c0_8 = arith.constant 0 : index
    %19 = memref.load %arg2[%c0_8] : memref<66xf32, #tpu.memory_space<smem>>
    %20 = vector.broadcast %19 : f32 to vector<8x320xf32>
    %21 = arith.mulf %15, %20 : vector<8x320xf32>
    %c0_9 = arith.constant 0 : index
    %c1 = arith.constant 1 : index
    %22 = vector.load %arg7[%c0_9, %c1] : memref<8x352xf32, #tpu.memory_space<vmem>>, vector<8x320xf32>
    %c1_10 = arith.constant 1 : index
    %23 = memref.load %arg1[%c1_10] : memref<66xf32, #tpu.memory_space<smem>>
    %24 = vector.broadcast %23 : f32 to vector<8x320xf32>
    %25 = arith.mulf %22, %24 : vector<8x320xf32>
    %26 = arith.addf %18, %25 : vector<8x320xf32>
    %c1_11 = arith.constant 1 : index
    %27 = memref.load %arg2[%c1_11] : memref<66xf32, #tpu.memory_space<smem>>
    %28 = vector.broadcast %27 : f32 to vector<8x320xf32>
    %29 = arith.mulf %22, %28 : vector<8x320xf32>
    %30 = arith.addf %21, %29 : vector<8x320xf32>
    %c0_12 = arith.constant 0 : index
    %c2 = arith.constant 2 : index
    %31 = vector.load %arg7[%c0_12, %c2] : memref<8x352xf32, #tpu.memory_space<vmem>>, vector<8x320xf32>
    %c2_13 = arith.constant 2 : index
    %32 = memref.load %arg1[%c2_13] : memref<66xf32, #tpu.memory_space<smem>>
    %33 = vector.broadcast %32 : f32 to vector<8x320xf32>
    %34 = arith.mulf %31, %33 : vector<8x320xf32>
    %35 = arith.addf %26, %34 : vector<8x320xf32>
    %c2_14 = arith.constant 2 : index
    %36 = memref.load %arg2[%c2_14] : memref<66xf32, #tpu.memory_space<smem>>
    %37 = vector.broadcast %36 : f32 to vector<8x320xf32>
    %38 = arith.mulf %31, %37 : vector<8x320xf32>
    %39 = arith.addf %30, %38 : vector<8x320xf32>
    %c0_15 = arith.constant 0 : index
    %c3 = arith.constant 3 : index
    %40 = vector.load %arg7[%c0_15, %c3] : memref<8x352xf32, #tpu.memory_space<vmem>>, vector<8x320xf32>
    %c3_16 = arith.constant 3 : index
    %41 = memref.load %arg1[%c3_16] : memref<66xf32, #tpu.memory_space<smem>>
    %42 = vector.broadcast %41 : f32 to vector<8x320xf32>
    %43 = arith.mulf %40, %42 : vector<8x320xf32>
    %44 = arith.addf %35, %43 : vector<8x320xf32>
    %c3_17 = arith.constant 3 : index
    %45 = memref.load %arg2[%c3_17] : memref<66xf32, #tpu.memory_space<smem>>
    %46 = vector.broadcast %45 : f32 to vector<8x320xf32>
    %47 = arith.mulf %40, %46 : vector<8x320xf32>
    %48 = arith.addf %39, %47 : vector<8x320xf32>
    %c0_18 = arith.constant 0 : index
    %c4 = arith.constant 4 : index
    %49 = vector.load %arg7[%c0_18, %c4] : memref<8x352xf32, #tpu.memory_space<vmem>>, vector<8x320xf32>
    %c4_19 = arith.constant 4 : index
    %50 = memref.load %arg1[%c4_19] : memref<66xf32, #tpu.memory_space<smem>>
    %51 = vector.broadcast %50 : f32 to vector<8x320xf32>
    %52 = arith.mulf %49, %51 : vector<8x320xf32>
    %53 = arith.addf %44, %52 : vector<8x320xf32>
    %c4_20 = arith.constant 4 : index
    %54 = memref.load %arg2[%c4_20] : memref<66xf32, #tpu.memory_space<smem>>
    %55 = vector.broadcast %54 : f32 to vector<8x320xf32>
    %56 = arith.mulf %49, %55 : vector<8x320xf32>
    %57 = arith.addf %48, %56 : vector<8x320xf32>
    %c0_21 = arith.constant 0 : index
    %c5 = arith.constant 5 : index
    %58 = vector.load %arg7[%c0_21, %c5] : memref<8x352xf32, #tpu.memory_space<vmem>>, vector<8x320xf32>
    %c5_22 = arith.constant 5 : index
    %59 = memref.load %arg1[%c5_22] : memref<66xf32, #tpu.memory_space<smem>>
    %60 = vector.broadcast %59 : f32 to vector<8x320xf32>
    %61 = arith.mulf %58, %60 : vector<8x320xf32>
    %62 = arith.addf %53, %61 : vector<8x320xf32>
    %c5_23 = arith.constant 5 : index
    %63 = memref.load %arg2[%c5_23] : memref<66xf32, #tpu.memory_space<smem>>
    %64 = vector.broadcast %63 : f32 to vector<8x320xf32>
    %65 = arith.mulf %58, %64 : vector<8x320xf32>
    %66 = arith.addf %57, %65 : vector<8x320xf32>
    %c0_24 = arith.constant 0 : index
    %c6 = arith.constant 6 : index
    %67 = vector.load %arg7[%c0_24, %c6] : memref<8x352xf32, #tpu.memory_space<vmem>>, vector<8x320xf32>
    %c6_25 = arith.constant 6 : index
    %68 = memref.load %arg1[%c6_25] : memref<66xf32, #tpu.memory_space<smem>>
    %69 = vector.broadcast %68 : f32 to vector<8x320xf32>
    %70 = arith.mulf %67, %69 : vector<8x320xf32>
    %71 = arith.addf %62, %70 : vector<8x320xf32>
    %c6_26 = arith.constant 6 : index
    %72 = memref.load %arg2[%c6_26] : memref<66xf32, #tpu.memory_space<smem>>
    %73 = vector.broadcast %72 : f32 to vector<8x320xf32>
    %74 = arith.mulf %67, %73 : vector<8x320xf32>
    %75 = arith.addf %66, %74 : vector<8x320xf32>
    %c0_27 = arith.constant 0 : index
    %c7 = arith.constant 7 : index
    %76 = vector.load %arg7[%c0_27, %c7] : memref<8x352xf32, #tpu.memory_space<vmem>>, vector<8x320xf32>
    %c7_28 = arith.constant 7 : index
    %77 = memref.load %arg1[%c7_28] : memref<66xf32, #tpu.memory_space<smem>>
    %78 = vector.broadcast %77 : f32 to vector<8x320xf32>
    %79 = arith.mulf %76, %78 : vector<8x320xf32>
    %80 = arith.addf %71, %79 : vector<8x320xf32>
    %c7_29 = arith.constant 7 : index
    %81 = memref.load %arg2[%c7_29] : memref<66xf32, #tpu.memory_space<smem>>
    %82 = vector.broadcast %81 : f32 to vector<8x320xf32>
    %83 = arith.mulf %76, %82 : vector<8x320xf32>
    %84 = arith.addf %75, %83 : vector<8x320xf32>
    %c0_30 = arith.constant 0 : index
    %c8 = arith.constant 8 : index
    %85 = vector.load %arg7[%c0_30, %c8] : memref<8x352xf32, #tpu.memory_space<vmem>>, vector<8x320xf32>
    %c8_31 = arith.constant 8 : index
    %86 = memref.load %arg1[%c8_31] : memref<66xf32, #tpu.memory_space<smem>>
    %87 = vector.broadcast %86 : f32 to vector<8x320xf32>
    %88 = arith.mulf %85, %87 : vector<8x320xf32>
    %89 = arith.addf %80, %88 : vector<8x320xf32>
    %c8_32 = arith.constant 8 : index
    %90 = memref.load %arg2[%c8_32] : memref<66xf32, #tpu.memory_space<smem>>
    %91 = vector.broadcast %90 : f32 to vector<8x320xf32>
    %92 = arith.mulf %85, %91 : vector<8x320xf32>
    %93 = arith.addf %84, %92 : vector<8x320xf32>
    %c0_33 = arith.constant 0 : index
    %c9 = arith.constant 9 : index
    %94 = vector.load %arg7[%c0_33, %c9] : memref<8x352xf32, #tpu.memory_space<vmem>>, vector<8x320xf32>
    %c9_34 = arith.constant 9 : index
    %95 = memref.load %arg1[%c9_34] : memref<66xf32, #tpu.memory_space<smem>>
    %96 = vector.broadcast %95 : f32 to vector<8x320xf32>
    %97 = arith.mulf %94, %96 : vector<8x320xf32>
    %98 = arith.addf %89, %97 : vector<8x320xf32>
    %c9_35 = arith.constant 9 : index
    %99 = memref.load %arg2[%c9_35] : memref<66xf32, #tpu.memory_space<smem>>
    %100 = vector.broadcast %99 : f32 to vector<8x320xf32>
    %101 = arith.mulf %94, %100 : vector<8x320xf32>
    %102 = arith.addf %93, %101 : vector<8x320xf32>
    %c0_36 = arith.constant 0 : index
    %c10 = arith.constant 10 : index
    %103 = vector.load %arg7[%c0_36, %c10] : memref<8x352xf32, #tpu.memory_space<vmem>>, vector<8x320xf32>
    %c10_37 = arith.constant 10 : index
    %104 = memref.load %arg1[%c10_37] : memref<66xf32, #tpu.memory_space<smem>>
    %105 = vector.broadcast %104 : f32 to vector<8x320xf32>
    %106 = arith.mulf %103, %105 : vector<8x320xf32>
    %107 = arith.addf %98, %106 : vector<8x320xf32>
    %c10_38 = arith.constant 10 : index
    %108 = memref.load %arg2[%c10_38] : memref<66xf32, #tpu.memory_space<smem>>
    %109 = vector.broadcast %108 : f32 to vector<8x320xf32>
    %110 = arith.mulf %103, %109 : vector<8x320xf32>
    %111 = arith.addf %102, %110 : vector<8x320xf32>
    %c0_39 = arith.constant 0 : index
    %c11 = arith.constant 11 : index
    %112 = vector.load %arg7[%c0_39, %c11] : memref<8x352xf32, #tpu.memory_space<vmem>>, vector<8x320xf32>
    %c11_40 = arith.constant 11 : index
    %113 = memref.load %arg1[%c11_40] : memref<66xf32, #tpu.memory_space<smem>>
    %114 = vector.broadcast %113 : f32 to vector<8x320xf32>
    %115 = arith.mulf %112, %114 : vector<8x320xf32>
    %116 = arith.addf %107, %115 : vector<8x320xf32>
    %c11_41 = arith.constant 11 : index
    %117 = memref.load %arg2[%c11_41] : memref<66xf32, #tpu.memory_space<smem>>
    %118 = vector.broadcast %117 : f32 to vector<8x320xf32>
    %119 = arith.mulf %112, %118 : vector<8x320xf32>
    %120 = arith.addf %111, %119 : vector<8x320xf32>
    %c0_42 = arith.constant 0 : index
    %c12 = arith.constant 12 : index
    %121 = vector.load %arg7[%c0_42, %c12] : memref<8x352xf32, #tpu.memory_space<vmem>>, vector<8x320xf32>
    %c12_43 = arith.constant 12 : index
    %122 = memref.load %arg1[%c12_43] : memref<66xf32, #tpu.memory_space<smem>>
    %123 = vector.broadcast %122 : f32 to vector<8x320xf32>
    %124 = arith.mulf %121, %123 : vector<8x320xf32>
    %125 = arith.addf %116, %124 : vector<8x320xf32>
    %c12_44 = arith.constant 12 : index
    %126 = memref.load %arg2[%c12_44] : memref<66xf32, #tpu.memory_space<smem>>
    %127 = vector.broadcast %126 : f32 to vector<8x320xf32>
    %128 = arith.mulf %121, %127 : vector<8x320xf32>
    %129 = arith.addf %120, %128 : vector<8x320xf32>
    %c0_45 = arith.constant 0 : index
    %c13 = arith.constant 13 : index
    %130 = vector.load %arg7[%c0_45, %c13] : memref<8x352xf32, #tpu.memory_space<vmem>>, vector<8x320xf32>
    %c13_46 = arith.constant 13 : index
    %131 = memref.load %arg1[%c13_46] : memref<66xf32, #tpu.memory_space<smem>>
    %132 = vector.broadcast %131 : f32 to vector<8x320xf32>
    %133 = arith.mulf %130, %132 : vector<8x320xf32>
    %134 = arith.addf %125, %133 : vector<8x320xf32>
    %c13_47 = arith.constant 13 : index
    %135 = memref.load %arg2[%c13_47] : memref<66xf32, #tpu.memory_space<smem>>
    %136 = vector.broadcast %135 : f32 to vector<8x320xf32>
    %137 = arith.mulf %130, %136 : vector<8x320xf32>
    %138 = arith.addf %129, %137 : vector<8x320xf32>
    %c0_48 = arith.constant 0 : index
    %c14 = arith.constant 14 : index
    %139 = vector.load %arg7[%c0_48, %c14] : memref<8x352xf32, #tpu.memory_space<vmem>>, vector<8x320xf32>
    %c14_49 = arith.constant 14 : index
    %140 = memref.load %arg1[%c14_49] : memref<66xf32, #tpu.memory_space<smem>>
    %141 = vector.broadcast %140 : f32 to vector<8x320xf32>
    %142 = arith.mulf %139, %141 : vector<8x320xf32>
    %143 = arith.addf %134, %142 : vector<8x320xf32>
    %c14_50 = arith.constant 14 : index
    %144 = memref.load %arg2[%c14_50] : memref<66xf32, #tpu.memory_space<smem>>
    %145 = vector.broadcast %144 : f32 to vector<8x320xf32>
    %146 = arith.mulf %139, %145 : vector<8x320xf32>
    %147 = arith.addf %138, %146 : vector<8x320xf32>
    %c0_51 = arith.constant 0 : index
    %c15 = arith.constant 15 : index
    %148 = vector.load %arg7[%c0_51, %c15] : memref<8x352xf32, #tpu.memory_space<vmem>>, vector<8x320xf32>
    %c15_52 = arith.constant 15 : index
    %149 = memref.load %arg1[%c15_52] : memref<66xf32, #tpu.memory_space<smem>>
    %150 = vector.broadcast %149 : f32 to vector<8x320xf32>
    %151 = arith.mulf %148, %150 : vector<8x320xf32>
    %152 = arith.addf %143, %151 : vector<8x320xf32>
    %c15_53 = arith.constant 15 : index
    %153 = memref.load %arg2[%c15_53] : memref<66xf32, #tpu.memory_space<smem>>
    %154 = vector.broadcast %153 : f32 to vector<8x320xf32>
    %155 = arith.mulf %148, %154 : vector<8x320xf32>
    %156 = arith.addf %147, %155 : vector<8x320xf32>
    %c0_54 = arith.constant 0 : index
    %c16 = arith.constant 16 : index
    %157 = vector.load %arg7[%c0_54, %c16] : memref<8x352xf32, #tpu.memory_space<vmem>>, vector<8x320xf32>
    %c16_55 = arith.constant 16 : index
    %158 = memref.load %arg1[%c16_55] : memref<66xf32, #tpu.memory_space<smem>>
    %159 = vector.broadcast %158 : f32 to vector<8x320xf32>
    %160 = arith.mulf %157, %159 : vector<8x320xf32>
    %161 = arith.addf %152, %160 : vector<8x320xf32>
    %c16_56 = arith.constant 16 : index
    %162 = memref.load %arg2[%c16_56] : memref<66xf32, #tpu.memory_space<smem>>
    %163 = vector.broadcast %162 : f32 to vector<8x320xf32>
    %164 = arith.mulf %157, %163 : vector<8x320xf32>
    %165 = arith.addf %156, %164 : vector<8x320xf32>
    %c0_57 = arith.constant 0 : index
    %c17 = arith.constant 17 : index
    %166 = vector.load %arg7[%c0_57, %c17] : memref<8x352xf32, #tpu.memory_space<vmem>>, vector<8x320xf32>
    %c17_58 = arith.constant 17 : index
    %167 = memref.load %arg1[%c17_58] : memref<66xf32, #tpu.memory_space<smem>>
    %168 = vector.broadcast %167 : f32 to vector<8x320xf32>
    %169 = arith.mulf %166, %168 : vector<8x320xf32>
    %170 = arith.addf %161, %169 : vector<8x320xf32>
    %c17_59 = arith.constant 17 : index
    %171 = memref.load %arg2[%c17_59] : memref<66xf32, #tpu.memory_space<smem>>
    %172 = vector.broadcast %171 : f32 to vector<8x320xf32>
    %173 = arith.mulf %166, %172 : vector<8x320xf32>
    %174 = arith.addf %165, %173 : vector<8x320xf32>
    %c0_60 = arith.constant 0 : index
    %c18 = arith.constant 18 : index
    %175 = vector.load %arg7[%c0_60, %c18] : memref<8x352xf32, #tpu.memory_space<vmem>>, vector<8x320xf32>
    %c18_61 = arith.constant 18 : index
    %176 = memref.load %arg1[%c18_61] : memref<66xf32, #tpu.memory_space<smem>>
    %177 = vector.broadcast %176 : f32 to vector<8x320xf32>
    %178 = arith.mulf %175, %177 : vector<8x320xf32>
    %179 = arith.addf %170, %178 : vector<8x320xf32>
    %c18_62 = arith.constant 18 : index
    %180 = memref.load %arg2[%c18_62] : memref<66xf32, #tpu.memory_space<smem>>
    %181 = vector.broadcast %180 : f32 to vector<8x320xf32>
    %182 = arith.mulf %175, %181 : vector<8x320xf32>
    %183 = arith.addf %174, %182 : vector<8x320xf32>
    %c0_63 = arith.constant 0 : index
    %c19 = arith.constant 19 : index
    %184 = vector.load %arg7[%c0_63, %c19] : memref<8x352xf32, #tpu.memory_space<vmem>>, vector<8x320xf32>
    %c19_64 = arith.constant 19 : index
    %185 = memref.load %arg1[%c19_64] : memref<66xf32, #tpu.memory_space<smem>>
    %186 = vector.broadcast %185 : f32 to vector<8x320xf32>
    %187 = arith.mulf %184, %186 : vector<8x320xf32>
    %188 = arith.addf %179, %187 : vector<8x320xf32>
    %c19_65 = arith.constant 19 : index
    %189 = memref.load %arg2[%c19_65] : memref<66xf32, #tpu.memory_space<smem>>
    %190 = vector.broadcast %189 : f32 to vector<8x320xf32>
    %191 = arith.mulf %184, %190 : vector<8x320xf32>
    %192 = arith.addf %183, %191 : vector<8x320xf32>
    %c0_66 = arith.constant 0 : index
    %c20 = arith.constant 20 : index
    %193 = vector.load %arg7[%c0_66, %c20] : memref<8x352xf32, #tpu.memory_space<vmem>>, vector<8x320xf32>
    %c20_67 = arith.constant 20 : index
    %194 = memref.load %arg1[%c20_67] : memref<66xf32, #tpu.memory_space<smem>>
    %195 = vector.broadcast %194 : f32 to vector<8x320xf32>
    %196 = arith.mulf %193, %195 : vector<8x320xf32>
    %197 = arith.addf %188, %196 : vector<8x320xf32>
    %c20_68 = arith.constant 20 : index
    %198 = memref.load %arg2[%c20_68] : memref<66xf32, #tpu.memory_space<smem>>
    %199 = vector.broadcast %198 : f32 to vector<8x320xf32>
    %200 = arith.mulf %193, %199 : vector<8x320xf32>
    %201 = arith.addf %192, %200 : vector<8x320xf32>
    %c0_69 = arith.constant 0 : index
    %c21 = arith.constant 21 : index
    %202 = vector.load %arg7[%c0_69, %c21] : memref<8x352xf32, #tpu.memory_space<vmem>>, vector<8x320xf32>
    %c21_70 = arith.constant 21 : index
    %203 = memref.load %arg1[%c21_70] : memref<66xf32, #tpu.memory_space<smem>>
    %204 = vector.broadcast %203 : f32 to vector<8x320xf32>
    %205 = arith.mulf %202, %204 : vector<8x320xf32>
    %206 = arith.addf %197, %205 : vector<8x320xf32>
    %c21_71 = arith.constant 21 : index
    %207 = memref.load %arg2[%c21_71] : memref<66xf32, #tpu.memory_space<smem>>
    %208 = vector.broadcast %207 : f32 to vector<8x320xf32>
    %209 = arith.mulf %202, %208 : vector<8x320xf32>
    %210 = arith.addf %201, %209 : vector<8x320xf32>
    %c0_72 = arith.constant 0 : index
    %c22 = arith.constant 22 : index
    %211 = vector.load %arg7[%c0_72, %c22] : memref<8x352xf32, #tpu.memory_space<vmem>>, vector<8x320xf32>
    %c22_73 = arith.constant 22 : index
    %212 = memref.load %arg1[%c22_73] : memref<66xf32, #tpu.memory_space<smem>>
    %213 = vector.broadcast %212 : f32 to vector<8x320xf32>
    %214 = arith.mulf %211, %213 : vector<8x320xf32>
    %215 = arith.addf %206, %214 : vector<8x320xf32>
    %c22_74 = arith.constant 22 : index
    %216 = memref.load %arg2[%c22_74] : memref<66xf32, #tpu.memory_space<smem>>
    %217 = vector.broadcast %216 : f32 to vector<8x320xf32>
    %218 = arith.mulf %211, %217 : vector<8x320xf32>
    %219 = arith.addf %210, %218 : vector<8x320xf32>
    %c0_75 = arith.constant 0 : index
    %c23 = arith.constant 23 : index
    %220 = vector.load %arg7[%c0_75, %c23] : memref<8x352xf32, #tpu.memory_space<vmem>>, vector<8x320xf32>
    %c23_76 = arith.constant 23 : index
    %221 = memref.load %arg1[%c23_76] : memref<66xf32, #tpu.memory_space<smem>>
    %222 = vector.broadcast %221 : f32 to vector<8x320xf32>
    %223 = arith.mulf %220, %222 : vector<8x320xf32>
    %224 = arith.addf %215, %223 : vector<8x320xf32>
    %c23_77 = arith.constant 23 : index
    %225 = memref.load %arg2[%c23_77] : memref<66xf32, #tpu.memory_space<smem>>
    %226 = vector.broadcast %225 : f32 to vector<8x320xf32>
    %227 = arith.mulf %220, %226 : vector<8x320xf32>
    %228 = arith.addf %219, %227 : vector<8x320xf32>
    %c0_78 = arith.constant 0 : index
    %c24 = arith.constant 24 : index
    %229 = vector.load %arg7[%c0_78, %c24] : memref<8x352xf32, #tpu.memory_space<vmem>>, vector<8x320xf32>
    %c24_79 = arith.constant 24 : index
    %230 = memref.load %arg1[%c24_79] : memref<66xf32, #tpu.memory_space<smem>>
    %231 = vector.broadcast %230 : f32 to vector<8x320xf32>
    %232 = arith.mulf %229, %231 : vector<8x320xf32>
    %233 = arith.addf %224, %232 : vector<8x320xf32>
    %c24_80 = arith.constant 24 : index
    %234 = memref.load %arg2[%c24_80] : memref<66xf32, #tpu.memory_space<smem>>
    %235 = vector.broadcast %234 : f32 to vector<8x320xf32>
    %236 = arith.mulf %229, %235 : vector<8x320xf32>
    %237 = arith.addf %228, %236 : vector<8x320xf32>
    %c0_81 = arith.constant 0 : index
    %c25 = arith.constant 25 : index
    %238 = vector.load %arg7[%c0_81, %c25] : memref<8x352xf32, #tpu.memory_space<vmem>>, vector<8x320xf32>
    %c25_82 = arith.constant 25 : index
    %239 = memref.load %arg1[%c25_82] : memref<66xf32, #tpu.memory_space<smem>>
    %240 = vector.broadcast %239 : f32 to vector<8x320xf32>
    %241 = arith.mulf %238, %240 : vector<8x320xf32>
    %242 = arith.addf %233, %241 : vector<8x320xf32>
    %c25_83 = arith.constant 25 : index
    %243 = memref.load %arg2[%c25_83] : memref<66xf32, #tpu.memory_space<smem>>
    %244 = vector.broadcast %243 : f32 to vector<8x320xf32>
    %245 = arith.mulf %238, %244 : vector<8x320xf32>
    %246 = arith.addf %237, %245 : vector<8x320xf32>
    %c0_84 = arith.constant 0 : index
    %c26 = arith.constant 26 : index
    %247 = vector.load %arg7[%c0_84, %c26] : memref<8x352xf32, #tpu.memory_space<vmem>>, vector<8x320xf32>
    %c26_85 = arith.constant 26 : index
    %248 = memref.load %arg1[%c26_85] : memref<66xf32, #tpu.memory_space<smem>>
    %249 = vector.broadcast %248 : f32 to vector<8x320xf32>
    %250 = arith.mulf %247, %249 : vector<8x320xf32>
    %251 = arith.addf %242, %250 : vector<8x320xf32>
    %c26_86 = arith.constant 26 : index
    %252 = memref.load %arg2[%c26_86] : memref<66xf32, #tpu.memory_space<smem>>
    %253 = vector.broadcast %252 : f32 to vector<8x320xf32>
    %254 = arith.mulf %247, %253 : vector<8x320xf32>
    %255 = arith.addf %246, %254 : vector<8x320xf32>
    %c0_87 = arith.constant 0 : index
    %c27 = arith.constant 27 : index
    %256 = vector.load %arg7[%c0_87, %c27] : memref<8x352xf32, #tpu.memory_space<vmem>>, vector<8x320xf32>
    %c27_88 = arith.constant 27 : index
    %257 = memref.load %arg1[%c27_88] : memref<66xf32, #tpu.memory_space<smem>>
    %258 = vector.broadcast %257 : f32 to vector<8x320xf32>
    %259 = arith.mulf %256, %258 : vector<8x320xf32>
    %260 = arith.addf %251, %259 : vector<8x320xf32>
    %c27_89 = arith.constant 27 : index
    %261 = memref.load %arg2[%c27_89] : memref<66xf32, #tpu.memory_space<smem>>
    %262 = vector.broadcast %261 : f32 to vector<8x320xf32>
    %263 = arith.mulf %256, %262 : vector<8x320xf32>
    %264 = arith.addf %255, %263 : vector<8x320xf32>
    %c0_90 = arith.constant 0 : index
    %c28 = arith.constant 28 : index
    %265 = vector.load %arg7[%c0_90, %c28] : memref<8x352xf32, #tpu.memory_space<vmem>>, vector<8x320xf32>
    %c28_91 = arith.constant 28 : index
    %266 = memref.load %arg1[%c28_91] : memref<66xf32, #tpu.memory_space<smem>>
    %267 = vector.broadcast %266 : f32 to vector<8x320xf32>
    %268 = arith.mulf %265, %267 : vector<8x320xf32>
    %269 = arith.addf %260, %268 : vector<8x320xf32>
    %c28_92 = arith.constant 28 : index
    %270 = memref.load %arg2[%c28_92] : memref<66xf32, #tpu.memory_space<smem>>
    %271 = vector.broadcast %270 : f32 to vector<8x320xf32>
    %272 = arith.mulf %265, %271 : vector<8x320xf32>
    %273 = arith.addf %264, %272 : vector<8x320xf32>
    %c0_93 = arith.constant 0 : index
    %c29 = arith.constant 29 : index
    %274 = vector.load %arg7[%c0_93, %c29] : memref<8x352xf32, #tpu.memory_space<vmem>>, vector<8x320xf32>
    %c29_94 = arith.constant 29 : index
    %275 = memref.load %arg1[%c29_94] : memref<66xf32, #tpu.memory_space<smem>>
    %276 = vector.broadcast %275 : f32 to vector<8x320xf32>
    %277 = arith.mulf %274, %276 : vector<8x320xf32>
    %278 = arith.addf %269, %277 : vector<8x320xf32>
    %c29_95 = arith.constant 29 : index
    %279 = memref.load %arg2[%c29_95] : memref<66xf32, #tpu.memory_space<smem>>
    %280 = vector.broadcast %279 : f32 to vector<8x320xf32>
    %281 = arith.mulf %274, %280 : vector<8x320xf32>
    %282 = arith.addf %273, %281 : vector<8x320xf32>
    %c0_96 = arith.constant 0 : index
    %c30 = arith.constant 30 : index
    %283 = vector.load %arg7[%c0_96, %c30] : memref<8x352xf32, #tpu.memory_space<vmem>>, vector<8x320xf32>
    %c30_97 = arith.constant 30 : index
    %284 = memref.load %arg1[%c30_97] : memref<66xf32, #tpu.memory_space<smem>>
    %285 = vector.broadcast %284 : f32 to vector<8x320xf32>
    %286 = arith.mulf %283, %285 : vector<8x320xf32>
    %287 = arith.addf %278, %286 : vector<8x320xf32>
    %c30_98 = arith.constant 30 : index
    %288 = memref.load %arg2[%c30_98] : memref<66xf32, #tpu.memory_space<smem>>
    %289 = vector.broadcast %288 : f32 to vector<8x320xf32>
    %290 = arith.mulf %283, %289 : vector<8x320xf32>
    %291 = arith.addf %282, %290 : vector<8x320xf32>
    %c0_99 = arith.constant 0 : index
    %c31 = arith.constant 31 : index
    %292 = vector.load %arg7[%c0_99, %c31] : memref<8x352xf32, #tpu.memory_space<vmem>>, vector<8x320xf32>
    %c31_100 = arith.constant 31 : index
    %293 = memref.load %arg1[%c31_100] : memref<66xf32, #tpu.memory_space<smem>>
    %294 = vector.broadcast %293 : f32 to vector<8x320xf32>
    %295 = arith.mulf %292, %294 : vector<8x320xf32>
    %296 = arith.addf %287, %295 : vector<8x320xf32>
    %c31_101 = arith.constant 31 : index
    %297 = memref.load %arg2[%c31_101] : memref<66xf32, #tpu.memory_space<smem>>
    %298 = vector.broadcast %297 : f32 to vector<8x320xf32>
    %299 = arith.mulf %292, %298 : vector<8x320xf32>
    %300 = arith.addf %291, %299 : vector<8x320xf32>
    %c0_102 = arith.constant 0 : index
    %c32 = arith.constant 32 : index
    %301 = vector.load %arg7[%c0_102, %c32] : memref<8x352xf32, #tpu.memory_space<vmem>>, vector<8x320xf32>
    %c32_103 = arith.constant 32 : index
    %302 = memref.load %arg1[%c32_103] : memref<66xf32, #tpu.memory_space<smem>>
    %303 = vector.broadcast %302 : f32 to vector<8x320xf32>
    %304 = arith.mulf %301, %303 : vector<8x320xf32>
    %305 = arith.addf %296, %304 : vector<8x320xf32>
    %c32_104 = arith.constant 32 : index
    %306 = memref.load %arg2[%c32_104] : memref<66xf32, #tpu.memory_space<smem>>
    %307 = vector.broadcast %306 : f32 to vector<8x320xf32>
    %308 = arith.mulf %301, %307 : vector<8x320xf32>
    %309 = arith.addf %300, %308 : vector<8x320xf32>
    %c4_i32_105 = arith.constant 4 : i32
    %310 = tpu.dynamic_rotate %309 by %c4_i32_105 dim 0 : vector<8x320xf32>, i32 -> vector<8x320xf32>
    %311 = vector.broadcast %13 : vector<8x1xf32> to vector<8x320xf32>
    %312 = arith.mulf %311, %310 : vector<8x320xf32>
    %313 = arith.addf %305, %312 : vector<8x320xf32>
    %314 = arith.mulf %313, %313 : vector<8x320xf32>
    %c4_i32_106 = arith.constant 4 : i32
    %315 = tpu.dynamic_rotate %314 by %c4_i32_106 dim 0 : vector<8x320xf32>, i32 -> vector<8x320xf32>
    %316 = arith.addf %314, %315 : vector<8x320xf32>
    %c2_i32 = arith.constant 2 : i32
    %317 = tpu.dynamic_rotate %316 by %c2_i32 dim 0 : vector<8x320xf32>, i32 -> vector<8x320xf32>
    %318 = arith.addf %316, %317 : vector<8x320xf32>
    %c0_107 = arith.constant 0 : index
    %c0_108 = arith.constant 0 : index
    %319 = vector.load %arg8[%c0_107, %c0_108] : memref<8x320xf32, #tpu.memory_space<vmem>>, vector<8x320xf32>
    tpu.vector_store %arg8[%c0_107, %c0_108], %318 {strides = array<i32>} : memref<8x320xf32, #tpu.memory_space<vmem>>, vector<8x320xf32>,
    %c0_109 = arith.constant 0 : index
    %c0_110 = arith.constant 0 : index
    %320 = vector.load %arg8[%c0_109, %c0_110] : memref<8x320xf32, #tpu.memory_space<vmem>>, vector<8x304xf32>
    %c0_111 = arith.constant 0 : index
    %321 = memref.load %arg3[%c0_111] : memref<34xf32, #tpu.memory_space<smem>>
    %322 = vector.broadcast %321 : f32 to vector<8x304xf32>
    %323 = arith.mulf %320, %322 : vector<8x304xf32>
    %c0_112 = arith.constant 0 : index
    %c1_113 = arith.constant 1 : index
    %324 = vector.load %arg8[%c0_112, %c1_113] : memref<8x320xf32, #tpu.memory_space<vmem>>, vector<8x304xf32>
    %c1_114 = arith.constant 1 : index
    %325 = memref.load %arg3[%c1_114] : memref<34xf32, #tpu.memory_space<smem>>
    %326 = vector.broadcast %325 : f32 to vector<8x304xf32>
    %327 = arith.mulf %324, %326 : vector<8x304xf32>
    %328 = arith.addf %323, %327 : vector<8x304xf32>
    %c0_115 = arith.constant 0 : index
    %c2_116 = arith.constant 2 : index
    %329 = vector.load %arg8[%c0_115, %c2_116] : memref<8x320xf32, #tpu.memory_space<vmem>>, vector<8x304xf32>
    %c2_117 = arith.constant 2 : index
    %330 = memref.load %arg3[%c2_117] : memref<34xf32, #tpu.memory_space<smem>>
    %331 = vector.broadcast %330 : f32 to vector<8x304xf32>
    %332 = arith.mulf %329, %331 : vector<8x304xf32>
    %333 = arith.addf %328, %332 : vector<8x304xf32>
    %c0_118 = arith.constant 0 : index
    %c3_119 = arith.constant 3 : index
    %334 = vector.load %arg8[%c0_118, %c3_119] : memref<8x320xf32, #tpu.memory_space<vmem>>, vector<8x304xf32>
    %c3_120 = arith.constant 3 : index
    %335 = memref.load %arg3[%c3_120] : memref<34xf32, #tpu.memory_space<smem>>
    %336 = vector.broadcast %335 : f32 to vector<8x304xf32>
    %337 = arith.mulf %334, %336 : vector<8x304xf32>
    %338 = arith.addf %333, %337 : vector<8x304xf32>
    %c0_121 = arith.constant 0 : index
    %c4_122 = arith.constant 4 : index
    %339 = vector.load %arg8[%c0_121, %c4_122] : memref<8x320xf32, #tpu.memory_space<vmem>>, vector<8x304xf32>
    %c4_123 = arith.constant 4 : index
    %340 = memref.load %arg3[%c4_123] : memref<34xf32, #tpu.memory_space<smem>>
    %341 = vector.broadcast %340 : f32 to vector<8x304xf32>
    %342 = arith.mulf %339, %341 : vector<8x304xf32>
    %343 = arith.addf %338, %342 : vector<8x304xf32>
    %c0_124 = arith.constant 0 : index
    %c5_125 = arith.constant 5 : index
    %344 = vector.load %arg8[%c0_124, %c5_125] : memref<8x320xf32, #tpu.memory_space<vmem>>, vector<8x304xf32>
    %c5_126 = arith.constant 5 : index
    %345 = memref.load %arg3[%c5_126] : memref<34xf32, #tpu.memory_space<smem>>
    %346 = vector.broadcast %345 : f32 to vector<8x304xf32>
    %347 = arith.mulf %344, %346 : vector<8x304xf32>
    %348 = arith.addf %343, %347 : vector<8x304xf32>
    %c0_127 = arith.constant 0 : index
    %c6_128 = arith.constant 6 : index
    %349 = vector.load %arg8[%c0_127, %c6_128] : memref<8x320xf32, #tpu.memory_space<vmem>>, vector<8x304xf32>
    %c6_129 = arith.constant 6 : index
    %350 = memref.load %arg3[%c6_129] : memref<34xf32, #tpu.memory_space<smem>>
    %351 = vector.broadcast %350 : f32 to vector<8x304xf32>
    %352 = arith.mulf %349, %351 : vector<8x304xf32>
    %353 = arith.addf %348, %352 : vector<8x304xf32>
    %c0_130 = arith.constant 0 : index
    %c7_131 = arith.constant 7 : index
    %354 = vector.load %arg8[%c0_130, %c7_131] : memref<8x320xf32, #tpu.memory_space<vmem>>, vector<8x304xf32>
    %c7_132 = arith.constant 7 : index
    %355 = memref.load %arg3[%c7_132] : memref<34xf32, #tpu.memory_space<smem>>
    %356 = vector.broadcast %355 : f32 to vector<8x304xf32>
    %357 = arith.mulf %354, %356 : vector<8x304xf32>
    %358 = arith.addf %353, %357 : vector<8x304xf32>
    %c0_133 = arith.constant 0 : index
    %c8_134 = arith.constant 8 : index
    %359 = vector.load %arg8[%c0_133, %c8_134] : memref<8x320xf32, #tpu.memory_space<vmem>>, vector<8x304xf32>
    %c8_135 = arith.constant 8 : index
    %360 = memref.load %arg3[%c8_135] : memref<34xf32, #tpu.memory_space<smem>>
    %361 = vector.broadcast %360 : f32 to vector<8x304xf32>
    %362 = arith.mulf %359, %361 : vector<8x304xf32>
    %363 = arith.addf %358, %362 : vector<8x304xf32>
    %c0_136 = arith.constant 0 : index
    %c9_137 = arith.constant 9 : index
    %364 = vector.load %arg8[%c0_136, %c9_137] : memref<8x320xf32, #tpu.memory_space<vmem>>, vector<8x304xf32>
    %c9_138 = arith.constant 9 : index
    %365 = memref.load %arg3[%c9_138] : memref<34xf32, #tpu.memory_space<smem>>
    %366 = vector.broadcast %365 : f32 to vector<8x304xf32>
    %367 = arith.mulf %364, %366 : vector<8x304xf32>
    %368 = arith.addf %363, %367 : vector<8x304xf32>
    %c0_139 = arith.constant 0 : index
    %c10_140 = arith.constant 10 : index
    %369 = vector.load %arg8[%c0_139, %c10_140] : memref<8x320xf32, #tpu.memory_space<vmem>>, vector<8x304xf32>
    %c10_141 = arith.constant 10 : index
    %370 = memref.load %arg3[%c10_141] : memref<34xf32, #tpu.memory_space<smem>>
    %371 = vector.broadcast %370 : f32 to vector<8x304xf32>
    %372 = arith.mulf %369, %371 : vector<8x304xf32>
    %373 = arith.addf %368, %372 : vector<8x304xf32>
    %c0_142 = arith.constant 0 : index
    %c11_143 = arith.constant 11 : index
    %374 = vector.load %arg8[%c0_142, %c11_143] : memref<8x320xf32, #tpu.memory_space<vmem>>, vector<8x304xf32>
    %c11_144 = arith.constant 11 : index
    %375 = memref.load %arg3[%c11_144] : memref<34xf32, #tpu.memory_space<smem>>
    %376 = vector.broadcast %375 : f32 to vector<8x304xf32>
    %377 = arith.mulf %374, %376 : vector<8x304xf32>
    %378 = arith.addf %373, %377 : vector<8x304xf32>
    %c0_145 = arith.constant 0 : index
    %c12_146 = arith.constant 12 : index
    %379 = vector.load %arg8[%c0_145, %c12_146] : memref<8x320xf32, #tpu.memory_space<vmem>>, vector<8x304xf32>
    %c12_147 = arith.constant 12 : index
    %380 = memref.load %arg3[%c12_147] : memref<34xf32, #tpu.memory_space<smem>>
    %381 = vector.broadcast %380 : f32 to vector<8x304xf32>
    %382 = arith.mulf %379, %381 : vector<8x304xf32>
    %383 = arith.addf %378, %382 : vector<8x304xf32>
    %c0_148 = arith.constant 0 : index
    %c13_149 = arith.constant 13 : index
    %384 = vector.load %arg8[%c0_148, %c13_149] : memref<8x320xf32, #tpu.memory_space<vmem>>, vector<8x304xf32>
    %c13_150 = arith.constant 13 : index
    %385 = memref.load %arg3[%c13_150] : memref<34xf32, #tpu.memory_space<smem>>
    %386 = vector.broadcast %385 : f32 to vector<8x304xf32>
    %387 = arith.mulf %384, %386 : vector<8x304xf32>
    %388 = arith.addf %383, %387 : vector<8x304xf32>
    %c0_151 = arith.constant 0 : index
    %c14_152 = arith.constant 14 : index
    %389 = vector.load %arg8[%c0_151, %c14_152] : memref<8x320xf32, #tpu.memory_space<vmem>>, vector<8x304xf32>
    %c14_153 = arith.constant 14 : index
    %390 = memref.load %arg3[%c14_153] : memref<34xf32, #tpu.memory_space<smem>>
    %391 = vector.broadcast %390 : f32 to vector<8x304xf32>
    %392 = arith.mulf %389, %391 : vector<8x304xf32>
    %393 = arith.addf %388, %392 : vector<8x304xf32>
    %c0_154 = arith.constant 0 : index
    %c15_155 = arith.constant 15 : index
    %394 = vector.load %arg8[%c0_154, %c15_155] : memref<8x320xf32, #tpu.memory_space<vmem>>, vector<8x304xf32>
    %c15_156 = arith.constant 15 : index
    %395 = memref.load %arg3[%c15_156] : memref<34xf32, #tpu.memory_space<smem>>
    %396 = vector.broadcast %395 : f32 to vector<8x304xf32>
    %397 = arith.mulf %394, %396 : vector<8x304xf32>
    %398 = arith.addf %393, %397 : vector<8x304xf32>
    %c0_157 = arith.constant 0 : index
    %c16_158 = arith.constant 16 : index
    %399 = vector.load %arg8[%c0_157, %c16_158] : memref<8x320xf32, #tpu.memory_space<vmem>>, vector<8x304xf32>
    %c16_159 = arith.constant 16 : index
    %400 = memref.load %arg3[%c16_159] : memref<34xf32, #tpu.memory_space<smem>>
    %401 = vector.broadcast %400 : f32 to vector<8x304xf32>
    %402 = arith.mulf %399, %401 : vector<8x304xf32>
    %403 = arith.addf %398, %402 : vector<8x304xf32>
    %404 = vector.broadcast %14 : vector<8x1xf32> to vector<8x304xf32>
    %405 = arith.mulf %403, %404 : vector<8x304xf32>
    %406 = math.cos %405 : vector<8x304xf32>
    %407 = math.sin %405 : vector<8x304xf32>
    %408 = vector.extract_strided_slice %313 {offsets = [0, 8], sizes = [8, 304], strides = [1, 1]} : vector<8x320xf32> to vector<8x304xf32>
    %409 = arith.mulf %408, %406 : vector<8x304xf32>
    %c4_i32_160 = arith.constant 4 : i32
    %410 = tpu.dynamic_rotate %408 by %c4_i32_160 dim 0 : vector<8x304xf32>, i32 -> vector<8x304xf32>
    %411 = vector.broadcast %13 : vector<8x1xf32> to vector<8x304xf32>
    %412 = arith.mulf %411, %410 : vector<8x304xf32>
    %413 = arith.mulf %412, %407 : vector<8x304xf32>
    %414 = arith.addf %409, %413 : vector<8x304xf32>
    %c0_161 = arith.constant 0 : index
    %c0_162 = arith.constant 0 : index
    %415 = vector.load %arg7[%c0_161, %c0_162] : memref<8x352xf32, #tpu.memory_space<vmem>>, vector<8x304xf32>
    tpu.vector_store %arg7[%c0_161, %c0_162], %414 {strides = array<i32>} : memref<8x352xf32, #tpu.memory_space<vmem>>, vector<8x304xf32>,
    %c0_163 = arith.constant 0 : index
    %c0_164 = arith.constant 0 : index
    %416 = vector.load %arg7[%c0_163, %c0_164] : memref<8x352xf32, #tpu.memory_space<vmem>>, vector<8x272xf32>
    %c33 = arith.constant 33 : index
    %417 = memref.load %arg1[%c33] : memref<66xf32, #tpu.memory_space<smem>>
    %418 = vector.broadcast %417 : f32 to vector<8x272xf32>
    %419 = arith.mulf %416, %418 : vector<8x272xf32>
    %c33_165 = arith.constant 33 : index
    %420 = memref.load %arg2[%c33_165] : memref<66xf32, #tpu.memory_space<smem>>
    %421 = vector.broadcast %420 : f32 to vector<8x272xf32>
    %422 = arith.mulf %416, %421 : vector<8x272xf32>
    %c0_166 = arith.constant 0 : index
    %c1_167 = arith.constant 1 : index
    %423 = vector.load %arg7[%c0_166, %c1_167] : memref<8x352xf32, #tpu.memory_space<vmem>>, vector<8x272xf32>
    %c34 = arith.constant 34 : index
    %424 = memref.load %arg1[%c34] : memref<66xf32, #tpu.memory_space<smem>>
    %425 = vector.broadcast %424 : f32 to vector<8x272xf32>
    %426 = arith.mulf %423, %425 : vector<8x272xf32>
    %427 = arith.addf %419, %426 : vector<8x272xf32>
    %c34_168 = arith.constant 34 : index
    %428 = memref.load %arg2[%c34_168] : memref<66xf32, #tpu.memory_space<smem>>
    %429 = vector.broadcast %428 : f32 to vector<8x272xf32>
    %430 = arith.mulf %423, %429 : vector<8x272xf32>
    %431 = arith.addf %422, %430 : vector<8x272xf32>
    %c0_169 = arith.constant 0 : index
    %c2_170 = arith.constant 2 : index
    %432 = vector.load %arg7[%c0_169, %c2_170] : memref<8x352xf32, #tpu.memory_space<vmem>>, vector<8x272xf32>
    %c35 = arith.constant 35 : index
    %433 = memref.load %arg1[%c35] : memref<66xf32, #tpu.memory_space<smem>>
    %434 = vector.broadcast %433 : f32 to vector<8x272xf32>
    %435 = arith.mulf %432, %434 : vector<8x272xf32>
    %436 = arith.addf %427, %435 : vector<8x272xf32>
    %c35_171 = arith.constant 35 : index
    %437 = memref.load %arg2[%c35_171] : memref<66xf32, #tpu.memory_space<smem>>
    %438 = vector.broadcast %437 : f32 to vector<8x272xf32>
    %439 = arith.mulf %432, %438 : vector<8x272xf32>
    %440 = arith.addf %431, %439 : vector<8x272xf32>
    %c0_172 = arith.constant 0 : index
    %c3_173 = arith.constant 3 : index
    %441 = vector.load %arg7[%c0_172, %c3_173] : memref<8x352xf32, #tpu.memory_space<vmem>>, vector<8x272xf32>
    %c36 = arith.constant 36 : index
    %442 = memref.load %arg1[%c36] : memref<66xf32, #tpu.memory_space<smem>>
    %443 = vector.broadcast %442 : f32 to vector<8x272xf32>
    %444 = arith.mulf %441, %443 : vector<8x272xf32>
    %445 = arith.addf %436, %444 : vector<8x272xf32>
    %c36_174 = arith.constant 36 : index
    %446 = memref.load %arg2[%c36_174] : memref<66xf32, #tpu.memory_space<smem>>
    %447 = vector.broadcast %446 : f32 to vector<8x272xf32>
    %448 = arith.mulf %441, %447 : vector<8x272xf32>
    %449 = arith.addf %440, %448 : vector<8x272xf32>
    %c0_175 = arith.constant 0 : index
    %c4_176 = arith.constant 4 : index
    %450 = vector.load %arg7[%c0_175, %c4_176] : memref<8x352xf32, #tpu.memory_space<vmem>>, vector<8x272xf32>
    %c37 = arith.constant 37 : index
    %451 = memref.load %arg1[%c37] : memref<66xf32, #tpu.memory_space<smem>>
    %452 = vector.broadcast %451 : f32 to vector<8x272xf32>
    %453 = arith.mulf %450, %452 : vector<8x272xf32>
    %454 = arith.addf %445, %453 : vector<8x272xf32>
    %c37_177 = arith.constant 37 : index
    %455 = memref.load %arg2[%c37_177] : memref<66xf32, #tpu.memory_space<smem>>
    %456 = vector.broadcast %455 : f32 to vector<8x272xf32>
    %457 = arith.mulf %450, %456 : vector<8x272xf32>
    %458 = arith.addf %449, %457 : vector<8x272xf32>
    %c0_178 = arith.constant 0 : index
    %c5_179 = arith.constant 5 : index
    %459 = vector.load %arg7[%c0_178, %c5_179] : memref<8x352xf32, #tpu.memory_space<vmem>>, vector<8x272xf32>
    %c38 = arith.constant 38 : index
    %460 = memref.load %arg1[%c38] : memref<66xf32, #tpu.memory_space<smem>>
    %461 = vector.broadcast %460 : f32 to vector<8x272xf32>
    %462 = arith.mulf %459, %461 : vector<8x272xf32>
    %463 = arith.addf %454, %462 : vector<8x272xf32>
    %c38_180 = arith.constant 38 : index
    %464 = memref.load %arg2[%c38_180] : memref<66xf32, #tpu.memory_space<smem>>
    %465 = vector.broadcast %464 : f32 to vector<8x272xf32>
    %466 = arith.mulf %459, %465 : vector<8x272xf32>
    %467 = arith.addf %458, %466 : vector<8x272xf32>
    %c0_181 = arith.constant 0 : index
    %c6_182 = arith.constant 6 : index
    %468 = vector.load %arg7[%c0_181, %c6_182] : memref<8x352xf32, #tpu.memory_space<vmem>>, vector<8x272xf32>
    %c39 = arith.constant 39 : index
    %469 = memref.load %arg1[%c39] : memref<66xf32, #tpu.memory_space<smem>>
    %470 = vector.broadcast %469 : f32 to vector<8x272xf32>
    %471 = arith.mulf %468, %470 : vector<8x272xf32>
    %472 = arith.addf %463, %471 : vector<8x272xf32>
    %c39_183 = arith.constant 39 : index
    %473 = memref.load %arg2[%c39_183] : memref<66xf32, #tpu.memory_space<smem>>
    %474 = vector.broadcast %473 : f32 to vector<8x272xf32>
    %475 = arith.mulf %468, %474 : vector<8x272xf32>
    %476 = arith.addf %467, %475 : vector<8x272xf32>
    %c0_184 = arith.constant 0 : index
    %c7_185 = arith.constant 7 : index
    %477 = vector.load %arg7[%c0_184, %c7_185] : memref<8x352xf32, #tpu.memory_space<vmem>>, vector<8x272xf32>
    %c40 = arith.constant 40 : index
    %478 = memref.load %arg1[%c40] : memref<66xf32, #tpu.memory_space<smem>>
    %479 = vector.broadcast %478 : f32 to vector<8x272xf32>
    %480 = arith.mulf %477, %479 : vector<8x272xf32>
    %481 = arith.addf %472, %480 : vector<8x272xf32>
    %c40_186 = arith.constant 40 : index
    %482 = memref.load %arg2[%c40_186] : memref<66xf32, #tpu.memory_space<smem>>
    %483 = vector.broadcast %482 : f32 to vector<8x272xf32>
    %484 = arith.mulf %477, %483 : vector<8x272xf32>
    %485 = arith.addf %476, %484 : vector<8x272xf32>
    %c0_187 = arith.constant 0 : index
    %c8_188 = arith.constant 8 : index
    %486 = vector.load %arg7[%c0_187, %c8_188] : memref<8x352xf32, #tpu.memory_space<vmem>>, vector<8x272xf32>
    %c41 = arith.constant 41 : index
    %487 = memref.load %arg1[%c41] : memref<66xf32, #tpu.memory_space<smem>>
    %488 = vector.broadcast %487 : f32 to vector<8x272xf32>
    %489 = arith.mulf %486, %488 : vector<8x272xf32>
    %490 = arith.addf %481, %489 : vector<8x272xf32>
    %c41_189 = arith.constant 41 : index
    %491 = memref.load %arg2[%c41_189] : memref<66xf32, #tpu.memory_space<smem>>
    %492 = vector.broadcast %491 : f32 to vector<8x272xf32>
    %493 = arith.mulf %486, %492 : vector<8x272xf32>
    %494 = arith.addf %485, %493 : vector<8x272xf32>
    %c0_190 = arith.constant 0 : index
    %c9_191 = arith.constant 9 : index
    %495 = vector.load %arg7[%c0_190, %c9_191] : memref<8x352xf32, #tpu.memory_space<vmem>>, vector<8x272xf32>
    %c42 = arith.constant 42 : index
    %496 = memref.load %arg1[%c42] : memref<66xf32, #tpu.memory_space<smem>>
    %497 = vector.broadcast %496 : f32 to vector<8x272xf32>
    %498 = arith.mulf %495, %497 : vector<8x272xf32>
    %499 = arith.addf %490, %498 : vector<8x272xf32>
    %c42_192 = arith.constant 42 : index
    %500 = memref.load %arg2[%c42_192] : memref<66xf32, #tpu.memory_space<smem>>
    %501 = vector.broadcast %500 : f32 to vector<8x272xf32>
    %502 = arith.mulf %495, %501 : vector<8x272xf32>
    %503 = arith.addf %494, %502 : vector<8x272xf32>
    %c0_193 = arith.constant 0 : index
    %c10_194 = arith.constant 10 : index
    %504 = vector.load %arg7[%c0_193, %c10_194] : memref<8x352xf32, #tpu.memory_space<vmem>>, vector<8x272xf32>
    %c43 = arith.constant 43 : index
    %505 = memref.load %arg1[%c43] : memref<66xf32, #tpu.memory_space<smem>>
    %506 = vector.broadcast %505 : f32 to vector<8x272xf32>
    %507 = arith.mulf %504, %506 : vector<8x272xf32>
    %508 = arith.addf %499, %507 : vector<8x272xf32>
    %c43_195 = arith.constant 43 : index
    %509 = memref.load %arg2[%c43_195] : memref<66xf32, #tpu.memory_space<smem>>
    %510 = vector.broadcast %509 : f32 to vector<8x272xf32>
    %511 = arith.mulf %504, %510 : vector<8x272xf32>
    %512 = arith.addf %503, %511 : vector<8x272xf32>
    %c0_196 = arith.constant 0 : index
    %c11_197 = arith.constant 11 : index
    %513 = vector.load %arg7[%c0_196, %c11_197] : memref<8x352xf32, #tpu.memory_space<vmem>>, vector<8x272xf32>
    %c44 = arith.constant 44 : index
    %514 = memref.load %arg1[%c44] : memref<66xf32, #tpu.memory_space<smem>>
    %515 = vector.broadcast %514 : f32 to vector<8x272xf32>
    %516 = arith.mulf %513, %515 : vector<8x272xf32>
    %517 = arith.addf %508, %516 : vector<8x272xf32>
    %c44_198 = arith.constant 44 : index
    %518 = memref.load %arg2[%c44_198] : memref<66xf32, #tpu.memory_space<smem>>
    %519 = vector.broadcast %518 : f32 to vector<8x272xf32>
    %520 = arith.mulf %513, %519 : vector<8x272xf32>
    %521 = arith.addf %512, %520 : vector<8x272xf32>
    %c0_199 = arith.constant 0 : index
    %c12_200 = arith.constant 12 : index
    %522 = vector.load %arg7[%c0_199, %c12_200] : memref<8x352xf32, #tpu.memory_space<vmem>>, vector<8x272xf32>
    %c45 = arith.constant 45 : index
    %523 = memref.load %arg1[%c45] : memref<66xf32, #tpu.memory_space<smem>>
    %524 = vector.broadcast %523 : f32 to vector<8x272xf32>
    %525 = arith.mulf %522, %524 : vector<8x272xf32>
    %526 = arith.addf %517, %525 : vector<8x272xf32>
    %c45_201 = arith.constant 45 : index
    %527 = memref.load %arg2[%c45_201] : memref<66xf32, #tpu.memory_space<smem>>
    %528 = vector.broadcast %527 : f32 to vector<8x272xf32>
    %529 = arith.mulf %522, %528 : vector<8x272xf32>
    %530 = arith.addf %521, %529 : vector<8x272xf32>
    %c0_202 = arith.constant 0 : index
    %c13_203 = arith.constant 13 : index
    %531 = vector.load %arg7[%c0_202, %c13_203] : memref<8x352xf32, #tpu.memory_space<vmem>>, vector<8x272xf32>
    %c46 = arith.constant 46 : index
    %532 = memref.load %arg1[%c46] : memref<66xf32, #tpu.memory_space<smem>>
    %533 = vector.broadcast %532 : f32 to vector<8x272xf32>
    %534 = arith.mulf %531, %533 : vector<8x272xf32>
    %535 = arith.addf %526, %534 : vector<8x272xf32>
    %c46_204 = arith.constant 46 : index
    %536 = memref.load %arg2[%c46_204] : memref<66xf32, #tpu.memory_space<smem>>
    %537 = vector.broadcast %536 : f32 to vector<8x272xf32>
    %538 = arith.mulf %531, %537 : vector<8x272xf32>
    %539 = arith.addf %530, %538 : vector<8x272xf32>
    %c0_205 = arith.constant 0 : index
    %c14_206 = arith.constant 14 : index
    %540 = vector.load %arg7[%c0_205, %c14_206] : memref<8x352xf32, #tpu.memory_space<vmem>>, vector<8x272xf32>
    %c47 = arith.constant 47 : index
    %541 = memref.load %arg1[%c47] : memref<66xf32, #tpu.memory_space<smem>>
    %542 = vector.broadcast %541 : f32 to vector<8x272xf32>
    %543 = arith.mulf %540, %542 : vector<8x272xf32>
    %544 = arith.addf %535, %543 : vector<8x272xf32>
    %c47_207 = arith.constant 47 : index
    %545 = memref.load %arg2[%c47_207] : memref<66xf32, #tpu.memory_space<smem>>
    %546 = vector.broadcast %545 : f32 to vector<8x272xf32>
    %547 = arith.mulf %540, %546 : vector<8x272xf32>
    %548 = arith.addf %539, %547 : vector<8x272xf32>
    %c0_208 = arith.constant 0 : index
    %c15_209 = arith.constant 15 : index
    %549 = vector.load %arg7[%c0_208, %c15_209] : memref<8x352xf32, #tpu.memory_space<vmem>>, vector<8x272xf32>
    %c48 = arith.constant 48 : index
    %550 = memref.load %arg1[%c48] : memref<66xf32, #tpu.memory_space<smem>>
    %551 = vector.broadcast %550 : f32 to vector<8x272xf32>
    %552 = arith.mulf %549, %551 : vector<8x272xf32>
    %553 = arith.addf %544, %552 : vector<8x272xf32>
    %c48_210 = arith.constant 48 : index
    %554 = memref.load %arg2[%c48_210] : memref<66xf32, #tpu.memory_space<smem>>
    %555 = vector.broadcast %554 : f32 to vector<8x272xf32>
    %556 = arith.mulf %549, %555 : vector<8x272xf32>
    %557 = arith.addf %548, %556 : vector<8x272xf32>
    %c0_211 = arith.constant 0 : index
    %c16_212 = arith.constant 16 : index
    %558 = vector.load %arg7[%c0_211, %c16_212] : memref<8x352xf32, #tpu.memory_space<vmem>>, vector<8x272xf32>
    %c49 = arith.constant 49 : index
    %559 = memref.load %arg1[%c49] : memref<66xf32, #tpu.memory_space<smem>>
    %560 = vector.broadcast %559 : f32 to vector<8x272xf32>
    %561 = arith.mulf %558, %560 : vector<8x272xf32>
    %562 = arith.addf %553, %561 : vector<8x272xf32>
    %c49_213 = arith.constant 49 : index
    %563 = memref.load %arg2[%c49_213] : memref<66xf32, #tpu.memory_space<smem>>
    %564 = vector.broadcast %563 : f32 to vector<8x272xf32>
    %565 = arith.mulf %558, %564 : vector<8x272xf32>
    %566 = arith.addf %557, %565 : vector<8x272xf32>
    %c0_214 = arith.constant 0 : index
    %c17_215 = arith.constant 17 : index
    %567 = vector.load %arg7[%c0_214, %c17_215] : memref<8x352xf32, #tpu.memory_space<vmem>>, vector<8x272xf32>
    %c50 = arith.constant 50 : index
    %568 = memref.load %arg1[%c50] : memref<66xf32, #tpu.memory_space<smem>>
    %569 = vector.broadcast %568 : f32 to vector<8x272xf32>
    %570 = arith.mulf %567, %569 : vector<8x272xf32>
    %571 = arith.addf %562, %570 : vector<8x272xf32>
    %c50_216 = arith.constant 50 : index
    %572 = memref.load %arg2[%c50_216] : memref<66xf32, #tpu.memory_space<smem>>
    %573 = vector.broadcast %572 : f32 to vector<8x272xf32>
    %574 = arith.mulf %567, %573 : vector<8x272xf32>
    %575 = arith.addf %566, %574 : vector<8x272xf32>
    %c0_217 = arith.constant 0 : index
    %c18_218 = arith.constant 18 : index
    %576 = vector.load %arg7[%c0_217, %c18_218] : memref<8x352xf32, #tpu.memory_space<vmem>>, vector<8x272xf32>
    %c51 = arith.constant 51 : index
    %577 = memref.load %arg1[%c51] : memref<66xf32, #tpu.memory_space<smem>>
    %578 = vector.broadcast %577 : f32 to vector<8x272xf32>
    %579 = arith.mulf %576, %578 : vector<8x272xf32>
    %580 = arith.addf %571, %579 : vector<8x272xf32>
    %c51_219 = arith.constant 51 : index
    %581 = memref.load %arg2[%c51_219] : memref<66xf32, #tpu.memory_space<smem>>
    %582 = vector.broadcast %581 : f32 to vector<8x272xf32>
    %583 = arith.mulf %576, %582 : vector<8x272xf32>
    %584 = arith.addf %575, %583 : vector<8x272xf32>
    %c0_220 = arith.constant 0 : index
    %c19_221 = arith.constant 19 : index
    %585 = vector.load %arg7[%c0_220, %c19_221] : memref<8x352xf32, #tpu.memory_space<vmem>>, vector<8x272xf32>
    %c52 = arith.constant 52 : index
    %586 = memref.load %arg1[%c52] : memref<66xf32, #tpu.memory_space<smem>>
    %587 = vector.broadcast %586 : f32 to vector<8x272xf32>
    %588 = arith.mulf %585, %587 : vector<8x272xf32>
    %589 = arith.addf %580, %588 : vector<8x272xf32>
    %c52_222 = arith.constant 52 : index
    %590 = memref.load %arg2[%c52_222] : memref<66xf32, #tpu.memory_space<smem>>
    %591 = vector.broadcast %590 : f32 to vector<8x272xf32>
    %592 = arith.mulf %585, %591 : vector<8x272xf32>
    %593 = arith.addf %584, %592 : vector<8x272xf32>
    %c0_223 = arith.constant 0 : index
    %c20_224 = arith.constant 20 : index
    %594 = vector.load %arg7[%c0_223, %c20_224] : memref<8x352xf32, #tpu.memory_space<vmem>>, vector<8x272xf32>
    %c53 = arith.constant 53 : index
    %595 = memref.load %arg1[%c53] : memref<66xf32, #tpu.memory_space<smem>>
    %596 = vector.broadcast %595 : f32 to vector<8x272xf32>
    %597 = arith.mulf %594, %596 : vector<8x272xf32>
    %598 = arith.addf %589, %597 : vector<8x272xf32>
    %c53_225 = arith.constant 53 : index
    %599 = memref.load %arg2[%c53_225] : memref<66xf32, #tpu.memory_space<smem>>
    %600 = vector.broadcast %599 : f32 to vector<8x272xf32>
    %601 = arith.mulf %594, %600 : vector<8x272xf32>
    %602 = arith.addf %593, %601 : vector<8x272xf32>
    %c0_226 = arith.constant 0 : index
    %c21_227 = arith.constant 21 : index
    %603 = vector.load %arg7[%c0_226, %c21_227] : memref<8x352xf32, #tpu.memory_space<vmem>>, vector<8x272xf32>
    %c54 = arith.constant 54 : index
    %604 = memref.load %arg1[%c54] : memref<66xf32, #tpu.memory_space<smem>>
    %605 = vector.broadcast %604 : f32 to vector<8x272xf32>
    %606 = arith.mulf %603, %605 : vector<8x272xf32>
    %607 = arith.addf %598, %606 : vector<8x272xf32>
    %c54_228 = arith.constant 54 : index
    %608 = memref.load %arg2[%c54_228] : memref<66xf32, #tpu.memory_space<smem>>
    %609 = vector.broadcast %608 : f32 to vector<8x272xf32>
    %610 = arith.mulf %603, %609 : vector<8x272xf32>
    %611 = arith.addf %602, %610 : vector<8x272xf32>
    %c0_229 = arith.constant 0 : index
    %c22_230 = arith.constant 22 : index
    %612 = vector.load %arg7[%c0_229, %c22_230] : memref<8x352xf32, #tpu.memory_space<vmem>>, vector<8x272xf32>
    %c55 = arith.constant 55 : index
    %613 = memref.load %arg1[%c55] : memref<66xf32, #tpu.memory_space<smem>>
    %614 = vector.broadcast %613 : f32 to vector<8x272xf32>
    %615 = arith.mulf %612, %614 : vector<8x272xf32>
    %616 = arith.addf %607, %615 : vector<8x272xf32>
    %c55_231 = arith.constant 55 : index
    %617 = memref.load %arg2[%c55_231] : memref<66xf32, #tpu.memory_space<smem>>
    %618 = vector.broadcast %617 : f32 to vector<8x272xf32>
    %619 = arith.mulf %612, %618 : vector<8x272xf32>
    %620 = arith.addf %611, %619 : vector<8x272xf32>
    %c0_232 = arith.constant 0 : index
    %c23_233 = arith.constant 23 : index
    %621 = vector.load %arg7[%c0_232, %c23_233] : memref<8x352xf32, #tpu.memory_space<vmem>>, vector<8x272xf32>
    %c56 = arith.constant 56 : index
    %622 = memref.load %arg1[%c56] : memref<66xf32, #tpu.memory_space<smem>>
    %623 = vector.broadcast %622 : f32 to vector<8x272xf32>
    %624 = arith.mulf %621, %623 : vector<8x272xf32>
    %625 = arith.addf %616, %624 : vector<8x272xf32>
    %c56_234 = arith.constant 56 : index
    %626 = memref.load %arg2[%c56_234] : memref<66xf32, #tpu.memory_space<smem>>
    %627 = vector.broadcast %626 : f32 to vector<8x272xf32>
    %628 = arith.mulf %621, %627 : vector<8x272xf32>
    %629 = arith.addf %620, %628 : vector<8x272xf32>
    %c0_235 = arith.constant 0 : index
    %c24_236 = arith.constant 24 : index
    %630 = vector.load %arg7[%c0_235, %c24_236] : memref<8x352xf32, #tpu.memory_space<vmem>>, vector<8x272xf32>
    %c57 = arith.constant 57 : index
    %631 = memref.load %arg1[%c57] : memref<66xf32, #tpu.memory_space<smem>>
    %632 = vector.broadcast %631 : f32 to vector<8x272xf32>
    %633 = arith.mulf %630, %632 : vector<8x272xf32>
    %634 = arith.addf %625, %633 : vector<8x272xf32>
    %c57_237 = arith.constant 57 : index
    %635 = memref.load %arg2[%c57_237] : memref<66xf32, #tpu.memory_space<smem>>
    %636 = vector.broadcast %635 : f32 to vector<8x272xf32>
    %637 = arith.mulf %630, %636 : vector<8x272xf32>
    %638 = arith.addf %629, %637 : vector<8x272xf32>
    %c0_238 = arith.constant 0 : index
    %c25_239 = arith.constant 25 : index
    %639 = vector.load %arg7[%c0_238, %c25_239] : memref<8x352xf32, #tpu.memory_space<vmem>>, vector<8x272xf32>
    %c58 = arith.constant 58 : index
    %640 = memref.load %arg1[%c58] : memref<66xf32, #tpu.memory_space<smem>>
    %641 = vector.broadcast %640 : f32 to vector<8x272xf32>
    %642 = arith.mulf %639, %641 : vector<8x272xf32>
    %643 = arith.addf %634, %642 : vector<8x272xf32>
    %c58_240 = arith.constant 58 : index
    %644 = memref.load %arg2[%c58_240] : memref<66xf32, #tpu.memory_space<smem>>
    %645 = vector.broadcast %644 : f32 to vector<8x272xf32>
    %646 = arith.mulf %639, %645 : vector<8x272xf32>
    %647 = arith.addf %638, %646 : vector<8x272xf32>
    %c0_241 = arith.constant 0 : index
    %c26_242 = arith.constant 26 : index
    %648 = vector.load %arg7[%c0_241, %c26_242] : memref<8x352xf32, #tpu.memory_space<vmem>>, vector<8x272xf32>
    %c59 = arith.constant 59 : index
    %649 = memref.load %arg1[%c59] : memref<66xf32, #tpu.memory_space<smem>>
    %650 = vector.broadcast %649 : f32 to vector<8x272xf32>
    %651 = arith.mulf %648, %650 : vector<8x272xf32>
    %652 = arith.addf %643, %651 : vector<8x272xf32>
    %c59_243 = arith.constant 59 : index
    %653 = memref.load %arg2[%c59_243] : memref<66xf32, #tpu.memory_space<smem>>
    %654 = vector.broadcast %653 : f32 to vector<8x272xf32>
    %655 = arith.mulf %648, %654 : vector<8x272xf32>
    %656 = arith.addf %647, %655 : vector<8x272xf32>
    %c0_244 = arith.constant 0 : index
    %c27_245 = arith.constant 27 : index
    %657 = vector.load %arg7[%c0_244, %c27_245] : memref<8x352xf32, #tpu.memory_space<vmem>>, vector<8x272xf32>
    %c60 = arith.constant 60 : index
    %658 = memref.load %arg1[%c60] : memref<66xf32, #tpu.memory_space<smem>>
    %659 = vector.broadcast %658 : f32 to vector<8x272xf32>
    %660 = arith.mulf %657, %659 : vector<8x272xf32>
    %661 = arith.addf %652, %660 : vector<8x272xf32>
    %c60_246 = arith.constant 60 : index
    %662 = memref.load %arg2[%c60_246] : memref<66xf32, #tpu.memory_space<smem>>
    %663 = vector.broadcast %662 : f32 to vector<8x272xf32>
    %664 = arith.mulf %657, %663 : vector<8x272xf32>
    %665 = arith.addf %656, %664 : vector<8x272xf32>
    %c0_247 = arith.constant 0 : index
    %c28_248 = arith.constant 28 : index
    %666 = vector.load %arg7[%c0_247, %c28_248] : memref<8x352xf32, #tpu.memory_space<vmem>>, vector<8x272xf32>
    %c61 = arith.constant 61 : index
    %667 = memref.load %arg1[%c61] : memref<66xf32, #tpu.memory_space<smem>>
    %668 = vector.broadcast %667 : f32 to vector<8x272xf32>
    %669 = arith.mulf %666, %668 : vector<8x272xf32>
    %670 = arith.addf %661, %669 : vector<8x272xf32>
    %c61_249 = arith.constant 61 : index
    %671 = memref.load %arg2[%c61_249] : memref<66xf32, #tpu.memory_space<smem>>
    %672 = vector.broadcast %671 : f32 to vector<8x272xf32>
    %673 = arith.mulf %666, %672 : vector<8x272xf32>
    %674 = arith.addf %665, %673 : vector<8x272xf32>
    %c0_250 = arith.constant 0 : index
    %c29_251 = arith.constant 29 : index
    %675 = vector.load %arg7[%c0_250, %c29_251] : memref<8x352xf32, #tpu.memory_space<vmem>>, vector<8x272xf32>
    %c62 = arith.constant 62 : index
    %676 = memref.load %arg1[%c62] : memref<66xf32, #tpu.memory_space<smem>>
    %677 = vector.broadcast %676 : f32 to vector<8x272xf32>
    %678 = arith.mulf %675, %677 : vector<8x272xf32>
    %679 = arith.addf %670, %678 : vector<8x272xf32>
    %c62_252 = arith.constant 62 : index
    %680 = memref.load %arg2[%c62_252] : memref<66xf32, #tpu.memory_space<smem>>
    %681 = vector.broadcast %680 : f32 to vector<8x272xf32>
    %682 = arith.mulf %675, %681 : vector<8x272xf32>
    %683 = arith.addf %674, %682 : vector<8x272xf32>
    %c0_253 = arith.constant 0 : index
    %c30_254 = arith.constant 30 : index
    %684 = vector.load %arg7[%c0_253, %c30_254] : memref<8x352xf32, #tpu.memory_space<vmem>>, vector<8x272xf32>
    %c63 = arith.constant 63 : index
    %685 = memref.load %arg1[%c63] : memref<66xf32, #tpu.memory_space<smem>>
    %686 = vector.broadcast %685 : f32 to vector<8x272xf32>
    %687 = arith.mulf %684, %686 : vector<8x272xf32>
    %688 = arith.addf %679, %687 : vector<8x272xf32>
    %c63_255 = arith.constant 63 : index
    %689 = memref.load %arg2[%c63_255] : memref<66xf32, #tpu.memory_space<smem>>
    %690 = vector.broadcast %689 : f32 to vector<8x272xf32>
    %691 = arith.mulf %684, %690 : vector<8x272xf32>
    %692 = arith.addf %683, %691 : vector<8x272xf32>
    %c0_256 = arith.constant 0 : index
    %c31_257 = arith.constant 31 : index
    %693 = vector.load %arg7[%c0_256, %c31_257] : memref<8x352xf32, #tpu.memory_space<vmem>>, vector<8x272xf32>
    %c64 = arith.constant 64 : index
    %694 = memref.load %arg1[%c64] : memref<66xf32, #tpu.memory_space<smem>>
    %695 = vector.broadcast %694 : f32 to vector<8x272xf32>
    %696 = arith.mulf %693, %695 : vector<8x272xf32>
    %697 = arith.addf %688, %696 : vector<8x272xf32>
    %c64_258 = arith.constant 64 : index
    %698 = memref.load %arg2[%c64_258] : memref<66xf32, #tpu.memory_space<smem>>
    %699 = vector.broadcast %698 : f32 to vector<8x272xf32>
    %700 = arith.mulf %693, %699 : vector<8x272xf32>
    %701 = arith.addf %692, %700 : vector<8x272xf32>
    %c0_259 = arith.constant 0 : index
    %c32_260 = arith.constant 32 : index
    %702 = vector.load %arg7[%c0_259, %c32_260] : memref<8x352xf32, #tpu.memory_space<vmem>>, vector<8x272xf32>
    %c65 = arith.constant 65 : index
    %703 = memref.load %arg1[%c65] : memref<66xf32, #tpu.memory_space<smem>>
    %704 = vector.broadcast %703 : f32 to vector<8x272xf32>
    %705 = arith.mulf %702, %704 : vector<8x272xf32>
    %706 = arith.addf %697, %705 : vector<8x272xf32>
    %c65_261 = arith.constant 65 : index
    %707 = memref.load %arg2[%c65_261] : memref<66xf32, #tpu.memory_space<smem>>
    %708 = vector.broadcast %707 : f32 to vector<8x272xf32>
    %709 = arith.mulf %702, %708 : vector<8x272xf32>
    %710 = arith.addf %701, %709 : vector<8x272xf32>
    %c4_i32_262 = arith.constant 4 : i32
    %711 = tpu.dynamic_rotate %710 by %c4_i32_262 dim 0 : vector<8x272xf32>, i32 -> vector<8x272xf32>
    %712 = vector.broadcast %13 : vector<8x1xf32> to vector<8x272xf32>
    %713 = arith.mulf %712, %711 : vector<8x272xf32>
    %714 = arith.addf %706, %713 : vector<8x272xf32>
    %715 = arith.mulf %714, %714 : vector<8x272xf32>
    %c4_i32_263 = arith.constant 4 : i32
    %716 = tpu.dynamic_rotate %715 by %c4_i32_263 dim 0 : vector<8x272xf32>, i32 -> vector<8x272xf32>
    %717 = arith.addf %715, %716 : vector<8x272xf32>
    %c2_i32_264 = arith.constant 2 : i32
    %718 = tpu.dynamic_rotate %717 by %c2_i32_264 dim 0 : vector<8x272xf32>, i32 -> vector<8x272xf32>
    %719 = arith.addf %717, %718 : vector<8x272xf32>
    %c0_265 = arith.constant 0 : index
    %c0_266 = arith.constant 0 : index
    %720 = vector.load %arg8[%c0_265, %c0_266] : memref<8x320xf32, #tpu.memory_space<vmem>>, vector<8x272xf32>
    tpu.vector_store %arg8[%c0_265, %c0_266], %719 {strides = array<i32>} : memref<8x320xf32, #tpu.memory_space<vmem>>, vector<8x272xf32>,
    %c0_267 = arith.constant 0 : index
    %c0_268 = arith.constant 0 : index
    %721 = vector.load %arg8[%c0_267, %c0_268] : memref<8x320xf32, #tpu.memory_space<vmem>>, vector<8x256xf32>
    %c17_269 = arith.constant 17 : index
    %722 = memref.load %arg3[%c17_269] : memref<34xf32, #tpu.memory_space<smem>>
    %723 = vector.broadcast %722 : f32 to vector<8x256xf32>
    %724 = arith.mulf %721, %723 : vector<8x256xf32>
    %c0_270 = arith.constant 0 : index
    %c1_271 = arith.constant 1 : index
    %725 = vector.load %arg8[%c0_270, %c1_271] : memref<8x320xf32, #tpu.memory_space<vmem>>, vector<8x256xf32>
    %c18_272 = arith.constant 18 : index
    %726 = memref.load %arg3[%c18_272] : memref<34xf32, #tpu.memory_space<smem>>
    %727 = vector.broadcast %726 : f32 to vector<8x256xf32>
    %728 = arith.mulf %725, %727 : vector<8x256xf32>
    %729 = arith.addf %724, %728 : vector<8x256xf32>
    %c0_273 = arith.constant 0 : index
    %c2_274 = arith.constant 2 : index
    %730 = vector.load %arg8[%c0_273, %c2_274] : memref<8x320xf32, #tpu.memory_space<vmem>>, vector<8x256xf32>
    %c19_275 = arith.constant 19 : index
    %731 = memref.load %arg3[%c19_275] : memref<34xf32, #tpu.memory_space<smem>>
    %732 = vector.broadcast %731 : f32 to vector<8x256xf32>
    %733 = arith.mulf %730, %732 : vector<8x256xf32>
    %734 = arith.addf %729, %733 : vector<8x256xf32>
    %c0_276 = arith.constant 0 : index
    %c3_277 = arith.constant 3 : index
    %735 = vector.load %arg8[%c0_276, %c3_277] : memref<8x320xf32, #tpu.memory_space<vmem>>, vector<8x256xf32>
    %c20_278 = arith.constant 20 : index
    %736 = memref.load %arg3[%c20_278] : memref<34xf32, #tpu.memory_space<smem>>
    %737 = vector.broadcast %736 : f32 to vector<8x256xf32>
    %738 = arith.mulf %735, %737 : vector<8x256xf32>
    %739 = arith.addf %734, %738 : vector<8x256xf32>
    %c0_279 = arith.constant 0 : index
    %c4_280 = arith.constant 4 : index
    %740 = vector.load %arg8[%c0_279, %c4_280] : memref<8x320xf32, #tpu.memory_space<vmem>>, vector<8x256xf32>
    %c21_281 = arith.constant 21 : index
    %741 = memref.load %arg3[%c21_281] : memref<34xf32, #tpu.memory_space<smem>>
    %742 = vector.broadcast %741 : f32 to vector<8x256xf32>
    %743 = arith.mulf %740, %742 : vector<8x256xf32>
    %744 = arith.addf %739, %743 : vector<8x256xf32>
    %c0_282 = arith.constant 0 : index
    %c5_283 = arith.constant 5 : index
    %745 = vector.load %arg8[%c0_282, %c5_283] : memref<8x320xf32, #tpu.memory_space<vmem>>, vector<8x256xf32>
    %c22_284 = arith.constant 22 : index
    %746 = memref.load %arg3[%c22_284] : memref<34xf32, #tpu.memory_space<smem>>
    %747 = vector.broadcast %746 : f32 to vector<8x256xf32>
    %748 = arith.mulf %745, %747 : vector<8x256xf32>
    %749 = arith.addf %744, %748 : vector<8x256xf32>
    %c0_285 = arith.constant 0 : index
    %c6_286 = arith.constant 6 : index
    %750 = vector.load %arg8[%c0_285, %c6_286] : memref<8x320xf32, #tpu.memory_space<vmem>>, vector<8x256xf32>
    %c23_287 = arith.constant 23 : index
    %751 = memref.load %arg3[%c23_287] : memref<34xf32, #tpu.memory_space<smem>>
    %752 = vector.broadcast %751 : f32 to vector<8x256xf32>
    %753 = arith.mulf %750, %752 : vector<8x256xf32>
    %754 = arith.addf %749, %753 : vector<8x256xf32>
    %c0_288 = arith.constant 0 : index
    %c7_289 = arith.constant 7 : index
    %755 = vector.load %arg8[%c0_288, %c7_289] : memref<8x320xf32, #tpu.memory_space<vmem>>, vector<8x256xf32>
    %c24_290 = arith.constant 24 : index
    %756 = memref.load %arg3[%c24_290] : memref<34xf32, #tpu.memory_space<smem>>
    %757 = vector.broadcast %756 : f32 to vector<8x256xf32>
    %758 = arith.mulf %755, %757 : vector<8x256xf32>
    %759 = arith.addf %754, %758 : vector<8x256xf32>
    %c0_291 = arith.constant 0 : index
    %c8_292 = arith.constant 8 : index
    %760 = vector.load %arg8[%c0_291, %c8_292] : memref<8x320xf32, #tpu.memory_space<vmem>>, vector<8x256xf32>
    %c25_293 = arith.constant 25 : index
    %761 = memref.load %arg3[%c25_293] : memref<34xf32, #tpu.memory_space<smem>>
    %762 = vector.broadcast %761 : f32 to vector<8x256xf32>
    %763 = arith.mulf %760, %762 : vector<8x256xf32>
    %764 = arith.addf %759, %763 : vector<8x256xf32>
    %c0_294 = arith.constant 0 : index
    %c9_295 = arith.constant 9 : index
    %765 = vector.load %arg8[%c0_294, %c9_295] : memref<8x320xf32, #tpu.memory_space<vmem>>, vector<8x256xf32>
    %c26_296 = arith.constant 26 : index
    %766 = memref.load %arg3[%c26_296] : memref<34xf32, #tpu.memory_space<smem>>
    %767 = vector.broadcast %766 : f32 to vector<8x256xf32>
    %768 = arith.mulf %765, %767 : vector<8x256xf32>
    %769 = arith.addf %764, %768 : vector<8x256xf32>
    %c0_297 = arith.constant 0 : index
    %c10_298 = arith.constant 10 : index
    %770 = vector.load %arg8[%c0_297, %c10_298] : memref<8x320xf32, #tpu.memory_space<vmem>>, vector<8x256xf32>
    %c27_299 = arith.constant 27 : index
    %771 = memref.load %arg3[%c27_299] : memref<34xf32, #tpu.memory_space<smem>>
    %772 = vector.broadcast %771 : f32 to vector<8x256xf32>
    %773 = arith.mulf %770, %772 : vector<8x256xf32>
    %774 = arith.addf %769, %773 : vector<8x256xf32>
    %c0_300 = arith.constant 0 : index
    %c11_301 = arith.constant 11 : index
    %775 = vector.load %arg8[%c0_300, %c11_301] : memref<8x320xf32, #tpu.memory_space<vmem>>, vector<8x256xf32>
    %c28_302 = arith.constant 28 : index
    %776 = memref.load %arg3[%c28_302] : memref<34xf32, #tpu.memory_space<smem>>
    %777 = vector.broadcast %776 : f32 to vector<8x256xf32>
    %778 = arith.mulf %775, %777 : vector<8x256xf32>
    %779 = arith.addf %774, %778 : vector<8x256xf32>
    %c0_303 = arith.constant 0 : index
    %c12_304 = arith.constant 12 : index
    %780 = vector.load %arg8[%c0_303, %c12_304] : memref<8x320xf32, #tpu.memory_space<vmem>>, vector<8x256xf32>
    %c29_305 = arith.constant 29 : index
    %781 = memref.load %arg3[%c29_305] : memref<34xf32, #tpu.memory_space<smem>>
    %782 = vector.broadcast %781 : f32 to vector<8x256xf32>
    %783 = arith.mulf %780, %782 : vector<8x256xf32>
    %784 = arith.addf %779, %783 : vector<8x256xf32>
    %c0_306 = arith.constant 0 : index
    %c13_307 = arith.constant 13 : index
    %785 = vector.load %arg8[%c0_306, %c13_307] : memref<8x320xf32, #tpu.memory_space<vmem>>, vector<8x256xf32>
    %c30_308 = arith.constant 30 : index
    %786 = memref.load %arg3[%c30_308] : memref<34xf32, #tpu.memory_space<smem>>
    %787 = vector.broadcast %786 : f32 to vector<8x256xf32>
    %788 = arith.mulf %785, %787 : vector<8x256xf32>
    %789 = arith.addf %784, %788 : vector<8x256xf32>
    %c0_309 = arith.constant 0 : index
    %c14_310 = arith.constant 14 : index
    %790 = vector.load %arg8[%c0_309, %c14_310] : memref<8x320xf32, #tpu.memory_space<vmem>>, vector<8x256xf32>
    %c31_311 = arith.constant 31 : index
    %791 = memref.load %arg3[%c31_311] : memref<34xf32, #tpu.memory_space<smem>>
    %792 = vector.broadcast %791 : f32 to vector<8x256xf32>
    %793 = arith.mulf %790, %792 : vector<8x256xf32>
    %794 = arith.addf %789, %793 : vector<8x256xf32>
    %c0_312 = arith.constant 0 : index
    %c15_313 = arith.constant 15 : index
    %795 = vector.load %arg8[%c0_312, %c15_313] : memref<8x320xf32, #tpu.memory_space<vmem>>, vector<8x256xf32>
    %c32_314 = arith.constant 32 : index
    %796 = memref.load %arg3[%c32_314] : memref<34xf32, #tpu.memory_space<smem>>
    %797 = vector.broadcast %796 : f32 to vector<8x256xf32>
    %798 = arith.mulf %795, %797 : vector<8x256xf32>
    %799 = arith.addf %794, %798 : vector<8x256xf32>
    %c0_315 = arith.constant 0 : index
    %c16_316 = arith.constant 16 : index
    %800 = vector.load %arg8[%c0_315, %c16_316] : memref<8x320xf32, #tpu.memory_space<vmem>>, vector<8x256xf32>
    %c33_317 = arith.constant 33 : index
    %801 = memref.load %arg3[%c33_317] : memref<34xf32, #tpu.memory_space<smem>>
    %802 = vector.broadcast %801 : f32 to vector<8x256xf32>
    %803 = arith.mulf %800, %802 : vector<8x256xf32>
    %804 = arith.addf %799, %803 : vector<8x256xf32>
    %805 = vector.broadcast %14 : vector<8x1xf32> to vector<8x256xf32>
    %806 = arith.mulf %804, %805 : vector<8x256xf32>
    %807 = math.cos %806 : vector<8x256xf32>
    %808 = math.sin %806 : vector<8x256xf32>
    %809 = vector.extract_strided_slice %714 {offsets = [0, 8], sizes = [8, 256], strides = [1, 1]} : vector<8x272xf32> to vector<8x256xf32>
    %810 = arith.mulf %809, %807 : vector<8x256xf32>
    %c4_i32_318 = arith.constant 4 : i32
    %811 = tpu.dynamic_rotate %809 by %c4_i32_318 dim 0 : vector<8x256xf32>, i32 -> vector<8x256xf32>
    %812 = vector.broadcast %13 : vector<8x1xf32> to vector<8x256xf32>
    %813 = arith.mulf %812, %811 : vector<8x256xf32>
    %814 = arith.mulf %813, %808 : vector<8x256xf32>
    %815 = arith.addf %810, %814 : vector<8x256xf32>
    %c0_319 = arith.constant 0 : index
    %c0_320 = arith.constant 0 : index
    %816 = vector.load %arg7[%c0_319, %c0_320] : memref<8x352xf32, #tpu.memory_space<vmem>>, vector<8x256xf32>
    tpu.vector_store %arg7[%c0_319, %c0_320], %815 {strides = array<i32>} : memref<8x352xf32, #tpu.memory_space<vmem>>, vector<8x256xf32>,
    %c0_321 = arith.constant 0 : index
    %c0_322 = arith.constant 0 : index
    %817 = vector.load %arg7[%c0_321, %c0_322] : memref<8x352xf32, #tpu.memory_space<vmem>>, vector<8x256xf32>
    %c0_323 = arith.constant 0 : index
    %c0_324 = arith.constant 0 : index
    %818 = vector.load %arg6[%c0_323, %c0_324] : memref<8x256xf32, #tpu.memory_space<vmem>>, vector<8x256xf32>
    tpu.vector_store %arg6[%c0_323, %c0_324], %817 {strides = array<i32>} : memref<8x256xf32, #tpu.memory_space<vmem>>, vector<8x256xf32>,
    return
  }
  func.func @transform_0(%arg0: i32) -> i32 {
    %c0_i32 = arith.constant 0 : i32
    %c0_i32_0 = arith.constant 0 : i32
    return %c0_i32 : i32
  }
  func.func @transform_1(%arg0: i32) -> i32 {
    %c0_i32 = arith.constant 0 : i32
    %c0_i32_0 = arith.constant 0 : i32
    return %c0_i32 : i32
  }
  func.func @transform_2(%arg0: i32) -> i32 {
    %c0_i32 = arith.constant 0 : i32
    %c0_i32_0 = arith.constant 0 : i32
    return %c0_i32 : i32
  }
  func.func @transform_3(%arg0: i32) -> (i32, i32) {
    %c0_i32 = arith.constant 0 : i32
    %c0_i32_0 = arith.constant 0 : i32
    %c0_i32_1 = arith.constant 0 : i32
    return %c0_i32, %c0_i32_0 : i32, i32
  }
  func.func @transform_5(%arg0: i32) -> (i32, i32) {
    %c0_i32 = arith.constant 0 : i32
    %c0_i32_0 = arith.constant 0 : i32
    return %c0_i32, %arg0 : i32, i32
  }
}

</mosaic_0001>

<bundles_post_ra>
// kernel: tpu_custom_call.1
= control target key start
LH: loop header
LB: loop body
LE: loop exit
PB: predicated region body
PF: predicated region fallthrough
CT: control target
= control target key end

     0   :  { %10 = vsyncpa [#allocation7], 0  ;;  %s8825_s0 = inlined_call_operand.hbm [shape: f32[66], index: 0, kind: input, shape index: {}]   ;;  %s8826_s1 = inlined_call_operand.hbm [shape: f32[66], index: 1, kind: input, shape index: {}]   ;;  %s8827_s2 = inlined_call_operand.hbm [shape: f32[34], index: 2, kind: input, shape index: {}]   ;;  %s8828_s3 = inlined_call_operand.vmem [shape: f32[8,1], index: 3, kind: input, shape index: {}]   ;;  %s8829_s4 = inlined_call_operand.vmem [shape: f32[8,352], index: 4, kind: input, shape index: {}]   ;;  %s8830_s5 = inlined_call_operand.hbm [shape: f32[8,256], index: 5, kind: output, shape index: {}]  }
   0x1   :  { %11 = vsyncpa [#allocation9], 0 }
   0x2   :  { %12 = vsyncpa [#allocation6], 0  ;;  %s5239_s20 = scalar_lea.hbm %s8826_s1, 16 }
   0x3   :  { %p5240_p0 = scmp.ne.s32.totalorder %s8826_s1, %s5239_s20  ;;  %p5243_p1 = scmp.lt.u32.totalorder %s5239_s20, %s8826_s1 }
   0x5   :  { %p5245_p2 = pnand %p5243_p1, %p5240_p0 }
   0x7   :  { %5248 = shalt.err (!%p5245_p2)
}
   0x8   :  { %s5299_s25 = smov [#allocation8]   ;;  %s5249_s30 = scalar_lea.hbm %s8825_s0, 16 }
   0x9   :  { %28 = dma.hbm_to_smem %s8826_s1, 16, %s5299_s25, [#allocation9]  }
   0xa   :  { %p5250_p3 = scmp.ne.s32.totalorder %s8825_s0, %s5249_s30  ;;  %p5253_p4 = scmp.lt.u32.totalorder %s5249_s30, %s8825_s0 }
   0xc   :  { %p5255_p5 = pnand %p5253_p4, %p5250_p3 }
   0xe   :  { %5258 = shalt.err (!%p5255_p5)
}
   0xf   :  { %s5300_s10 = smov [#allocation5]   ;;  %s5259_s14 = scalar_lea.hbm %s8827_s2, 16 }
  0x10   :  { %20 = dma.hbm_to_smem %s8825_s0, 16, %s5300_s10, [#allocation7]  }
  0x11   :  { %p5260_p6 = scmp.ne.s32.totalorder %s8827_s2, %s5259_s14  ;;  %p5263_p7 = scmp.lt.u32.totalorder %s5259_s14, %s8827_s2 }
  0x13   :  { %p5265_p8 = pnand %p5263_p7, %p5260_p6 }
  0x15   :  { %5268 = shalt.err (!%p5265_p8)
}
  0x16   :  { %s5301_s19 = smov [#allocation10]  }
  0x17   :  { %36 = dma.hbm_to_smem %s8827_s2, 16, %s5301_s19, [#allocation9]  }
  0x18   :  { %5291 = dma.done.wait [#allocation7], 16  }
  0x19   :  { %5292 = vsyncadd [#allocation7], 4294967280 }
  0x1a   :  { %5293 = dma.done.wait [#allocation9], 32  }
  0x1b   :  { %5294 = vsyncadd [#allocation9], 4294967264 }
  0x1c   :  { %48 = sfence }
  0x1d   :  { %v86_v0 = vld [vmem:[%s8829_s4] sm:$0xff]  ;;  %v88_v1 = vld [vmem:[%s8829_s4 + $0x8] sm:$0xff]  ;;  %v90_v2 = vld [vmem:[%s8829_s4 + $0x10] sm:$0xff] }
  0x1e   :  { %87 = vst [vmem:[#allocation2] sm:$0xff] %v86_v0  ;;  %89 = vst [vmem:[#allocation2 + $0x8] sm:$0xff] %v88_v1 }
  0x1f   :  { %91 = vst [vmem:[#allocation2 + $0x10] sm:$0xff] %v90_v2 }
  0x20   :  { %99 = vsyncadd [#allocation4], 384 }
  0x21   :  { %5295 = dma.done.wait [#allocation4], 384 }
  0x22   :  { %5296 = vsyncadd [#allocation4], 4294966912  ;;  %s4945_s2 = sld [smem:[#allocation5 + $0x1]]  ;;  %s4947_s28 = sld [smem:[#allocation5 + $0x2]]  ;;  %vm136_vm0 = vcmask 1039360   ;;  %vm181_vm1 = vcmask 1031168  }
  0x23   :  { %s4946_s27 = sld [smem:[#allocation8 + $0x1]]  ;;  %s5302_s4 = smov 127   ;;  %vm226_vm2 = vcmask 1022976   ;;  %vm271_vm3 = vcmask 1014784   ;;  %vm316_vm4 = vcmask 1006592   ;;  %vm361_vm5 = vcmask 998400  }
  0x24   :  { %s4948_s29 = sld [smem:[#allocation8 + $0x2]]  ;;  %s4949_s30 = sld [smem:[#allocation5 + $0x3]]  ;;  %vm406_vm6 = vcmask 990208   ;;  %vm8924_vm7 = vcmask 982016   ;;  %vm8920_vm8 = vcmask 973824   ;;  %vm8909_vm9 = vcmask 965632  }
  0x25   :  { %v5421_v5 = vld [vmem:[#allocation2] sm:$0xff]  ;;  %v5423_v7 = vld [vmem:[#allocation2 + $0x8] sm:$0xff]  ;;  %s5303_s6 = smov 126   ;;  %s4950_s7 = sld [smem:[#allocation8 + $0x3]]  ;;  %vm8910_vm10 = vcmask 957440   ;;  %vm8911_vm11 = vcmask 949248  }
  0x26   :  { %v5419_v3 = vld [vmem:[#allocation2 + $0x10] sm:$0xff]  ;;  %s4951_s8 = sld [smem:[#allocation5 + $0x4]]  ;;  %s5304_s9 = smov 125   ;;  %vm8912_vm12 = vcmask 941056   ;;  %vm8913_vm13 = vcmask 932864   ;;  %vm8914_vm14 = vcmask 924672  }
  0x27   :  { %s4952_s10 = sld [smem:[#allocation8 + $0x4]]  ;;  %s4953_s11 = sld [smem:[#allocation5 + $0x5]]  ;;  %vm8915_vm15 = vcmask 916480  }
  0x28   :  { %v123_v4 = vstv %s4945_s2  ;;  %v168_v14 = vstv %s4947_s28  ;;  %s5305_s12 = smov 124   ;;  %s4954_s1 = sld [smem:[#allocation8 + $0x5]] }
  0x29   :  { %v146_v6 = vstv %s4946_s27  ;;  %v126_v8 = vmul.f32 %v123_v4, %v5419_v3  ;;  %v124_v9 = vmul.f32 %v123_v4, %v5421_v5  ;;  %v125_v11 = vmul.f32 %v123_v4, %v5423_v7  ;;  %s4955_s13 = sld [smem:[#allocation5 + $0x6]]  ;;  %s5306_s14 = smov 123  }
  0x2a   :  { %v147_v10 = vmul.f32 %v146_v6, %v5421_v5  ;;  %v149_v12 = vmul.f32 %v146_v6, %v5419_v3  ;;  %v148_v13 = vmul.f32 %v146_v6, %v5423_v7  ;;  %v170_v15 = vmul.f32 %v168_v14, %v5423_v7  ;;  %s4956_s15 = sld [smem:[#allocation8 + $0x6]]  ;;  %s4957_s16 = sld [smem:[#allocation5 + $0x7]] }
  0x2b   :  { %134 = vrot.lane.b32.xlu1 %v126_v8, %s5302_s4  ;;  %130 = vrot.lane.b32.xlu0 %v124_v9, %s5302_s4  ;;  %v169_v16 = vmul.f32 %v168_v14, %v5421_v5  ;;  %v191_v17 = vstv %s4948_s29  ;;  %v171_v19 = vmul.f32 %v168_v14, %v5419_v3  ;;  %v213_v22 = vstv %s4949_s30  ;;  %s8974_s17 = smov 122   ;;  %s4958_s18 = sld [smem:[#allocation8 + $0x7]] }
  0x2c   :  { %v192_v18 = vmul.f32 %v191_v17, %v5421_v5  ;;  %v194_v20 = vmul.f32 %v191_v17, %v5419_v3  ;;  %v193_v21 = vmul.f32 %v191_v17, %v5423_v7  ;;  %v215_v23 = vmul.f32 %v213_v22, %v5423_v7  ;;  %s4959_s19 = sld [smem:[#allocation5 + $0x8]]  ;;  %s5308_s20 = smov 121  }
  0x2d   :  { %v214_v24 = vmul.f32 %v213_v22, %v5421_v5  ;;  %v236_v25 = vstv %s4950_s7  ;;  %v216_v27 = vmul.f32 %v213_v22, %v5419_v3  ;;  %v258_v30 = vstv %s4951_s8  ;;  %s4960_s21 = sld [smem:[#allocation8 + $0x8]]  ;;  %s4961_s0 = sld [smem:[#allocation5 + $0x9]] }
  0x2e   :  { %v237_v26 = vmul.f32 %v236_v25, %v5421_v5  ;;  %v239_v28 = vmul.f32 %v236_v25, %v5419_v3  ;;  %v238_v29 = vmul.f32 %v236_v25, %v5423_v7  ;;  %v260_v31 = vmul.f32 %v258_v30, %v5423_v7  ;;  %s8972_s22 = smov 120   ;;  %s4962_s23 = sld [smem:[#allocation8 + $0x9]] }
  0x2f   :  { %153 = vrot.lane.b32.xlu1 %v147_v10, %s5302_s4  ;;  %132 = vrot.lane.b32.xlu0 %v125_v11, %s5302_s4  ;;  %v259_v32 = vmul.f32 %v258_v30, %v5421_v5  ;;  %v281_v33 = vstv %s4952_s10  ;;  %v261_v35 = vmul.f32 %v258_v30, %v5419_v3  ;;  %v303_v38 = vstv %s4953_s11  ;;  %s4963_s24 = sld [smem:[#allocation5 + $0xa]]  ;;  %s8970_s25 = smov 119  }
  0x30   :  { %v282_v34 = vmul.f32 %v281_v33, %v5421_v5  ;;  %v284_v36 = vmul.f32 %v281_v33, %v5419_v3  ;;  %v283_v37 = vmul.f32 %v281_v33, %v5423_v7  ;;  %v305_v39 = vmul.f32 %v303_v38, %v5423_v7  ;;  %s4964_s26 = sld [smem:[#allocation8 + $0xa]]  ;;  %s4966_s2 = sld [smem:[#allocation8 + $0xb]] }
  0x31   :  { %v304_v40 = vmul.f32 %v303_v38, %v5421_v5  ;;  %v326_v41 = vstv %s4954_s1  ;;  %v306_v43 = vmul.f32 %v303_v38, %v5419_v3  ;;  %v348_v46 = vstv %s4955_s13  ;;  %s4965_s27 = sld [smem:[#allocation5 + $0xb]]  ;;  %s8968_s28 = smov 118  }
  0x32   :  { %v327_v42 = vmul.f32 %v326_v41, %v5421_v5  ;;  %v329_v44 = vmul.f32 %v326_v41, %v5419_v3  ;;  %v328_v45 = vmul.f32 %v326_v41, %v5423_v7  ;;  %v350_v47 = vmul.f32 %v348_v46, %v5423_v7  ;;  %s4968_s29 = sld [smem:[#allocation8 + $0xc]]  ;;  %s8966_s30 = smov 117  }
  0x33   :  { %157 = vrot.lane.b32.xlu1 %v149_v12, %s5302_s4  ;;  %155 = vrot.lane.b32.xlu0 %v148_v13, %s5302_s4  ;;  %v349_v48 = vmul.f32 %v348_v46, %v5421_v5  ;;  %v371_v49 = vstv %s4956_s15  ;;  %v351_v51 = vmul.f32 %v348_v46, %v5419_v3  ;;  %v393_v54 = vstv %s4957_s16  ;;  %s4970_s7 = sld [smem:[#allocation8 + $0xd]]  ;;  %s8964_s8 = smov 116  }
  0x34   :  { %v372_v50 = vmul.f32 %v371_v49, %v5421_v5  ;;  %v374_v52 = vmul.f32 %v371_v49, %v5419_v3  ;;  %v373_v53 = vmul.f32 %v371_v49, %v5423_v7  ;;  %v395_v55 = vmul.f32 %v393_v54, %v5423_v7  ;;  %s4967_s10 = sld [smem:[#allocation5 + $0xc]]  ;;  %s4972_s11 = sld [smem:[#allocation8 + $0xe]] }
  0x35   :  { %v394_v56 = vmul.f32 %v393_v54, %v5421_v5  ;;  %v416_v57 = vstv %s4958_s18  ;;  %v396_v59 = vmul.f32 %v393_v54, %v5419_v3  ;;  %v438_v62 = vstv %s4959_s19  ;;  %s8962_s1 = smov 115   ;;  %s4969_s13 = sld [smem:[#allocation5 + $0xd]] }
  0x36   :  { %v417_v58 = vmul.f32 %v416_v57, %v5421_v5  ;;  %v419_v60 = vmul.f32 %v416_v57, %v5419_v3  ;;  %v418_v61 = vmul.f32 %v416_v57, %v5423_v7  ;;  %v440_v63 = vmul.f32 %v438_v62, %v5423_v7  ;;  %s4974_s15 = sld [smem:[#allocation8 + $0xf]]  ;;  %s8960_s16 = smov 114  }
  0x37   :  { %177 = vrot.lane.b32.xlu1 %v170_v15, %s5303_s6  ;;  %175 = vrot.lane.b32.xlu0 %v169_v16, %s5303_s6  ;;  %v439_v0 = vmul.f32 %v438_v62, %v5421_v5  ;;  %v461_v1 = vstv %s4960_s21  ;;  %v441_v4 = vmul.f32 %v438_v62, %v5419_v3  ;;  %v483_v9 = vstv %s4961_s0  ;;  %s4971_s18 = sld [smem:[#allocation5 + $0xe]]  ;;  %s4976_s19 = sld [smem:[#allocation8 + $0x10]] }
  0x38   :  { %v462_v2 = vmul.f32 %v461_v1, %v5421_v5  ;;  %v464_v6 = vmul.f32 %v461_v1, %v5419_v3  ;;  %v463_v8 = vmul.f32 %v461_v1, %v5423_v7  ;;  %v485_v10 = vmul.f32 %v483_v9, %v5423_v7  ;;  %s8958_s21 = smov 113   ;;  %s4973_s0 = sld [smem:[#allocation5 + $0xf]] }
  0x39   :  { %v484_v11 = vmul.f32 %v483_v9, %v5421_v5  ;;  %v506_v12 = vstv %s4962_s23  ;;  %v486_v14 = vmul.f32 %v483_v9, %v5419_v3  ;;  %v528_v17 = vstv %s4963_s24  ;;  %s4978_s23 = sld [smem:[#allocation8 + $0x11]]  ;;  %s8956_s24 = smov 112  }
  0x3a   :  { %v507_v13 = vmul.f32 %v506_v12, %v5421_v5  ;;  %v509_v15 = vmul.f32 %v506_v12, %v5419_v3  ;;  %v508_v16 = vmul.f32 %v506_v12, %v5423_v7  ;;  %v531_v22 = vmul.f32 %v528_v17, %v5419_v3 }
  0x3b   :  { %198 = vrot.lane.b32.xlu1 %v192_v18, %s5303_s6  ;;  %179 = vrot.lane.b32.xlu0 %v171_v19, %s5303_s6  ;;  %v530_v18 = vmul.f32 %v528_v17, %v5423_v7  ;;  %v529_v19 = vmul.f32 %v528_v17, %v5421_v5  ;;  %v596_v25 = vstv %s4966_s2  ;;  %s4980_s2 = sld [smem:[#allocation8 + $0x12]] }
  0x3c   :  { %v599_v33 = vmul.f32 %v596_v25, %v5419_v3 }
  0x3f   :  { %202 = vrot.lane.b32.xlu1 %v194_v20, %s5303_s6  ;;  %200 = vrot.lane.b32.xlu0 %v193_v21, %s5303_s6  ;;  %v551_v20 = vstv %s4964_s26  ;;  %s4975_s26 = sld [smem:[#allocation5 + $0x10]] }
  0x40   :  { %v552_v21 = vmul.f32 %v551_v20, %v5421_v5 }
  0x43   :  { %222 = vrot.lane.b32.xlu1 %v215_v23, %s5304_s9  ;;  %220 = vrot.lane.b32.xlu0 %v214_v24, %s5304_s9  ;;  %v554_v23 = vmul.f32 %v551_v20, %v5419_v3  ;;  %v553_v24 = vmul.f32 %v551_v20, %v5423_v7  ;;  %v708_v20 = vstv %s4971_s18  ;;  %s4981_s18 = sld [smem:[#allocation5 + $0x13]] }
  0x47   :  { %243 = vrot.lane.b32.xlu1 %v237_v26, %s5304_s9  ;;  %224 = vrot.lane.b32.xlu0 %v216_v27, %s5304_s9  ;;  %v573_v26 = vstv %s4965_s27  ;;  %s8954_s27 = smov 111  }
  0x48   :  { %v574_v30 = vmul.f32 %v573_v26, %v5421_v5 }
  0x4b   :  { %247 = vrot.lane.b32.xlu1 %v239_v28, %s5304_s9  ;;  %245 = vrot.lane.b32.xlu0 %v238_v29, %s5304_s9  ;;  %v597_v29 = vmul.f32 %v596_v25, %v5421_v5 }
  0x4f   :  { %267 = vrot.lane.b32.xlu1 %v260_v31, %s5305_s12  ;;  %265 = vrot.lane.b32.xlu0 %v259_v32, %s5305_s12 }
  0x53   :  { %288 = vrot.lane.b32.xlu1 %v282_v34, %s5305_s12  ;;  %269 = vrot.lane.b32.xlu0 %v261_v35, %s5305_s12  ;;  %v598_v34 = vmul.f32 %v596_v25, %v5423_v7  ;;  %v641_v35 = vstv %s4968_s29  ;;  %v821_v25 = vstv %s4976_s19  ;;  %s4977_s29 = sld [smem:[#allocation5 + $0x11]]  ;;  %s4986_s19 = sld [smem:[#allocation8 + $0x15]] }
  0x54   :  { %v643_v38 = vmul.f32 %v641_v35, %v5423_v7 }
  0x57   :  { %292 = vrot.lane.b32.xlu1 %v284_v36, %s5305_s12  ;;  %290 = vrot.lane.b32.xlu0 %v283_v37, %s5305_s12 }
  0x5b   :  { %312 = vrot.lane.b32.xlu1 %v305_v39, %s5306_s14  ;;  %310 = vrot.lane.b32.xlu0 %v304_v40, %s5306_s14  ;;  %v642_v39 = vmul.f32 %v641_v35, %v5421_v5 }
  0x5f   :  { %333 = vrot.lane.b32.xlu1 %v327_v42, %s5306_s14  ;;  %314 = vrot.lane.b32.xlu0 %v306_v43, %s5306_s14  ;;  %v575_v42 = vmul.f32 %v573_v26, %v5423_v7  ;;  %v644_v43 = vmul.f32 %v641_v35, %v5419_v3 }
  0x63   :  { %337 = vrot.lane.b32.xlu1 %v329_v44, %s5306_s14  ;;  %335 = vrot.lane.b32.xlu0 %v328_v45, %s5306_s14  ;;  %v686_v44 = vstv %s4970_s7  ;;  %s4982_s7 = sld [smem:[#allocation8 + $0x13]] }
  0x67   :  { %357 = vrot.lane.b32.xlu1 %v350_v47, %s8974_s17  ;;  %355 = vrot.lane.b32.xlu0 %v349_v48, %s8974_s17  ;;  %v687_v47 = vmul.f32 %v686_v44, %v5421_v5  ;;  %v576_v48 = vmul.f32 %v573_v26, %v5419_v3 }
  0x6b   :  { %378 = vrot.lane.b32.xlu1 %v372_v50, %s8974_s17  ;;  %359 = vrot.lane.b32.xlu0 %v351_v51, %s8974_s17  ;;  %v689_v51 = vmul.f32 %v686_v44, %v5419_v3 }
  0x6f   :  { %382 = vrot.lane.b32.xlu1 %v374_v52, %s8974_s17  ;;  %380 = vrot.lane.b32.xlu0 %v373_v53, %s8974_s17  ;;  %v688_v52 = vmul.f32 %v686_v44, %v5423_v7  ;;  %v618_v53 = vstv %s4967_s10  ;;  %s8952_s10 = smov 110  }
  0x70   :  { %v619_v57 = vmul.f32 %v618_v53, %v5421_v5  ;;  %v621_v62 = vmul.f32 %v618_v53, %v5419_v3 }
  0x73   :  { %402 = vrot.lane.b32.xlu1 %v395_v55, %s5308_s20  ;;  %400 = vrot.lane.b32.xlu0 %v394_v56, %s5308_s20  ;;  %v620_v56 = vmul.f32 %v618_v53, %v5423_v7 }
  0x77   :  { %423 = vrot.lane.b32.xlu1 %v417_v58, %s5308_s20  ;;  %404 = vrot.lane.b32.xlu0 %v396_v59, %s5308_s20  ;;  %v731_v58 = vstv %s4972_s11  ;;  %s4979_s11 = sld [smem:[#allocation5 + $0x12]] }
  0x78   :  { %v734_v1 = vmul.f32 %v731_v58, %v5419_v3 }
  0x7b   :  { %427 = vrot.lane.b32.xlu1 %v419_v60, %s5308_s20  ;;  %425 = vrot.lane.b32.xlu0 %v418_v61, %s5308_s20  ;;  %v732_v61 = vmul.f32 %v731_v58, %v5421_v5 }
  0x7f   :  { %447 = vrot.lane.b32.xlu1 %v440_v63, %s8972_s22  ;;  %445 = vrot.lane.b32.xlu0 %v439_v0, %s8972_s22 }
  0x83   :  { %468 = vrot.lane.b32.xlu1 %v462_v2, %s8972_s22  ;;  %449 = vrot.lane.b32.xlu0 %v441_v4, %s8972_s22  ;;  %v733_v2 = vmul.f32 %v731_v58, %v5423_v7  ;;  %v663_v4 = vstv %s4969_s13  ;;  %s4984_s13 = sld [smem:[#allocation8 + $0x14]] }
  0x84   :  { %v665_v9 = vmul.f32 %v663_v4, %v5423_v7 }
  0x87   :  { %472 = vrot.lane.b32.xlu1 %v464_v6, %s8972_s22  ;;  %470 = vrot.lane.b32.xlu0 %v463_v8, %s8972_s22 }
  0x8b   :  { %492 = vrot.lane.b32.xlu1 %v485_v10, %s8970_s25  ;;  %490 = vrot.lane.b32.xlu0 %v484_v11, %s8970_s25  ;;  %v664_v10 = vmul.f32 %v663_v4, %v5421_v5  ;;  %v776_v11 = vstv %s4974_s15  ;;  %s8950_s15 = smov 109  }
  0x8f   :  { %513 = vrot.lane.b32.xlu1 %v507_v13, %s8970_s25  ;;  %494 = vrot.lane.b32.xlu0 %v486_v14, %s8970_s25  ;;  %v777_v14 = vmul.f32 %v776_v11, %v5421_v5 }
  0x93   :  { %517 = vrot.lane.b32.xlu1 %v509_v15, %s8970_s25  ;;  %515 = vrot.lane.b32.xlu0 %v508_v16, %s8970_s25  ;;  %v666_v15 = vmul.f32 %v663_v4, %v5419_v3 }
  0x97   :  { %537 = vrot.lane.b32.xlu1 %v530_v18, %s8968_s28  ;;  %535 = vrot.lane.b32.xlu0 %v529_v19, %s8968_s28  ;;  %v779_v18 = vmul.f32 %v776_v11, %v5419_v3  ;;  %v778_v19 = vmul.f32 %v776_v11, %v5423_v7 }
  0x9b   :  { %558 = vrot.lane.b32.xlu1 %v552_v21, %s8968_s28  ;;  %539 = vrot.lane.b32.xlu0 %v531_v22, %s8968_s28 }
  0x9d   :  { %v5543_v27 = vpop.permute.xlu1 %134  ;;  %v5545_v28 = vpop.permute.xlu0 %130 }
  0x9f   :  { %562 = vrot.lane.b32.xlu1 %v554_v23, %s8968_s28  ;;  %560 = vrot.lane.b32.xlu0 %v553_v24, %s8968_s28  ;;  %v710_v23 = vmul.f32 %v708_v20, %v5423_v7  ;;  %v709_v24 = vmul.f32 %v708_v20, %v5421_v5 }
  0xa1   :  { %v5551_v31 = vpop.permute.xlu1 %153  ;;  %v5553_v32 = vpop.permute.xlu0 %132 }
  0xa3   :  { %603 = vrot.lane.b32.xlu1 %v597_v29, %s8966_s30  ;;  %580 = vrot.lane.b32.xlu0 %v574_v30, %s8966_s30  ;;  %v822_v30 = vmul.f32 %v821_v25, %v5421_v5 }
  0xa5   :  { %v5559_v36 = vpop.permute.xlu1 %157  ;;  %v5561_v37 = vpop.permute.xlu0 %155 }
  0xa7   :  { %607 = vrot.lane.b32.xlu1 %v599_v33, %s8966_s30  ;;  %605 = vrot.lane.b32.xlu0 %v598_v34, %s8966_s30  ;;  %v711_v33 = vmul.f32 %v708_v20, %v5419_v3 }
  0xa9   :  { %v5567_v40 = vpop.permute.xlu1 %177  ;;  %v5569_v41 = vpop.permute.xlu0 %175 }
  0xab   :  { %650 = vrot.lane.b32.xlu1 %v643_v38, %s8964_s8  ;;  %648 = vrot.lane.b32.xlu0 %v642_v39, %s8964_s8  ;;  %v824_v38 = vmul.f32 %v821_v25, %v5419_v3  ;;  %v823_v39 = vmul.f32 %v821_v25, %v5423_v7 }
  0xad   :  { %v5575_v45 = vpop.permute.xlu1 %198  ;;  %v5577_v46 = vpop.permute.xlu0 %179 }
  0xaf   :  { %582 = vrot.lane.b32.xlu1 %v575_v42, %s8966_s30  ;;  %652 = vrot.lane.b32.xlu0 %v644_v43, %s8964_s8  ;;  %v753_v42 = vstv %s4973_s0  ;;  %s8948_s0 = smov 108  }
  0xb1   :  { %v5583_v49 = vpop.permute.xlu1 %202  ;;  %v5585_v50 = vpop.permute.xlu0 %200 }
  0xb3   :  { %693 = vrot.lane.b32.xlu1 %v687_v47, %s8962_s1  ;;  %584 = vrot.lane.b32.xlu0 %v576_v48, %s8966_s30  ;;  %v755_v47 = vmul.f32 %v753_v42, %v5423_v7  ;;  %v754_v48 = vmul.f32 %v753_v42, %v5421_v5 }
  0xb5   :  { %v5591_v54 = vpop.permute.xlu1 %222  ;;  %v5593_v55 = vpop.permute.xlu0 %220 }
  0xb7   :  { %697 = vrot.lane.b32.xlu1 %v689_v51, %s8962_s1  ;;  %695 = vrot.lane.b32.xlu0 %v688_v52, %s8962_s1  ;;  %v866_v51 = vstv %s4978_s23  ;;  %s4983_s23 = sld [smem:[#allocation5 + $0x14]] }
  0xb9   :  { %v5599_v59 = vpop.permute.xlu1 %243  ;;  %v5601_v60 = vpop.permute.xlu0 %224 }
  0xbb   :  { %627 = vrot.lane.b32.xlu1 %v620_v56, %s8964_s8  ;;  %625 = vrot.lane.b32.xlu0 %v619_v57, %s8964_s8  ;;  %v867_v56 = vmul.f32 %v866_v51, %v5421_v5  ;;  %v756_v57 = vmul.f32 %v753_v42, %v5419_v3 }
  0xbd   :  { %v5607_v63 = vpop.permute.xlu1 %247  ;;  %v5609_v0 = vpop.permute.xlu0 %245 }
  0xbf   :  { %738 = vrot.lane.b32.xlu1 %v732_v61, %s8960_s16  ;;  %629 = vrot.lane.b32.xlu0 %v621_v62, %s8964_s8  ;;  %v869_v62 = vmul.f32 %v866_v51, %v5419_v3 }
  0xc1   :  { %v5615_v6 = vpop.permute.xlu1 %267  ;;  %v5617_v8 = vpop.permute.xlu0 %265 }
  0xc3   :  { %742 = vrot.lane.b32.xlu1 %v734_v1, %s8960_s16  ;;  %740 = vrot.lane.b32.xlu0 %v733_v2, %s8960_s16  ;;  %v868_v1 = vmul.f32 %v866_v51, %v5423_v7  ;;  %v798_v2 = vstv %s4975_s26  ;;  %s4988_s26 = sld [smem:[#allocation8 + $0x16]] }
  0xc4   :  { %v799_v11 = vmul.f32 %v798_v2, %v5421_v5  ;;  %v801_v20 = vmul.f32 %v798_v2, %v5419_v3 }
  0xc5   :  { %v5623_v12 = vpop.permute.xlu1 %288  ;;  %v5625_v13 = vpop.permute.xlu0 %269 }
  0xc7   :  { %672 = vrot.lane.b32.xlu1 %v665_v9, %s8962_s1  ;;  %670 = vrot.lane.b32.xlu0 %v664_v10, %s8962_s1  ;;  %v800_v10 = vmul.f32 %v798_v2, %v5423_v7 }
  0xc9   :  { %v5631_v16 = vpop.permute.xlu1 %292  ;;  %v5633_v17 = vpop.permute.xlu0 %290 }
  0xcb   :  { %783 = vrot.lane.b32.xlu1 %v777_v14, %s8958_s21  ;;  %674 = vrot.lane.b32.xlu0 %v666_v15, %s8962_s1  ;;  %v911_v14 = vstv %s4980_s2  ;;  %s8946_s2 = smov 107  }
  0xcc   :  { %v914_v25 = vmul.f32 %v911_v14, %v5419_v3 }
  0xcd   :  { %v5639_v21 = vpop.permute.xlu1 %312  ;;  %v5641_v22 = vpop.permute.xlu0 %310 }
  0xcf   :  { %787 = vrot.lane.b32.xlu1 %v779_v18, %s8958_s21  ;;  %785 = vrot.lane.b32.xlu0 %v778_v19, %s8958_s21  ;;  %v912_v19 = vmul.f32 %v911_v14, %v5421_v5 }
  0xd1   :  { %v5647_v26 = vpop.permute.xlu1 %333  ;;  %v5649_v29 = vpop.permute.xlu0 %314 }
  0xd3   :  { %717 = vrot.lane.b32.xlu1 %v710_v23, %s8960_s16  ;;  %715 = vrot.lane.b32.xlu0 %v709_v24, %s8960_s16 }
  0xd5   :  { %v5655_v34 = vpop.permute.xlu1 %337  ;;  %v5657_v35 = vpop.permute.xlu0 %335 }
  0xd7   :  { %828 = vrot.lane.b32.xlu1 %v822_v30, %s8956_s24  ;;  %719 = vrot.lane.b32.xlu0 %v711_v33, %s8960_s16  ;;  %v913_v30 = vmul.f32 %v911_v14, %v5423_v7  ;;  %v843_v33 = vstv %s4977_s29  ;;  %v888_v14 = vstv %s4979_s11  ;;  %s4985_s29 = sld [smem:[#allocation5 + $0x15]]  ;;  %s8944_s11 = smov 106  }
  0xd8   :  { %v845_v42 = vmul.f32 %v843_v33, %v5423_v7 }
  0xd9   :  { %v5663_v43 = vpop.permute.xlu1 %357  ;;  %v5665_v44 = vpop.permute.xlu0 %355 }
  0xdb   :  { %832 = vrot.lane.b32.xlu1 %v824_v38, %s8956_s24  ;;  %830 = vrot.lane.b32.xlu0 %v823_v39, %s8956_s24 }
  0xdd   :  { %v5671_v52 = vpop.permute.xlu1 %378  ;;  %v5673_v53 = vpop.permute.xlu0 %359 }
  0xdf   :  { %762 = vrot.lane.b32.xlu1 %v755_v47, %s8958_s21  ;;  %760 = vrot.lane.b32.xlu0 %v754_v48, %s8958_s21  ;;  %v844_v47 = vmul.f32 %v843_v33, %v5421_v5  ;;  %v956_v48 = vstv %s4982_s7  ;;  %s4990_s7 = sld [smem:[#allocation8 + $0x17]] }
  0xe1   :  { %v5679_v58 = vpop.permute.xlu1 %382  ;;  %v5681_v61 = vpop.permute.xlu0 %380 }
  0xe3   :  { %873 = vrot.lane.b32.xlu1 %v867_v56, %s8954_s27  ;;  %764 = vrot.lane.b32.xlu0 %v756_v57, %s8958_s21  ;;  %v957_v57 = vmul.f32 %v956_v48, %v5421_v5 }
  0xe5   :  { %v5687_v4 = vpop.permute.xlu1 %402  ;;  %v5689_v9 = vpop.permute.xlu0 %400 }
  0xe7   :  { %877 = vrot.lane.b32.xlu1 %v869_v62, %s8954_s27  ;;  %875 = vrot.lane.b32.xlu0 %v868_v1, %s8954_s27  ;;  %v846_v62 = vmul.f32 %v843_v33, %v5419_v3  ;;  %v1001_v33 = vstv %s4984_s13  ;;  %s4987_s13 = sld [smem:[#allocation5 + $0x16]] }
  0xe9   :  { %v5695_v15 = vpop.permute.xlu1 %423  ;;  %v5697_v18 = vpop.permute.xlu0 %404 }
  0xeb   :  { %807 = vrot.lane.b32.xlu1 %v800_v10, %s8956_s24  ;;  %805 = vrot.lane.b32.xlu0 %v799_v11, %s8956_s24  ;;  %v959_v10 = vmul.f32 %v956_v48, %v5419_v3  ;;  %v958_v11 = vmul.f32 %v956_v48, %v5423_v7  ;;  %v1002_v48 = vmul.f32 %v1001_v33, %v5421_v5 }
  0xed   :  { %v5703_v23 = vpop.permute.xlu1 %427  ;;  %v5705_v24 = vpop.permute.xlu0 %425 }
  0xef   :  { %918 = vrot.lane.b32.xlu1 %v912_v19, %s8952_s10  ;;  %809 = vrot.lane.b32.xlu0 %v801_v20, %s8956_s24 }
  0xf1   :  { %v5711_v38 = vpop.permute.xlu1 %447  ;;  %v5713_v39 = vpop.permute.xlu0 %445 }
  0xf3   :  { %922 = vrot.lane.b32.xlu1 %v914_v25, %s8952_s10  ;;  %920 = vrot.lane.b32.xlu0 %v913_v30, %s8952_s10  ;;  %v890_v25 = vmul.f32 %v888_v14, %v5423_v7  ;;  %v889_v30 = vmul.f32 %v888_v14, %v5421_v5 }
  0xf5   :  { %v5719_v51 = vpop.permute.xlu1 %468  ;;  %v5721_v56 = vpop.permute.xlu0 %449 }
  0xf7   :  { %852 = vrot.lane.b32.xlu1 %v845_v42, %s8954_s27  ;;  %850 = vrot.lane.b32.xlu0 %v844_v47, %s8954_s27 }
  0xf9   :  { %v5727_v1 = vpop.permute.xlu1 %472  ;;  %v5729_v2 = vpop.permute.xlu0 %470 }
  0xfb   :  { %963 = vrot.lane.b32.xlu1 %v957_v57, %s8950_s15  ;;  %854 = vrot.lane.b32.xlu0 %v846_v62, %s8954_s27  ;;  %v891_v57 = vmul.f32 %v888_v14, %v5419_v3  ;;  %s7044_s27 = sld [smem:[#allocation8 + $0x2c]] }
  0xfd   :  { %v5735_v19 = vpop.permute.xlu1 %492  ;;  %v5737_v20 = vpop.permute.xlu0 %490 }
  0xfe   :  { %9055 = vst [vmem:[#allocation17_spill] sm:$0xff] %v5737_v20 }
  0xff   :  { %967 = vrot.lane.b32.xlu1 %v959_v10, %s8950_s15  ;;  %965 = vrot.lane.b32.xlu0 %v958_v11, %s8950_s15  ;;  %v1004_v11 = vmul.f32 %v1001_v33, %v5419_v3 }
 0x101   :  { %v5743_v42 = vpop.permute.xlu1 %513  ;;  %v5745_v47 = vpop.permute.xlu0 %494 }
 0x102   :  { %9056 = vst [vmem:[#allocation18_spill] sm:$0xff] %v5743_v42  ;;  %9057 = vst [vmem:[#allocation19_spill] sm:$0xff] %v5745_v47  ;;  %v933_v47 = vstv %s4981_s18  ;;  %s4992_s18 = sld [smem:[#allocation8 + $0x18]] }
 0x103   :  { %897 = vrot.lane.b32.xlu1 %v890_v25, %s8952_s10  ;;  %895 = vrot.lane.b32.xlu0 %v889_v30, %s8952_s10  ;;  %v1003_v25 = vmul.f32 %v1001_v33, %v5423_v7  ;;  %v935_v14 = vmul.f32 %v933_v47, %v5423_v7 }
 0x105   :  { %v5751_v62 = vpop.permute.xlu1 %517  ;;  %v5753_v10 = vpop.permute.xlu0 %515 }
 0x106   :  { %9058 = vst [vmem:[#allocation20_spill] sm:$0xff] %v5751_v62  ;;  %9059 = vst [vmem:[#allocation21_spill] sm:$0xff] %v5753_v10  ;;  %v934_v62 = vmul.f32 %v933_v47, %v5421_v5 }
 0x107   :  { %1008 = vrot.lane.b32.xlu1 %v1002_v48, %s8948_s0  ;;  %899 = vrot.lane.b32.xlu0 %v891_v57, %s8952_s10  ;;  %v1046_v48 = vstv %s4986_s19  ;;  %s8942_s19 = smov 105   ;;  %s7042_s10 = sld [smem:[#allocation5 + $0x29]] }
 0x108   :  { %v1047_v33 = vmul.f32 %v1046_v48, %v5421_v5 }
 0x109   :  { %v5759_v30 = vpop.permute.xlu1 %537  ;;  %v5761_v42 = vpop.permute.xlu0 %535 }
 0x10a   :  { %9060 = vst [vmem:[#allocation22_spill] sm:$0xff] %v5759_v30  ;;  %9061 = vst [vmem:[#allocation23_spill] sm:$0xff] %v5761_v42  ;;  %v978_v30 = vstv %s4983_s23  ;;  %s4989_s23 = sld [smem:[#allocation5 + $0x17]] }
 0x10b   :  { %1012 = vrot.lane.b32.xlu1 %v1004_v11, %s8948_s0  ;;  %1010 = vrot.lane.b32.xlu0 %v1003_v25, %s8948_s0  ;;  %v936_v11 = vmul.f32 %v933_v47, %v5419_v3  ;;  %v980_v47 = vmul.f32 %v978_v30, %v5423_v7 }
 0x10d   :  { %v5767_v57 = vpop.permute.xlu1 %558  ;;  %v5769_v10 = vpop.permute.xlu0 %539 }
 0x10e   :  { %9062 = vst [vmem:[#allocation24_spill] sm:$0xff] %v5767_v57  ;;  %9063 = vst [vmem:[#allocation25_spill] sm:$0xff] %v5769_v10  ;;  %v1049_v10 = vmul.f32 %v1046_v48, %v5419_v3 }
 0x10f   :  { %942 = vrot.lane.b32.xlu1 %v935_v14, %s8950_s15  ;;  %940 = vrot.lane.b32.xlu0 %v934_v62, %s8950_s15  ;;  %v1048_v14 = vmul.f32 %v1046_v48, %v5423_v7 }
 0x111   :  { %v5775_v25 = vpop.permute.xlu1 %562  ;;  %v5777_v42 = vpop.permute.xlu0 %560 }
 0x112   :  { %9064 = vst [vmem:[#allocation26_spill] sm:$0xff] %v5775_v25  ;;  %9065 = vst [vmem:[#allocation27_spill] sm:$0xff] %v5777_v42  ;;  %v979_v25 = vmul.f32 %v978_v30, %v5421_v5 }
 0x113   :  { %1053 = vrot.lane.b32.xlu1 %v1047_v33, %s8946_s2  ;;  %944 = vrot.lane.b32.xlu0 %v936_v11, %s8950_s15  ;;  %v1091_v33 = vstv %s4988_s26  ;;  %s4994_s26 = sld [smem:[#allocation8 + $0x19]]  ;;  %s7040_s15 = sld [smem:[#allocation8 + $0x2b]] }
 0x114   :  { %v1092_v48 = vmul.f32 %v1091_v33, %v5421_v5 }
 0x115   :  { %v5783_v62 = vpop.permute.xlu1 %603  ;;  %v5785_v57 = vpop.permute.xlu0 %580 }
 0x116   :  { %9066 = vst [vmem:[#allocation28_spill] sm:$0xff] %v5783_v62  ;;  %9067 = vst [vmem:[#allocation29_spill] sm:$0xff] %v5785_v57  ;;  %v1023_v62 = vstv %s4985_s29  ;;  %s8858_s29 = smov 104  }
 0x117   :  { %1057 = vrot.lane.b32.xlu1 %v1049_v10, %s8946_s2  ;;  %1055 = vrot.lane.b32.xlu0 %v1048_v14, %s8946_s2  ;;  %v981_v10 = vmul.f32 %v978_v30, %v5419_v3  ;;  %v1025_v30 = vmul.f32 %v1023_v62, %v5423_v7 }
 0x119   :  { %v5791_v11 = vpop.permute.xlu1 %607  ;;  %v5793_v42 = vpop.permute.xlu0 %605 }
 0x11a   :  { %9068 = vst [vmem:[#allocation30_spill] sm:$0xff] %v5791_v11  ;;  %9069 = vst [vmem:[#allocation31_spill] sm:$0xff] %v5793_v42  ;;  %v1094_v11 = vmul.f32 %v1091_v33, %v5419_v3 }
 0x11b   :  { %987 = vrot.lane.b32.xlu1 %v980_v47, %s8948_s0  ;;  %985 = vrot.lane.b32.xlu0 %v979_v25, %s8948_s0  ;;  %v1093_v47 = vmul.f32 %v1091_v33, %v5423_v7 }
 0x11d   :  { %v5799_v14 = vpop.permute.xlu1 %650  ;;  %v5801_v57 = vpop.permute.xlu0 %648 }
 0x11e   :  { %9070 = vst [vmem:[#allocation32_spill] sm:$0xff] %v5799_v14  ;;  %9071 = vst [vmem:[#allocation33_spill] sm:$0xff] %v5801_v57  ;;  %v1024_v57 = vmul.f32 %v1023_v62, %v5421_v5 }
 0x11f   :  { %1098 = vrot.lane.b32.xlu1 %v1092_v48, %s8944_s11  ;;  %989 = vrot.lane.b32.xlu0 %v981_v10, %s8948_s0  ;;  %v1136_v48 = vstv %s4990_s7  ;;  %s4991_s7 = sld [smem:[#allocation5 + $0x18]]  ;;  %s7038_s0 = sld [smem:[#allocation8 + $0x2a]] }
 0x120   :  { %v1137_v33 = vmul.f32 %v1136_v48, %v5421_v5 }
 0x121   :  { %v5807_v25 = vpop.permute.xlu1 %582  ;;  %v5809_v42 = vpop.permute.xlu0 %652 }
 0x122   :  { %9072 = vst [vmem:[#allocation34_spill] sm:$0xff] %v5807_v25  ;;  %9073 = vst [vmem:[#allocation35_spill] sm:$0xff] %v5809_v42 }
 0x123   :  { %1102 = vrot.lane.b32.xlu1 %v1094_v11, %s8944_s11  ;;  %1100 = vrot.lane.b32.xlu0 %v1093_v47, %s8944_s11  ;;  %v1026_v11 = vmul.f32 %v1023_v62, %v5419_v3 }
 0x125   :  { %v5815_v10 = vpop.permute.xlu1 %693  ;;  %v5817_v14 = vpop.permute.xlu0 %584 }
 0x126   :  { %9074 = vst [vmem:[#allocation36_spill] sm:$0xff] %v5815_v10  ;;  %9075 = vst [vmem:[#allocation37_spill] sm:$0xff] %v5817_v14  ;;  %v1139_v10 = vmul.f32 %v1136_v48, %v5419_v3  ;;  %v1068_v14 = vstv %s4987_s13  ;;  %s4996_s13 = sld [smem:[#allocation8 + $0x1a]] }
 0x127   :  { %1032 = vrot.lane.b32.xlu1 %v1025_v30, %s8946_s2  ;;  %1030 = vrot.lane.b32.xlu0 %v1024_v57, %s8946_s2  ;;  %v1138_v30 = vmul.f32 %v1136_v48, %v5423_v7  ;;  %v1070_v62 = vmul.f32 %v1068_v14, %v5423_v7 }
 0x129   :  { %v5823_v47 = vpop.permute.xlu1 %697  ;;  %v5825_v42 = vpop.permute.xlu0 %695 }
 0x12a   :  { %9076 = vst [vmem:[#allocation38_spill] sm:$0xff] %v5823_v47  ;;  %9077 = vst [vmem:[#allocation39_spill] sm:$0xff] %v5825_v42  ;;  %v1069_v47 = vmul.f32 %v1068_v14, %v5421_v5 }
 0x12b   :  { %1143 = vrot.lane.b32.xlu1 %v1137_v33, %s8942_s19  ;;  %1034 = vrot.lane.b32.xlu0 %v1026_v11, %s8946_s2  ;;  %v1181_v33 = vstv %s4992_s18  ;;  %s8864_s18 = smov 103   ;;  %s7036_s2 = sld [smem:[#allocation5 + $0x26]] }
 0x12c   :  { %v1182_v48 = vmul.f32 %v1181_v33, %v5421_v5 }
 0x12d   :  { %v5831_v57 = vpop.permute.xlu1 %627  ;;  %v5833_v25 = vpop.permute.xlu0 %625 }
 0x12e   :  { %9078 = vst [vmem:[#allocation40_spill] sm:$0xff] %v5831_v57  ;;  %9079 = vst [vmem:[#allocation41_spill] sm:$0xff] %v5833_v25 }
 0x12f   :  { %1147 = vrot.lane.b32.xlu1 %v1139_v10, %s8942_s19  ;;  %1145 = vrot.lane.b32.xlu0 %v1138_v30, %s8942_s19  ;;  %v1071_v10 = vmul.f32 %v1068_v14, %v5419_v3 }
 0x131   :  { %v5839_v11 = vpop.permute.xlu1 %738  ;;  %v5841_v42 = vpop.permute.xlu0 %629 }
 0x132   :  { %9080 = vst [vmem:[#allocation42_spill] sm:$0xff] %v5839_v11  ;;  %9081 = vst [vmem:[#allocation43_spill] sm:$0xff] %v5841_v42  ;;  %v1184_v11 = vmul.f32 %v1181_v33, %v5419_v3  ;;  %v1113_v42 = vstv %s4989_s23  ;;  %s4993_s23 = sld [smem:[#allocation5 + $0x19]] }
 0x133   :  { %1077 = vrot.lane.b32.xlu1 %v1070_v62, %s8944_s11  ;;  %1075 = vrot.lane.b32.xlu0 %v1069_v47, %s8944_s11  ;;  %v1183_v62 = vmul.f32 %v1181_v33, %v5423_v7  ;;  %v1115_v14 = vmul.f32 %v1113_v42, %v5423_v7 }
 0x135   :  { %v5847_v30 = vpop.permute.xlu1 %742  ;;  %v5849_v25 = vpop.permute.xlu0 %740 }
 0x136   :  { %9082 = vst [vmem:[#allocation44_spill] sm:$0xff] %v5847_v30  ;;  %9083 = vst [vmem:[#allocation45_spill] sm:$0xff] %v5849_v25  ;;  %v1114_v30 = vmul.f32 %v1113_v42, %v5421_v5 }
 0x137   :  { %1188 = vrot.lane.b32.xlu1 %v1182_v48, %s8858_s29  ;;  %1079 = vrot.lane.b32.xlu0 %v1071_v10, %s8944_s11  ;;  %v1226_v48 = vstv %s4994_s26  ;;  %s4998_s26 = sld [smem:[#allocation8 + $0x1b]]  ;;  %s7034_s11 = sld [smem:[#allocation8 + $0x26]] }
 0x138   :  { %v1227_v33 = vmul.f32 %v1226_v48, %v5421_v5 }
 0x139   :  { %v5855_v47 = vpop.permute.xlu1 %672  ;;  %v5857_v57 = vpop.permute.xlu0 %670 }
 0x13a   :  { %9084 = vst [vmem:[#allocation46_spill] sm:$0xff] %v5855_v47  ;;  %9085 = vst [vmem:[#allocation47_spill] sm:$0xff] %v5857_v57 }
 0x13b   :  { %1192 = vrot.lane.b32.xlu1 %v1184_v11, %s8858_s29  ;;  %1190 = vrot.lane.b32.xlu0 %v1183_v62, %s8858_s29  ;;  %v1116_v11 = vmul.f32 %v1113_v42, %v5419_v3 }
 0x13d   :  { %v5863_v10 = vpop.permute.xlu1 %783  ;;  %v5865_v25 = vpop.permute.xlu0 %674 }
 0x13e   :  { %9086 = vst [vmem:[#allocation48_spill] sm:$0xff] %v5863_v10  ;;  %9087 = vst [vmem:[#allocation49_spill] sm:$0xff] %v5865_v25  ;;  %v1229_v10 = vmul.f32 %v1226_v48, %v5419_v3  ;;  %v1158_v25 = vstv %s4991_s7  ;;  %s8870_s7 = smov 102  }
 0x13f   :  { %1122 = vrot.lane.b32.xlu1 %v1115_v14, %s8942_s19  ;;  %1120 = vrot.lane.b32.xlu0 %v1114_v30, %s8942_s19  ;;  %v1228_v14 = vmul.f32 %v1226_v48, %v5423_v7  ;;  %v1160_v42 = vmul.f32 %v1158_v25, %v5423_v7 }
 0x141   :  { %v5871_v62 = vpop.permute.xlu1 %787  ;;  %v5873_v57 = vpop.permute.xlu0 %785 }
 0x142   :  { %9088 = vst [vmem:[#allocation50_spill] sm:$0xff] %v5871_v62  ;;  %9089 = vst [vmem:[#allocation51_spill] sm:$0xff] %v5873_v57  ;;  %v1159_v62 = vmul.f32 %v1158_v25, %v5421_v5 }
 0x143   :  { %1233 = vrot.lane.b32.xlu1 %v1227_v33, %s8864_s18  ;;  %1124 = vrot.lane.b32.xlu0 %v1116_v11, %s8942_s19  ;;  %v1271_v33 = vstv %s4996_s13  ;;  %s4995_s13 = sld [smem:[#allocation5 + $0x1a]]  ;;  %s5057_s19 = sld [smem:[#allocation5 + $0x25]] }
 0x144   :  { %v1272_v48 = vmul.f32 %v1271_v33, %v5421_v5 }
 0x145   :  { %v5879_v30 = vpop.permute.xlu1 %717  ;;  %v5881_v47 = vpop.permute.xlu0 %715 }
 0x146   :  { %9090 = vst [vmem:[#allocation52_spill] sm:$0xff] %v5879_v30  ;;  %9091 = vst [vmem:[#allocation53_spill] sm:$0xff] %v5881_v47 }
 0x147   :  { %1237 = vrot.lane.b32.xlu1 %v1229_v10, %s8864_s18  ;;  %1235 = vrot.lane.b32.xlu0 %v1228_v14, %s8864_s18  ;;  %v1161_v10 = vmul.f32 %v1158_v25, %v5419_v3  ;;  %v5911_v25 = vld [vmem:[#allocation2 + $0x8] sm:$0xff] }
 0x149   :  { %v5887_v11 = vpop.permute.xlu1 %828  ;;  %v5889_v57 = vpop.permute.xlu0 %719 }
 0x14a   :  { %9092 = vst [vmem:[#allocation54_spill] sm:$0xff] %v5887_v11  ;;  %9093 = vst [vmem:[#allocation55_spill] sm:$0xff] %v5889_v57  ;;  %v5901_v11 = vld [vmem:[#allocation2 + $0x10] sm:$0xff]  ;;  %v1203_v57 = vstv %s4993_s23  ;;  %s5000_s23 = sld [smem:[#allocation8 + $0x1c]] }
 0x14b   :  { %1167 = vrot.lane.b32.xlu1 %v1160_v42, %s8858_s29  ;;  %1165 = vrot.lane.b32.xlu0 %v1159_v62, %s8858_s29  ;;  %v1274_v42 = vmul.f32 %v5901_v11, %v1271_v33  ;;  %v1273_v62 = vmul.f32 %v1271_v33, %v5423_v7 }
 0x14d   :  { %v5895_v14 = vpop.permute.xlu1 %832  ;;  %v5897_v47 = vpop.permute.xlu0 %830 }
 0x14e   :  { %9094 = vst [vmem:[#allocation56_spill] sm:$0xff] %v5895_v14  ;;  %9095 = vst [vmem:[#allocation57_spill] sm:$0xff] %v5897_v47  ;;  %v1316_v47 = vstv %s4998_s26  ;;  %s4997_s26 = sld [smem:[#allocation5 + $0x1b]] }
 0x14f   :  { %1278 = vrot.lane.b32.xlu1 %v1272_v48, %s8870_s7  ;;  %1169 = vrot.lane.b32.xlu0 %v1161_v10, %s8858_s29  ;;  %v1205_v48 = vmul.f32 %v5911_v25, %v1203_v57  ;;  %v5914_v10 = vld [vmem:[#allocation2] sm:$0xff]  ;;  %s8876_s29 = smov 101  }
 0x150   :  { %v1204_v14 = vmul.f32 %v5914_v10, %v1203_v57 }
 0x151   :  { %v5905_v5 = vpop.permute.xlu1 %762  ;;  %v5907_v3 = vpop.permute.xlu0 %760 }
 0x152   :  { %9096 = vst [vmem:[#allocation58_spill] sm:$0xff] %v5905_v5  ;;  %9097 = vst [vmem:[#allocation59_spill] sm:$0xff] %v5907_v3 }
 0x153   :  { %1282 = vrot.lane.b32.xlu1 %v1274_v42, %s8870_s7  ;;  %1280 = vrot.lane.b32.xlu0 %v1273_v62, %s8870_s7  ;;  %v1317_v42 = vmul.f32 %v5914_v10, %v1316_v47  ;;  %v1206_v62 = vmul.f32 %v5901_v11, %v1203_v57 }
 0x155   :  { %v5917_v7 = vpop.permute.xlu1 %873  ;;  %v5919_v33 = vpop.permute.xlu0 %764 }
 0x156   :  { %9098 = vst [vmem:[#allocation60_spill] sm:$0xff] %v5917_v7  ;;  %9099 = vst [vmem:[#allocation61_spill] sm:$0xff] %v5919_v33  ;;  %v1319_v7 = vmul.f32 %v5901_v11, %v1316_v47  ;;  %v1248_v33 = vstv %s4995_s13  ;;  %s5002_s13 = sld [smem:[#allocation8 + $0x1d]] }
 0x157   :  { %1212 = vrot.lane.b32.xlu1 %v1205_v48, %s8864_s18  ;;  %1210 = vrot.lane.b32.xlu0 %v1204_v14, %s8864_s18  ;;  %v1318_v48 = vmul.f32 %v5911_v25, %v1316_v47  ;;  %v1250_v57 = vmul.f32 %v5911_v25, %v1248_v33 }
 0x159   :  { %v5925_v3 = vpop.permute.xlu1 %877  ;;  %v5927_v5 = vpop.permute.xlu0 %875 }
 0x15a   :  { %9100 = vst [vmem:[#allocation62_spill] sm:$0xff] %v5925_v3  ;;  %9101 = vst [vmem:[#allocation63_spill] sm:$0xff] %v5927_v5  ;;  %v1249_v3 = vmul.f32 %v5914_v10, %v1248_v33 }
 0x15b   :  { %1323 = vrot.lane.b32.xlu1 %v1317_v42, %s8876_s29  ;;  %1214 = vrot.lane.b32.xlu0 %v1206_v62, %s8864_s18  ;;  %v1361_v42 = vstv %s5000_s23  ;;  %s8882_s18 = smov 100   ;;  %s4999_s23 = sld [smem:[#allocation5 + $0x1c]] }
 0x15c   :  { %v1362_v47 = vmul.f32 %v5914_v10, %v1361_v42 }
 0x15d   :  { %v5933_v14 = vpop.permute.xlu1 %807  ;;  %v5935_v30 = vpop.permute.xlu0 %805 }
 0x15e   :  { %9102 = vst [vmem:[#allocation64_spill] sm:$0xff] %v5933_v14  ;;  %9103 = vst [vmem:[#allocation65_spill] sm:$0xff] %v5935_v30 }
 0x15f   :  { %1327 = vrot.lane.b32.xlu1 %v1319_v7, %s8876_s29  ;;  %1325 = vrot.lane.b32.xlu0 %v1318_v48, %s8876_s29  ;;  %v1251_v7 = vmul.f32 %v5901_v11, %v1248_v33 }
 0x161   :  { %v5941_v62 = vpop.permute.xlu1 %918  ;;  %v5943_v5 = vpop.permute.xlu0 %809 }
 0x162   :  { %9104 = vst [vmem:[#allocation66_spill] sm:$0xff] %v5941_v62  ;;  %9105 = vst [vmem:[#allocation67_spill] sm:$0xff] %v5943_v5  ;;  %v1364_v62 = vmul.f32 %v5901_v11, %v1361_v42  ;;  %v1293_v5 = vstv %s4997_s26  ;;  %s5004_s26 = sld [smem:[#allocation8 + $0x1e]] }
 0x163   :  { %1257 = vrot.lane.b32.xlu1 %v1250_v57, %s8870_s7  ;;  %1255 = vrot.lane.b32.xlu0 %v1249_v3, %s8870_s7  ;;  %v1363_v57 = vmul.f32 %v5911_v25, %v1361_v42  ;;  %v1295_v33 = vmul.f32 %v5911_v25, %v1293_v5 }
 0x165   :  { %v5949_v48 = vpop.permute.xlu1 %922  ;;  %v5951_v30 = vpop.permute.xlu0 %920 }
 0x166   :  { %9106 = vst [vmem:[#allocation68_spill] sm:$0xff] %v5949_v48  ;;  %9107 = vst [vmem:[#allocation69_spill] sm:$0xff] %v5951_v30  ;;  %v1294_v48 = vmul.f32 %v5914_v10, %v1293_v5 }
 0x167   :  { %1368 = vrot.lane.b32.xlu1 %v1362_v47, %s8882_s18  ;;  %1259 = vrot.lane.b32.xlu0 %v1251_v7, %s8870_s7  ;;  %v1406_v47 = vstv %s5002_s13  ;;  %s8888_s7 = smov 99   ;;  %s5001_s13 = sld [smem:[#allocation5 + $0x1d]] }
 0x168   :  { %v1407_v42 = vmul.f32 %v5914_v10, %v1406_v47 }
 0x169   :  { %v5957_v3 = vpop.permute.xlu1 %852  ;;  %v5959_v14 = vpop.permute.xlu0 %850 }
 0x16a   :  { %9108 = vst [vmem:[#allocation70_spill] sm:$0xff] %v5957_v3  ;;  %9109 = vst [vmem:[#allocation71_spill] sm:$0xff] %v5959_v14 }
 0x16b   :  { %1372 = vrot.lane.b32.xlu1 %v1364_v62, %s8882_s18  ;;  %1370 = vrot.lane.b32.xlu0 %v1363_v57, %s8882_s18  ;;  %v1296_v62 = vmul.f32 %v5901_v11, %v1293_v5 }
 0x16d   :  { %v5965_v7 = vpop.permute.xlu1 %963  ;;  %v5967_v30 = vpop.permute.xlu0 %854 }
 0x16e   :  { %9110 = vst [vmem:[#allocation72_spill] sm:$0xff] %v5965_v7  ;;  %9111 = vst [vmem:[#allocation73_spill] sm:$0xff] %v5967_v30  ;;  %v1409_v7 = vmul.f32 %v5901_v11, %v1406_v47  ;;  %v1338_v30 = vstv %s4999_s23  ;;  %s5006_s23 = sld [smem:[#allocation8 + $0x1f]] }
 0x16f   :  { %1302 = vrot.lane.b32.xlu1 %v1295_v33, %s8876_s29  ;;  %1300 = vrot.lane.b32.xlu0 %v1294_v48, %s8876_s29  ;;  %v1408_v33 = vmul.f32 %v5911_v25, %v1406_v47  ;;  %v1340_v5 = vmul.f32 %v5911_v25, %v1338_v30 }
 0x171   :  { %v5973_v57 = vpop.permute.xlu1 %967  ;;  %v5975_v14 = vpop.permute.xlu0 %965 }
 0x172   :  { %9112 = vst [vmem:[#allocation74_spill] sm:$0xff] %v5973_v57  ;;  %9113 = vst [vmem:[#allocation75_spill] sm:$0xff] %v5975_v14  ;;  %v1339_v57 = vmul.f32 %v5914_v10, %v1338_v30 }
 0x173   :  { %1413 = vrot.lane.b32.xlu1 %v1407_v42, %s8888_s7  ;;  %1304 = vrot.lane.b32.xlu0 %v1296_v62, %s8876_s29  ;;  %v1451_v42 = vstv %s5004_s26  ;;  %s8940_s29 = smov 98   ;;  %s5003_s26 = sld [smem:[#allocation5 + $0x1e]] }
 0x174   :  { %v1452_v47 = vmul.f32 %v5914_v10, %v1451_v42 }
 0x175   :  { %v5981_v48 = vpop.permute.xlu1 %897  ;;  %v5983_v3 = vpop.permute.xlu0 %895 }
 0x176   :  { %9114 = vst [vmem:[#allocation76_spill] sm:$0xff] %v5981_v48  ;;  %9115 = vst [vmem:[#allocation77_spill] sm:$0xff] %v5983_v3 }
 0x177   :  { %1417 = vrot.lane.b32.xlu1 %v1409_v7, %s8888_s7  ;;  %1415 = vrot.lane.b32.xlu0 %v1408_v33, %s8888_s7  ;;  %v1341_v7 = vmul.f32 %v5901_v11, %v1338_v30 }
 0x179   :  { %v5989_v62 = vpop.permute.xlu1 %1008  ;;  %v5991_v14 = vpop.permute.xlu0 %899 }
 0x17a   :  { %9116 = vst [vmem:[#allocation78_spill] sm:$0xff] %v5989_v62  ;;  %9117 = vst [vmem:[#allocation79_spill] sm:$0xff] %v5991_v14  ;;  %v1454_v62 = vmul.f32 %v5901_v11, %v1451_v42  ;;  %v1383_v14 = vstv %s5001_s13  ;;  %s5008_s13 = sld [smem:[#allocation8 + $0x20]] }
 0x17b   :  { %1347 = vrot.lane.b32.xlu1 %v1340_v5, %s8882_s18  ;;  %1345 = vrot.lane.b32.xlu0 %v1339_v57, %s8882_s18  ;;  %v1453_v5 = vmul.f32 %v5911_v25, %v1451_v42  ;;  %v1385_v30 = vmul.f32 %v5911_v25, %v1383_v14 }
 0x17d   :  { %v5997_v33 = vpop.permute.xlu1 %1012  ;;  %v5999_v3 = vpop.permute.xlu0 %1010 }
 0x17e   :  { %9118 = vst [vmem:[#allocation80_spill] sm:$0xff] %v5997_v33  ;;  %9119 = vst [vmem:[#allocation81_spill] sm:$0xff] %v5999_v3  ;;  %v1384_v33 = vmul.f32 %v5914_v10, %v1383_v14 }
 0x17f   :  { %1458 = vrot.lane.b32.xlu1 %v1452_v47, %s8940_s29  ;;  %1349 = vrot.lane.b32.xlu0 %v1341_v7, %s8882_s18  ;;  %v1496_v47 = vstv %s5006_s23  ;;  %s8938_s18 = smov 97   ;;  %s5005_s23 = sld [smem:[#allocation5 + $0x1f]] }
 0x180   :  { %v1497_v42 = vmul.f32 %v5914_v10, %v1496_v47 }
 0x181   :  { %v6005_v57 = vpop.permute.xlu1 %942  ;;  %v6007_v48 = vpop.permute.xlu0 %940 }
 0x182   :  { %9120 = vst [vmem:[#allocation82_spill] sm:$0xff] %v6005_v57  ;;  %9121 = vst [vmem:[#allocation83_spill] sm:$0xff] %v6007_v48 }
 0x183   :  { %1462 = vrot.lane.b32.xlu1 %v1454_v62, %s8940_s29  ;;  %1460 = vrot.lane.b32.xlu0 %v1453_v5, %s8940_s29  ;;  %v1386_v62 = vmul.f32 %v5901_v11, %v1383_v14 }
 0x185   :  { %v6013_v7 = vpop.permute.xlu1 %1053  ;;  %v6015_v3 = vpop.permute.xlu0 %944 }
 0x186   :  { %9122 = vst [vmem:[#allocation84_spill] sm:$0xff] %v6013_v7  ;;  %9123 = vst [vmem:[#allocation85_spill] sm:$0xff] %v6015_v3  ;;  %v1499_v7 = vmul.f32 %v5901_v11, %v1496_v47  ;;  %v1428_v3 = vstv %s5003_s26  ;;  %s5007_s26 = sld [smem:[#allocation5 + $0x20]] }
 0x187   :  { %1392 = vrot.lane.b32.xlu1 %v1385_v30, %s8888_s7  ;;  %1390 = vrot.lane.b32.xlu0 %v1384_v33, %s8888_s7  ;;  %v1498_v30 = vmul.f32 %v5911_v25, %v1496_v47  ;;  %v1430_v14 = vmul.f32 %v5911_v25, %v1428_v3 }
 0x189   :  { %v6021_v5 = vpop.permute.xlu1 %1057  ;;  %v6023_v48 = vpop.permute.xlu0 %1055 }
 0x18a   :  { %9124 = vst [vmem:[#allocation86_spill] sm:$0xff] %v6021_v5  ;;  %9125 = vst [vmem:[#allocation87_spill] sm:$0xff] %v6023_v48  ;;  %v1429_v5 = vmul.f32 %v5914_v10, %v1428_v3 }
 0x18b   :  { %1503 = vrot.lane.b32.xlu1 %v1497_v42, %s8938_s18  ;;  %1394 = vrot.lane.b32.xlu0 %v1386_v62, %s8888_s7  ;;  %v1541_v42 = vstv %s5008_s13  ;;  %s8926_s7 = smov 96   ;;  %s112_s13 = sld [smem:[#allocation5]] }
 0x18c   :  { %v1542_v47 = vmul.f32 %v5914_v10, %v1541_v42 }
 0x18d   :  { %v6029_v33 = vpop.permute.xlu1 %987  ;;  %v6031_v57 = vpop.permute.xlu0 %985 }
 0x18e   :  { %9126 = vst [vmem:[#allocation88_spill] sm:$0xff] %v6029_v33  ;;  %9127 = vst [vmem:[#allocation89_spill] sm:$0xff] %v6031_v57 }
 0x18f   :  { %1507 = vrot.lane.b32.xlu1 %v1499_v7, %s8938_s18  ;;  %1505 = vrot.lane.b32.xlu0 %v1498_v30, %s8938_s18  ;;  %v1431_v7 = vmul.f32 %v5901_v11, %v1428_v3 }
 0x191   :  { %v6037_v62 = vpop.permute.xlu1 %1098  ;;  %v6039_v48 = vpop.permute.xlu0 %989 }
 0x192   :  { %9128 = vst [vmem:[#allocation90_spill] sm:$0xff] %v6037_v62  ;;  %9129 = vst [vmem:[#allocation91_spill] sm:$0xff] %v6039_v48  ;;  %v1544_v62 = vmul.f32 %v5901_v11, %v1541_v42  ;;  %v1473_v48 = vstv %s5005_s23  ;;  %s117_s23 = sld [smem:[#allocation8]] }
 0x193   :  { %1437 = vrot.lane.b32.xlu1 %v1430_v14, %s8940_s29  ;;  %1435 = vrot.lane.b32.xlu0 %v1429_v5, %s8940_s29  ;;  %v1543_v14 = vmul.f32 %v5911_v25, %v1541_v42  ;;  %v1475_v3 = vmul.f32 %v5911_v25, %v1473_v48 }
 0x195   :  { %v6045_v30 = vpop.permute.xlu1 %1102  ;;  %v6047_v57 = vpop.permute.xlu0 %1100 }
 0x196   :  { %9130 = vst [vmem:[#allocation92_spill] sm:$0xff] %v6045_v30  ;;  %9131 = vst [vmem:[#allocation93_spill] sm:$0xff] %v6047_v57  ;;  %v1474_v30 = vmul.f32 %v5914_v10, %v1473_v48 }
 0x197   :  { %1548 = vrot.lane.b32.xlu1 %v1542_v47, %s8926_s7  ;;  %1439 = vrot.lane.b32.xlu0 %v1431_v7, %s8940_s29  ;;  %v1518_v47 = vstv %s5007_s26  ;;  %s5009_s26 = sld [smem:[#allocation10 + $0x1]]  ;;  %s7032_s29 = sld [smem:[#allocation8 + $0x25]] }
 0x198   :  { %v1519_v42 = vmul.f32 %v5914_v10, %v1518_v47 }
 0x199   :  { %v6053_v5 = vpop.permute.xlu1 %1032  ;;  %v6055_v33 = vpop.permute.xlu0 %1030 }
 0x19a   :  { %9132 = vst [vmem:[#allocation94_spill] sm:$0xff] %v6053_v5  ;;  %9133 = vst [vmem:[#allocation95_spill] sm:$0xff] %v6055_v33  ;;  %v1476_v33 = vmul.f32 %v5901_v11, %v1473_v48 }
 0x19b   :  { %1552 = vrot.lane.b32.xlu1 %v1544_v62, %s8926_s7  ;;  %1550 = vrot.lane.b32.xlu0 %v1543_v14, %s8926_s7 }
 0x19d   :  { %v6061_v57 = vpop.permute.xlu1 %1143  ;;  %v6063_v7 = vpop.permute.xlu0 %1034 }
 0x19e   :  { %9134 = vst [vmem:[#allocation96_spill] sm:$0xff] %v6061_v57  ;;  %9135 = vst [vmem:[#allocation97_spill] sm:$0xff] %v6063_v7  ;;  %v1521_v57 = vmul.f32 %v5901_v11, %v1518_v47  ;;  %v1520_v7 = vmul.f32 %v5911_v25, %v1518_v47 }
 0x19f   :  { %1482 = vrot.lane.b32.xlu1 %v1475_v3, %s8938_s18  ;;  %1480 = vrot.lane.b32.xlu0 %v1474_v30, %s8938_s18 }
 0x1a1   :  { %v6069_v62 = vpop.permute.xlu1 %1147  ;;  %v6071_v14 = vpop.permute.xlu0 %1145 }
 0x1a2   :  { %9136 = vst [vmem:[#allocation98_spill] sm:$0xff] %v6069_v62  ;;  %9137 = vst [vmem:[#allocation99_spill] sm:$0xff] %v6071_v14 }
 0x1a3   :  { %1525 = vrot.lane.b32.xlu1 %v1519_v42, %s8926_s7  ;;  %1484 = vrot.lane.b32.xlu0 %v1476_v33, %s8938_s18  ;;  %s5055_s18 = sld [smem:[#allocation5 + $0x24]] }
 0x1a5   :  { %v6077_v5 = vpop.permute.xlu1 %1077  ;;  %v6079_v3 = vpop.permute.xlu0 %1075 }
 0x1a6   :  { %9138 = vst [vmem:[#allocation100_spill] sm:$0xff] %v6077_v5  ;;  %9139 = vst [vmem:[#allocation101_spill] sm:$0xff] %v6079_v3 }
 0x1a7   :  { %1529 = vrot.lane.b32.xlu1 %v1521_v57, %s8926_s7  ;;  %1527 = vrot.lane.b32.xlu0 %v1520_v7, %s8926_s7  ;;  %s5012_s7 = sld [smem:[#allocation10 + $0x4]] }
 0x1a9   :  { %v6083_v48 = vpop.permute.xlu1 %1188  ;;  %v6085_v30 = vpop.permute.xlu0 %1079 }
 0x1aa   :  { %9140 = vst [vmem:[#allocation102_spill] sm:$0xff] %v6083_v48  ;;  %9141 = vst [vmem:[#allocation103_spill] sm:$0xff] %v6085_v30 }
 0x1ad   :  { %v6087_v62 = vpop.permute.xlu1 %1192  ;;  %v6089_v42 = vpop.permute.xlu0 %1190 }
 0x1ae   :  { %9142 = vst [vmem:[#allocation104_spill] sm:$0xff] %v6087_v62  ;;  %9143 = vst [vmem:[#allocation105_spill] sm:$0xff] %v6089_v42  ;;  %v113_v62 = vstv %s112_s13  ;;  %s5010_s13 = sld [smem:[#allocation10 + $0x2]] }
 0x1b1   :  { %v6091_v33 = vpop.permute.xlu1 %1122  ;;  %v6093_v14 = vpop.permute.xlu0 %1120 }
 0x1b2   :  { %9144 = vst [vmem:[#allocation106_spill] sm:$0xff] %v6091_v33  ;;  %9145 = vst [vmem:[#allocation107_spill] sm:$0xff] %v6093_v14  ;;  %v118_v14 = vstv %s117_s23  ;;  %s5011_s23 = sld [smem:[#allocation10 + $0x3]] }
 0x1b3   :  { %v119_v20 = vmul.f32 %v5914_v10, %v118_v14 }
 0x1b5   :  { %v6095_v47 = vpop.permute.xlu1 %1233  ;;  %v6097_v5 = vpop.permute.xlu0 %1124 }
 0x1b6   :  { %9146 = vst [vmem:[#allocation108_spill] sm:$0xff] %v6095_v47  ;;  %9147 = vst [vmem:[#allocation109_spill] sm:$0xff] %v6097_v5  ;;  %v116_v47 = vmul.f32 %v5901_v11, %v113_v62  ;;  %v115_v5 = vmul.f32 %v5911_v25, %v113_v62 }
 0x1b9   :  { %v6099_v57 = vpop.permute.xlu1 %1237  ;;  %v6101_v7 = vpop.permute.xlu0 %1235 }
 0x1ba   :  { %9148 = vst [vmem:[#allocation110_spill] sm:$0xff] %v6099_v57  ;;  %9149 = vst [vmem:[#allocation111_spill] sm:$0xff] %v6101_v7  ;;  %v114_v57 = vmul.f32 %v5914_v10, %v113_v62  ;;  %v121_v7 = vmul.f32 %v5901_v11, %v118_v14  ;;  %v159_v11 = vsel %vm136_vm0, %v5551_v31, %v5561_v37 }
 0x1bb   :  { %v144_v62 = vadd.f32 %v5543_v27, %v116_v47  ;;  %v183_v31 = vsel %vm181_vm1, %v5567_v40, %v5577_v46 }
 0x1bd   :  { %v6103_v48 = vpop.permute.xlu1 %1167  ;;  %v6105_v30 = vpop.permute.xlu0 %1165 }
 0x1be   :  { %9150 = vst [vmem:[#allocation112_spill] sm:$0xff] %v6103_v48  ;;  %9151 = vst [vmem:[#allocation113_spill] sm:$0xff] %v6105_v30  ;;  %v120_v30 = vmul.f32 %v5911_v25, %v118_v14  ;;  %v204_v14 = vsel %vm181_vm1, %v5575_v45, %v5585_v50  ;;  %v189_v45 = vadd.f32 %v5577_v46, %v144_v62 }
 0x1bf   :  { %v272_v46 = vsel %vm271_vm3, %v5617_v8, %v5615_v6  ;;  %v294_v62 = vsel %vm271_vm3, %v5623_v12, %v5633_v17  ;;  %v295_v8 = vsel %vm271_vm3, %v5633_v17, %v5631_v16  ;;  %v318_v12 = vsel %vm316_vm4, %v5639_v21, %v5649_v29 }
 0x1c0   :  { %v339_v17 = vsel %vm316_vm4, %v5647_v26, %v5657_v35  ;;  %v363_v26 = vsel %vm361_vm5, %v5663_v43, %v5673_v53 }
 0x1c1   :  { %v6107_v42 = vpop.permute.xlu1 %1278  ;;  %v6109_v33 = vpop.permute.xlu0 %1169 }
 0x1c2   :  { %9152 = vst [vmem:[#allocation114_spill] sm:$0xff] %v6107_v42  ;;  %9153 = vst [vmem:[#allocation115_spill] sm:$0xff] %v6109_v33  ;;  %v137_v42 = vsel %vm136_vm0, %v5545_v28, %v5553_v32  ;;  %v138_v33 = vsel %vm136_vm0, %v5553_v32, %v5543_v27  ;;  %v160_v28 = vsel %vm136_vm0, %v5561_v37, %v5559_v36 }
 0x1c3   :  { %v182_v32 = vsel %vm181_vm1, %v5569_v41, %v5567_v40  ;;  %v142_v25 = vadd.f32 %v137_v42, %v114_v57  ;;  %v143_v10 = vadd.f32 %v138_v33, %v115_v5  ;;  %v166_v37 = vadd.f32 %v5559_v36, %v121_v7 }
 0x1c4   :  { %v205_v41 = vsel %vm181_vm1, %v5585_v50, %v5583_v49  ;;  %v227_v40 = vsel %vm226_vm2, %v5593_v55, %v5591_v54  ;;  %v165_v5 = vadd.f32 %v160_v28, %v120_v30  ;;  %v228_v33 = vsel %vm226_vm2, %v5591_v54, %v5601_v60 }
 0x1c5   :  { %v6115_v3 = vpop.permute.xlu1 %1282  ;;  %v6117_v48 = vpop.permute.xlu0 %1280  ;;  %v187_v42 = vadd.f32 %v182_v32, %v142_v25  ;;  %v188_v57 = vadd.f32 %v183_v31, %v143_v10  ;;  %v211_v36 = vadd.f32 %v5583_v49, %v166_v37  ;;  %v249_v50 = vsel %vm226_vm2, %v5599_v59, %v5609_v0 }
 0x1c6   :  { %9154 = vst [vmem:[#allocation116_spill] sm:$0xff] %v6115_v3  ;;  %v164_v3 = vadd.f32 %v159_v11, %v119_v20  ;;  %v210_v7 = vadd.f32 %v205_v41, %v165_v5  ;;  %v250_v55 = vsel %vm226_vm2, %v5609_v0, %v5607_v63  ;;  %v273_v59 = vsel %vm271_vm3, %v5615_v6, %v5625_v13 }
 0x1c7   :  { %v232_v11 = vadd.f32 %v227_v40, %v187_v42  ;;  %v233_v49 = vadd.f32 %v228_v33, %v188_v57  ;;  %v256_v0 = vadd.f32 %v5607_v63, %v211_v36  ;;  %v384_v5 = vsel %vm361_vm5, %v5671_v52, %v5681_v61 }
 0x1c8   :  { %v209_v20 = vadd.f32 %v204_v14, %v164_v3  ;;  %v234_v3 = vadd.f32 %v5601_v60, %v189_v45  ;;  %v317_v60 = vsel %vm316_vm4, %v5641_v22, %v5639_v21  ;;  %v255_v32 = vadd.f32 %v250_v55, %v210_v7 }
 0x1c9   :  { %v6143_v27 = vpop.permute.xlu1 %1212  ;;  %v6145_v47 = vpop.permute.xlu0 %1210  ;;  %v277_v25 = vadd.f32 %v272_v46, %v232_v11  ;;  %v278_v10 = vadd.f32 %v273_v59, %v233_v49  ;;  %v301_v63 = vadd.f32 %v5631_v16, %v256_v0  ;;  %v362_v21 = vsel %vm361_vm5, %v5665_v44, %v5663_v43  ;;  %v9156_v0 = vld [vmem:[#allocation21_spill] sm:$0xff] }
 0x1ca   :  { %v254_v28 = vadd.f32 %v249_v50, %v209_v20  ;;  %v279_v6 = vadd.f32 %v5625_v13, %v234_v3  ;;  %v300_v22 = vadd.f32 %v295_v8, %v255_v32  ;;  %v340_v13 = vsel %vm316_vm4, %v5657_v35, %v5655_v34 }
 0x1cb   :  { %v322_v41 = vadd.f32 %v317_v60, %v277_v25  ;;  %v323_v16 = vadd.f32 %v318_v12, %v278_v10  ;;  %v346_v42 = vadd.f32 %v5655_v34, %v301_v63  ;;  %v385_v44 = vsel %vm361_vm5, %v5681_v61, %v5679_v58  ;;  %v9158_v60 = vld [vmem:[#allocation19_spill] sm:$0xff]  ;;  %v9159_v25 = vld [vmem:[#allocation20_spill] sm:$0xff] }
 0x1cc   :  { %v299_v31 = vadd.f32 %v294_v62, %v254_v28  ;;  %v324_v40 = vadd.f32 %v5649_v29, %v279_v6  ;;  %v407_v29 = vsel %vm406_vm6, %v5689_v9, %v5687_v4  ;;  %v345_v45 = vadd.f32 %v340_v13, %v300_v22  ;;  %v9157_v28 = vld [vmem:[#allocation18_spill] sm:$0xff]  ;;  %v9163_v13 = vld [vmem:[#allocation23_spill] sm:$0xff] }
 0x1cd   :  { %v6168_v54 = vpop.permute.xlu1 %1323  ;;  %v6170_v30 = vpop.permute.xlu0 %1214  ;;  %v367_v33 = vadd.f32 %v362_v21, %v322_v41  ;;  %v408_v52 = vsel %vm406_vm6, %v5687_v4, %v5697_v18  ;;  %v368_v36 = vadd.f32 %v363_v26, %v323_v16  ;;  %v391_v61 = vadd.f32 %v5679_v58, %v346_v42  ;;  %v9162_v41 = vld [vmem:[#allocation22_spill] sm:$0xff] }
 0x1ce   :  { %v344_v35 = vadd.f32 %v339_v17, %v299_v31  ;;  %v369_v43 = vadd.f32 %v5673_v53, %v324_v40  ;;  %v429_v9 = vsel %vm406_vm6, %v5695_v15, %v5705_v24  ;;  %v390_v50 = vadd.f32 %v385_v44, %v345_v45  ;;  %v9161_v31 = vld [vmem:[#allocation24_spill] sm:$0xff]  ;;  %v9165_v44 = vld [vmem:[#allocation31_spill] sm:$0xff] }
 0x1cf   :  { %v412_v7 = vadd.f32 %v407_v29, %v367_v33  ;;  %v430_v53 = vsel %vm406_vm6, %v5705_v24, %v5703_v23  ;;  %v452_v4 = vsel %vm8924_vm7, %v5713_v39, %v5711_v38  ;;  %v413_v11 = vadd.f32 %v408_v52, %v368_v36  ;;  %v9155_v39 = vld [vmem:[#allocation17_spill] sm:$0xff]  ;;  %v9166_v29 = vld [vmem:[#allocation28_spill] sm:$0xff] }
 0x1d0   :  { %v389_v20 = vadd.f32 %v384_v5, %v344_v35  ;;  %v414_v55 = vadd.f32 %v5697_v18, %v369_v43  ;;  %v436_v58 = vadd.f32 %v5703_v23, %v391_v61  ;;  %v474_v15 = vsel %vm8924_vm7, %v5719_v51, %v5729_v2  ;;  %v9167_v33 = vld [vmem:[#allocation25_spill] sm:$0xff]  ;;  %v9168_v61 = vld [vmem:[#allocation30_spill] sm:$0xff] }
 0x1d1   :  { %v6194_v14 = vpop.permute.xlu1 %1327  ;;  %v6196_v37 = vpop.permute.xlu0 %1325  ;;  %v453_v49 = vsel %vm8924_vm7, %v5711_v38, %v5721_v56  ;;  %v475_v24 = vsel %vm8924_vm7, %v5729_v2, %v5727_v1  ;;  %v497_v3 = vsel %vm8920_vm8, %v9155_v39, %v5735_v19  ;;  %v435_v59 = vadd.f32 %v430_v53, %v390_v50  ;;  %v9169_v53 = vld [vmem:[#allocation32_spill] sm:$0xff] }
 0x1d2   :  { %v434_v46 = vadd.f32 %v429_v9, %v389_v20  ;;  %v457_v62 = vadd.f32 %v452_v4, %v412_v7  ;;  %v459_v51 = vadd.f32 %v5721_v56, %v414_v55  ;;  %v519_v38 = vsel %vm8920_vm8, %v9157_v28, %v9156_v0  ;;  %v9160_v56 = vld [vmem:[#allocation27_spill] sm:$0xff]  ;;  %v9170_v4 = vld [vmem:[#allocation33_spill] sm:$0xff] }
 0x1d3   :  { %v481_v8 = vadd.f32 %v5727_v1, %v436_v58  ;;  %v498_v32 = vsel %vm8920_vm8, %v5735_v19, %v9158_v60  ;;  %v520_v6 = vsel %vm8920_vm8, %v9156_v0, %v9159_v25  ;;  %v458_v12 = vadd.f32 %v453_v49, %v413_v11  ;;  %v9164_v19 = vld [vmem:[#allocation26_spill] sm:$0xff]  ;;  %v9174_v0 = vld [vmem:[#allocation37_spill] sm:$0xff] }
 0x1d4   :  { %v479_v2 = vadd.f32 %v474_v15, %v434_v46  ;;  %v480_v10 = vadd.f32 %v475_v24, %v435_v59  ;;  %v502_v63 = vadd.f32 %v497_v3, %v457_v62  ;;  %v564_v17 = vsel %vm8909_vm9, %v9161_v31, %v9160_v56  ;;  %v9171_v15 = vld [vmem:[#allocation34_spill] sm:$0xff]  ;;  %v9172_v46 = vld [vmem:[#allocation29_spill] sm:$0xff]  ;;  %v9173_v24 = vld [vmem:[#allocation35_spill] sm:$0xff] }
 0x1d5   :  { %v6222_v57 = vpop.permute.xlu1 %1257  ;;  %v6224_v34 = vpop.permute.xlu0 %1255  ;;  %v526_v22 = vadd.f32 %v9159_v25, %v481_v8  ;;  %v542_v21 = vsel %vm8909_vm9, %v9163_v13, %v9162_v41  ;;  %v565_v16 = vsel %vm8909_vm9, %v9160_v56, %v9164_v19  ;;  %v503_v5 = vadd.f32 %v498_v32, %v458_v12  ;;  %v9176_v8 = vld [vmem:[#allocation36_spill] sm:$0xff]  ;;  %v9177_v25 = vld [vmem:[#allocation38_spill] sm:$0xff] }
 0x1d6   :  { %v524_v1 = vadd.f32 %v519_v38, %v479_v2  ;;  %v504_v42 = vadd.f32 %v9158_v60, %v459_v51  ;;  %v525_v35 = vadd.f32 %v520_v6, %v480_v10  ;;  %v609_v45 = vsel %vm8910_vm10, %v9166_v29, %v9165_v44  ;;  %v9175_v38 = vld [vmem:[#allocation39_spill] sm:$0xff]  ;;  %v9178_v12 = vld [vmem:[#allocation40_spill] sm:$0xff]  ;;  %v9179_v10 = vld [vmem:[#allocation41_spill] sm:$0xff] }
 0x1d7   :  { %v543_v43 = vsel %vm8909_vm9, %v9162_v41, %v9167_v33  ;;  %v571_v52 = vadd.f32 %v9164_v19, %v526_v22  ;;  %v610_v20 = vsel %vm8910_vm10, %v9165_v44, %v9168_v61  ;;  %v547_v9 = vadd.f32 %v542_v21, %v502_v63  ;;  %v9180_v22 = vld [vmem:[#allocation43_spill] sm:$0xff]  ;;  %v9181_v19 = vld [vmem:[#allocation45_spill] sm:$0xff] }
 0x1d8   :  { %v569_v36 = vadd.f32 %v564_v17, %v524_v1  ;;  %v549_v50 = vadd.f32 %v9167_v33, %v504_v42  ;;  %v570_v7 = vadd.f32 %v565_v16, %v525_v35  ;;  %v654_v11 = vsel %vm8911_vm11, %v9170_v4, %v9169_v53  ;;  %v9182_v16 = vld [vmem:[#allocation42_spill] sm:$0xff] }
 0x1d9   :  { %v6250_v18 = vpop.permute.xlu1 %1368  ;;  %v6252_v23 = vpop.permute.xlu0 %1259  ;;  %v616_v55 = vadd.f32 %v9168_v61, %v571_v52  ;;  %v587_v49 = vsel %vm8910_vm10, %v9172_v46, %v9171_v15  ;;  %v655_v39 = vsel %vm8911_vm11, %v9169_v53, %v9173_v24  ;;  %vm8916_vm9 = vcmask 908288   ;;  %v9185_v52 = vld [vmem:[#allocation47_spill] sm:$0xff]  ;;  %v9188_v53 = vld [vmem:[#allocation48_spill] sm:$0xff] }
 0x1da   :  { %v614_v58 = vadd.f32 %v609_v45, %v569_v36  ;;  %v548_v62 = vadd.f32 %v543_v43, %v503_v5  ;;  %v615_v51 = vadd.f32 %v610_v20, %v570_v7  ;;  %v588_v28 = vsel %vm8910_vm10, %v9171_v15, %v9174_v0  ;;  %v9183_v45 = vld [vmem:[#allocation44_spill] sm:$0xff]  ;;  %v9184_v43 = vld [vmem:[#allocation46_spill] sm:$0xff]  ;;  %v9187_v7 = vld [vmem:[#allocation51_spill] sm:$0xff] }
 0x1db   :  { %v699_v2 = vsel %vm8912_vm12, %v9176_v8, %v9175_v38  ;;  %v661_v32 = vadd.f32 %v9173_v24, %v616_v55  ;;  %v700_v6 = vsel %vm8912_vm12, %v9175_v38, %v9177_v25  ;;  %v632_v63 = vsel %vm8911_vm11, %v9179_v10, %v9178_v12  ;;  %v9190_v46 = vld [vmem:[#allocation52_spill] sm:$0xff] }
 0x1dc   :  { %v659_v60 = vadd.f32 %v654_v11, %v614_v58  ;;  %v592_v56 = vadd.f32 %v587_v49, %v547_v9  ;;  %v660_v31 = vadd.f32 %v655_v39, %v615_v51  ;;  %v594_v17 = vadd.f32 %v9174_v0, %v549_v50  ;;  %v9186_v9 = vld [vmem:[#allocation49_spill] sm:$0xff]  ;;  %v9189_v58 = vld [vmem:[#allocation50_spill] sm:$0xff]  ;;  %v9192_v0 = vld [vmem:[#allocation55_spill] sm:$0xff] }
 0x1dd   :  { %v6275_v40 = vpop.permute.xlu1 %1372  ;;  %v6277_v26 = vpop.permute.xlu0 %1370  ;;  %v633_v1 = vsel %vm8911_vm11, %v9178_v12, %v9180_v22  ;;  %vm8917_vm10 = vcmask 900096   ;;  %v593_v41 = vadd.f32 %v588_v28, %v548_v62  ;;  %v706_v13 = vadd.f32 %v9177_v25, %v661_v32  ;;  %v9191_v49 = vld [vmem:[#allocation53_spill] sm:$0xff] }
 0x1de   :  { %v704_v21 = vadd.f32 %v699_v2, %v659_v60  ;;  %v744_v5 = vsel %vm8913_vm13, %v9182_v16, %v9181_v19  ;;  %v705_v44 = vadd.f32 %v700_v6, %v660_v31  ;;  %v637_v29 = vadd.f32 %v632_v63, %v592_v56  ;;  %v9193_v25 = vld [vmem:[#allocation57_spill] sm:$0xff]  ;;  %v9194_v6 = vld [vmem:[#allocation54_spill] sm:$0xff]  ;;  %v9195_v56 = vld [vmem:[#allocation56_spill] sm:$0xff] }
 0x1df   :  { %v745_v33 = vsel %vm8913_vm13, %v9181_v19, %v9183_v45  ;;  %v677_v36 = vsel %vm8912_vm12, %v9185_v52, %v9184_v43  ;;  %vm8918_vm11 = vcmask 891904   ;;  %v638_v61 = vadd.f32 %v633_v1, %v593_v41  ;;  %v9199_v16 = vld [vmem:[#allocation63_spill] sm:$0xff]  ;;  %v9202_v52 = vld [vmem:[#allocation64_spill] sm:$0xff] }
 0x1e0   :  { %v639_v20 = vadd.f32 %v9180_v22, %v594_v17  ;;  %v678_v50 = vsel %vm8912_vm12, %v9184_v43, %v9186_v9  ;;  %v789_v4 = vsel %vm8914_vm14, %v9188_v53, %v9187_v7  ;;  %v751_v11 = vadd.f32 %v9183_v45, %v706_v13  ;;  %v9196_v17 = vld [vmem:[#allocation58_spill] sm:$0xff]  ;;  %v9197_v22 = vld [vmem:[#allocation59_spill] sm:$0xff] }
 0x1e1   :  { %v6301_v3 = vpop.permute.xlu1 %1302  ;;  %v6303_v59 = vpop.permute.xlu0 %1300  ;;  %v749_v55 = vadd.f32 %v744_v5, %v704_v21  ;;  %v790_v15 = vsel %vm8914_vm14, %v9187_v7, %v9189_v58  ;;  %v722_v24 = vsel %vm8913_vm13, %v9191_v49, %v9190_v46  ;;  %v750_v39 = vadd.f32 %v745_v33, %v705_v44  ;;  %v9198_v21 = vld [vmem:[#allocation61_spill] sm:$0xff]  ;;  %v9200_v5 = vld [vmem:[#allocation60_spill] sm:$0xff]  ;;  %v9201_v33 = vld [vmem:[#allocation62_spill] sm:$0xff] }
 0x1e2   :  { %v682_v62 = vadd.f32 %v677_v36, %v637_v29  ;;  %v684_v51 = vadd.f32 %v9186_v9, %v639_v20  ;;  %v723_v28 = vsel %vm8913_vm13, %v9190_v46, %v9192_v0  ;;  %vm8919_vm12 = vcmask 883712   ;;  %v9203_v36 = vld [vmem:[#allocation65_spill] sm:$0xff]  ;;  %v9206_v49 = vld [vmem:[#allocation66_spill] sm:$0xff] }
 0x1e3   :  { %v683_v2 = vadd.f32 %v678_v50, %v638_v61  ;;  %v796_v60 = vadd.f32 %v9189_v58, %v751_v11  ;;  %v794_v32 = vadd.f32 %v789_v4, %v749_v55  ;;  %v834_v12 = vsel %vm8915_vm15, %v9194_v6, %v9193_v25  ;;  %v9204_v4 = vld [vmem:[#allocation67_spill] sm:$0xff]  ;;  %v9205_v46 = vld [vmem:[#allocation69_spill] sm:$0xff] }
 0x1e4   :  { %v795_v10 = vadd.f32 %v790_v15, %v750_v39  ;;  %v727_v63 = vadd.f32 %v722_v24, %v682_v62  ;;  %v835_v31 = vsel %vm8915_vm15, %v9193_v25, %v9195_v56  ;;  %v767_v1 = vsel %vm8914_vm14, %v9197_v22, %v9196_v17  ;;  %v9210_v6 = vld [vmem:[#allocation73_spill] sm:$0xff] }
 0x1e5   :  { %v6326_v42 = vpop.permute.xlu1 %1413  ;;  %v6328_v35 = vpop.permute.xlu0 %1304  ;;  %vm8921_vm13 = vcmask 875520   ;;  %v728_v41 = vadd.f32 %v723_v28, %v683_v2  ;;  %v729_v13 = vadd.f32 %v9192_v0, %v684_v51  ;;  %v768_v19 = vsel %vm8914_vm14, %v9196_v17, %v9198_v21  ;;  %v9207_v51 = vld [vmem:[#allocation68_spill] sm:$0xff]  ;;  %v9208_v28 = vld [vmem:[#allocation70_spill] sm:$0xff]  ;;  %v9209_v2 = vld [vmem:[#allocation71_spill] sm:$0xff] }
 0x1e6   :  { %v879_v44 = vsel %vm8916_vm9, %v9200_v5, %v9199_v16  ;;  %v841_v29 = vadd.f32 %v9195_v56, %v796_v60  ;;  %v839_v45 = vadd.f32 %v834_v12, %v794_v32  ;;  %v880_v43 = vsel %vm8916_vm9, %v9199_v16, %v9201_v33 }
 0x1e7   :  { %v812_v61 = vsel %vm8915_vm15, %v9203_v36, %v9202_v52  ;;  %v840_v50 = vadd.f32 %v835_v31, %v795_v10  ;;  %v772_v7 = vadd.f32 %v767_v1, %v727_v63  ;;  %v774_v53 = vadd.f32 %v9198_v21, %v729_v13  ;;  %v9211_v10 = vld [vmem:[#allocation75_spill] sm:$0xff]  ;;  %v9212_v63 = vld [vmem:[#allocation72_spill] sm:$0xff] }
 0x1e8   :  { %v813_v11 = vsel %vm8915_vm15, %v9202_v52, %v9204_v4  ;;  %v773_v55 = vadd.f32 %v768_v19, %v728_v41  ;;  %v886_v58 = vadd.f32 %v9201_v33, %v841_v29  ;;  %v884_v15 = vadd.f32 %v879_v44, %v839_v45  ;;  %v9213_v41 = vld [vmem:[#allocation74_spill] sm:$0xff]  ;;  %v9214_v21 = vld [vmem:[#allocation76_spill] sm:$0xff]  ;;  %v9215_v19 = vld [vmem:[#allocation77_spill] sm:$0xff] }
 0x1e9   :  { %v6354_v38 = vpop.permute.xlu1 %1417  ;;  %v6356_v8 = vpop.permute.xlu0 %1415  ;;  %v924_v24 = vsel %vm8917_vm10, %v9206_v49, %v9205_v46  ;;  %vm8922_vm14 = vcmask 867328   ;;  %v885_v39 = vadd.f32 %v880_v43, %v840_v50  ;;  %v817_v62 = vadd.f32 %v812_v61, %v772_v7  ;;  %v9216_v45 = vld [vmem:[#allocation79_spill] sm:$0xff]  ;;  %v9217_v61 = vld [vmem:[#allocation81_spill] sm:$0xff]  ;;  %v9218_v50 = vld [vmem:[#allocation78_spill] sm:$0xff] }
 0x1ea   :  { %v925_v0 = vsel %vm8917_vm10, %v9205_v46, %v9207_v51  ;;  %v857_v60 = vsel %vm8916_vm9, %v9209_v2, %v9208_v28  ;;  %v818_v32 = vadd.f32 %v813_v11, %v773_v55  ;;  %v819_v25 = vadd.f32 %v9204_v4, %v774_v53  ;;  %v9219_v11 = vld [vmem:[#allocation80_spill] sm:$0xff] }
 0x1eb   :  { %v858_v12 = vsel %vm8916_vm9, %v9208_v28, %v9210_v6  ;;  %v969_v56 = vsel %vm8918_vm11, %v9212_v63, %v9211_v10  ;;  %vm8923_vm15 = vcmask 859136   ;;  %v931_v22 = vadd.f32 %v9207_v51, %v886_v58  ;;  %v9220_v58 = vld [vmem:[#allocation82_spill] sm:$0xff]  ;;  %v9222_v51 = vld [vmem:[#allocation85_spill] sm:$0xff]  ;;  %v9223_v28 = vld [vmem:[#allocation87_spill] sm:$0xff] }
 0x1ec   :  { %v929_v1 = vadd.f32 %v924_v24, %v884_v15  ;;  %v970_v13 = vsel %vm8918_vm11, %v9211_v10, %v9213_v41  ;;  %v902_v16 = vsel %vm8917_vm10, %v9215_v19, %v9214_v21  ;;  %v930_v5 = vadd.f32 %v925_v0, %v885_v39  ;;  %v9221_v15 = vld [vmem:[#allocation83_spill] sm:$0xff]  ;;  %v9224_v2 = vld [vmem:[#allocation84_spill] sm:$0xff] }
 0x1ed   :  { %v6382_v20 = vpop.permute.xlu1 %1347  ;;  %v6384_v9 = vpop.permute.xlu0 %1345  ;;  %v862_v44 = vadd.f32 %v857_v60, %v817_v62  ;;  %v864_v29 = vadd.f32 %v9210_v6, %v819_v25  ;;  %v903_v33 = vsel %vm8917_vm10, %v9214_v21, %v9216_v45  ;;  %v863_v43 = vadd.f32 %v858_v12, %v818_v32  ;;  %v9225_v6 = vld [vmem:[#allocation86_spill] sm:$0xff] }
 0x1ee   :  { %v976_v52 = vadd.f32 %v9213_v41, %v931_v22  ;;  %v974_v36 = vadd.f32 %v969_v56, %v929_v1  ;;  %v1014_v7 = vsel %vm8919_vm12, %v9218_v50, %v9217_v61  ;;  %vm8935_vm9 = vcmask 850944   ;;  %v9226_v1 = vld [vmem:[#allocation88_spill] sm:$0xff]  ;;  %v9227_v41 = vld [vmem:[#allocation89_spill] sm:$0xff] }
 0x1ef   :  { %v975_v53 = vadd.f32 %v970_v13, %v930_v5  ;;  %v907_v4 = vadd.f32 %v902_v16, %v862_v44  ;;  %v1015_v55 = vsel %vm8919_vm12, %v9217_v61, %v9219_v11  ;;  %v947_v46 = vsel %vm8918_vm11, %v9221_v15, %v9220_v58  ;;  %v9228_v5 = vld [vmem:[#allocation91_spill] sm:$0xff]  ;;  %v9231_v61 = vld [vmem:[#allocation92_spill] sm:$0xff] }
 0x1f0   :  { %v908_v39 = vadd.f32 %v903_v33, %v863_v43  ;;  %v909_v62 = vadd.f32 %v9216_v45, %v864_v29  ;;  %v948_v0 = vsel %vm8918_vm11, %v9220_v58, %v9222_v51  ;;  %v1059_v60 = vsel %vm8921_vm13, %v9224_v2, %v9223_v28  ;;  %v9229_v43 = vld [vmem:[#allocation93_spill] sm:$0xff] }
 0x1f1   :  { %v6407_v31 = vpop.permute.xlu1 %1458  ;;  %v6409_v17 = vpop.permute.xlu0 %1349  ;;  %v1021_v32 = vadd.f32 %v9219_v11, %v976_v52  ;;  %v1019_v25 = vadd.f32 %v1014_v7, %v974_v36  ;;  %v1060_v12 = vsel %vm8921_vm13, %v9223_v28, %v9225_v6  ;;  %vm8925_vm10 = vcmask 842752   ;;  %v9230_v52 = vld [vmem:[#allocation90_spill] sm:$0xff] }
 0x1f2   :  { %v104_v10 = vlaneseq  ;;  %v1020_v63 = vadd.f32 %v1015_v55, %v975_v53  ;;  %v952_v56 = vadd.f32 %v947_v46, %v907_v4  ;;  %v954_v22 = vadd.f32 %v9222_v51, %v909_v62  ;;  %v9232_v7 = vld [vmem:[#allocation94_spill] sm:$0xff]  ;;  %v9233_v53 = vld [vmem:[#allocation95_spill] sm:$0xff] }
 0x1f3   :  { %v992_v13 = vsel %vm8919_vm12, %v9227_v41, %v9226_v1  ;;  %v953_v21 = vadd.f32 %v948_v0, %v908_v39  ;;  %v1066_v19 = vadd.f32 %v9225_v6, %v1021_v32  ;;  %v1064_v16 = vadd.f32 %v1059_v60, %v1019_v25  ;;  %v9234_v39 = vld [vmem:[#allocation97_spill] sm:$0xff]  ;;  %v9235_v51 = vld [vmem:[#allocation99_spill] sm:$0xff]  ;;  %v9236_v0 = vld [vmem:[#allocation96_spill] sm:$0xff] }
 0x1f4   :  { %v993_v44 = vsel %vm8919_vm12, %v9226_v1, %v9228_v5  ;;  %vm8934_vm11 = vcmask 834560   ;;  %v1065_v33 = vadd.f32 %v1060_v12, %v1020_v63  ;;  %v1104_v36 = vsel %vm8922_vm14, %v9230_v52, %v9229_v43  ;;  %v9237_v25 = vld [vmem:[#allocation98_spill] sm:$0xff]  ;;  %v9240_v41 = vld [vmem:[#allocation103_spill] sm:$0xff] }
 0x1f5   :  { %v6432_v49 = vpop.permute.xlu1 %1462  ;;  %v6434_v24 = vpop.permute.xlu0 %1460  ;;  %v1105_v50 = vsel %vm8922_vm14, %v9229_v43, %v9231_v61  ;;  %v1037_v4 = vsel %vm8921_vm13, %v9233_v53, %v9232_v7  ;;  %v997_v11 = vadd.f32 %v992_v13, %v952_v56  ;;  %v999_v55 = vadd.f32 %v9228_v5, %v954_v22  ;;  %v9238_v56 = vld [vmem:[#allocation100_spill] sm:$0xff]  ;;  %v9239_v22 = vld [vmem:[#allocation101_spill] sm:$0xff] }
 0x1f6   :  { %vm8933_vm12 = vcmask 826368   ;;  %v6469_v58 = vshrl.u32 %v104_v10, 7  ;;  %v998_v15 = vadd.f32 %v993_v44, %v953_v21  ;;  %v1111_v46 = vadd.f32 %v9231_v61, %v1066_v19  ;;  %v9241_v5 = vld [vmem:[#allocation105_spill] sm:$0xff]  ;;  %v9242_v44 = vld [vmem:[#allocation102_spill] sm:$0xff] }
 0x1f7   :  { %v1038_v62 = vsel %vm8921_vm13, %v9232_v7, %v9234_v39  ;;  %v1149_v28 = vsel %vm8923_vm15, %v9236_v0, %v9235_v51  ;;  %v1109_v2 = vadd.f32 %v1104_v36, %v1064_v16  ;;  %v1110_v60 = vadd.f32 %v1105_v50, %v1065_v33  ;;  %v9243_v36 = vld [vmem:[#allocation104_spill] sm:$0xff]  ;;  %v9244_v50 = vld [vmem:[#allocation106_spill] sm:$0xff]  ;;  %v9245_v7 = vld [vmem:[#allocation107_spill] sm:$0xff] }
 0x1f8   :  { %v1042_v32 = vadd.f32 %v1037_v4, %v997_v11  ;;  %v1150_v6 = vsel %vm8923_vm15, %v9235_v51, %v9237_v25  ;;  %vm8932_vm8 = vcmask 818176   ;;  %v1044_v63 = vadd.f32 %v9234_v39, %v999_v55  ;;  %v9246_v4 = vld [vmem:[#allocation109_spill] sm:$0xff] }
 0x1f9   :  { %v6455_v29 = vpop.permute.xlu1 %1392  ;;  %v6457_v45 = vpop.permute.xlu0 %1390  ;;  %v1082_v1 = vsel %vm8922_vm14, %v9239_v22, %v9238_v56  ;;  %v1083_v13 = vsel %vm8922_vm14, %v9238_v56, %v9240_v41  ;;  %v1043_v21 = vadd.f32 %v1038_v62, %v998_v15  ;;  %v1156_v19 = vadd.f32 %v9237_v25, %v1111_v46  ;;  %v9249_v25 = vld [vmem:[#allocation110_spill] sm:$0xff]  ;;  %v9250_v56 = vld [vmem:[#allocation112_spill] sm:$0xff] }
 0x1fa   :  { %v1154_v16 = vadd.f32 %v1149_v28, %v1109_v2  ;;  %v1194_v33 = vsel %vm8935_vm9, %v9242_v44, %v9241_v5  ;;  %vm8931_vm13 = vcmask 809984   ;;  %v5334_v43 = vmov 0   ;;  %v9247_v28 = vld [vmem:[#allocation111_spill] sm:$0xff]  ;;  %v9248_v2 = vld [vmem:[#allocation108_spill] sm:$0xff] }
 0x1fb   :  { %5214 = vset.pattern.permute.xlu0 %v5334_v43  ;;  %v1155_v52 = vadd.f32 %v1150_v6, %v1110_v60  ;;  %v1195_v61 = vsel %vm8935_vm9, %v9241_v5, %v9243_v36  ;;  %v1127_v53 = vsel %vm8923_vm15, %v9245_v7, %v9244_v50  ;;  %v1128_v11 = vsel %vm8923_vm15, %v9244_v50, %v9246_v4  ;;  %v9253_v5 = vld [vmem:[#allocation114_spill] sm:$0xff] }
 0x1fc   :  { %v1087_v55 = vadd.f32 %v1082_v1, %v1042_v32  ;;  %v1088_v15 = vadd.f32 %v1083_v13, %v1043_v21  ;;  %v1089_v46 = vadd.f32 %v9240_v41, %v1044_v63  ;;  %v1201_v39 = vadd.f32 %v9243_v36, %v1156_v19  ;;  %v9251_v32 = vld [vmem:[#allocation113_spill] sm:$0xff]  ;;  %v9252_v19 = vld [vmem:[#allocation115_spill] sm:$0xff] }
 0x1fd   :  { %v6481_v12 = vpop.permute.xlu1 %1503  ;;  %v6483_v10 = vpop.permute.xlu0 %1394  ;;  %vm8930_vm14 = vcmask 801792   ;;  %v1199_v0 = vadd.f32 %v1194_v33, %v1154_v16  ;;  %v1239_v60 = vsel %vm8925_vm10, %v9248_v2, %v9247_v28  ;;  %v1240_v6 = vsel %vm8925_vm10, %v9247_v28, %v9249_v25  ;;  %v9254_v33 = vld [vmem:[#allocation116_spill] sm:$0xff] }
 0x1fe   :  { %v1172_v22 = vsel %vm8935_vm9, %v9251_v32, %v9250_v56  ;;  %v1200_v63 = vadd.f32 %v1195_v61, %v1155_v52  ;;  %v1132_v1 = vadd.f32 %v1127_v53, %v1087_v55  ;;  %v1133_v41 = vadd.f32 %v1128_v11, %v1088_v15 }
 0x1ff   :  { %v1134_v13 = vadd.f32 %v9246_v4, %v1089_v46  ;;  %vm8929_vm15 = vcmask 793600   ;;  %v1246_v21 = vadd.f32 %v9249_v25, %v1201_v39  ;;  %v1173_v16 = vsel %vm8935_vm9, %v9250_v56, %v9252_v19 }
 0x200   :  { %v1284_v44 = vsel %vm8934_vm11, %v9253_v5, %v6117_v48  ;;  %v1285_v43 = vsel %vm8934_vm11, %v6117_v48, %v9254_v33  ;;  %v1244_v52 = vadd.f32 %v1239_v60, %v1199_v0  ;;  %v1245_v36 = vadd.f32 %v1240_v6, %v1200_v63 }
 0x201   :  { %v6507_v62 = vpop.permute.xlu1 %1507  ;;  %v1506_v51 = vpop.permute.xlu0 %1505  ;;  %v1177_v61 = vadd.f32 %v1172_v22, %v1132_v1  ;;  %v1179_v50 = vadd.f32 %v9252_v19, %v1134_v13  ;;  %vm8928_vm7 = vcmask 785408   ;;  %v1291_v4 = vadd.f32 %v9254_v33, %v1246_v21 }
 0x202   :  { %v1217_v11 = vsel %vm8925_vm10, %v6145_v47, %v6143_v27  ;;  %v1329_v48 = vsel %vm8933_vm12, %v6168_v54, %v6196_v37  ;;  %v1330_v55 = vsel %vm8933_vm12, %v6196_v37, %v6194_v14  ;;  %v1178_v15 = vadd.f32 %v1173_v16, %v1133_v41 }
 0x203   :  { %v1289_v46 = vadd.f32 %v1284_v44, %v1244_v52  ;;  %v1290_v39 = vadd.f32 %v1285_v43, %v1245_v36  ;;  %v1218_v0 = vsel %vm8925_vm10, %v6143_v27, %v6170_v30  ;;  %v1336_v28 = vadd.f32 %v6194_v14, %v1291_v4 }
 0x204   :  { %v1262_v47 = vsel %vm8934_vm11, %v6224_v34, %v6222_v57  ;;  %v1374_v54 = vsel %vm8932_vm8, %v6250_v18, %v6277_v26  ;;  %v1375_v37 = vsel %vm8932_vm8, %v6277_v26, %v6275_v40  ;;  %v1222_v2 = vadd.f32 %v1217_v11, %v1177_v61 }
 0x205   :  { %v6530_v7 = vpop.permute.xlu1 %1437  ;;  %v6532_v53 = vpop.permute.xlu0 %1435  ;;  %v1224_v60 = vadd.f32 %v6170_v30, %v1179_v50  ;;  %v1334_v25 = vadd.f32 %v1329_v48, %v1289_v46  ;;  %v1335_v6 = vadd.f32 %v1330_v55, %v1290_v39  ;;  %v1263_v14 = vsel %vm8934_vm11, %v6222_v57, %v6252_v23 }
 0x206   :  { %v1381_v34 = vadd.f32 %v6275_v40, %v1336_v28  ;;  %v1419_v18 = vsel %vm8931_vm13, %v6326_v42, %v6356_v8  ;;  %v1420_v26 = vsel %vm8931_vm13, %v6356_v8, %v6354_v38  ;;  %vm106_vm10 = vcmp.lt.s32.totalorder %v6469_v58, 4 }
 0x207   :  { %v1223_v30 = vadd.f32 %v1218_v0, %v1178_v15  ;;  %v1267_v32 = vadd.f32 %v1262_v47, %v1222_v2  ;;  %v1379_v22 = vadd.f32 %v1374_v54, %v1334_v25  ;;  %v1380_v63 = vadd.f32 %v1375_v37, %v1335_v6 }
 0x208   :  { %v1269_v1 = vadd.f32 %v6252_v23, %v1224_v60  ;;  %v1426_v57 = vadd.f32 %v6354_v38, %v1381_v34  ;;  %v1464_v40 = vsel %vm8930_vm14, %v6407_v31, %v6434_v24  ;;  %v1465_v42 = vsel %vm8930_vm14, %v6434_v24, %v6432_v49 }
 0x209   :  { %v1549_v27 = vpop.permute.xlu1 %1548  ;;  %v1440_v56 = vpop.permute.xlu0 %1439  ;;  %v1268_v41 = vadd.f32 %v1263_v14, %v1223_v30  ;;  %v1307_v8 = vsel %vm8933_vm12, %v6303_v59, %v6301_v3  ;;  %v1424_v13 = vadd.f32 %v1419_v18, %v1379_v22  ;;  %v1425_v21 = vadd.f32 %v1420_v26, %v1380_v63 }
 0x20a   :  { %v1308_v23 = vsel %vm8933_vm12, %v6301_v3, %v6328_v35  ;;  %v1471_v38 = vadd.f32 %v6432_v49, %v1426_v57  ;;  %v1509_v31 = vsel %vm8929_vm15, %v6481_v12, %v1506_v51  ;;  %v1510_v24 = vsel %vm8929_vm15, %v1506_v51, %v6507_v62 }
 0x20b   :  { %v1314_v5 = vadd.f32 %v6328_v35, %v1269_v1  ;;  %v1352_v59 = vsel %vm8932_vm8, %v6384_v9, %v6382_v20  ;;  %v1469_v44 = vadd.f32 %v1464_v40, %v1424_v13  ;;  %v1470_v33 = vadd.f32 %v1465_v42, %v1425_v21 }
 0x20c   :  { %v1353_v3 = vsel %vm8932_vm8, %v6382_v20, %v6409_v17  ;;  %v1516_v49 = vadd.f32 %v6507_v62, %v1471_v38  ;;  %v1312_v52 = vadd.f32 %v1307_v8, %v1267_v32  ;;  %v1313_v51 = vadd.f32 %v1308_v23, %v1268_v41 }
 0x20d   :  { %v1553_v19 = vpop.permute.xlu1 %1552  ;;  %v1551_v16 = vpop.permute.xlu0 %1550  ;;  %v1514_v36 = vadd.f32 %v1509_v31, %v1469_v44  ;;  %v1515_v35 = vadd.f32 %v1510_v24, %v1470_v33  ;;  %v1359_v9 = vadd.f32 %v6409_v17, %v1314_v5  ;;  %v1397_v4 = vsel %vm8931_vm13, %v6457_v45, %v6455_v29 }
 0x20e   :  { %v1554_v43 = vsel %vm8928_vm7, %v1549_v27, %v1551_v16  ;;  %v1555_v12 = vsel %vm8928_vm7, %v1551_v16, %v1553_v19  ;;  %v1398_v20 = vsel %vm8931_vm13, %v6455_v29, %v6483_v10  ;;  %v1561_v62 = vadd.f32 %v1553_v19, %v1516_v49 }
 0x20f   :  { %v1357_v11 = vadd.f32 %v1352_v59, %v1312_v52  ;;  %v1358_v48 = vadd.f32 %v1353_v3, %v1313_v51  ;;  %v1559_v55 = vadd.f32 %v1554_v43, %v1514_v36  ;;  %v1560_v15 = vadd.f32 %v1555_v12, %v1515_v35 }
 0x210   :  { %v1404_v46 = vadd.f32 %v6483_v10, %v1359_v9  ;;  %v1442_v39 = vsel %vm8930_vm14, %v6532_v53, %v6530_v7  ;;  %v1443_v17 = vsel %vm8930_vm14, %v6530_v7, %v1440_v56  ;;  %v5335_v28 = vmov 1.0  }
 0x211   :  { %v1483_v61 = vpop.permute.xlu1 %1482  ;;  %v1481_v50 = vpop.permute.xlu0 %1480  ;;  %v1402_v0 = vadd.f32 %v1397_v4, %v1357_v11  ;;  %v1403_v45 = vadd.f32 %v1398_v20, %v1358_v48  ;;  %v6613_v29 = vsel %vm106_vm10, -1.0, %v5335_v28  ;;  %v1564_v2 = vrot.slane %v1561_v62, 4 }
 0x212   :  { %9255 = vst [vmem:[#allocation17_spill] sm:$0xff] %v6613_v29  ;;  %v1449_v37 = vadd.f32 %v1440_v56, %v1404_v46  ;;  %v1487_v10 = vsel %vm8929_vm15, %v1481_v50, %v1483_v61  ;;  %v1562_v6 = vrot.slane %v1559_v55, 4  ;;  %v1563_v27 = vrot.slane %v1560_v15, 4 }
 0x213   :  { %v1447_v25 = vadd.f32 %v1442_v39, %v1402_v0  ;;  %v1448_v53 = vadd.f32 %v1443_v17, %v1403_v45  ;;  %v1567_v58 = vmul.f32 %v1564_v2, %v6613_v29  ;;  %vm1588_vm10 = vcmask 523264  }
 0x214   :  { %v1565_v22 = vmul.f32 %v1562_v6, %v6613_v29  ;;  %v1566_v63 = vmul.f32 %v1563_v27, %v6613_v29  ;;  %v1599_v3 = vstv %s5009_s26  ;;  %v1621_v51 = vstv %s5010_s13  ;;  %s5013_s26 = sld [smem:[#allocation10 + $0x5]]  ;;  %s5014_s13 = sld [smem:[#allocation10 + $0x6]] }
 0x215   :  { %v1526_v47 = vpop.permute.xlu1 %1525  ;;  %v1485_v54 = vpop.permute.xlu0 %1484  ;;  %v1492_v14 = vadd.f32 %v1487_v10, %v1447_v25  ;;  %v1643_v9 = vstv %s5011_s23  ;;  %v1665_v62 = vstv %s5012_s7  ;;  %s5015_s7 = sld [smem:[#allocation10 + $0x7]]  ;;  %s5016_s23 = sld [smem:[#allocation10 + $0x8]] }
 0x216   :  { %v1488_v60 = vsel %vm8929_vm15, %v1483_v61, %v1485_v54  ;;  %v1494_v7 = vadd.f32 %v1485_v54, %v1449_v37  ;;  %vm9258_vm15 = vcmask 973824  }
 0x217   :  { %v1493_v34 = vadd.f32 %v1488_v60, %v1448_v53  ;;  %vm9259_vm14 = vmmov %vm9258_vm15 }
 0x219   :  { %v1530_v18 = vpop.permute.xlu1 %1529  ;;  %v1528_v26 = vpop.permute.xlu0 %1527 }
 0x21a   :  { %v1539_v30 = vadd.f32 %v1530_v18, %v1494_v7  ;;  %v1532_v32 = vsel %vm8928_vm7, %v1526_v47, %v1528_v26  ;;  %v1533_v56 = vsel %vm8928_vm7, %v1528_v26, %v1530_v18  ;;  %v1687_v46 = vstv %s5013_s26  ;;  %s5017_s26 = sld [smem:[#allocation10 + $0x9]] }
 0x21b   :  { %v1537_v1 = vadd.f32 %v1532_v32, %v1492_v14  ;;  %v1538_v57 = vadd.f32 %v1533_v56, %v1493_v34  ;;  %v1709_v0 = vstv %s5014_s13  ;;  %v1731_v37 = vstv %s5015_s7  ;;  %s5018_s13 = sld [smem:[#allocation10 + $0xa]]  ;;  %s5019_s7 = sld [smem:[#allocation10 + $0xb]] }
 0x21c   :  { %v6622_v40 = vadd.f32 %v1567_v58, %v1539_v30  ;;  %v1753_v60 = vstv %s5016_s23  ;;  %s5020_s23 = sld [smem:[#allocation10 + $0xc]] }
 0x21d   :  { %v6624_v42 = vadd.f32 %v1565_v22, %v1537_v1  ;;  %v6626_v41 = vadd.f32 %v1566_v63, %v1538_v57 }
 0x21e   :  { %v1573_v8 = vmul.f32 %v6622_v40, %v6622_v40 }
 0x21f   :  { %v1571_v13 = vmul.f32 %v6624_v42, %v6624_v42  ;;  %v1572_v21 = vmul.f32 %v6626_v41, %v6626_v41 }
 0x220   :  { %v1576_v19 = vrot.slane %v1573_v8, 4  ;;  %v1775_v7 = vstv %s5017_s26  ;;  %s5021_s26 = sld [smem:[#allocation10 + $0xd]] }
 0x221   :  { %v1574_v16 = vrot.slane %v1571_v13, 4  ;;  %v1575_v23 = vrot.slane %v1572_v21, 4  ;;  %v1797_v18 = vstv %s5018_s13  ;;  %v1819_v56 = vstv %s5019_s7  ;;  %s5022_s13 = sld [smem:[#allocation10 + $0xe]]  ;;  %s5023_s7 = sld [smem:[#allocation10 + $0xf]] }
 0x222   :  { %v1579_v38 = vadd.f32 %v1576_v19, %v1573_v8  ;;  %v1841_v1 = vstv %s5020_s23  ;;  %s5024_s23 = sld [smem:[#allocation10 + $0x10]] }
 0x223   :  { %v1577_v31 = vadd.f32 %v1574_v16, %v1571_v13  ;;  %v1578_v24 = vadd.f32 %v1575_v23, %v1572_v21 }
 0x224   :  { %v1582_v5 = vrot.slane %v1579_v38, 6 }
 0x225   :  { %v1580_v59 = vrot.slane %v1577_v31, 6  ;;  %v1581_v44 = vrot.slane %v1578_v24, 6 }
 0x226   :  { %v1585_v33 = vadd.f32 %v1582_v5, %v1579_v38  ;;  %v1863_v19 = vstv %s5021_s26  ;;  %s5051_s26 = sld [smem:[#allocation5 + $0x22]] }
 0x227   :  { %v6634_v49 = vadd.f32 %v1580_v59, %v1577_v31  ;;  %v6636_v43 = vadd.f32 %v1581_v44, %v1578_v24  ;;  %v1885_v38 = vstv %s5022_s13  ;;  %v1907_v44 = vstv %s5023_s7  ;;  %s8936_s7 = smov 8   ;;  %s5054_s13 = sld [smem:[#allocation8 + $0x23]] }
 0x228   :  { %1589 = vst.msk [vmem:[#allocation3 + $0x10] sm:$0xff] %vm1588_vm10, %v1585_v33  ;;  %vm9256_vm10 = vcmask 982016  }
 0x229   :  { %v1601_v12 = vmul.f32 %v1599_v3, %v6636_v43  ;;  %v1600_v52 = vmul.f32 %v1599_v3, %v6634_v49  ;;  %v1622_v36 = vmul.f32 %v1621_v51, %v6634_v49  ;;  %v1623_v4 = vmul.f32 %v1621_v51, %v6636_v43  ;;  %vm9257_vm7 = vmmov %vm9256_vm10 }
 0x22a   :  { %v1645_v20 = vmul.f32 %v1643_v9, %v6636_v43  ;;  %v1644_v11 = vmul.f32 %v1643_v9, %v6634_v49  ;;  %v1666_v48 = vmul.f32 %v1665_v62, %v6634_v49  ;;  %v1667_v39 = vmul.f32 %v1665_v62, %v6636_v43 }
 0x22b   :  { %1608 = vrot.lane.b32.xlu1 %v1601_v12, %s5302_s4  ;;  %1606 = vrot.lane.b32.xlu0 %v1600_v52, %s5302_s4  ;;  %v1689_v17 = vmul.f32 %v1687_v46, %v6636_v43  ;;  %v1688_v45 = vmul.f32 %v1687_v46, %v6634_v49  ;;  %v1710_v28 = vmul.f32 %v1709_v0, %v6634_v49  ;;  %v108_v12 = vld [vmem:[%s8828_s3] sm:$0xff]  ;;  %s1593_s3 = sld [smem:[#allocation10]] }
 0x22c   :  { %v1711_v2 = vmul.f32 %v1709_v0, %v6636_v43  ;;  %v1733_v10 = vmul.f32 %v1731_v37, %v6636_v43  ;;  %v1732_v25 = vmul.f32 %v1731_v37, %v6634_v49  ;;  %v1754_v53 = vmul.f32 %v1753_v60, %v6634_v49 }
 0x22d   :  { %v1755_v14 = vmul.f32 %v1753_v60, %v6636_v43  ;;  %v1777_v34 = vmul.f32 %v1775_v7, %v6636_v43  ;;  %v1776_v26 = vmul.f32 %v1775_v7, %v6634_v49  ;;  %v1798_v58 = vmul.f32 %v1797_v18, %v6634_v49 }
 0x22e   :  { %v1799_v22 = vmul.f32 %v1797_v18, %v6636_v43  ;;  %v1821_v63 = vmul.f32 %v1819_v56, %v6636_v43  ;;  %v1820_v57 = vmul.f32 %v1819_v56, %v6634_v49  ;;  %v1842_v8 = vmul.f32 %v1841_v1, %v6634_v49 }
 0x22f   :  { %v6643_v35 = vld [vmem:[#allocation3 + $0x10] sm:$0xff]  ;;  %1628 = vrot.lane.b32.xlu1 %v1622_v36, %s5303_s6  ;;  %v1843_v16 = vmul.f32 %v1841_v1, %v6636_v43  ;;  %v1865_v23 = vmul.f32 %v1863_v19, %v6636_v43  ;;  %v1864_v31 = vmul.f32 %v1863_v19, %v6634_v49  ;;  %v1886_v24 = vmul.f32 %v1885_v38, %v6634_v49 }
 0x230   :  { %v1602_v61 = vmul.f32 %v1599_v3, %v6643_v35  ;;  %v1624_v50 = vmul.f32 %v1621_v51, %v6643_v35  ;;  %v1646_v55 = vmul.f32 %v1643_v9, %v6643_v35  ;;  %v1668_v15 = vmul.f32 %v1665_v62, %v6643_v35 }
 0x231   :  { %v1690_v47 = vmul.f32 %v1687_v46, %v6643_v35  ;;  %v1712_v54 = vmul.f32 %v1709_v0, %v6643_v35  ;;  %v1734_v6 = vmul.f32 %v1731_v37, %v6643_v35  ;;  %v1756_v27 = vmul.f32 %v1753_v60, %v6643_v35 }
 0x232   :  { %1610 = vrot.lane.b32.xlu0 %v1602_v61, %s5302_s4  ;;  %v1778_v30 = vmul.f32 %v1775_v7, %v6643_v35  ;;  %v1800_v32 = vmul.f32 %v1797_v18, %v6643_v35  ;;  %v1822_v13 = vmul.f32 %v1819_v56, %v6643_v35  ;;  %v1844_v21 = vmul.f32 %v1841_v1, %v6643_v35 }
 0x233   :  { %1632 = vrot.lane.b32.xlu1 %v1624_v50, %s5303_s6  ;;  %v1866_v5 = vmul.f32 %v1863_v19, %v6643_v35  ;;  %v1888_v59 = vmul.f32 %v1885_v38, %v6643_v35  ;;  %v1887_v33 = vmul.f32 %v1885_v38, %v6636_v43  ;;  %v1908_v3 = vmul.f32 %v1907_v44, %v6634_v49 }
 0x234   :  { %v1909_v52 = vmul.f32 %v1907_v44, %v6636_v43  ;;  %v1929_v51 = vstv %s5024_s23  ;;  %v1910_v36 = vmul.f32 %v1907_v44, %v6643_v35  ;;  %s5052_s23 = sld [smem:[#allocation8 + $0x22]] }
 0x235   :  { %v1930_v61 = vmul.f32 %v1929_v51, %v6634_v49  ;;  %v1931_v50 = vmul.f32 %v1929_v51, %v6636_v43  ;;  %v1932_v9 = vmul.f32 %v1929_v51, %v6643_v35 }
 0x236   :  { %1630 = vrot.lane.b32.xlu0 %v1623_v4, %s5303_s6 }
 0x237   :  { %1652 = vrot.lane.b32.xlu1 %v1645_v20, %s5304_s9 }
 0x23a   :  { %1650 = vrot.lane.b32.xlu0 %v1644_v11, %s5304_s9 }
 0x23b   :  { %1672 = vrot.lane.b32.xlu1 %v1666_v48, %s5305_s12 }
 0x23e   :  { %1654 = vrot.lane.b32.xlu0 %v1646_v55, %s5304_s9 }
 0x23f   :  { %1676 = vrot.lane.b32.xlu1 %v1668_v15, %s5305_s12 }
 0x242   :  { %1674 = vrot.lane.b32.xlu0 %v1667_v39, %s5305_s12 }
 0x243   :  { %1696 = vrot.lane.b32.xlu1 %v1689_v17, %s5306_s14 }
 0x246   :  { %1694 = vrot.lane.b32.xlu0 %v1688_v45, %s5306_s14 }
 0x247   :  { %1716 = vrot.lane.b32.xlu1 %v1710_v28, %s8974_s17 }
 0x24a   :  { %1698 = vrot.lane.b32.xlu0 %v1690_v47, %s5306_s14 }
 0x24b   :  { %1720 = vrot.lane.b32.xlu1 %v1712_v54, %s8974_s17 }
 0x24e   :  { %1718 = vrot.lane.b32.xlu0 %v1711_v2, %s8974_s17  ;;  %s7074_s17 = sld [smem:[#allocation8 + $0x31]] }
 0x24f   :  { %1740 = vrot.lane.b32.xlu1 %v1733_v10, %s5308_s20 }
 0x252   :  { %1738 = vrot.lane.b32.xlu0 %v1732_v25, %s5308_s20 }
 0x253   :  { %1760 = vrot.lane.b32.xlu1 %v1754_v53, %s8972_s22 }
 0x256   :  { %1742 = vrot.lane.b32.xlu0 %v1734_v6, %s5308_s20 }
 0x257   :  { %1764 = vrot.lane.b32.xlu1 %v1756_v27, %s8972_s22 }
 0x25a   :  { %1762 = vrot.lane.b32.xlu0 %v1755_v14, %s8972_s22 }
 0x25b   :  { %1784 = vrot.lane.b32.xlu1 %v1777_v34, %s8970_s25 }
 0x25e   :  { %1782 = vrot.lane.b32.xlu0 %v1776_v26, %s8970_s25 }
 0x25f   :  { %1804 = vrot.lane.b32.xlu1 %v1798_v58, %s8968_s28 }
 0x262   :  { %1786 = vrot.lane.b32.xlu0 %v1778_v30, %s8970_s25  ;;  %v1594_v30 = vstv %s1593_s3  ;;  %s5053_s3 = sld [smem:[#allocation5 + $0x23]]  ;;  %s7066_s25 = sld [smem:[#allocation8 + $0x30]] }
 0x263   :  { %1808 = vrot.lane.b32.xlu1 %v1800_v32, %s8968_s28 }
 0x266   :  { %1806 = vrot.lane.b32.xlu0 %v1799_v22, %s8968_s28  ;;  %v1597_v22 = vmul.f32 %v1594_v30, %v6643_v35  ;;  %s7058_s28 = sld [smem:[#allocation5 + $0x2d]] }
 0x267   :  { %1828 = vrot.lane.b32.xlu1 %v1821_v63, %s8966_s30 }
 0x26a   :  { %1826 = vrot.lane.b32.xlu0 %v1820_v57, %s8966_s30 }
 0x26b   :  { %1848 = vrot.lane.b32.xlu1 %v1842_v8, %s8964_s8 }
 0x26e   :  { %1830 = vrot.lane.b32.xlu0 %v1822_v13, %s8966_s30  ;;  %s7056_s30 = sld [smem:[#allocation8 + $0x2f]] }
 0x26f   :  { %1852 = vrot.lane.b32.xlu1 %v1844_v21, %s8964_s8 }
 0x272   :  { %1850 = vrot.lane.b32.xlu0 %v1843_v16, %s8964_s8  ;;  %s7054_s8 = sld [smem:[#allocation5 + $0x2c]] }
 0x273   :  { %1872 = vrot.lane.b32.xlu1 %v1865_v23, %s8962_s1 }
 0x276   :  { %1870 = vrot.lane.b32.xlu0 %v1864_v31, %s8962_s1 }
 0x277   :  { %1892 = vrot.lane.b32.xlu1 %v1886_v24, %s8960_s16 }
 0x27a   :  { %1874 = vrot.lane.b32.xlu0 %v1866_v5, %s8962_s1  ;;  %v1595_v5 = vmul.f32 %v1594_v30, %v6634_v49  ;;  %s7052_s1 = sld [smem:[#allocation8 + $0x2e]] }
 0x27b   :  { %1896 = vrot.lane.b32.xlu1 %v1888_v59, %s8960_s16  ;;  %v1596_v59 = vmul.f32 %v1594_v30, %v6636_v43 }
 0x27e   :  { %1894 = vrot.lane.b32.xlu0 %v1887_v33, %s8960_s16  ;;  %s7050_s16 = sld [smem:[#allocation5 + $0x2b]] }
 0x27f   :  { %1914 = vrot.lane.b32.xlu1 %v1908_v3, %s8958_s21 }
 0x282   :  { %1952 = vperm.xlu0 %5214, %v108_v12  }
 0x283   :  { %1916 = vrot.lane.b32.xlu1 %v1909_v52, %s8958_s21 }
 0x286   :  { %1918 = vrot.lane.b32.xlu0 %v1910_v36, %s8958_s21  ;;  %s7048_s21 = sld [smem:[#allocation8 + $0x2d]] }
 0x287   :  { %1936 = vrot.lane.b32.xlu1 %v1930_v61, %s8956_s24 }
 0x28a   :  { %1938 = vrot.lane.b32.xlu0 %v1931_v50, %s8956_s24 }
 0x28b   :  { %1940 = vrot.lane.b32.xlu1 %v1932_v9, %s8956_s24  ;;  %s7046_s24 = sld [smem:[#allocation5 + $0x2a]] }
 0x28e   :  { %2600 = vrot.lane.b32.xlu0 %v6624_v42, %s8972_s22 }
 0x28f   :  { %2602 = vrot.lane.b32.xlu1 %v6626_v41, %s8972_s22 }
 0x292   :  { %2604 = vrot.lane.b32.xlu0 %v6622_v40, %s8972_s22 }
 0x29d   :  { %v1609_v4 = vpop.permute.xlu1 %1608  ;;  %v1607_v20 = vpop.permute.xlu0 %1606 }
 0x29e   :  { %v1612_v24 = vsel %vm136_vm0, %v1607_v20, %v1609_v4 }
 0x29f   :  { %v1617_v52 = vadd.f32 %v1612_v24, %v1595_v5 }
 0x2a1   :  { %v1629_v62 = vpop.permute.xlu1 %1628 }
 0x2a4   :  { %v1611_v11 = vpop.permute.xlu0 %1610 }
 0x2a5   :  { %v1633_v48 = vpop.permute.xlu1 %1632  ;;  %v1619_v63 = vadd.f32 %v1611_v11, %v1597_v22  ;;  %v1613_v35 = vsel %vm136_vm0, %v1609_v4, %v1611_v11 }
 0x2a6   :  { %v1618_v51 = vadd.f32 %v1613_v35, %v1596_v59 }
 0x2a7   :  { %v1641_v8 = vadd.f32 %v1633_v48, %v1619_v63 }
 0x2a8   :  { %v1631_v55 = vpop.permute.xlu0 %1630 }
 0x2a9   :  { %v1653_v15 = vpop.permute.xlu1 %1652  ;;  %v1634_v33 = vsel %vm181_vm1, %v1629_v62, %v1631_v55  ;;  %v1635_v3 = vsel %vm181_vm1, %v1631_v55, %v1633_v48 }
 0x2aa   :  { %v1639_v9 = vadd.f32 %v1634_v33, %v1617_v52  ;;  %v1640_v20 = vadd.f32 %v1635_v3, %v1618_v51 }
 0x2ac   :  { %v1651_v46 = vpop.permute.xlu0 %1650 }
 0x2ad   :  { %v1673_v39 = vpop.permute.xlu1 %1672  ;;  %v1656_v36 = vsel %vm226_vm2, %v1651_v46, %v1653_v15 }
 0x2ae   :  { %v1661_v11 = vadd.f32 %v1656_v36, %v1639_v9 }
 0x2b0   :  { %v1655_v17 = vpop.permute.xlu0 %1654 }
 0x2b1   :  { %v1677_v0 = vpop.permute.xlu1 %1676  ;;  %v1663_v21 = vadd.f32 %v1655_v17, %v1641_v8  ;;  %v1657_v61 = vsel %vm226_vm2, %v1653_v15, %v1655_v17 }
 0x2b2   :  { %v1662_v30 = vadd.f32 %v1657_v61, %v1640_v20 }
 0x2b3   :  { %v1685_v23 = vadd.f32 %v1677_v0, %v1663_v21 }
 0x2b4   :  { %v1675_v45 = vpop.permute.xlu0 %1674 }
 0x2b5   :  { %v1697_v28 = vpop.permute.xlu1 %1696  ;;  %v1678_v49 = vsel %vm271_vm3, %v1673_v39, %v1675_v45  ;;  %v1679_v43 = vsel %vm271_vm3, %v1675_v45, %v1677_v0 }
 0x2b6   :  { %v1683_v63 = vadd.f32 %v1678_v49, %v1661_v11  ;;  %v1684_v46 = vadd.f32 %v1679_v43, %v1662_v30 }
 0x2b8   :  { %v1695_v47 = vpop.permute.xlu0 %1694 }
 0x2b9   :  { %v1717_v54 = vpop.permute.xlu1 %1716  ;;  %v1700_v48 = vsel %vm316_vm4, %v1695_v47, %v1697_v28 }
 0x2ba   :  { %v1705_v21 = vadd.f32 %v1700_v48, %v1683_v63 }
 0x2bc   :  { %v1699_v37 = vpop.permute.xlu0 %1698 }
 0x2bd   :  { %v1721_v2 = vpop.permute.xlu1 %1720  ;;  %v1707_v38 = vadd.f32 %v1699_v37, %v1685_v23  ;;  %v1701_v55 = vsel %vm316_vm4, %v1697_v28, %v1699_v37 }
 0x2be   :  { %v1706_v23 = vadd.f32 %v1701_v55, %v1684_v46 }
 0x2bf   :  { %v1729_v12 = vadd.f32 %v1721_v2, %v1707_v38 }
 0x2c0   :  { %v1719_v10 = vpop.permute.xlu0 %1718 }
 0x2c1   :  { %v1741_v60 = vpop.permute.xlu1 %1740  ;;  %v1722_v15 = vsel %vm361_vm5, %v1717_v54, %v1719_v10  ;;  %v1723_v17 = vsel %vm361_vm5, %v1719_v10, %v1721_v2 }
 0x2c2   :  { %v1727_v38 = vadd.f32 %v1722_v15, %v1705_v21  ;;  %v1728_v24 = vadd.f32 %v1723_v17, %v1706_v23 }
 0x2c4   :  { %v1739_v25 = vpop.permute.xlu0 %1738 }
 0x2c5   :  { %v6745_v53 = vpop.permute.xlu1 %1760  ;;  %v1744_v0 = vsel %vm406_vm6, %v1739_v25, %v1741_v60 }
 0x2c6   :  { %v1749_v35 = vadd.f32 %v1744_v0, %v1727_v38 }
 0x2c8   :  { %v1743_v6 = vpop.permute.xlu0 %1742 }
 0x2c9   :  { %v1765_v27 = vpop.permute.xlu1 %1764  ;;  %v1751_v50 = vadd.f32 %v1743_v6, %v1729_v12  ;;  %v1745_v45 = vsel %vm406_vm6, %v1741_v60, %v1743_v6 }
 0x2ca   :  { %v1750_v2 = vadd.f32 %v1745_v45, %v1728_v24 }
 0x2cb   :  { %v1773_v22 = vadd.f32 %v1765_v27, %v1751_v50 }
 0x2cc   :  { %v1763_v7 = vpop.permute.xlu0 %1762 }
 0x2cd   :  { %v6747_v14 = vpop.permute.xlu1 %1784  ;;  %v1766_v28 = vsel %vm9256_vm10, %v6745_v53, %v1763_v7  ;;  %v1767_v37 = vsel %vm9257_vm7, %v1763_v7, %v1765_v27  ;;  %vm9260_vm10 = vcmask 965632  }
 0x2ce   :  { %v1771_v6 = vadd.f32 %v1766_v28, %v1749_v35  ;;  %v1772_v5 = vadd.f32 %v1767_v37, %v1750_v2  ;;  %vm9261_vm7 = vmmov %vm9260_vm10 }
 0x2d0   :  { %v6749_v34 = vpop.permute.xlu0 %1782 }
 0x2d1   :  { %v6751_v18 = vpop.permute.xlu1 %1804  ;;  %v1788_v10 = vsel %vm9258_vm15, %v6749_v34, %v6747_v14  ;;  %vm9262_vm15 = vcmask 957440  }
 0x2d2   :  { %v1793_v7 = vadd.f32 %v1788_v10, %v1771_v6 }
 0x2d4   :  { %v1787_v26 = vpop.permute.xlu0 %1786 }
 0x2d5   :  { %v6753_v58 = vpop.permute.xlu1 %1808  ;;  %v1795_v8 = vadd.f32 %v1787_v26, %v1773_v22  ;;  %v1789_v25 = vsel %vm9259_vm14, %v6747_v14, %v1787_v26  ;;  %vm9263_vm14 = vmmov %vm9262_vm15 }
 0x2d6   :  { %v1794_v33 = vadd.f32 %v1789_v25, %v1772_v5 }
 0x2d7   :  { %v1817_v54 = vadd.f32 %v6753_v58, %v1795_v8 }
 0x2d8   :  { %v6755_v32 = vpop.permute.xlu0 %1806 }
 0x2d9   :  { %v6757_v56 = vpop.permute.xlu1 %1828  ;;  %v1810_v53 = vsel %vm9260_vm10, %v6751_v18, %v6755_v32  ;;  %v1811_v27 = vsel %vm9261_vm7, %v6755_v32, %v6753_v58  ;;  %vm9264_vm10 = vcmask 949248   ;;  %vm9267_vm7 = vcmask 941056  }
 0x2da   :  { %v1815_v12 = vadd.f32 %v1810_v53, %v1793_v7  ;;  %v1816_v52 = vadd.f32 %v1811_v27, %v1794_v33  ;;  %vm9265_vm13 = vmmov %vm9264_vm10 }
 0x2dc   :  { %v6762_v57 = vpop.permute.xlu0 %1826 }
 0x2dd   :  { %v6760_v1 = vpop.permute.xlu1 %1848  ;;  %v1832_v34 = vsel %vm9262_vm15, %v6762_v57, %v6757_v56  ;;  %vm9268_vm15 = vmmov %vm9267_vm7 }
 0x2de   :  { %v1837_v51 = vadd.f32 %v1832_v34, %v1815_v12 }
 0x2e0   :  { %v1831_v19 = vpop.permute.xlu0 %1830 }
 0x2e1   :  { %v6764_v13 = vpop.permute.xlu1 %1852  ;;  %v1839_v60 = vadd.f32 %v1831_v19, %v1817_v54  ;;  %v1833_v14 = vsel %vm9263_vm14, %v6757_v56, %v1831_v19  ;;  %vm9269_vm14 = vcmask 932864  }
 0x2e2   :  { %v1838_v36 = vadd.f32 %v1833_v14, %v1816_v52 }
 0x2e3   :  { %v1861_v26 = vadd.f32 %v6764_v13, %v1839_v60 }
 0x2e4   :  { %v1851_v44 = vpop.permute.xlu0 %1850 }
 0x2e5   :  { %v6766_v16 = vpop.permute.xlu1 %1872  ;;  %v1854_v18 = vsel %vm9264_vm10, %v6760_v1, %v1851_v44  ;;  %v1855_v58 = vsel %vm9265_vm13, %v1851_v44, %v6764_v13  ;;  %vm9270_vm10 = vmmov %vm9269_vm14  ;;  %vm9271_vm13 = vcmask 924672  }
 0x2e6   :  { %v1859_v19 = vadd.f32 %v1854_v18, %v1837_v51  ;;  %v1860_v9 = vadd.f32 %v1855_v58, %v1838_v36  ;;  %vm9272_vm8 = vmmov %vm9271_vm13  ;;  %v8980_v36 = vmov 683565275  }
 0x2e8   :  { %v1871_v62 = vpop.permute.xlu0 %1870 }
 0x2e9   :  { %v6768_v31 = vpop.permute.xlu1 %1892  ;;  %v1876_v57 = vsel %vm9267_vm7, %v1871_v62, %v6766_v16  ;;  %vm9273_vm7 = vcmask 916480  }
 0x2ea   :  { %v1881_v44 = vadd.f32 %v1876_v57, %v1859_v19  ;;  %v8978_v57 = vmov 2475754826   ;;  %v8976_v19 = vmov 2131351028  }
 0x2ec   :  { %v1875_v47 = vpop.permute.xlu0 %1874 }
 0x2ed   :  { %v1897_v4 = vpop.permute.xlu1 %1896  ;;  %v1883_v32 = vadd.f32 %v1875_v47, %v1861_v26  ;;  %v1877_v56 = vsel %vm9268_vm15, %v6766_v16, %v1875_v47  ;;  %vm9274_vm15 = vmmov %vm9273_vm7 }
 0x2ee   :  { %v1882_v49 = vadd.f32 %v1877_v56, %v1860_v9 }
 0x2ef   :  { %v1905_v20 = vadd.f32 %v1897_v4, %v1883_v32 }
 0x2f0   :  { %v1895_v3 = vpop.permute.xlu0 %1894 }
 0x2f1   :  { %v1915_v39 = vpop.permute.xlu1 %1914  ;;  %v1898_v1 = vsel %vm9269_vm14, %v6768_v31, %v1895_v3  ;;  %v1899_v13 = vsel %vm9270_vm10, %v1895_v3, %v1897_v4 }
 0x2f2   :  { %v1903_v62 = vadd.f32 %v1898_v1, %v1881_v44  ;;  %v1904_v55 = vadd.f32 %v1899_v13, %v1882_v49  ;;  %v8986_v13 = vmov 2102212464  }
 0x2f5   :  { %v1917_v59 = vpop.permute.xlu1 %1916 }
 0x2f6   :  { %v1920_v11 = vsel %vm9271_vm13, %v1915_v39, %v1917_v59 }
 0x2f7   :  { %v1925_v63 = vadd.f32 %v1920_v11, %v1903_v62 }
 0x2f9   :  { %v1937_v61 = vpop.permute.xlu1 %1936 }
 0x2fd   :  { %v1941_v22 = vpop.permute.xlu1 %1940 }
 0x301   :  { %v6811_v50 = vpop.permute.xlu0 %1952 }
 0x302   :  { %9266 = vst [vmem:[#allocation21_spill] sm:$0xff] %v6811_v50 }
 0x305   :  { %v1919_v43 = vpop.permute.xlu0 %1918 }
 0x306   :  { %v1921_v30 = vsel %vm9272_vm8, %v1917_v59, %v1919_v43  ;;  %v1927_v48 = vadd.f32 %v1919_v43, %v1905_v20  ;;  %v8984_v43 = vmov 920167782  }
 0x307   :  { %v1926_v46 = vadd.f32 %v1921_v30, %v1904_v55 }
 0x308   :  { %v1949_v16 = vadd.f32 %v1941_v22, %v1927_v48  ;;  %v8982_v48 = vmov 1326507024  }
 0x309   :  { %v1939_v15 = vpop.permute.xlu0 %1938 }
 0x30a   :  { %v6823_v17 = vmul.f32 %v6811_v50, %v1949_v16  ;;  %v1942_v31 = vsel %vm9273_vm7, %v1937_v61, %v1939_v15  ;;  %v1943_v4 = vsel %vm9274_vm15, %v1939_v15, %v1941_v22 }
 0x30b   :  { %v1947_v8 = vadd.f32 %v1942_v31, %v1925_v63  ;;  %v1948_v21 = vadd.f32 %v1943_v4, %v1926_v46 }
 0x30c   :  { %v2167_v23 = vand.u32 2139095040, %v6823_v17 }
 0x30d   :  { %v6829_v39 = vmul.f32 %v6811_v50, %v1947_v8  ;;  %v6832_v0 = vmul.f32 %v6811_v50, %v1948_v21 }
 0x30e   :  { %v2168_v45 = vshrl.u32 %v2167_v23, 23 }
 0x30f   :  { %v1961_v38 = vand.u32 2139095040, %v6829_v39  ;;  %v2064_v24 = vand.u32 2139095040, %v6832_v0  ;;  %v2061_v47 = vand.u32 2147483647, %v6832_v0  ;;  %v1958_v2 = vand.u32 2147483647, %v6829_v39 }
 0x310   :  { %v5033_v28 = vadd.s32 4294967169, %v2168_v45 }
 0x311   :  { %v1962_v37 = vshrl.u32 %v1961_v38, 23  ;;  %v2065_v54 = vshrl.u32 %v2064_v24, 23  ;;  %v2068_v60 = vand.u32 8388607, %v2061_v47  ;;  %v1965_v59 = vand.u32 8388607, %v1958_v2 }
 0x312   :  { %v2174_v35 = vadd.s32 1, %v5033_v28 }
 0x313   :  { %v5025_v10 = vadd.s32 4294967169, %v1962_v37  ;;  %v5029_v25 = vadd.s32 4294967169, %v2065_v54  ;;  %v2069_v27 = vor.u32 8388608, %v2068_v60  ;;  %v1966_v3 = vor.u32 8388608, %v1965_v59 }
 0x314   :  { %vm2175_vm8 = vcmp.gt.s32.totalorder %v2174_v35, 0 }
 0x315   :  { %v1968_v6 = vadd.s32 1, %v5025_v10  ;;  %v2071_v5 = vadd.s32 1, %v5029_v25  ;;  %v6842_v53 = vsel %vm2175_vm8, %v2174_v35, 0  ;;  %v6851_v58 = vshll.u32 %v2069_v27, 8 }
 0x316   :  { %v6847_v26 = vand.u32 31, %v6842_v53  ;;  %v6853_v32 = vshll.u32 %v1966_v3, 8 }
 0x317   :  { %vm1969_vm14 = vcmp.gt.s32.totalorder %v1968_v6, 0  ;;  %vm2072_vm10 = vcmp.gt.s32.totalorder %v2071_v5, 0 }
 0x318   :  { %v1970_v7 = vsel %vm1969_vm14, %v1968_v6, 0  ;;  %v2073_v33 = vsel %vm2072_vm10, %v2071_v5, 0 }
 0x319   :  { %v6844_v34 = vand.u32 31, %v1970_v7  ;;  %v2075_v14 = vand.u32 31, %v2073_v33  ;;  %v2074_v12 = vshrl.u32 %v2073_v33, 5  ;;  %v6849_v52 = vshrl.u32 %v1970_v7, 5 }
 0x31b   :  { %v2076_v18 = vsub.s32 32, %v2075_v14  ;;  %v1973_v51 = vsub.s32 32, %v6844_v34  ;;  %v2078_v61 = vshll.u32 %v8980_v36, %v2075_v14  ;;  %v2081_v56 = vshll.u32 %v8978_v57, %v2075_v14 }
 0x31c   :  { %v2084_v9 = vshll.u32 %v8976_v19, %v2075_v14  ;;  %v2087_v49 = vshll.u32 %v8986_v13, %v2075_v14  ;;  %v2090_v30 = vshll.u32 %v8984_v43, %v2075_v14  ;;  %vm2093_vm13 = vcmp.lt.s32.totalorder %v2074_v12, 1 }
 0x31d   :  { %v2079_v20 = vshrl.u32 %v8978_v57, %v2076_v18  ;;  %v2082_v1 = vshrl.u32 %v8976_v19, %v2076_v18  ;;  %v2085_v44 = vshrl.u32 %v8986_v13, %v2076_v18  ;;  %v2088_v11 = vshrl.u32 %v8984_v43, %v2076_v18 }
 0x31e   :  { %v2091_v62 = vshrl.u32 %v8982_v48, %v2076_v18  ;;  %v2077_v55 = vshrl.u32 %v8980_v36, %v2076_v18  ;;  %vm2095_vm7 = vcmp.lt.s32.totalorder %v2074_v12, 3  ;;  %vm2096_vm15 = vcmp.lt.s32.totalorder %v2074_v12, 4 }
 0x31f   :  { %v2080_v22 = vor.u32 %v2079_v20, %v2078_v61  ;;  %v2083_v16 = vor.u32 %v2082_v1, %v2081_v56  ;;  %v2086_v63 = vor.u32 %v2085_v44, %v2084_v9  ;;  %v2089_v46 = vor.u32 %v2088_v11, %v2087_v49 }
 0x320   :  { %v2092_v15 = vor.u32 %v2091_v62, %v2090_v30  ;;  %v1976_v24 = vshrl.u32 %v8978_v57, %v1973_v51  ;;  %vm2094_vm8 = vcmp.lt.s32.totalorder %v2074_v12, 2  ;;  %v1975_v54 = vshll.u32 %v8980_v36, %v6844_v34 }
 0x321   :  { %v2097_v31 = vsel %vm2093_vm13, %v2077_v55, %v2080_v22  ;;  %v2098_v4 = vsel %vm2096_vm15, %v2086_v63, 2102212464  ;;  %v2101_v8 = vsel %vm2093_vm13, %v2080_v22, %v2083_v16  ;;  %v2105_v21 = vsel %vm2093_vm13, %v2083_v16, %v2086_v63 }
 0x322   :  { %v2099_v23 = vsel %vm2095_vm7, %v2083_v16, %v2098_v4  ;;  %v2102_v45 = vsel %vm2096_vm15, %v2089_v46, 920167782  ;;  %v2106_v38 = vsel %vm2096_vm15, %v2092_v15, 1326507024  ;;  %v1978_v60 = vshll.u32 %v8978_v57, %v6844_v34 }
 0x323   :  { %v2103_v28 = vsel %vm2095_vm7, %v2086_v63, %v2102_v45  ;;  %v2107_v37 = vsel %vm2095_vm7, %v2089_v46, %v2106_v38  ;;  %v2100_v35 = vsel %vm2094_vm8, %v2097_v31, %v2099_v23  ;;  %v1977_v7 = vor.u32 %v1976_v24, %v1975_v54 }
 0x324   :  { %v2104_v10 = vsel %vm2094_vm8, %v2101_v8, %v2103_v28  ;;  %v2108_v25 = vsel %vm2094_vm8, %v2105_v21, %v2107_v37  ;;  %v1979_v33 = vshrl.u32 %v8976_v19, %v1973_v51  ;;  %v1981_v3 = vshll.u32 %v8976_v19, %v6844_v34 }
 0x325   :  { %v6873_v6 = vmul.u32.u64.low %v6851_v58, %v2108_v25  ;;  %v6874_v5 = vmul.u32.u64.high %v6851_v58, %v2108_v25, %v6873_v6  ;;  %v6877_v59 = vmul.u32.u64.low %v6851_v58, %v2104_v10  ;;  %v6878_v27 = vmul.u32.u64.high %v6851_v58, %v2104_v10, %v6877_v59 }
 0x326   :  { %v1982_v14 = vshrl.u32 %v8986_v13, %v1973_v51  ;;  %v1974_v12 = vshrl.u32 %v8980_v36, %v1973_v51  ;;  %v1984_v18 = vshll.u32 %v8986_v13, %v6844_v34  ;;  %v1985_v61 = vshrl.u32 %v8984_v43, %v1973_v51 }
 0x327   :  { %v1988_v56 = vshrl.u32 %v8982_v48, %v1973_v51  ;;  %v2116_v9 = vmul.u32 %v6851_v58, %v2100_v35  ;;  %v1980_v20 = vor.u32 %v1979_v33, %v1978_v60  ;;  %v1987_v44 = vshll.u32 %v8984_v43, %v6844_v34 }
 0x328   :  { %v1983_v1 = vor.u32 %v1982_v14, %v1981_v3  ;;  %vm2118_vm14 = vc.u32 %v6874_v5, %v6877_v59  ;;  %v2119_v49 = vadd.s32 1, %v6878_v27  ;;  %v1986_v11 = vor.u32 %v1985_v61, %v1984_v18 }
 0x329   :  { %vm1990_vm10 = vcmp.lt.s32.totalorder %v6849_v52, 1  ;;  %v1989_v30 = vor.u32 %v1988_v56, %v1987_v44  ;;  %vm1992_vm13 = vcmp.lt.s32.totalorder %v6849_v52, 3  ;;  %vm1993_vm7 = vcmp.lt.s32.totalorder %v6849_v52, 4 }
 0x32a   :  { %v1998_v51 = vsel %vm1990_vm10, %v1977_v7, %v1980_v20  ;;  %v2120_v58 = vsel %vm2118_vm14, %v2119_v49, %v6878_v27  ;;  %v1995_v62 = vsel %vm1993_vm7, %v1983_v1, 2102212464  ;;  %v1999_v55 = vsel %vm1993_vm7, %v1986_v11, 920167782 }
 0x32b   :  { %v2002_v22 = vsel %vm1990_vm10, %v1980_v20, %v1983_v1  ;;  %v2121_v34 = vadd.s32 %v2120_v58, %v2116_v9  ;;  %vm1991_vm15 = vcmp.lt.s32.totalorder %v6849_v52, 2  ;;  %v2000_v16 = vsel %vm1992_vm13, %v1983_v1, %v1999_v55 }
 0x32c   :  { %v2003_v63 = vsel %vm1993_vm7, %v1989_v30, 1326507024  ;;  %v1994_v46 = vsel %vm1990_vm10, %v1974_v12, %v1977_v7  ;;  %v1996_v15 = vsel %vm1992_vm13, %v1980_v20, %v1995_v62  ;;  %v2001_v31 = vsel %vm1991_vm15, %v1998_v51, %v2000_v16 }
 0x32d   :  { %v2004_v4 = vsel %vm1992_vm13, %v1986_v11, %v2003_v63  ;;  %v2122_v8 = vadd.s32 536870912, %v2121_v34  ;;  %v6902_v23 = vmul.u32.u64.low %v6853_v32, %v2001_v31  ;;  %v6903_v45 = vmul.u32.u64.high %v6853_v32, %v2001_v31, %v6902_v23 }
 0x32e   :  { %v2005_v21 = vsel %vm1991_vm15, %v2002_v22, %v2004_v4  ;;  %v2179_v38 = vsub.s32 32, %v6847_v26  ;;  %v1997_v37 = vsel %vm1991_vm15, %v1994_v46, %v1996_v15  ;;  %v2164_v25 = vand.u32 2147483647, %v6823_v17 }
 0x32f   :  { %v6908_v24 = vmul.u32.u64.low %v6853_v32, %v2005_v21  ;;  %v6909_v28 = vmul.u32.u64.high %v6853_v32, %v2005_v21, %v6908_v24  ;;  %v6911_v52 = vshrl.u32 %v2122_v8, 30  ;;  %v2016_v35 = vadd.s32 1, %v6903_v45 }
 0x330   :  { %v2013_v10 = vmul.u32 %v6853_v32, %v1997_v37  ;;  %v2191_v60 = vshrl.u32 %v8984_v43, %v2179_v38  ;;  %v2185_v7 = vshrl.u32 %v8976_v19, %v2179_v38  ;;  %v2188_v33 = vshrl.u32 %v8986_v13, %v2179_v38 }
 0x331   :  { %v2124_v54 = vshll.u32 %v6911_v52, 30  ;;  %vm2015_vm8 = vc.u32 %v6909_v28, %v6902_v23  ;;  %v2177_v3 = vshrl.u32 %v6842_v53, 5  ;;  %v2190_v32 = vshll.u32 %v8986_v13, %v6847_v26 }
 0x332   :  { %v2017_v27 = vsel %vm2015_vm8, %v2016_v35, %v6903_v45  ;;  %v2194_v12 = vshrl.u32 %v8982_v48, %v2179_v38  ;;  %v2182_v61 = vshrl.u32 %v8978_v57, %v2179_v38  ;;  %v2184_v56 = vshll.u32 %v8978_v57, %v6847_v26 }
 0x333   :  { %v2125_v6 = vsub.s32 %v2121_v34, %v2124_v54  ;;  %v2018_v14 = vadd.s32 %v2017_v27, %v2013_v10  ;;  %v2187_v9 = vshll.u32 %v8976_v19, %v6847_v26  ;;  %v2171_v1 = vand.u32 8388607, %v2164_v25 }
 0x334   :  { %v2192_v53 = vor.u32 %v2191_v60, %v2190_v32  ;;  %v2193_v44 = vshll.u32 %v8984_v43, %v6847_v26  ;;  %v2181_v11 = vshll.u32 %v8980_v36, %v6847_v26  ;;  %v2186_v30 = vor.u32 %v2185_v7, %v2184_v56 }
 0x335   :  { %v2127_v18 = vsub.s32 0, %v2125_v6  ;;  %v2019_v20 = vadd.s32 536870912, %v2018_v14  ;;  %v2189_v51 = vor.u32 %v2188_v33, %v2187_v9  ;;  %vm2199_vm14 = vcmp.lt.s32.totalorder %v2177_v3, 4 }
 0x336   :  { %v2195_v62 = vor.u32 %v2194_v12, %v2193_v44  ;;  %v2183_v22 = vor.u32 %v2182_v61, %v2181_v11  ;;  %v2172_v16 = vor.u32 8388608, %v2171_v1  ;;  %vm2196_vm10 = vcmp.lt.s32.totalorder %v2177_v3, 1 }
 0x337   :  { %v5030_v49 = vmin.u32 %v2127_v18, %v2125_v6  ;;  %v6938_v58 = vshrl.u32 %v2019_v20, 30  ;;  %v2205_v63 = vsel %vm2199_vm14, %v2192_v53, 920167782  ;;  %v2180_v15 = vshrl.u32 %v8980_v36, %v2179_v38 }
 0x338   :  { %v2208_v31 = vsel %vm2196_vm10, %v2186_v30, %v2189_v51  ;;  %vm2197_vm13 = vcmp.lt.s32.totalorder %v2177_v3, 2  ;;  %vm2198_vm7 = vcmp.lt.s32.totalorder %v2177_v3, 3  ;;  %v2209_v4 = vsel %vm2199_vm14, %v2195_v62, 1326507024 }
 0x339   :  { %v2129_v55 = vclz %v5030_v49  ;;  %v2021_v34 = vshll.u32 %v6938_v58, 30  ;;  %v2204_v8 = vsel %vm2196_vm10, %v2183_v22, %v2186_v30  ;;  %v2206_v21 = vsel %vm2198_vm7, %v2189_v51, %v2205_v63 }
 0x33a   :  { %v2210_v45 = vsel %vm2198_vm7, %v2192_v53, %v2209_v4  ;;  %v2212_v35 = vshll.u32 %v2172_v16, 8  ;;  %v2117_v38 = vadd.s32 %v6877_v59, %v6874_v5  ;;  %v2201_v27 = vsel %vm2199_vm14, %v2189_v51, 2102212464 }
 0x33b   :  { %v5031_v46 = vadd.s32 4294967294, %v2129_v55  ;;  %v2022_v26 = vsub.s32 %v2018_v14, %v2021_v34  ;;  %v2211_v54 = vsel %vm2197_vm13, %v2208_v31, %v2210_v45  ;;  %v2207_v33 = vsel %vm2197_vm13, %v2204_v8, %v2206_v21 }
 0x33c   :  { %v6953_v14 = vmul.u32.u64.low %v2212_v35, %v2211_v54  ;;  %v6954_v32 = vmul.u32.u64.high %v2212_v35, %v2211_v54, %v6953_v14  ;;  %v2200_v9 = vsel %vm2196_vm10, %v2180_v15, %v2183_v22  ;;  %v2202_v20 = vsel %vm2198_vm7, %v2186_v30, %v2201_v27 }
 0x33d   :  { %vm5032_vm15 = vcmp.lt.s32.totalorder %v5031_v46, 0  ;;  %v2024_v37 = vsub.s32 0, %v2022_v26  ;;  %v6958_v59 = vmul.u32.u64.low %v2212_v35, %v2207_v33  ;;  %v6959_v53 = vmul.u32.u64.high %v2212_v35, %v2207_v33, %v6958_v59 }
 0x33e   :  { %v2132_v24 = vsel %vm5032_vm15, 0, %v5031_v46  ;;  %v2203_v11 = vsel %vm2197_vm13, %v2200_v9, %v2202_v20  ;;  %v2147_v51 = vsub.s32 4, %v6911_v52  ;;  %v2014_v22 = vadd.s32 %v6902_v23, %v6909_v28 }
 0x33f   :  { %v2133_v10 = vsub.s32 32, %v2132_v24  ;;  %v2137_v60 = vsub.s32 4294967266, %v2132_v24  ;;  %v5026_v7 = vmin.u32 %v2024_v37, %v2022_v26  ;;  %v2134_v12 = vshll.u32 %v2125_v6, %v2132_v24 }
 0x340   :  { %vm2221_vm14 = vc.u32 %v6954_v32, %v6958_v59  ;;  %v2222_v30 = vadd.s32 1, %v6959_v53  ;;  %v2219_v63 = vmul.u32 %v2212_v35, %v2203_v11  ;;  %vm2063_vm10 = vcmp.lt.s32.totalorder %v6832_v0, 0 }
 0x341   :  { %v2135_v18 = vshrl.u32 %v2117_v38, %v2133_v10  ;;  %v2138_v61 = vadd.s32 127, %v2137_v60  ;;  %v2026_v56 = vclz %v5026_v7  ;;  %v2148_v45 = vsel %vm2063_vm10, %v2147_v51, %v6911_v52  ;;  %v2601_v52 = vpop.permute.xlu0 %2600 }
 0x342   :  { %v2223_v3 = vsel %vm2221_vm14, %v2222_v30, %v6959_v53  ;;  %vm2062_vm13 = vcmp.le.f32.partialorder %v2061_v47, 0.7853982  ;;  %v2044_v33 = vsub.s32 4, %v6938_v58  ;;  %v6979_v47 = vpop.permute.xlu1 %2602  ;;  %vm9275_vm7 = vcmask 982016  }
 0x343   :  { %v2136_v1 = vor.u32 %v2135_v18, %v2134_v12  ;;  %v2139_v5 = vshll.u32 %v2138_v61, 23  ;;  %v5027_v44 = vadd.s32 4294967294, %v2026_v56  ;;  %v2224_v8 = vadd.s32 %v2223_v3, %v2219_v63 }
 0x344   :  { %v2606_v56 = vsel %vm9275_vm7, %v2601_v52, %v6979_v47  ;;  %vm1959_vm15 = vcmp.le.f32.partialorder %v1958_v2, 0.7853982  ;;  %vm2153_vm14 = vweird.f32 %v6832_v0 }
 0x345   :  { %v2140_v49 = vor.u32 4788187, %v2139_v5  ;;  %vm5028_vm8 = vcmp.lt.s32.totalorder %v5027_v44, 0  ;;  %v2143_v62 = vcvt.s32.f32 %v2136_v1  ;;  %v2225_v54 = vadd.s32 536870912, %v2224_v8 }
 0x346   :  { %v2029_v55 = vsel %vm5028_vm8, 0, %v5027_v44  ;;  %vm1960_vm8 = vcmp.lt.s32.totalorder %v6829_v39, 0  ;;  %v2611_v51 = vrot.slane %v2606_v56, 4 }
 0x347   :  { %v2141_v6 = vand.u32 2147483647, %v2140_v49  ;;  %v2030_v34 = vsub.s32 32, %v2029_v55  ;;  %v2034_v16 = vsub.s32 4294967266, %v2029_v55  ;;  %v2031_v15 = vshll.u32 %v2022_v26, %v2029_v55 }
 0x348   :  { %v6975_v38 = vshrl.u32 %v2225_v54, 30  ;;  %v2150_v26 = vsel %vm2062_vm13, 0, %v2148_v45  ;;  %v2045_v1 = vsel %vm1960_vm8, %v2044_v33, %v6938_v58 }
 0x349   :  { %v2144_v46 = vmul.f32 %v2143_v62, %v2141_v6  ;;  %v2032_v31 = vshrl.u32 %v2014_v22, %v2030_v34  ;;  %v2035_v4 = vadd.s32 127, %v2034_v16  ;;  %v2464_v12 = vadd.s32 3, %v2150_v26 }
 0x34a   :  { %v2227_v27 = vshll.u32 %v6975_v38, 30  ;;  %v2154_v9 = vand.u32 3, %v2150_v26  ;;  %v2047_v6 = vsel %vm1959_vm15, 0, %v2045_v1 }
 0x34b   :  { %v2145_v21 = vxor.u32 2147483648, %v2144_v46  ;;  %v2033_v24 = vor.u32 %v2032_v31, %v2031_v15  ;;  %v2036_v37 = vshll.u32 %v2035_v4, 23  ;;  %v2465_v53 = vand.u32 3, %v2464_v12 }
 0x34c   :  { %v2228_v14 = vsub.s32 %v2224_v8, %v2227_v27  ;;  %vm2159_vm7 = vcmp.eq.s32.totalorder %v2154_v9, 2  ;;  %v2360_v34 = vadd.s32 3, %v2047_v6  ;;  %v2220_v31 = vadd.s32 %v6958_v59, %v6954_v32 }
 0x34d   :  { %v2146_v23 = vsel %vm2063_vm10, %v2145_v21, %v2144_v46  ;;  %v2037_v35 = vor.u32 4788187, %v2036_v37  ;;  %v2040_v60 = vcvt.s32.f32 %v2033_v24  ;;  %vm2155_vm10 = vcmp.lt.s32.totalorder %v2154_v9, 2 }
 0x34e   :  { %v2149_v28 = vsel %vm2062_vm13, %v6832_v0, %v2146_v23  ;;  %v2230_v61 = vsub.s32 0, %v2228_v14  ;;  %vm2156_vm13 = vcmp.eq.s32.totalorder %v2154_v9, 0  ;;  %vm2470_vm12 = vcmp.eq.s32.totalorder %v2465_v53, 2 }
 0x34f   :  { %5215 = vcosq.f32 %v2149_v28  ;;  %v2038_v10 = vand.u32 2147483647, %v2037_v35  ;;  %vm2466_vm9 = vcmp.lt.s32.totalorder %v2465_v53, 2  ;;  %v2051_v24 = vand.u32 3, %v2047_v6 }
 0x350   :  { %5217 = vsinq.f32 %v2149_v28  ;;  %v5034_v5 = vmin.u32 %v2230_v61, %v2228_v14  ;;  %v2361_v37 = vand.u32 3, %v2360_v34  ;;  %v2614_v32 = vmul.f32 %v2611_v51, %v6613_v29 }
 0x351   :  { %v2041_v7 = vmul.f32 %v2040_v60, %v2038_v10 }
 0x352   :  { %v2232_v49 = vclz %v5034_v5 }
 0x353   :  { %v2042_v18 = vxor.u32 2147483648, %v2041_v7 }
 0x354   :  { %v5035_v55 = vadd.s32 4294967294, %v2232_v49 }
 0x355   :  { %v2043_v20 = vsel %vm1960_vm8, %v2042_v18, %v2041_v7  ;;  %vm2467_vm8 = vcmp.eq.s32.totalorder %v2465_v53, 0  ;;  %v2250_v53 = vsub.s32 4, %v6975_v38 }
 0x356   :  { %v2046_v44 = vsel %vm1959_vm15, %v6829_v39, %v2043_v20  ;;  %vm5036_vm11 = vcmp.lt.s32.totalorder %v5035_v55, 0  ;;  %vm2366_vm15 = vcmp.eq.s32.totalorder %v2361_v37, 2 }
 0x357   :  { %5219 = vcosq.f32 %v2046_v44  ;;  %v2235_v46 = vsel %vm5036_vm11, 0, %v5035_v55  ;;  %vm2053_vm11 = vcmp.eq.s32.totalorder %v2051_v24, 0 }
 0x358   :  { %5221 = vsinq.f32 %v2046_v44  ;;  %v2236_v4 = vsub.s32 32, %v2235_v46  ;;  %v2240_v45 = vsub.s32 4294967266, %v2235_v46  ;;  %v2237_v23 = vshll.u32 %v2228_v14, %v2235_v46 }
 0x359   :  { %v5216_v11 = vpop.eup %5215 }
 0x35a   :  { %v5218_v62 = vpop.eup %5217  ;;  %v2160_v2 = vxor.u32 2147483648, %v5216_v11  ;;  %v2238_v54 = vshrl.u32 %v2220_v31, %v2236_v4  ;;  %v2241_v28 = vadd.s32 127, %v2240_v45 }
 0x35b   :  { %v2157_v30 = vxor.u32 2147483648, %v5218_v62 }
 0x35c   :  { %v2161_v58 = vsel %vm2159_vm7, %v2160_v2, %v5218_v62  ;;  %v2472_v22 = vsel %vm2470_vm12, %v2160_v2, %v5218_v62  ;;  %v2239_v10 = vor.u32 %v2238_v54, %v2237_v23  ;;  %v2242_v0 = vshll.u32 %v2241_v28, 23  ;;  %v2605_v62 = vpop.permute.xlu0 %2604 }
 0x35d   :  { %v2158_v16 = vsel %vm2156_vm13, %v5216_v11, %v2157_v30  ;;  %v2469_v63 = vsel %vm2467_vm8, %v5216_v11, %v2157_v30  ;;  %vm2056_vm12 = vcmp.eq.s32.totalorder %v2051_v24, 2  ;;  %vm2362_vm13 = vcmp.lt.s32.totalorder %v2361_v37, 2 }
 0x35e   :  { %v2162_v3 = vsel %vm2155_vm10, %v2158_v16, %v2161_v58  ;;  %v2473_v15 = vsel %vm2466_vm9, %v2469_v63, %v2472_v22  ;;  %vm2050_vm9 = vweird.f32 %v6829_v39  ;;  %v2243_v7 = vor.u32 4788187, %v2242_v0 }
 0x35f   :  { %v2163_v8 = vsel %vm2153_vm14, nan, %v2162_v3  ;;  %v6996_v21 = vsel %vm2153_vm14, nan, %v2473_v15  ;;  %vm2363_vm14 = vcmp.eq.s32.totalorder %v2361_v37, 0  ;;  %vm2052_vm10 = vcmp.lt.s32.totalorder %v2051_v24, 2 }
 0x360   :  { %2584 = vrot.lane.b32.xlu0 %v2163_v8, %s8936_s7  ;;  %v2244_v61 = vand.u32 2147483647, %v2243_v7  ;;  %v2246_v56 = vcvt.s32.f32 %v2239_v10  ;;  %vm2166_vm7 = vcmp.lt.s32.totalorder %v6823_v17, 0  ;;  %vm2165_vm8 = vcmp.le.f32.partialorder %v2164_v25, 0.7853982 }
 0x361   :  { %v5220_v35 = vpop.eup %5219  ;;  %v2251_v11 = vsel %vm2166_vm7, %v2250_v53, %v6975_v38  ;;  %v2613_v34 = vrot.slane %v2605_v62, 4  ;;  %v7087_v53 = vstv %s7032_s29  ;;  %s5081_s29 = sld [smem:[#allocation5 + $0x31]] }
 0x362   :  { %v5222_v59 = vpop.eup %5221  ;;  %v2057_v26 = vxor.u32 2147483648, %v5220_v35  ;;  %v2247_v5 = vmul.f32 %v2246_v56, %v2244_v61  ;;  %v2253_v51 = vsel %vm2165_vm8, 0, %v2251_v11  ;;  %v7094_v11 = vstv %s7034_s11  ;;  %s9295_s11 = smov 112  }
 0x363   :  { %v2054_v60 = vxor.u32 2147483648, %v5222_v59  ;;  %v2568_v6 = vadd.s32 3, %v2253_v51  ;;  %v2257_v2 = vand.u32 3, %v2253_v51  ;;  %v2616_v31 = vmul.f32 %v2613_v34, %v6613_v29 }
 0x364   :  { %v2058_v27 = vsel %vm2056_vm12, %v2057_v26, %v5222_v59  ;;  %v2368_v52 = vsel %vm2366_vm15, %v2057_v26, %v5222_v59  ;;  %v2248_v44 = vxor.u32 2147483648, %v2247_v5  ;;  %v7100_v51 = vstv %s7038_s0  ;;  %s9293_s0 = smov 114  }
 0x365   :  { %v2055_v33 = vsel %vm2053_vm11, %v5220_v35, %v2054_v60  ;;  %v2365_v14 = vsel %vm2363_vm14, %v5220_v35, %v2054_v60  ;;  %v2569_v55 = vand.u32 3, %v2568_v6  ;;  %vm2262_vm11 = vcmp.eq.s32.totalorder %v2257_v2, 2 }
 0x366   :  { %v2059_v12 = vsel %vm2052_vm10, %v2055_v33, %v2058_v27  ;;  %v2369_v18 = vsel %vm2362_vm13, %v2365_v14, %v2368_v52  ;;  %v2249_v49 = vsel %vm2166_vm7, %v2248_v44, %v2247_v5  ;;  %vm2259_vm15 = vcmp.eq.s32.totalorder %v2257_v2, 0 }
 0x367   :  { %v2060_v9 = vsel %vm2050_vm9, nan, %v2059_v12  ;;  %v2370_v20 = vsel %vm2050_vm9, nan, %v2369_v18  ;;  %v2252_v39 = vsel %vm2165_vm8, %v6823_v17, %v2249_v49  ;;  %vm9276_vm9 = vcmask 982016  }
 0x368   :  { %2582 = vrot.lane.b32.xlu1 %v2060_v9, %s8936_s7  ;;  %v2617_v1 = vmul.f32 %v2614_v32, %v2370_v20  ;;  %5223 = vcosq.f32 %v2252_v39  ;;  %v2607_v30 = vsel %vm9276_vm9, %v6979_v47, %v2605_v62  ;;  %vm2574_vm12 = vcmp.eq.s32.totalorder %v2569_v55, 2 }
 0x369   :  { %5225 = vsinq.f32 %v2252_v39  ;;  %v2612_v25 = vrot.slane %v2607_v30, 4  ;;  %vm2571_vm14 = vcmp.eq.s32.totalorder %v2569_v55, 0  ;;  %vm2258_vm10 = vcmp.lt.s32.totalorder %v2257_v2, 2 }
 0x36a   :  { %2623 = vrot.lane.b32.xlu0 %v2617_v1, %s8936_s7  ;;  %vm2570_vm13 = vcmp.lt.s32.totalorder %v2569_v55, 2  ;;  %vm2256_vm7 = vweird.f32 %v6823_v17  ;;  %vm2588_vm8 = vcmask 64512   ;;  %vm2653_vm9 = vcmask 392192  }
 0x36b   :  { %v2615_v24 = vmul.f32 %v2612_v25, %v6613_v29  ;;  %v7062_v12 = vstv %s5052_s23  ;;  %v7064_v18 = vstv %s5051_s26  ;;  %v7076_v9 = vstv %s5054_s13  ;;  %s7091_s23 = sld [smem:[#allocation5 + $0x2f]]  ;;  %s5083_s26 = sld [smem:[#allocation5 + $0x32]] }
 0x36c   :  { %v7078_v20 = vstv %s5053_s3  ;;  %v7082_v5 = vstv %s5055_s18  ;;  %v7089_v44 = vstv %s5057_s19  ;;  %v7097_v39 = vstv %s7036_s2  ;;  %s9294_s2 = smov 113   ;;  %s5084_s19 = sld [smem:[#allocation8 + $0x32]] }
 0x36d   :  { %v2618_v54 = vmul.f32 %v2615_v24, %v6996_v21  ;;  %v7103_v6 = vstv %s7040_s15  ;;  %v7110_v55 = vstv %s7042_s10  ;;  %v7113_v30 = vstv %s7044_s27  ;;  %s9290_s27 = smov 117   ;;  %s9291_s10 = smov 116  }
 0x36e   :  { %v7122_v34 = vstv %s7050_s16  ;;  %s9288_s16 = smov 119   ;;  %s9292_s15 = smov 115  }
 0x36f   :  { %s5086_s18 = sld [smem:[#allocation8 + $0x33]]  ;;  %s5088_s13 = sld [smem:[#allocation8 + $0x34]] }
 0x370   :  { %s9307_s3 = smov 110  }
 0x372   :  { %v5224_v58 = vpop.eup %5223 }
 0x373   :  { %v5226_v22 = vpop.eup %5225  ;;  %v2263_v16 = vxor.u32 2147483648, %v5224_v58 }
 0x374   :  { %v2260_v63 = vxor.u32 2147483648, %v5226_v22 }
 0x375   :  { %v2264_v38 = vsel %vm2262_vm11, %v2263_v16, %v5226_v22  ;;  %v2576_v46 = vsel %vm2574_vm12, %v2263_v16, %v5226_v22  ;;  %v7119_v22 = vstv %s7048_s21  ;;  %v7125_v16 = vstv %s7052_s1  ;;  %s9287_s1 = smov 120   ;;  %s9289_s21 = smov 118  }
 0x376   :  { %v2261_v3 = vsel %vm2259_vm15, %v5224_v58, %v2260_v63  ;;  %v2573_v15 = vsel %vm2571_vm14, %v5224_v58, %v2260_v63  ;;  %v7116_v58 = vstv %s7046_s24  ;;  %vm9277_vm11 = vcmask 982016   ;;  %s7138_s24 = sld [smem:[#allocation5 + $0x30]] }
 0x377   :  { %v2265_v47 = vsel %vm2258_vm10, %v2261_v3, %v2264_v38  ;;  %v2577_v4 = vsel %vm2570_vm13, %v2573_v15, %v2576_v46  ;;  %v7133_v63 = vstv %s7054_s8  ;;  %v7136_v38 = vstv %s7056_s30  ;;  %vm9278_vm12 = vmmov %vm9277_vm11  ;;  %s5063_s30 = sld [smem:[#allocation5 + $0x28]]  ;;  %s9286_s8 = smov 122  }
 0x378   :  { %v2266_v8 = vsel %vm2256_vm7, nan, %v2265_v47  ;;  %v2578_v45 = vsel %vm2256_vm7, nan, %v2577_v4  ;;  %v7144_v3 = vstv %s7058_s28  ;;  %v7147_v15 = vstv %s7066_s25  ;;  %s5066_s25 = sld [smem:[#allocation8 + $0x29]]  ;;  %s5061_s28 = sld [smem:[#allocation5 + $0x27]]  ;;  %vm9435_vm15 = vmmov %vm9277_vm11 }
 0x379   :  { %2586 = vrot.lane.b32.xlu1 %v2266_v8, %s8936_s7  ;;  %v2619_v37 = vmul.f32 %v2616_v31, %v2578_v45  ;;  %v7159_v45 = vstv %s7074_s17  ;;  %s7190_s17 = sld [smem:[#allocation8 + $0x28]]  ;;  %vm9436_vm14 = vmmov %vm9277_vm11  ;;  %vm9441_vm10 = vcmask 973824  }
 0x37a   :  { %vm9442_vm13 = vmmov %vm9441_vm10 }
 0x37b   :  { %2627 = vrot.lane.b32.xlu0 %v2619_v37, %s8936_s7  ;;  %vm9445_vm7 = vmmov %vm9277_vm11 }
 0x37d   :  { %2625 = vrot.lane.b32.xlu1 %v2618_v54, %s8936_s7  ;;  %s5056_s7 = sld [smem:[#allocation8 + $0x24]] }
 0x37f   :  { %v7304_v13 = vstv %s7190_s17  ;;  %s9309_s17 = smov 109  }
 0x383   :  { %v7080_v1 = vstv %s5056_s7  ;;  %s9305_s7 = smov 111  }
 0x3d2   :  { %v2585_v23 = vpop.permute.xlu0 %2584 }
 0x3da   :  { %v2583_v28 = vpop.permute.xlu1 %2582 }
 0x3db   :  { %v2594_v35 = vmul.f32 %v2583_v28, %v6624_v42  ;;  %v2589_v26 = vsel %vm2588_vm8, %v2583_v28, %v2585_v23  ;;  %v7176_v28 = vstv %s7091_s23  ;;  %s5085_s23 = sld [smem:[#allocation5 + $0x33]] }
 0x3dc   :  { %v2624_v17 = vpop.permute.xlu0 %2623  ;;  %v2595_v21 = vmul.f32 %v2589_v26, %v6626_v41 }
 0x3dd   :  { %v2634_v32 = vadd.f32 %v2624_v17, %v2594_v35 }
 0x3df   :  { %2640 = vrot.lane.b32.xlu1 %v2634_v32, %s8972_s22 }
 0x3eb   :  { %v2587_v59 = vpop.permute.xlu1 %2586 }
 0x3ec   :  { %v2590_v10 = vsel %vm2588_vm8, %v2585_v23, %v2587_v59 }
 0x3ed   :  { %v2628_v0 = vpop.permute.xlu0 %2627  ;;  %v2596_v60 = vmul.f32 %v2590_v10, %v6622_v40 }
 0x3ef   :  { %v2626_v27 = vpop.permute.xlu1 %2625 }
 0x3f0   :  { %v2629_v52 = vsel %vm2588_vm8, %v2624_v17, %v2626_v27  ;;  %v2630_v42 = vsel %vm2588_vm8, %v2626_v27, %v2628_v0 }
 0x3f1   :  { %v2635_v7 = vadd.f32 %v2629_v52, %v2595_v21  ;;  %v2636_v33 = vadd.f32 %v2630_v42, %v2596_v60 }
 0x3f3   :  { %2642 = vrot.lane.b32.xlu0 %v2635_v7, %s8972_s22  ;;  %2644 = vrot.lane.b32.xlu1 %v2636_v33, %s8972_s22  ;;  %s7068_s22 = sld [smem:[#allocation5 + $0x2e]] }
 0x3f9   :  { %v7150_v31 = vstv %s7068_s22  ;;  %s7192_s22 = sld [smem:[#allocation8 + $0x27]] }
 0x3ff   :  { %v7307_v50 = vstv %s7192_s22  ;;  %s5087_s22 = sld [smem:[#allocation5 + $0x34]] }
 0x451   :  { %v2641_v14 = vpop.permute.xlu1 %2640 }
 0x465   :  { %v2645_v41 = vpop.permute.xlu1 %2644  ;;  %v2643_v49 = vpop.permute.xlu0 %2642 }
 0x466   :  { %2654 = vst.msk [vmem:[#allocation2 + $0x10] sm:$0xff] %vm2653_vm9, %v2645_v41  ;;  %v7128_v25 = vsel %vm9277_vm11, %v2643_v49, %v2645_v41  ;;  %v7141_v46 = vsel %vm9278_vm12, %v2641_v14, %v2643_v49  ;;  %v7245_v41 = vstv %s7138_s24  ;;  %s5090_s24 = sld [smem:[#allocation8 + $0x35]]  ;;  %vm9446_vm9 = vmmov %vm9445_vm7  ;;  %vm9449_vm11 = vcmask 965632  }
 0x467   :  { %v7167_v54 = vmul.f32 %v7110_v55, %v7128_v25  ;;  %v7171_v23 = vmul.f32 %v7100_v51, %v7128_v25  ;;  %v7180_v35 = vmul.f32 %v7103_v6, %v7141_v46  ;;  %v7184_v17 = vmul.f32 %v7110_v55, %v7141_v46  ;;  %vm9450_vm12 = vmmov %vm9449_vm11 }
 0x468   :  { %v7188_v32 = vmul.f32 %v7116_v58, %v7128_v25  ;;  %v7196_v59 = vmul.f32 %v7103_v6, %v7128_v25  ;;  %v7200_v26 = vmul.f32 %v7113_v30, %v7141_v46  ;;  %v7204_v10 = vmul.f32 %v7116_v58, %v7141_v46 }
 0x469   :  { %v7208_v0 = vmul.f32 %v7122_v34, %v7128_v25  ;;  %v7212_v21 = vmul.f32 %v7113_v30, %v7128_v25  ;;  %v7216_v60 = vmul.f32 %v7119_v22, %v7141_v46  ;;  %v7220_v27 = vmul.f32 %v7122_v34, %v7141_v46 }
 0x46a   :  { %v7224_v52 = vmul.f32 %v7133_v63, %v7128_v25  ;;  %v7228_v42 = vmul.f32 %v7119_v22, %v7128_v25  ;;  %v7232_v7 = vmul.f32 %v7125_v16, %v7141_v46  ;;  %v7236_v33 = vmul.f32 %v7133_v63, %v7141_v46 }
 0x46b   :  { %v7240_v14 = vmul.f32 %v7144_v3, %v7128_v25  ;;  %v7257_v49 = vmul.f32 %v7144_v3, %v7141_v46  ;;  %v7283_v19 = vmul.f32 %v7147_v15, %v7128_v25  ;;  %v7287_v57 = vmul.f32 %v7159_v45, %v7141_v46 }
 0x46c   :  { %v7291_v36 = vmul.f32 %v7176_v28, %v7141_v46  ;;  %v7295_v48 = vmul.f32 %v7245_v41, %v7128_v25  ;;  %v7299_v43 = vmul.f32 %v7159_v45, %v7128_v25  ;;  %v7311_v29 = vmul.f32 %v7245_v41, %v7141_v46 }
 0x46d   :  { %v7060_v40 = vld [vmem:[#allocation2 + $0x10] sm:$0xff]  ;;  %9280 = vst [vmem:[#allocation19_spill] sm:$0xff] %v7283_v19  ;;  %9281 = vst [vmem:[#allocation20_spill] sm:$0xff] %v7287_v57  ;;  %v7329_v57 = vstv %s5063_s30  ;;  %s5089_s30 = sld [smem:[#allocation5 + $0x35]] }
 0x46e   :  { %v2694_v61 = vmul.f32 %v7062_v12, %v7060_v40  ;;  %v2672_v56 = vmul.f32 %v7064_v18, %v7060_v40  ;;  %v2738_v62 = vmul.f32 %v7076_v9, %v7060_v40  ;;  %v2716_v2 = vmul.f32 %v7078_v20, %v7060_v40  ;;  %9282 = vst [vmem:[#allocation27_spill] sm:$0xff] %v7291_v36 }
 0x46f   :  { %v2782_v47 = vmul.f32 %v7080_v1, %v7060_v40  ;;  %v2760_v4 = vmul.f32 %v7082_v5, %v7060_v40  ;;  %v2826_v8 = vmul.f32 %v7087_v53, %v7060_v40  ;;  %v2804_v24 = vmul.f32 %v7089_v44, %v7060_v40  ;;  %9283 = vst [vmem:[#allocation24_spill] sm:$0xff] %v7295_v48 }
 0x470   :  { %2702 = vrot.lane.b32.xlu1 %v2694_v61, %s5302_s4  ;;  %2680 = vrot.lane.b32.xlu0 %v2672_v56, %s5302_s4  ;;  %v2870_v37 = vmul.f32 %v7094_v11, %v7060_v40  ;;  %v7249_v61 = vmul.f32 %v7125_v16, %v7128_v25  ;;  %v7253_v56 = vmul.f32 %v7136_v38, %v7141_v46 }
 0x471   :  { %9284 = vst [vmem:[#allocation22_spill] sm:$0xff] %v7299_v43  ;;  %9285 = vst [vmem:[#allocation23_spill] sm:$0xff] %v7311_v29  ;;  %v2958_v48 = vmul.f32 %v7304_v13, %v7060_v40  ;;  %v2914_v36 = vmul.f32 %v7307_v50, %v7060_v40  ;;  %v3090_v19 = vmul.f32 %v7103_v6, %v7060_v40 }
 0x472   :  { %v3178_v6 = vmul.f32 %v7119_v22, %v7060_v40  ;;  %v3156_v22 = vmul.f32 %v7144_v3, %v7060_v40  ;;  %v3288_v3 = vmul.f32 %v7245_v41, %v7060_v40  ;;  %v2693_v41 = vmul.f32 %v7062_v12, %v7128_v25 }
 0x474   :  { %2746 = vrot.lane.b32.xlu1 %v2738_v62, %s5303_s6  ;;  %2724 = vrot.lane.b32.xlu0 %v2716_v2, %s5303_s6  ;;  %v7261_v62 = vmul.f32 %v7150_v31, %v7128_v25  ;;  %v7265_v2 = vmul.f32 %v7136_v38, %v7128_v25 }
 0x478   :  { %2790 = vrot.lane.b32.xlu1 %v2782_v47, %s5304_s9  ;;  %2768 = vrot.lane.b32.xlu0 %v2760_v4, %s5304_s9  ;;  %v7269_v47 = vmul.f32 %v7147_v15, %v7141_v46  ;;  %v7273_v4 = vmul.f32 %v7150_v31, %v7141_v46 }
 0x47c   :  { %2834 = vrot.lane.b32.xlu1 %v2826_v8, %s5305_s12  ;;  %2812 = vrot.lane.b32.xlu0 %v2804_v24, %s5305_s12  ;;  %v2848_v8 = vmul.f32 %v7097_v39, %v7060_v40  ;;  %v7279_v24 = vmul.f32 %v7176_v28, %v7128_v25 }
 0x47e   :  { %9279 = vst [vmem:[#allocation18_spill] sm:$0xff] %v7279_v24  ;;  %v3024_v24 = vmul.f32 %v7116_v58, %v7060_v40  ;;  %v3266_v58 = vmul.f32 %v7136_v38, %v7060_v40  ;;  %v3244_v38 = vmul.f32 %v7176_v28, %v7060_v40  ;;  %v2715_v28 = vmul.f32 %v7078_v20, %v7128_v25 }
 0x480   :  { %2878 = vrot.lane.b32.xlu1 %v2870_v37, %s5306_s14  ;;  %2856 = vrot.lane.b32.xlu0 %v2848_v8, %s5306_s14  ;;  %v7319_v37 = vstv %s5066_s25  ;;  %v7321_v8 = vstv %s5061_s28  ;;  %s5092_s25 = sld [smem:[#allocation8 + $0x36]]  ;;  %s9313_s28 = smov 108  }
 0x481   :  { %v3002_v43 = vmul.f32 %v7319_v37, %v7060_v40  ;;  %v2892_v29 = vmul.f32 %v7321_v8, %v7060_v40 }
 0x484   :  { %2966 = vrot.lane.b32.xlu1 %v2958_v48, %s5308_s20  ;;  %2922 = vrot.lane.b32.xlu0 %v2914_v36, %s9286_s8  ;;  %v3046_v48 = vmul.f32 %v7100_v51, %v7060_v40  ;;  %v2936_v36 = vmul.f32 %v7329_v57, %v7060_v40 }
 0x488   :  { %3010 = vrot.lane.b32.xlu1 %v3002_v43, %s9287_s1  ;;  %2900 = vrot.lane.b32.xlu0 %v2892_v29, %s9286_s8  ;;  %v2980_v43 = vmul.f32 %v7110_v55, %v7060_v40  ;;  %v3134_v29 = vmul.f32 %v7113_v30, %v7060_v40  ;;  %v3068_v55 = vmul.f32 %v7122_v34, %v7060_v40 }
 0x489   :  { %v3112_v30 = vmul.f32 %v7133_v63, %v7060_v40  ;;  %v3310_v34 = vmul.f32 %v7147_v15, %v7060_v40  ;;  %v3354_v63 = vmul.f32 %v7159_v45, %v7060_v40  ;;  %v2671_v15 = vmul.f32 %v7064_v18, %v7128_v25 }
 0x48a   :  { %v2670_v45 = vmul.f32 %v7064_v18, %v7141_v46  ;;  %v2714_v18 = vmul.f32 %v7078_v20, %v7141_v46  ;;  %v2758_v20 = vmul.f32 %v7082_v5, %v7141_v46 }
 0x48c   :  { %3054 = vrot.lane.b32.xlu1 %v3046_v48, %s9288_s16  ;;  %2944 = vrot.lane.b32.xlu0 %v2936_v36, %s5308_s20  ;;  %v2759_v48 = vmul.f32 %v7082_v5, %v7128_v25  ;;  %v2780_v36 = vmul.f32 %v7080_v1, %v7141_v46  ;;  %v2802_v5 = vmul.f32 %v7089_v44, %v7141_v46 }
 0x490   :  { %3098 = vrot.lane.b32.xlu1 %v3090_v19, %s9289_s21  ;;  %2988 = vrot.lane.b32.xlu0 %v2980_v43, %s9287_s1  ;;  %v3222_v19 = vmul.f32 %v7125_v16, %v7060_v40  ;;  %v3200_v16 = vmul.f32 %v7150_v31, %v7060_v40  ;;  %v2692_v31 = vmul.f32 %v7062_v12, %v7141_v46 }
 0x491   :  { %v2737_v12 = vmul.f32 %v7076_v9, %v7128_v25  ;;  %v2803_v43 = vmul.f32 %v7089_v44, %v7128_v25  ;;  %v2846_v44 = vmul.f32 %v7097_v39, %v7141_v46 }
 0x494   :  { %3142 = vrot.lane.b32.xlu1 %v3134_v29, %s9290_s27  ;;  %3032 = vrot.lane.b32.xlu0 %v3024_v24, %s9288_s16  ;;  %v2736_v24 = vmul.f32 %v7076_v9, %v7141_v46  ;;  %v2781_v9 = vmul.f32 %v7080_v1, %v7128_v25  ;;  %v2824_v29 = vmul.f32 %v7087_v53, %v7141_v46 }
 0x495   :  { %v2825_v1 = vmul.f32 %v7087_v53, %v7128_v25  ;;  %v2869_v53 = vmul.f32 %v7094_v11, %v7128_v25 }
 0x498   :  { %3186 = vrot.lane.b32.xlu1 %v3178_v6, %s9291_s10  ;;  %3076 = vrot.lane.b32.xlu0 %v3068_v55, %s9289_s21  ;;  %v2847_v6 = vmul.f32 %v7097_v39, %v7128_v25  ;;  %v2868_v55 = vmul.f32 %v7094_v11, %v7141_v46  ;;  %v2912_v39 = vmul.f32 %v7307_v50, %v7141_v46 }
 0x499   :  { %v2957_v11 = vmul.f32 %v7304_v13, %v7128_v25 }
 0x49c   :  { %3230 = vrot.lane.b32.xlu1 %v3222_v19, %s9292_s15  ;;  %3120 = vrot.lane.b32.xlu0 %v3112_v30, %s9290_s27  ;;  %v2913_v19 = vmul.f32 %v7307_v50, %v7128_v25  ;;  %v2956_v30 = vmul.f32 %v7304_v13, %v7141_v46  ;;  %v2890_v50 = vmul.f32 %v7321_v8, %v7141_v46 }
 0x49d   :  { %v2935_v13 = vmul.f32 %v7329_v57, %v7128_v25 }
 0x4a0   :  { %3274 = vrot.lane.b32.xlu1 %v3266_v58, %s9293_s0  ;;  %3164 = vrot.lane.b32.xlu0 %v3156_v22, %s9291_s10  ;;  %v2891_v58 = vmul.f32 %v7321_v8, %v7128_v25  ;;  %v3000_v22 = vmul.f32 %v7319_v37, %v7141_v46 }
 0x4a4   :  { %3318 = vrot.lane.b32.xlu1 %v3310_v34, %s9294_s2  ;;  %3208 = vrot.lane.b32.xlu0 %v3200_v16, %s9292_s15 }
 0x4a8   :  { %3362 = vrot.lane.b32.xlu1 %v3354_v63, %s9295_s11  ;;  %3252 = vrot.lane.b32.xlu0 %v3244_v38, %s9293_s0  ;;  %v3001_v63 = vmul.f32 %v7319_v37, %v7128_v25 }
 0x4ac   :  { %3296 = vrot.lane.b32.xlu0 %v3288_v3, %s9294_s2  ;;  %2678 = vrot.lane.b32.xlu1 %v2671_v15, %s5302_s4  ;;  %v3044_v3 = vmul.f32 %v7100_v51, %v7141_v46  ;;  %v2934_v15 = vmul.f32 %v7329_v57, %v7141_v46 }
 0x4b0   :  { %2698 = vrot.lane.b32.xlu1 %v2692_v31, %s5302_s4  ;;  %2676 = vrot.lane.b32.xlu0 %v2670_v45, %s5302_s4 }
 0x4b4   :  { %2722 = vrot.lane.b32.xlu1 %v2715_v28, %s5303_s6  ;;  %2700 = vrot.lane.b32.xlu0 %v2693_v41, %s5302_s4 }
 0x4b8   :  { %2742 = vrot.lane.b32.xlu1 %v2736_v24, %s5303_s6  ;;  %2720 = vrot.lane.b32.xlu0 %v2714_v18, %s5303_s6 }
 0x4bc   :  { %2766 = vrot.lane.b32.xlu1 %v2759_v48, %s5304_s9  ;;  %2744 = vrot.lane.b32.xlu0 %v2737_v12, %s5303_s6  ;;  %v3395_v12 = vstv %s5084_s19  ;;  %s5094_s19 = sld [smem:[#allocation8 + $0x37]] }
 0x4c0   :  { %2786 = vrot.lane.b32.xlu1 %v2780_v36, %s5304_s9  ;;  %2764 = vrot.lane.b32.xlu0 %v2758_v20, %s5304_s9  ;;  %v9303_v36 = vld [vmem:[#allocation24_spill] sm:$0xff]  ;;  %v9304_v20 = vld [vmem:[#allocation22_spill] sm:$0xff] }
 0x4c4   :  { %2810 = vrot.lane.b32.xlu1 %v2803_v43, %s5305_s12  ;;  %2788 = vrot.lane.b32.xlu0 %v2781_v9, %s5304_s9 }
 0x4c8   :  { %2830 = vrot.lane.b32.xlu1 %v2824_v29, %s5305_s12  ;;  %2808 = vrot.lane.b32.xlu0 %v2802_v5, %s5305_s12  ;;  %v3396_v29 = vmul.f32 %v3395_v12, %v7141_v46  ;;  %v9306_v5 = vld [vmem:[#allocation23_spill] sm:$0xff] }
 0x4cc   :  { %2854 = vrot.lane.b32.xlu1 %v2847_v6, %s5306_s14  ;;  %2832 = vrot.lane.b32.xlu0 %v2825_v1, %s5305_s12 }
 0x4d0   :  { %2874 = vrot.lane.b32.xlu1 %v2868_v55, %s5306_s14  ;;  %2852 = vrot.lane.b32.xlu0 %v2846_v44, %s5306_s14  ;;  %v3398_v55 = vmul.f32 %v3395_v12, %v7060_v40  ;;  %v3397_v44 = vmul.f32 %v3395_v12, %v7128_v25 }
 0x4d4   :  { %2920 = vrot.lane.b32.xlu1 %v2913_v19, %s9286_s8  ;;  %2876 = vrot.lane.b32.xlu0 %v2869_v53, %s5306_s14  ;;  %v3329_v19 = vstv %s5081_s29  ;;  %s9320_s29 = smov 107  }
 0x4d8   :  { %2962 = vrot.lane.b32.xlu1 %v2956_v30, %s5308_s20  ;;  %2918 = vrot.lane.b32.xlu0 %v2912_v39, %s9286_s8  ;;  %v3331_v39 = vmul.f32 %v3329_v19, %v7128_v25 }
 0x4dc   :  { %2898 = vrot.lane.b32.xlu1 %v2891_v58, %s9286_s8  ;;  %2964 = vrot.lane.b32.xlu0 %v2957_v11, %s5308_s20  ;;  %v3330_v58 = vmul.f32 %v3329_v19, %v7141_v46  ;;  %v3439_v11 = vstv %s5086_s18  ;;  %s5091_s18 = sld [smem:[#allocation5 + $0x36]] }
 0x4e0   :  { %3006 = vrot.lane.b32.xlu1 %v3000_v22, %s9287_s1  ;;  %2896 = vrot.lane.b32.xlu0 %v2890_v50, %s9286_s8 }
 0x4e2   :  { %v7463_v34 = vpop.permute.xlu1 %2702  ;;  %v7465_v16 = vpop.permute.xlu0 %2680 }
 0x4e4   :  { %2942 = vrot.lane.b32.xlu1 %v2935_v13, %s5308_s20  ;;  %3008 = vrot.lane.b32.xlu0 %v3001_v63, %s9287_s1  ;;  %v3440_v13 = vmul.f32 %v3439_v11, %v7141_v46  ;;  %v3332_v63 = vmul.f32 %v3329_v19, %v7060_v40 }
 0x4e6   :  { %v7473_v38 = vpop.permute.xlu1 %2746  ;;  %v7475_v8 = vpop.permute.xlu0 %2724 }
 0x4e8   :  { %3050 = vrot.lane.b32.xlu1 %v3044_v3, %s9288_s16  ;;  %2940 = vrot.lane.b32.xlu0 %v2934_v15, %s5308_s20 }
 0x4ea   :  { %v7483_v31 = vpop.permute.xlu1 %2790  ;;  %v7485_v37 = vpop.permute.xlu0 %2768 }
 0x4ec   :  { %2986 = vrot.lane.b32.xlu1 %v7167_v54, %s9287_s1  ;;  %3052 = vrot.lane.b32.xlu0 %v7171_v23, %s9288_s16 }
 0x4ee   :  { %v7491_v45 = vpop.permute.xlu1 %2834  ;;  %v7493_v51 = vpop.permute.xlu0 %2812 }
 0x4f0   :  { %3094 = vrot.lane.b32.xlu1 %v7180_v35, %s9289_s21  ;;  %2984 = vrot.lane.b32.xlu0 %v7184_v17, %s9287_s1 }
 0x4f2   :  { %v7499_v57 = vpop.permute.xlu1 %2878  ;;  %v7501_v28 = vpop.permute.xlu0 %2856 }
 0x4f4   :  { %3030 = vrot.lane.b32.xlu1 %v7188_v32, %s9288_s16  ;;  %3096 = vrot.lane.b32.xlu0 %v7196_v59, %s9289_s21 }
 0x4f6   :  { %v7507_v54 = vpop.permute.xlu1 %2966  ;;  %v7509_v23 = vpop.permute.xlu0 %2922 }
 0x4f8   :  { %3138 = vrot.lane.b32.xlu1 %v7200_v26, %s9290_s27  ;;  %3028 = vrot.lane.b32.xlu0 %v7204_v10, %s9288_s16 }
 0x4fa   :  { %v7515_v35 = vpop.permute.xlu1 %3010  ;;  %v7517_v17 = vpop.permute.xlu0 %2900 }
 0x4fc   :  { %3074 = vrot.lane.b32.xlu1 %v7208_v0, %s9289_s21  ;;  %3140 = vrot.lane.b32.xlu0 %v7212_v21, %s9290_s27 }
 0x4fe   :  { %v7523_v32 = vpop.permute.xlu1 %3054  ;;  %v7525_v59 = vpop.permute.xlu0 %2944 }
 0x500   :  { %3182 = vrot.lane.b32.xlu1 %v7216_v60, %s9291_s10  ;;  %3072 = vrot.lane.b32.xlu0 %v7220_v27, %s9289_s21 }
 0x502   :  { %v7531_v26 = vpop.permute.xlu1 %3098  ;;  %v7533_v10 = vpop.permute.xlu0 %2988 }
 0x504   :  { %3118 = vrot.lane.b32.xlu1 %v7224_v52, %s9290_s27  ;;  %3184 = vrot.lane.b32.xlu0 %v7228_v42, %s9291_s10 }
 0x506   :  { %v7539_v0 = vpop.permute.xlu1 %3142  ;;  %v7541_v21 = vpop.permute.xlu0 %3032 }
 0x508   :  { %3226 = vrot.lane.b32.xlu1 %v7232_v7, %s9292_s15  ;;  %3116 = vrot.lane.b32.xlu0 %v7236_v33, %s9290_s27 }
 0x50a   :  { %v7547_v60 = vpop.permute.xlu1 %3186  ;;  %v7549_v27 = vpop.permute.xlu0 %3076 }
 0x50c   :  { %3162 = vrot.lane.b32.xlu1 %v7240_v14, %s9291_s10  ;;  %3228 = vrot.lane.b32.xlu0 %v7249_v61, %s9292_s15 }
 0x50e   :  { %v7555_v52 = vpop.permute.xlu1 %3230  ;;  %v7557_v42 = vpop.permute.xlu0 %3120 }
 0x510   :  { %3270 = vrot.lane.b32.xlu1 %v7253_v56, %s9293_s0  ;;  %3160 = vrot.lane.b32.xlu0 %v7257_v49, %s9291_s10 }
 0x512   :  { %v7563_v7 = vpop.permute.xlu1 %3274  ;;  %v7565_v33 = vpop.permute.xlu0 %3164 }
 0x514   :  { %3206 = vrot.lane.b32.xlu1 %v7261_v62, %s9292_s15  ;;  %3272 = vrot.lane.b32.xlu0 %v7265_v2, %s9293_s0  ;;  %v9298_v62 = vld [vmem:[#allocation18_spill] sm:$0xff]  ;;  %v9299_v2 = vld [vmem:[#allocation19_spill] sm:$0xff] }
 0x516   :  { %v7571_v14 = vpop.permute.xlu1 %3318  ;;  %v7573_v61 = vpop.permute.xlu0 %3208 }
 0x518   :  { %3314 = vrot.lane.b32.xlu1 %v7269_v47, %s9294_s2  ;;  %3204 = vrot.lane.b32.xlu0 %v7273_v4, %s9292_s15  ;;  %v9301_v47 = vld [vmem:[#allocation20_spill] sm:$0xff]  ;;  %v9302_v4 = vld [vmem:[#allocation27_spill] sm:$0xff] }
 0x51a   :  { %v7579_v56 = vpop.permute.xlu1 %3362  ;;  %v7581_v49 = vpop.permute.xlu0 %3252 }
 0x51b   :  { %9296 = vst [vmem:[#allocation26_spill] sm:$0xff] %v7579_v56  ;;  %9297 = vst [vmem:[#allocation31_spill] sm:$0xff] %v7581_v49 }
 0x51c   :  { %3250 = vrot.lane.b32.xlu1 %v9298_v62, %s9293_s0  ;;  %3316 = vrot.lane.b32.xlu0 %v9299_v2, %s9294_s2  ;;  %v3442_v62 = vmul.f32 %v3439_v11, %v7060_v40  ;;  %v3441_v2 = vmul.f32 %v3439_v11, %v7128_v25 }
 0x51e   :  { %v7587_v41 = vpop.permute.xlu1 %2678  ;;  %v7589_v24 = vpop.permute.xlu0 %3296 }
 0x51f   :  { %9300 = vst [vmem:[#allocation28_spill] sm:$0xff] %v7589_v24 }
 0x520   :  { %3358 = vrot.lane.b32.xlu1 %v9301_v47, %s9295_s11  ;;  %3248 = vrot.lane.b32.xlu0 %v9302_v4, %s9293_s0  ;;  %v3373_v47 = vstv %s5083_s26  ;;  %s9327_s26 = smov 106  }
 0x521   :  { %v3376_v19 = vmul.f32 %v3373_v47, %v7060_v40 }
 0x522   :  { %v7595_v18 = vpop.permute.xlu1 %2698  ;;  %v7597_v48 = vpop.permute.xlu0 %2676 }
 0x524   :  { %3294 = vrot.lane.b32.xlu1 %v9303_v36, %s9294_s2  ;;  %3360 = vrot.lane.b32.xlu0 %v9304_v20, %s9295_s11  ;;  %v3375_v36 = vmul.f32 %v3373_v47, %v7128_v25  ;;  %v3374_v20 = vmul.f32 %v3373_v47, %v7141_v46 }
 0x526   :  { %v7603_v43 = vpop.permute.xlu1 %2722  ;;  %v7605_v9 = vpop.permute.xlu0 %2700 }
 0x528   :  { %3402 = vrot.lane.b32.xlu1 %v3396_v29, %s9305_s7  ;;  %3292 = vrot.lane.b32.xlu0 %v9306_v5, %s9294_s2  ;;  %v3483_v29 = vstv %s5088_s13  ;;  %s5093_s13 = sld [smem:[#allocation5 + $0x37]] }
 0x529   :  { %v3486_v11 = vmul.f32 %v3483_v29, %v7060_v40 }
 0x52a   :  { %v7611_v6 = vpop.permute.xlu1 %2742  ;;  %v7613_v1 = vpop.permute.xlu0 %2720 }
 0x52c   :  { %3406 = vrot.lane.b32.xlu1 %v3398_v55, %s9305_s7  ;;  %3404 = vrot.lane.b32.xlu0 %v3397_v44, %s9305_s7  ;;  %v3484_v44 = vmul.f32 %v3483_v29, %v7141_v46 }
 0x52e   :  { %v7619_v53 = vpop.permute.xlu1 %2766  ;;  %v7621_v30 = vpop.permute.xlu0 %2744 }
 0x530   :  { %3338 = vrot.lane.b32.xlu1 %v3331_v39, %s9295_s11  ;;  %3336 = vrot.lane.b32.xlu0 %v3330_v58, %s9295_s11 }
 0x532   :  { %v7627_v22 = vpop.permute.xlu1 %2786  ;;  %v7629_v50 = vpop.permute.xlu0 %2764 }
 0x534   :  { %3446 = vrot.lane.b32.xlu1 %v3440_v13, %s9307_s3  ;;  %3340 = vrot.lane.b32.xlu0 %v3332_v63, %s9295_s11  ;;  %v3485_v13 = vmul.f32 %v3483_v29, %v7128_v25  ;;  %v3417_v63 = vstv %s5085_s23  ;;  %s9334_s23 = smov 105  }
 0x535   :  { %v3419_v47 = vmul.f32 %v3417_v63, %v7128_v25 }
 0x536   :  { %v7635_v3 = vpop.permute.xlu1 %2810  ;;  %v7637_v15 = vpop.permute.xlu0 %2788 }
 0x538   :  { %3450 = vrot.lane.b32.xlu1 %v3442_v62, %s9307_s3  ;;  %3448 = vrot.lane.b32.xlu0 %v3441_v2, %s9307_s3 }
 0x53a   :  { %v7643_v4 = vpop.permute.xlu1 %2830  ;;  %v7645_v12 = vpop.permute.xlu0 %2808 }
 0x53c   :  { %3382 = vrot.lane.b32.xlu1 %v3375_v36, %s9305_s7  ;;  %3380 = vrot.lane.b32.xlu0 %v3374_v20, %s9305_s7  ;;  %v3418_v36 = vmul.f32 %v3417_v63, %v7141_v46  ;;  %v3527_v20 = vstv %s5090_s24  ;;  %s5095_s24 = sld [smem:[#allocation5 + $0x38]] }
 0x53e   :  { %v7651_v5 = vpop.permute.xlu1 %2854  ;;  %v7653_v55 = vpop.permute.xlu0 %2832 }
 0x53f   :  { %9308 = vst [vmem:[#allocation25_spill] sm:$0xff] %v7651_v5 }
 0x540   :  { %3490 = vrot.lane.b32.xlu1 %v3484_v44, %s9309_s17  ;;  %3384 = vrot.lane.b32.xlu0 %v3376_v19, %s9305_s7  ;;  %v3528_v19 = vmul.f32 %v3527_v20, %v7141_v46  ;;  %s5096_s7 = sld [smem:[#allocation8 + $0x38]] }
 0x542   :  { %v7659_v39 = vpop.permute.xlu1 %2874  ;;  %v7661_v58 = vpop.permute.xlu0 %2852 }
 0x543   :  { %9310 = vst [vmem:[#allocation30_spill] sm:$0xff] %v7661_v58 }
 0x544   :  { %3494 = vrot.lane.b32.xlu1 %v3486_v11, %s9309_s17  ;;  %3492 = vrot.lane.b32.xlu0 %v3485_v13, %s9309_s17  ;;  %v3420_v11 = vmul.f32 %v3417_v63, %v7060_v40 }
 0x546   :  { %v7667_v62 = vpop.permute.xlu1 %2920  ;;  %v7669_v2 = vpop.permute.xlu0 %2876 }
 0x548   :  { %3426 = vrot.lane.b32.xlu1 %v3419_v47, %s9307_s3  ;;  %3424 = vrot.lane.b32.xlu0 %v3418_v36, %s9307_s3  ;;  %v3530_v47 = vmul.f32 %v3527_v20, %v7060_v40  ;;  %v3529_v36 = vmul.f32 %v3527_v20, %v7128_v25 }
 0x54a   :  { %v7675_v29 = vpop.permute.xlu1 %2962  ;;  %v7677_v44 = vpop.permute.xlu0 %2918 }
 0x54b   :  { %9311 = vst [vmem:[#allocation32_spill] sm:$0xff] %v7675_v29  ;;  %9312 = vst [vmem:[#allocation33_spill] sm:$0xff] %v7677_v44  ;;  %v3461_v29 = vstv %s5087_s22  ;;  %s9341_s22 = smov 104  }
 0x54c   :  { %3534 = vrot.lane.b32.xlu1 %v3528_v19, %s9313_s28  ;;  %3428 = vrot.lane.b32.xlu0 %v3420_v11, %s9307_s3  ;;  %v3463_v19 = vmul.f32 %v3461_v29, %v7128_v25  ;;  %v3462_v11 = vmul.f32 %v3461_v29, %v7141_v46  ;;  %s5098_s3 = sld [smem:[#allocation8 + $0x39]] }
 0x54e   :  { %v7683_v13 = vpop.permute.xlu1 %2898  ;;  %v7685_v24 = vpop.permute.xlu0 %2964 }
 0x54f   :  { %9314 = vst [vmem:[#allocation34_spill] sm:$0xff] %v7683_v13  ;;  %9315 = vst [vmem:[#allocation29_spill] sm:$0xff] %v7685_v24  ;;  %v3571_v13 = vstv %s5092_s25  ;;  %s5097_s25 = sld [smem:[#allocation5 + $0x39]] }
 0x550   :  { %3538 = vrot.lane.b32.xlu1 %v3530_v47, %s9313_s28  ;;  %3536 = vrot.lane.b32.xlu0 %v3529_v36, %s9313_s28  ;;  %v3572_v47 = vmul.f32 %v3571_v13, %v7141_v46  ;;  %v3464_v36 = vmul.f32 %v3461_v29, %v7060_v40 }
 0x552   :  { %v7691_v58 = vpop.permute.xlu1 %3006  ;;  %v7693_v63 = vpop.permute.xlu0 %2896 }
 0x553   :  { %9316 = vst [vmem:[#allocation35_spill] sm:$0xff] %v7691_v58  ;;  %9317 = vst [vmem:[#allocation37_spill] sm:$0xff] %v7693_v63 }
 0x554   :  { %3470 = vrot.lane.b32.xlu1 %v3463_v19, %s9309_s17  ;;  %3468 = vrot.lane.b32.xlu0 %v3462_v11, %s9309_s17  ;;  %v3574_v19 = vmul.f32 %v3571_v13, %v7060_v40  ;;  %v3573_v11 = vmul.f32 %v3571_v13, %v7128_v25 }
 0x556   :  { %v7699_v20 = vpop.permute.xlu1 %2942  ;;  %v7701_v24 = vpop.permute.xlu0 %3008 }
 0x557   :  { %9318 = vst [vmem:[#allocation39_spill] sm:$0xff] %v7699_v20  ;;  %9319 = vst [vmem:[#allocation36_spill] sm:$0xff] %v7701_v24  ;;  %v3505_v20 = vstv %s5089_s30  ;;  %s9348_s30 = smov 103  }
 0x558   :  { %3578 = vrot.lane.b32.xlu1 %v3572_v47, %s9320_s29  ;;  %3472 = vrot.lane.b32.xlu0 %v3464_v36, %s9309_s17  ;;  %v3507_v47 = vmul.f32 %v3505_v20, %v7128_v25  ;;  %v3506_v36 = vmul.f32 %v3505_v20, %v7141_v46  ;;  %s5100_s17 = sld [smem:[#allocation8 + $0x3a]] }
 0x55a   :  { %v7707_v58 = vpop.permute.xlu1 %3050  ;;  %v7709_v63 = vpop.permute.xlu0 %2940 }
 0x55b   :  { %9321 = vst [vmem:[#allocation38_spill] sm:$0xff] %v7707_v58  ;;  %9322 = vst [vmem:[#allocation40_spill] sm:$0xff] %v7709_v63  ;;  %v3615_v58 = vstv %s5094_s19  ;;  %s5099_s19 = sld [smem:[#allocation5 + $0x3a]] }
 0x55c   :  { %3582 = vrot.lane.b32.xlu1 %v3574_v19, %s9320_s29  ;;  %3580 = vrot.lane.b32.xlu0 %v3573_v11, %s9320_s29  ;;  %v3616_v19 = vmul.f32 %v3615_v58, %v7141_v46  ;;  %v3508_v11 = vmul.f32 %v3505_v20, %v7060_v40 }
 0x55e   :  { %v7715_v24 = vpop.permute.xlu1 %2986  ;;  %v7717_v29 = vpop.permute.xlu0 %3052 }
 0x55f   :  { %9323 = vst [vmem:[#allocation41_spill] sm:$0xff] %v7715_v24  ;;  %9324 = vst [vmem:[#allocation43_spill] sm:$0xff] %v7717_v29 }
 0x560   :  { %3514 = vrot.lane.b32.xlu1 %v3507_v47, %s9313_s28  ;;  %3512 = vrot.lane.b32.xlu0 %v3506_v36, %s9313_s28  ;;  %v3618_v47 = vmul.f32 %v3615_v58, %v7060_v40  ;;  %v3617_v36 = vmul.f32 %v3615_v58, %v7128_v25 }
 0x562   :  { %v7723_v13 = vpop.permute.xlu1 %3094  ;;  %v7725_v63 = vpop.permute.xlu0 %2984 }
 0x563   :  { %9325 = vst [vmem:[#allocation45_spill] sm:$0xff] %v7723_v13  ;;  %9326 = vst [vmem:[#allocation42_spill] sm:$0xff] %v7725_v63  ;;  %v3549_v13 = vstv %s5091_s18  ;;  %s9355_s18 = smov 102  }
 0x564   :  { %3622 = vrot.lane.b32.xlu1 %v3616_v19, %s9327_s26  ;;  %3516 = vrot.lane.b32.xlu0 %v3508_v11, %s9313_s28  ;;  %v3551_v19 = vmul.f32 %v3549_v13, %v7128_v25  ;;  %v3550_v11 = vmul.f32 %v3549_v13, %v7141_v46  ;;  %s5102_s28 = sld [smem:[#allocation8 + $0x3b]] }
 0x566   :  { %v7731_v24 = vpop.permute.xlu1 %3030  ;;  %v7733_v29 = vpop.permute.xlu0 %3096 }
 0x567   :  { %9328 = vst [vmem:[#allocation44_spill] sm:$0xff] %v7731_v24  ;;  %9329 = vst [vmem:[#allocation46_spill] sm:$0xff] %v7733_v29  ;;  %v3659_v24 = vstv %s5096_s7  ;;  %s5101_s7 = sld [smem:[#allocation5 + $0x3b]] }
 0x568   :  { %3626 = vrot.lane.b32.xlu1 %v3618_v47, %s9327_s26  ;;  %3624 = vrot.lane.b32.xlu0 %v3617_v36, %s9327_s26  ;;  %v3660_v47 = vmul.f32 %v3659_v24, %v7141_v46  ;;  %v3552_v36 = vmul.f32 %v3549_v13, %v7060_v40 }
 0x56a   :  { %v7739_v63 = vpop.permute.xlu1 %3138  ;;  %v7741_v20 = vpop.permute.xlu0 %3028 }
 0x56b   :  { %9330 = vst [vmem:[#allocation47_spill] sm:$0xff] %v7739_v63  ;;  %9331 = vst [vmem:[#allocation49_spill] sm:$0xff] %v7741_v20 }
 0x56c   :  { %3558 = vrot.lane.b32.xlu1 %v3551_v19, %s9320_s29  ;;  %3556 = vrot.lane.b32.xlu0 %v3550_v11, %s9320_s29  ;;  %v3662_v19 = vmul.f32 %v3659_v24, %v7060_v40  ;;  %v3661_v11 = vmul.f32 %v3659_v24, %v7128_v25 }
 0x56e   :  { %v7747_v58 = vpop.permute.xlu1 %3074  ;;  %v7749_v29 = vpop.permute.xlu0 %3140 }
 0x56f   :  { %9332 = vst [vmem:[#allocation51_spill] sm:$0xff] %v7747_v58  ;;  %9333 = vst [vmem:[#allocation48_spill] sm:$0xff] %v7749_v29  ;;  %v3593_v58 = vstv %s5093_s13  ;;  %s9362_s13 = smov 101  }
 0x570   :  { %3666 = vrot.lane.b32.xlu1 %v3660_v47, %s9334_s23  ;;  %3560 = vrot.lane.b32.xlu0 %v3552_v36, %s9320_s29  ;;  %v3595_v47 = vmul.f32 %v3593_v58, %v7128_v25  ;;  %v3594_v36 = vmul.f32 %v3593_v58, %v7141_v46  ;;  %s5104_s29 = sld [smem:[#allocation8 + $0x3c]] }
 0x572   :  { %v7755_v63 = vpop.permute.xlu1 %3182  ;;  %v7757_v20 = vpop.permute.xlu0 %3072 }
 0x573   :  { %9335 = vst [vmem:[#allocation50_spill] sm:$0xff] %v7755_v63  ;;  %9336 = vst [vmem:[#allocation52_spill] sm:$0xff] %v7757_v20  ;;  %v3703_v63 = vstv %s5098_s3  ;;  %s5103_s3 = sld [smem:[#allocation5 + $0x3c]] }
 0x574   :  { %3670 = vrot.lane.b32.xlu1 %v3662_v19, %s9334_s23  ;;  %3668 = vrot.lane.b32.xlu0 %v3661_v11, %s9334_s23  ;;  %v3704_v19 = vmul.f32 %v3703_v63, %v7141_v46  ;;  %v3596_v11 = vmul.f32 %v3593_v58, %v7060_v40 }
 0x576   :  { %v7763_v29 = vpop.permute.xlu1 %3118  ;;  %v7765_v13 = vpop.permute.xlu0 %3184 }
 0x577   :  { %9337 = vst [vmem:[#allocation53_spill] sm:$0xff] %v7763_v29  ;;  %9338 = vst [vmem:[#allocation55_spill] sm:$0xff] %v7765_v13 }
 0x578   :  { %3602 = vrot.lane.b32.xlu1 %v3595_v47, %s9327_s26  ;;  %3600 = vrot.lane.b32.xlu0 %v3594_v36, %s9327_s26  ;;  %v3706_v47 = vmul.f32 %v3703_v63, %v7060_v40  ;;  %v3705_v36 = vmul.f32 %v3703_v63, %v7128_v25 }
 0x57a   :  { %v7771_v24 = vpop.permute.xlu1 %3226  ;;  %v7773_v20 = vpop.permute.xlu0 %3116 }
 0x57b   :  { %9339 = vst [vmem:[#allocation57_spill] sm:$0xff] %v7771_v24  ;;  %9340 = vst [vmem:[#allocation54_spill] sm:$0xff] %v7773_v20  ;;  %v3637_v24 = vstv %s5095_s24  ;;  %s9369_s24 = smov 100  }
 0x57c   :  { %3710 = vrot.lane.b32.xlu1 %v3704_v19, %s9341_s22  ;;  %3604 = vrot.lane.b32.xlu0 %v3596_v11, %s9327_s26  ;;  %v3639_v19 = vmul.f32 %v3637_v24, %v7128_v25  ;;  %v3638_v11 = vmul.f32 %v3637_v24, %v7141_v46  ;;  %s5106_s26 = sld [smem:[#allocation8 + $0x3d]] }
 0x57e   :  { %v7779_v29 = vpop.permute.xlu1 %3162  ;;  %v7781_v13 = vpop.permute.xlu0 %3228 }
 0x57f   :  { %9342 = vst [vmem:[#allocation56_spill] sm:$0xff] %v7779_v29  ;;  %9343 = vst [vmem:[#allocation58_spill] sm:$0xff] %v7781_v13  ;;  %v3747_v29 = vstv %s5100_s17  ;;  %s5105_s17 = sld [smem:[#allocation5 + $0x3d]] }
 0x580   :  { %3714 = vrot.lane.b32.xlu1 %v3706_v47, %s9341_s22  ;;  %3712 = vrot.lane.b32.xlu0 %v3705_v36, %s9341_s22  ;;  %v3748_v47 = vmul.f32 %v3747_v29, %v7141_v46  ;;  %v3640_v36 = vmul.f32 %v3637_v24, %v7060_v40 }
 0x582   :  { %v7787_v20 = vpop.permute.xlu1 %3270  ;;  %v7789_v58 = vpop.permute.xlu0 %3160 }
 0x583   :  { %9344 = vst [vmem:[#allocation59_spill] sm:$0xff] %v7787_v20  ;;  %9345 = vst [vmem:[#allocation61_spill] sm:$0xff] %v7789_v58 }
 0x584   :  { %3646 = vrot.lane.b32.xlu1 %v3639_v19, %s9334_s23  ;;  %3644 = vrot.lane.b32.xlu0 %v3638_v11, %s9334_s23  ;;  %v3750_v19 = vmul.f32 %v3747_v29, %v7060_v40  ;;  %v3749_v11 = vmul.f32 %v3747_v29, %v7128_v25 }
 0x586   :  { %v7795_v63 = vpop.permute.xlu1 %3206  ;;  %v7797_v13 = vpop.permute.xlu0 %3272 }
 0x587   :  { %9346 = vst [vmem:[#allocation63_spill] sm:$0xff] %v7795_v63  ;;  %9347 = vst [vmem:[#allocation60_spill] sm:$0xff] %v7797_v13  ;;  %v3681_v63 = vstv %s5097_s25  ;;  %s9376_s25 = smov 99  }
 0x588   :  { %3754 = vrot.lane.b32.xlu1 %v3748_v47, %s9348_s30  ;;  %3648 = vrot.lane.b32.xlu0 %v3640_v36, %s9334_s23  ;;  %v3683_v47 = vmul.f32 %v3681_v63, %v7128_v25  ;;  %v3682_v36 = vmul.f32 %v3681_v63, %v7141_v46  ;;  %s5108_s23 = sld [smem:[#allocation8 + $0x3e]] }
 0x58a   :  { %v7803_v20 = vpop.permute.xlu1 %3314  ;;  %v7805_v58 = vpop.permute.xlu0 %3204 }
 0x58b   :  { %9349 = vst [vmem:[#allocation62_spill] sm:$0xff] %v7803_v20  ;;  %9350 = vst [vmem:[#allocation64_spill] sm:$0xff] %v7805_v58  ;;  %v3791_v20 = vstv %s5102_s28  ;;  %s5107_s28 = sld [smem:[#allocation5 + $0x3e]] }
 0x58c   :  { %3758 = vrot.lane.b32.xlu1 %v3750_v19, %s9348_s30  ;;  %3756 = vrot.lane.b32.xlu0 %v3749_v11, %s9348_s30  ;;  %v3792_v19 = vmul.f32 %v3791_v20, %v7141_v46  ;;  %v3684_v11 = vmul.f32 %v3681_v63, %v7060_v40 }
 0x58e   :  { %v7811_v13 = vpop.permute.xlu1 %3250  ;;  %v7813_v24 = vpop.permute.xlu0 %3316 }
 0x58f   :  { %9351 = vst [vmem:[#allocation65_spill] sm:$0xff] %v7811_v13  ;;  %9352 = vst [vmem:[#allocation67_spill] sm:$0xff] %v7813_v24 }
 0x590   :  { %3690 = vrot.lane.b32.xlu1 %v3683_v47, %s9341_s22  ;;  %3688 = vrot.lane.b32.xlu0 %v3682_v36, %s9341_s22  ;;  %v3794_v47 = vmul.f32 %v3791_v20, %v7060_v40  ;;  %v3793_v36 = vmul.f32 %v3791_v20, %v7128_v25 }
 0x592   :  { %v7819_v29 = vpop.permute.xlu1 %3358  ;;  %v7821_v58 = vpop.permute.xlu0 %3248 }
 0x593   :  { %9353 = vst [vmem:[#allocation69_spill] sm:$0xff] %v7819_v29  ;;  %9354 = vst [vmem:[#allocation66_spill] sm:$0xff] %v7821_v58  ;;  %v3725_v29 = vstv %s5099_s19  ;;  %s9383_s19 = smov 98  }
 0x594   :  { %3798 = vrot.lane.b32.xlu1 %v3792_v19, %s9355_s18  ;;  %3692 = vrot.lane.b32.xlu0 %v3684_v11, %s9341_s22  ;;  %v3727_v19 = vmul.f32 %v3725_v29, %v7128_v25  ;;  %v3726_v11 = vmul.f32 %v3725_v29, %v7141_v46  ;;  %s5110_s22 = sld [smem:[#allocation8 + $0x3f]] }
 0x596   :  { %v7827_v13 = vpop.permute.xlu1 %3294  ;;  %v7829_v24 = vpop.permute.xlu0 %3360 }
 0x597   :  { %9356 = vst [vmem:[#allocation68_spill] sm:$0xff] %v7827_v13  ;;  %9357 = vst [vmem:[#allocation70_spill] sm:$0xff] %v7829_v24  ;;  %v3835_v13 = vstv %s5104_s29  ;;  %s5109_s29 = sld [smem:[#allocation5 + $0x3f]] }
 0x598   :  { %3802 = vrot.lane.b32.xlu1 %v3794_v47, %s9355_s18  ;;  %3800 = vrot.lane.b32.xlu0 %v3793_v36, %s9355_s18  ;;  %v3836_v47 = vmul.f32 %v3835_v13, %v7141_v46  ;;  %v3728_v36 = vmul.f32 %v3725_v29, %v7060_v40 }
 0x59a   :  { %v7835_v58 = vpop.permute.xlu1 %3402  ;;  %v7837_v63 = vpop.permute.xlu0 %3292 }
 0x59b   :  { %9358 = vst [vmem:[#allocation71_spill] sm:$0xff] %v7835_v58  ;;  %9359 = vst [vmem:[#allocation73_spill] sm:$0xff] %v7837_v63 }
 0x59c   :  { %3734 = vrot.lane.b32.xlu1 %v3727_v19, %s9348_s30  ;;  %3732 = vrot.lane.b32.xlu0 %v3726_v11, %s9348_s30  ;;  %v3838_v19 = vmul.f32 %v3835_v13, %v7060_v40  ;;  %v3837_v11 = vmul.f32 %v3835_v13, %v7128_v25 }
 0x59e   :  { %v7843_v20 = vpop.permute.xlu1 %3406  ;;  %v7845_v24 = vpop.permute.xlu0 %3404 }
 0x59f   :  { %9360 = vst [vmem:[#allocation75_spill] sm:$0xff] %v7843_v20  ;;  %9361 = vst [vmem:[#allocation72_spill] sm:$0xff] %v7845_v24  ;;  %v3769_v20 = vstv %s5101_s7  ;;  %s9390_s7 = smov 97  }
 0x5a0   :  { %3842 = vrot.lane.b32.xlu1 %v3836_v47, %s9362_s13  ;;  %3736 = vrot.lane.b32.xlu0 %v3728_v36, %s9348_s30  ;;  %v3771_v47 = vmul.f32 %v3769_v20, %v7128_v25  ;;  %v3770_v36 = vmul.f32 %v3769_v20, %v7141_v46  ;;  %s5112_s30 = sld [smem:[#allocation8 + $0x40]] }
 0x5a2   :  { %v7851_v58 = vpop.permute.xlu1 %3338  ;;  %v7853_v63 = vpop.permute.xlu0 %3336 }
 0x5a3   :  { %9363 = vst [vmem:[#allocation74_spill] sm:$0xff] %v7851_v58  ;;  %9364 = vst [vmem:[#allocation76_spill] sm:$0xff] %v7853_v63  ;;  %v3879_v58 = vstv %s5106_s26  ;;  %s5111_s26 = sld [smem:[#allocation5 + $0x40]] }
 0x5a4   :  { %3846 = vrot.lane.b32.xlu1 %v3838_v19, %s9362_s13  ;;  %3844 = vrot.lane.b32.xlu0 %v3837_v11, %s9362_s13  ;;  %v3880_v19 = vmul.f32 %v3879_v58, %v7141_v46  ;;  %v3772_v11 = vmul.f32 %v3769_v20, %v7060_v40 }
 0x5a6   :  { %v7859_v24 = vpop.permute.xlu1 %3446  ;;  %v7861_v29 = vpop.permute.xlu0 %3340 }
 0x5a7   :  { %9365 = vst [vmem:[#allocation77_spill] sm:$0xff] %v7859_v24  ;;  %9366 = vst [vmem:[#allocation79_spill] sm:$0xff] %v7861_v29 }
 0x5a8   :  { %3778 = vrot.lane.b32.xlu1 %v3771_v47, %s9355_s18  ;;  %3776 = vrot.lane.b32.xlu0 %v3770_v36, %s9355_s18  ;;  %v7879_v47 = vld [vmem:[#allocation2 + $0x10] sm:$0xff] }
 0x5a9   :  { %v3882_v36 = vmul.f32 %v7879_v47, %v3879_v58 }
 0x5aa   :  { %v7867_v13 = vpop.permute.xlu1 %3450  ;;  %v7869_v63 = vpop.permute.xlu0 %3448 }
 0x5ab   :  { %9367 = vst [vmem:[#allocation81_spill] sm:$0xff] %v7867_v13  ;;  %9368 = vst [vmem:[#allocation78_spill] sm:$0xff] %v7869_v63  ;;  %v3881_v13 = vmul.f32 %v3879_v58, %v7128_v25  ;;  %v3813_v63 = vstv %s5103_s3  ;;  %s9397_s3 = smov 96  }
 0x5ac   :  { %3886 = vrot.lane.b32.xlu1 %v3880_v19, %s9369_s24  ;;  %3780 = vrot.lane.b32.xlu0 %v3772_v11, %s9355_s18  ;;  %v3815_v19 = vmul.f32 %v3813_v63, %v7128_v25  ;;  %v3814_v11 = vmul.f32 %v3813_v63, %v7141_v46  ;;  %s5114_s18 = sld [smem:[#allocation8 + $0x41]] }
 0x5ae   :  { %v7875_v24 = vpop.permute.xlu1 %3382  ;;  %v7877_v29 = vpop.permute.xlu0 %3380 }
 0x5af   :  { %9370 = vst [vmem:[#allocation80_spill] sm:$0xff] %v7875_v24  ;;  %9371 = vst [vmem:[#allocation82_spill] sm:$0xff] %v7877_v29  ;;  %v3923_v29 = vstv %s5108_s23  ;;  %s5050_s23 = sld [smem:[#allocation8 + $0x21]] }
 0x5b0   :  { %3890 = vrot.lane.b32.xlu1 %v3882_v36, %s9369_s24  ;;  %3888 = vrot.lane.b32.xlu0 %v3881_v13, %s9369_s24  ;;  %v3924_v13 = vmul.f32 %v3923_v29, %v7141_v46  ;;  %v3816_v36 = vmul.f32 %v7879_v47, %v3813_v63 }
 0x5b2   :  { %v7885_v40 = vpop.permute.xlu1 %3490  ;;  %v7887_v20 = vpop.permute.xlu0 %3384 }
 0x5b3   :  { %9372 = vst [vmem:[#allocation83_spill] sm:$0xff] %v7885_v40  ;;  %9373 = vst [vmem:[#allocation85_spill] sm:$0xff] %v7887_v20 }
 0x5b4   :  { %3822 = vrot.lane.b32.xlu1 %v3815_v19, %s9362_s13  ;;  %3820 = vrot.lane.b32.xlu0 %v3814_v11, %s9362_s13  ;;  %v3926_v19 = vmul.f32 %v7879_v47, %v3923_v29  ;;  %v3925_v11 = vmul.f32 %v3923_v29, %v7128_v25 }
 0x5b6   :  { %v7893_v58 = vpop.permute.xlu1 %3494  ;;  %v7895_v24 = vpop.permute.xlu0 %3492 }
 0x5b7   :  { %9374 = vst [vmem:[#allocation87_spill] sm:$0xff] %v7893_v58  ;;  %9375 = vst [vmem:[#allocation84_spill] sm:$0xff] %v7895_v24  ;;  %v3857_v58 = vstv %s5105_s17  ;;  %s5116_s17 = sld [smem:[#allocation10 + $0x12]] }
 0x5b8   :  { %3930 = vrot.lane.b32.xlu1 %v3924_v13, %s9376_s25  ;;  %3824 = vrot.lane.b32.xlu0 %v3816_v36, %s9362_s13  ;;  %v3859_v13 = vmul.f32 %v3857_v58, %v7128_v25  ;;  %v3858_v36 = vmul.f32 %v3857_v58, %v7141_v46  ;;  %s5113_s13 = sld [smem:[#allocation5 + $0x41]] }
 0x5ba   :  { %v7901_v40 = vpop.permute.xlu1 %3426  ;;  %v7903_v20 = vpop.permute.xlu0 %3424 }
 0x5bb   :  { %9377 = vst [vmem:[#allocation86_spill] sm:$0xff] %v7901_v40  ;;  %9378 = vst [vmem:[#allocation88_spill] sm:$0xff] %v7903_v20  ;;  %v3967_v40 = vstv %s5110_s22  ;;  %s5117_s22 = sld [smem:[#allocation10 + $0x13]] }
 0x5bc   :  { %3934 = vrot.lane.b32.xlu1 %v3926_v19, %s9376_s25  ;;  %3932 = vrot.lane.b32.xlu0 %v3925_v11, %s9376_s25  ;;  %v3968_v19 = vmul.f32 %v3967_v40, %v7141_v46  ;;  %v3860_v11 = vmul.f32 %v7879_v47, %v3857_v58 }
 0x5be   :  { %v7909_v24 = vpop.permute.xlu1 %3534  ;;  %v7911_v63 = vpop.permute.xlu0 %3428 }
 0x5bf   :  { %9379 = vst [vmem:[#allocation89_spill] sm:$0xff] %v7909_v24  ;;  %9380 = vst [vmem:[#allocation91_spill] sm:$0xff] %v7911_v63 }
 0x5c0   :  { %3866 = vrot.lane.b32.xlu1 %v3859_v13, %s9369_s24  ;;  %3864 = vrot.lane.b32.xlu0 %v3858_v36, %s9369_s24  ;;  %v3970_v13 = vmul.f32 %v7879_v47, %v3967_v40  ;;  %v3969_v36 = vmul.f32 %v3967_v40, %v7128_v25 }
 0x5c2   :  { %v7917_v29 = vpop.permute.xlu1 %3538  ;;  %v7919_v20 = vpop.permute.xlu0 %3536 }
 0x5c3   :  { %9381 = vst [vmem:[#allocation93_spill] sm:$0xff] %v7917_v29  ;;  %9382 = vst [vmem:[#allocation90_spill] sm:$0xff] %v7919_v20  ;;  %v3901_v29 = vstv %s5107_s28  ;;  %s5119_s28 = sld [smem:[#allocation10 + $0x15]] }
 0x5c4   :  { %3974 = vrot.lane.b32.xlu1 %v3968_v19, %s9383_s19  ;;  %3868 = vrot.lane.b32.xlu0 %v3860_v11, %s9369_s24  ;;  %v3903_v19 = vmul.f32 %v3901_v29, %v7128_v25  ;;  %v3902_v11 = vmul.f32 %v3901_v29, %v7141_v46  ;;  %s5049_s24 = sld [smem:[#allocation5 + $0x21]] }
 0x5c6   :  { %v7925_v24 = vpop.permute.xlu1 %3470  ;;  %v7927_v63 = vpop.permute.xlu0 %3468 }
 0x5c7   :  { %9384 = vst [vmem:[#allocation92_spill] sm:$0xff] %v7925_v24  ;;  %9385 = vst [vmem:[#allocation94_spill] sm:$0xff] %v7927_v63  ;;  %v4011_v24 = vstv %s5112_s30  ;;  %s5120_s30 = sld [smem:[#allocation10 + $0x16]] }
 0x5c8   :  { %3978 = vrot.lane.b32.xlu1 %v3970_v13, %s9383_s19  ;;  %3976 = vrot.lane.b32.xlu0 %v3969_v36, %s9383_s19  ;;  %v4012_v13 = vmul.f32 %v4011_v24, %v7141_v46  ;;  %v3904_v36 = vmul.f32 %v7879_v47, %v3901_v29 }
 0x5ca   :  { %v7933_v20 = vpop.permute.xlu1 %3578  ;;  %v7935_v58 = vpop.permute.xlu0 %3472 }
 0x5cb   :  { %9386 = vst [vmem:[#allocation95_spill] sm:$0xff] %v7933_v20  ;;  %9387 = vst [vmem:[#allocation97_spill] sm:$0xff] %v7935_v58 }
 0x5cc   :  { %3910 = vrot.lane.b32.xlu1 %v3903_v19, %s9376_s25  ;;  %3908 = vrot.lane.b32.xlu0 %v3902_v11, %s9376_s25  ;;  %v4014_v19 = vmul.f32 %v7879_v47, %v4011_v24  ;;  %v4013_v11 = vmul.f32 %v4011_v24, %v7128_v25 }
 0x5ce   :  { %v7941_v40 = vpop.permute.xlu1 %3582  ;;  %v7943_v63 = vpop.permute.xlu0 %3580 }
 0x5cf   :  { %9388 = vst [vmem:[#allocation99_spill] sm:$0xff] %v7941_v40  ;;  %9389 = vst [vmem:[#allocation96_spill] sm:$0xff] %v7943_v63  ;;  %v3945_v40 = vstv %s5109_s29  ;;  %s5129_s29 = sld [smem:[#allocation10 + $0x1f]] }
 0x5d0   :  { %4018 = vrot.lane.b32.xlu1 %v4012_v13, %s9390_s7  ;;  %3912 = vrot.lane.b32.xlu0 %v3904_v36, %s9376_s25  ;;  %v3947_v13 = vmul.f32 %v3945_v40, %v7128_v25  ;;  %v3946_v36 = vmul.f32 %v3945_v40, %v7141_v46  ;;  %s5118_s25 = sld [smem:[#allocation10 + $0x14]] }
 0x5d2   :  { %v7949_v20 = vpop.permute.xlu1 %3514  ;;  %v7951_v58 = vpop.permute.xlu0 %3512 }
 0x5d3   :  { %9391 = vst [vmem:[#allocation98_spill] sm:$0xff] %v7949_v20  ;;  %9392 = vst [vmem:[#allocation100_spill] sm:$0xff] %v7951_v58  ;;  %v4055_v20 = vstv %s5114_s18 }
 0x5d4   :  { %4022 = vrot.lane.b32.xlu1 %v4014_v19, %s9390_s7  ;;  %4020 = vrot.lane.b32.xlu0 %v4013_v11, %s9390_s7  ;;  %v4056_v19 = vmul.f32 %v4055_v20, %v7141_v46  ;;  %v3948_v11 = vmul.f32 %v7879_v47, %v3945_v40 }
 0x5d6   :  { %v7957_v63 = vpop.permute.xlu1 %3622  ;;  %v7959_v29 = vpop.permute.xlu0 %3516 }
 0x5d7   :  { %9393 = vst [vmem:[#allocation101_spill] sm:$0xff] %v7957_v63  ;;  %9394 = vst [vmem:[#allocation103_spill] sm:$0xff] %v7959_v29 }
 0x5d8   :  { %3954 = vrot.lane.b32.xlu1 %v3947_v13, %s9383_s19  ;;  %3952 = vrot.lane.b32.xlu0 %v3946_v36, %s9383_s19  ;;  %v4058_v13 = vmul.f32 %v7879_v47, %v4055_v20  ;;  %v4057_v36 = vmul.f32 %v4055_v20, %v7128_v25 }
 0x5da   :  { %v7965_v24 = vpop.permute.xlu1 %3626  ;;  %v7967_v58 = vpop.permute.xlu0 %3624 }
 0x5db   :  { %9395 = vst [vmem:[#allocation105_spill] sm:$0xff] %v7965_v24  ;;  %9396 = vst [vmem:[#allocation102_spill] sm:$0xff] %v7967_v58  ;;  %v3989_v24 = vstv %s5111_s26 }
 0x5dc   :  { %4062 = vrot.lane.b32.xlu1 %v4056_v19, %s9397_s3  ;;  %3956 = vrot.lane.b32.xlu0 %v3948_v11, %s9383_s19  ;;  %v3991_v19 = vmul.f32 %v3989_v24, %v7128_v25  ;;  %v3990_v11 = vmul.f32 %v3989_v24, %v7141_v46  ;;  %s5121_s19 = sld [smem:[#allocation10 + $0x17]] }
 0x5de   :  { %v7973_v63 = vpop.permute.xlu1 %3558  ;;  %v7975_v29 = vpop.permute.xlu0 %3556 }
 0x5df   :  { %9398 = vst [vmem:[#allocation104_spill] sm:$0xff] %v7973_v63  ;;  %9399 = vst [vmem:[#allocation106_spill] sm:$0xff] %v7975_v29  ;;  %v4033_v63 = vstv %s5113_s13 }
 0x5e0   :  { %4066 = vrot.lane.b32.xlu1 %v4058_v13, %s9397_s3  ;;  %4064 = vrot.lane.b32.xlu0 %v4057_v36, %s9397_s3  ;;  %v4034_v13 = vmul.f32 %v4033_v63, %v7141_v46  ;;  %v3992_v36 = vmul.f32 %v7879_v47, %v3989_v24 }
 0x5e2   :  { %v7981_v58 = vpop.permute.xlu1 %3666  ;;  %v7983_v40 = vpop.permute.xlu0 %3560 }
 0x5e3   :  { %9400 = vst [vmem:[#allocation107_spill] sm:$0xff] %v7981_v58  ;;  %9401 = vst [vmem:[#allocation109_spill] sm:$0xff] %v7983_v40 }
 0x5e4   :  { %3998 = vrot.lane.b32.xlu1 %v3991_v19, %s9390_s7  ;;  %3996 = vrot.lane.b32.xlu0 %v3990_v11, %s9390_s7  ;;  %v4036_v19 = vmul.f32 %v7879_v47, %v4033_v63  ;;  %v4035_v11 = vmul.f32 %v4033_v63, %v7128_v25 }
 0x5e6   :  { %v7989_v29 = vpop.permute.xlu1 %3670  ;;  %v7991_v20 = vpop.permute.xlu0 %3668 }
 0x5e7   :  { %9402 = vst [vmem:[#allocation111_spill] sm:$0xff] %v7989_v29  ;;  %9403 = vst [vmem:[#allocation108_spill] sm:$0xff] %v7991_v20 }
 0x5e8   :  { %4040 = vrot.lane.b32.xlu1 %v4034_v13, %s9397_s3  ;;  %4000 = vrot.lane.b32.xlu0 %v3992_v36, %s9390_s7 }
 0x5ea   :  { %v7997_v58 = vpop.permute.xlu1 %3602  ;;  %v7999_v40 = vpop.permute.xlu0 %3600 }
 0x5eb   :  { %9404 = vst [vmem:[#allocation110_spill] sm:$0xff] %v7997_v58  ;;  %9405 = vst [vmem:[#allocation112_spill] sm:$0xff] %v7999_v40  ;;  %v2664_v58 = vstv %s5050_s23 }
 0x5ec   :  { %4044 = vrot.lane.b32.xlu1 %v4036_v19, %s9397_s3  ;;  %4042 = vrot.lane.b32.xlu0 %v4035_v11, %s9397_s3  ;;  %v2667_v40 = vmul.f32 %v7879_v47, %v2664_v58 }
 0x5ee   :  { %v8005_v29 = vpop.permute.xlu1 %3710  ;;  %v8007_v24 = vpop.permute.xlu0 %3604  ;;  %v2711_v20 = vadd.f32 %v7463_v34, %v2667_v40 }
 0x5ef   :  { %9406 = vst [vmem:[#allocation113_spill] sm:$0xff] %v8005_v29  ;;  %9407 = vst [vmem:[#allocation115_spill] sm:$0xff] %v8007_v24 }
 0x5f0   :  { %v2755_v19 = vadd.f32 %v7473_v38, %v2711_v20 }
 0x5f2   :  { %v8009_v13 = vpop.permute.xlu1 %3714  ;;  %v8011_v36 = vpop.permute.xlu0 %3712  ;;  %v2799_v11 = vadd.f32 %v7483_v31, %v2755_v19 }
 0x5f3   :  { %9408 = vst [vmem:[#allocation114_spill] sm:$0xff] %v8009_v13  ;;  %9409 = vst [vmem:[#allocation116_spill] sm:$0xff] %v8011_v36  ;;  %v2659_v36 = vstv %s5049_s24 }
 0x5f4   :  { %v2843_v13 = vadd.f32 %v7491_v45, %v2799_v11  ;;  %v2662_v49 = vmul.f32 %v7879_v47, %v2659_v36 }
 0x5f6   :  { %v8015_v63 = vpop.permute.xlu1 %3646  ;;  %v8017_v5 = vpop.permute.xlu0 %3644  ;;  %v2887_v56 = vadd.f32 %v7499_v57, %v2843_v13 }
 0x5f7   :  { %9410 = vst [vmem:[#allocation18_spill] sm:$0xff] %v8015_v63  ;;  %9411 = vst [vmem:[#allocation19_spill] sm:$0xff] %v8017_v5  ;;  %v2689_v5 = vadd.f32 %v7465_v16, %v2662_v49 }
 0x5f8   :  { %v2931_v20 = vadd.f32 %v7509_v23, %v2887_v56 }
 0x5f9   :  { %v2733_v19 = vadd.f32 %v7475_v8, %v2689_v5 }
 0x5fa   :  { %v8021_v29 = vpop.permute.xlu1 %3754  ;;  %v8023_v24 = vpop.permute.xlu0 %3648  ;;  %v2975_v47 = vadd.f32 %v7507_v54, %v2931_v20 }
 0x5fb   :  { %9412 = vst [vmem:[#allocation20_spill] sm:$0xff] %v8021_v29  ;;  %9413 = vst [vmem:[#allocation27_spill] sm:$0xff] %v8023_v24  ;;  %v2777_v11 = vadd.f32 %v7485_v37, %v2733_v19 }
 0x5fc   :  { %v3019_v56 = vadd.f32 %v7515_v35, %v2975_v47 }
 0x5fd   :  { %v2821_v13 = vadd.f32 %v7493_v51, %v2777_v11 }
 0x5fe   :  { %v8028_v40 = vpop.permute.xlu1 %3758  ;;  %v8030_v63 = vpop.permute.xlu0 %3756 }
 0x5ff   :  { %9414 = vst [vmem:[#allocation24_spill] sm:$0xff] %v8028_v40  ;;  %9415 = vst [vmem:[#allocation22_spill] sm:$0xff] %v8030_v63  ;;  %v2865_v49 = vadd.f32 %v7501_v28, %v2821_v13 }
 0x601   :  { %v2909_v5 = vadd.f32 %v7517_v17, %v2865_v49 }
 0x602   :  { %v8035_v29 = vpop.permute.xlu1 %3690  ;;  %v8037_v24 = vpop.permute.xlu0 %3688 }
 0x603   :  { %9416 = vst [vmem:[#allocation23_spill] sm:$0xff] %v8035_v29  ;;  %9417 = vst [vmem:[#allocation117_spill] sm:$0xff] %v8037_v24  ;;  %v3063_v29 = vadd.f32 %v7523_v32, %v3019_v56  ;;  %v2953_v20 = vadd.f32 %v7525_v59, %v2909_v5  ;;  %v2705_v56 = vsel %vm136_vm0, %v7605_v9, %v7463_v34 }
 0x604   :  { %v2665_v34 = vmul.f32 %v2664_v58, %v7141_v46 }
 0x605   :  { %v3107_v19 = vadd.f32 %v7531_v26, %v3063_v29  ;;  %v2997_v11 = vadd.f32 %v7533_v10, %v2953_v20  ;;  %v2666_v20 = vmul.f32 %v2664_v58, %v7128_v25 }
 0x606   :  { %v8042_v44 = vpop.permute.xlu1 %3798  ;;  %v8044_v40 = vpop.permute.xlu0 %3692 }
 0x607   :  { %9418 = vst [vmem:[#allocation118_spill] sm:$0xff] %v8042_v44  ;;  %9419 = vst [vmem:[#allocation119_spill] sm:$0xff] %v8044_v40  ;;  %v3151_v44 = vadd.f32 %v7539_v0, %v3107_v19  ;;  %v3041_v47 = vadd.f32 %v7541_v21, %v2997_v11  ;;  %v2704_v19 = vsel %vm136_vm0, %v7595_v18, %v7605_v9 }
 0x608   :  { %v2660_v11 = vmul.f32 %v2659_v36, %v7141_v46  ;;  %v2748_v18 = vsel %vm181_vm1, %v7611_v6, %v7621_v30  ;;  %v2682_v46 = vsel %vm136_vm0, %v7597_v48, %v7587_v41  ;;  %v2709_v9 = vadd.f32 %v2704_v19, %v2665_v34 }
 0x609   :  { %v3195_v49 = vadd.f32 %v7547_v60, %v3151_v44  ;;  %v3085_v5 = vadd.f32 %v7549_v27, %v3041_v47  ;;  %v2661_v44 = vmul.f32 %v2659_v36, %v7128_v25  ;;  %v2749_v47 = vsel %vm181_vm1, %v7621_v30, %v7473_v38 }
 0x60a   :  { %v8050_v63 = vpop.permute.xlu1 %3802  ;;  %v8052_v24 = vpop.permute.xlu0 %3800  ;;  %v2683_v25 = vsel %vm136_vm0, %v7587_v41, %v7465_v16  ;;  %v2793_v38 = vsel %vm226_vm2, %v7637_v15, %v7483_v31  ;;  %v2792_v6 = vsel %vm226_vm2, %v7627_v22, %v7637_v15  ;;  %v2727_v41 = vsel %vm181_vm1, %v7603_v43, %v7475_v8 }
 0x60b   :  { %9420 = vst [vmem:[#allocation120_spill] sm:$0xff] %v8050_v63  ;;  %9421 = vst [vmem:[#allocation121_spill] sm:$0xff] %v8052_v24  ;;  %v3239_v29 = vadd.f32 %v7555_v52, %v3195_v49  ;;  %v3129_v49 = vadd.f32 %v7557_v42, %v3085_v5  ;;  %v2710_v24 = vadd.f32 %v2705_v56, %v2666_v20 }
 0x60c   :  { %v2726_v31 = vsel %vm181_vm1, %v7613_v1, %v7603_v43  ;;  %v2753_v48 = vadd.f32 %v2748_v18, %v2709_v9  ;;  %v2687_v5 = vadd.f32 %v2682_v46, %v2660_v11  ;;  %v2836_v15 = vsel %vm271_vm3, %v7643_v4, %v7653_v55  ;;  %v9427_v9 = vld [vmem:[#allocation25_spill] sm:$0xff] }
 0x60d   :  { %v3283_v63 = vadd.f32 %v7563_v7, %v3239_v29  ;;  %v3173_v58 = vadd.f32 %v7565_v33, %v3129_v49  ;;  %v2754_v56 = vadd.f32 %v2749_v47, %v2710_v24  ;;  %v2837_v24 = vsel %vm271_vm3, %v7653_v55, %v7491_v45  ;;  %v9425_v49 = vld [vmem:[#allocation26_spill] sm:$0xff] }
 0x60e   :  { %v8058_v40 = vpop.permute.xlu1 %3734  ;;  %v8060_v13 = vpop.permute.xlu0 %3732  ;;  %v2771_v8 = vsel %vm226_vm2, %v7619_v53, %v7485_v37  ;;  %v2770_v43 = vsel %vm226_vm2, %v7629_v50, %v7619_v53  ;;  %v2797_v1 = vadd.f32 %v2792_v6, %v2753_v48  ;;  %v2881_v45 = vsel %vm316_vm4, %v7669_v2, %v7499_v57  ;;  %v9429_v6 = vld [vmem:[#allocation29_spill] sm:$0xff] }
 0x60f   :  { %9422 = vst [vmem:[#allocation122_spill] sm:$0xff] %v8058_v40  ;;  %9423 = vst [vmem:[#allocation123_spill] sm:$0xff] %v8060_v13  ;;  %v3327_v36 = vadd.f32 %v7571_v14, %v3283_v63  ;;  %v2688_v63 = vadd.f32 %v2683_v25, %v2661_v44  ;;  %v2798_v22 = vadd.f32 %v2793_v38, %v2754_v56  ;;  %v9426_v25 = vld [vmem:[#allocation31_spill] sm:$0xff] }
 0x610   :  { %v2731_v20 = vadd.f32 %v2726_v31, %v2687_v5  ;;  %v2880_v4 = vsel %vm316_vm4, %v7659_v39, %v7669_v2  ;;  %v3217_v37 = vadd.f32 %v7573_v61, %v3173_v58  ;;  %v2815_v53 = vsel %vm271_vm3, %v7635_v3, %v7493_v51  ;;  %v9424_v39 = vld [vmem:[#allocation33_spill] sm:$0xff]  ;;  %v9428_v51 = vld [vmem:[#allocation30_spill] sm:$0xff] }
 0x611   :  { %v2732_v29 = vadd.f32 %v2727_v41, %v2688_v63  ;;  %v2842_v19 = vadd.f32 %v2837_v24, %v2798_v22  ;;  %v2814_v57 = vsel %vm271_vm3, %v7645_v12, %v7635_v3  ;;  %v2841_v50 = vadd.f32 %v2836_v15, %v2797_v1  ;;  %v9430_v41 = vld [vmem:[#allocation32_spill] sm:$0xff]  ;;  %v9431_v22 = vld [vmem:[#allocation34_spill] sm:$0xff]  ;;  %v9432_v15 = vld [vmem:[#allocation37_spill] sm:$0xff] }
 0x612   :  { %v8073_v40 = vpop.permute.xlu1 %3842  ;;  %v8075_v13 = vpop.permute.xlu0 %3736  ;;  %v2775_v34 = vadd.f32 %v2770_v43, %v2731_v20  ;;  %v2924_v2 = vsel %vm361_vm5, %v9424_v39, %v7667_v62  ;;  %v8145_v18 = vadd.f32 %v9425_v49, %v3327_v36  ;;  %v8148_v46 = vadd.f32 %v9426_v25, %v3217_v37 }
 0x613   :  { %v2776_v11 = vadd.f32 %v2771_v8, %v2732_v29  ;;  %v2886_v47 = vadd.f32 %v2881_v45, %v2842_v19  ;;  %v2858_v38 = vsel %vm316_vm4, %v9428_v51, %v9427_v9  ;;  %v2885_v58 = vadd.f32 %v2880_v4, %v2841_v50  ;;  %v9433_v45 = vld [vmem:[#allocation36_spill] sm:$0xff]  ;;  %v9434_v29 = vld [vmem:[#allocation35_spill] sm:$0xff]  ;;  %v9443_v51 = vld [vmem:[#allocation41_spill] sm:$0xff] }
 0x614   :  { %v2819_v12 = vadd.f32 %v2814_v57, %v2775_v34  ;;  %v2859_v56 = vsel %vm316_vm4, %v9427_v9, %v7501_v28  ;;  %v2968_v31 = vsel %vm406_vm6, %v9430_v41, %v9429_v6  ;;  %v2925_v24 = vsel %vm361_vm5, %v7667_v62, %v7509_v23  ;;  %v9437_v19 = vld [vmem:[#allocation39_spill] sm:$0xff]  ;;  %v9438_v4 = vld [vmem:[#allocation40_spill] sm:$0xff] }
 0x615   :  { %v2820_v3 = vadd.f32 %v2815_v53, %v2776_v11  ;;  %v2929_v63 = vadd.f32 %v2924_v2, %v2885_v58  ;;  %v2969_v5 = vsel %vm406_vm6, %v9429_v6, %v7507_v54  ;;  %v2902_v28 = vsel %vm361_vm5, %v9432_v15, %v9431_v22  ;;  %v9439_v50 = vld [vmem:[#allocation43_spill] sm:$0xff]  ;;  %v9440_v11 = vld [vmem:[#allocation38_spill] sm:$0xff]  ;;  %v9448_v6 = vld [vmem:[#allocation45_spill] sm:$0xff] }
 0x616   :  { %v8102_v30 = vpop.permute.xlu1 %3846  ;;  %v8104_v16 = vpop.permute.xlu0 %3844  ;;  %v2863_v8 = vadd.f32 %v2858_v38, %v2819_v12  ;;  %v2903_v43 = vsel %vm361_vm5, %v9431_v22, %v7517_v17  ;;  %v2930_v1 = vadd.f32 %v2925_v24, %v2886_v47  ;;  %v3012_v20 = vsel %vm9435_vm15, %v9434_v29, %v9433_v45  ;;  %v9444_v38 = vld [vmem:[#allocation42_spill] sm:$0xff]  ;;  %vm9453_vm15 = vmmov %vm9441_vm10 }
 0x617   :  { %v2864_v23 = vadd.f32 %v2859_v56, %v2820_v3  ;;  %v2973_v62 = vadd.f32 %v2968_v31, %v2929_v63  ;;  %v3013_v54 = vsel %vm9436_vm14, %v9433_v45, %v7515_v35  ;;  %v2946_v37 = vsel %vm406_vm6, %v9438_v4, %v9437_v19  ;;  %v9447_v56 = vld [vmem:[#allocation46_spill] sm:$0xff]  ;;  %v9451_v63 = vld [vmem:[#allocation44_spill] sm:$0xff]  ;;  %vm9454_vm14 = vmmov %vm9441_vm10 }
 0x618   :  { %v2974_v53 = vadd.f32 %v2969_v5, %v2930_v1  ;;  %v2907_v57 = vadd.f32 %v2902_v28, %v2863_v8  ;;  %v2947_v17 = vsel %vm406_vm6, %v9437_v19, %v7525_v59  ;;  %v3056_v34 = vsel %vm9441_vm10, %v9440_v11, %v9439_v50  ;;  %v9452_v5 = vld [vmem:[#allocation49_spill] sm:$0xff]  ;;  %v9455_v8 = vld [vmem:[#allocation48_spill] sm:$0xff] }
 0x619   :  { %v2908_v2 = vadd.f32 %v2903_v43, %v2864_v23  ;;  %v3017_v35 = vadd.f32 %v3012_v20, %v2973_v62  ;;  %v3057_v9 = vsel %vm9442_vm13, %v9439_v50, %v7523_v32  ;;  %v2990_v58 = vsel %vm9445_vm7, %v9444_v38, %v9443_v51  ;;  %v9456_v43 = vld [vmem:[#allocation47_spill] sm:$0xff]  ;;  %vm9461_vm7 = vmmov %vm9449_vm11  ;;  %v9471_v38 = vld [vmem:[#allocation58_spill] sm:$0xff] }
 0x61a   :  { %v8130_v55 = vpop.permute.xlu1 %3778  ;;  %v8132_v44 = vpop.permute.xlu0 %3776  ;;  %v3018_v3 = vadd.f32 %v3013_v54, %v2974_v53  ;;  %v2951_v59 = vadd.f32 %v2946_v37, %v2907_v57  ;;  %v2991_v12 = vsel %vm9446_vm9, %v9443_v51, %v7533_v10  ;;  %v3100_v41 = vsel %vm9449_vm11, %v9448_v6, %v9447_v56  ;;  %v9459_v62 = vld [vmem:[#allocation51_spill] sm:$0xff]  ;;  %v9460_v54 = vld [vmem:[#allocation52_spill] sm:$0xff]  ;;  %vm9462_vm9 = vmmov %vm9461_vm7 }
 0x61b   :  { %v2952_v31 = vadd.f32 %v2947_v17, %v2908_v2  ;;  %v3061_v24 = vadd.f32 %v3056_v34, %v3017_v35  ;;  %v3101_v32 = vsel %vm9450_vm12, %v9447_v56, %v7531_v26  ;;  %v3034_v22 = vsel %vm9453_vm15, %v9452_v5, %v9451_v63  ;;  %v9463_v53 = vld [vmem:[#allocation55_spill] sm:$0xff]  ;;  %v9464_v57 = vld [vmem:[#allocation50_spill] sm:$0xff]  ;;  %v9467_v34 = vld [vmem:[#allocation53_spill] sm:$0xff] }
 0x61c   :  { %v3062_v15 = vadd.f32 %v3057_v9, %v3018_v3  ;;  %v2995_v28 = vadd.f32 %v2990_v58, %v2951_v59  ;;  %v3035_v10 = vsel %vm9454_vm14, %v9451_v63, %v7541_v21  ;;  %vm9457_vm10 = vcmask 957440   ;;  %v9468_v2 = vld [vmem:[#allocation54_spill] sm:$0xff]  ;;  %v9472_v58 = vld [vmem:[#allocation57_spill] sm:$0xff]  ;;  %v9479_v5 = vld [vmem:[#allocation60_spill] sm:$0xff] }
 0x61d   :  { %v3144_v1 = vsel %vm9457_vm10, %v9456_v43, %v9455_v8  ;;  %v2996_v20 = vadd.f32 %v2991_v12, %v2952_v31  ;;  %v3105_v26 = vadd.f32 %v3100_v41, %v3061_v24  ;;  %vm9458_vm13 = vmmov %vm9457_vm10  ;;  %v3078_v19 = vsel %vm9461_vm7, %v9460_v54, %v9459_v62  ;;  %v9475_v41 = vld [vmem:[#allocation56_spill] sm:$0xff]  ;;  %v9476_v31 = vld [vmem:[#allocation61_spill] sm:$0xff] }
 0x61e   :  { %v8159_v36 = vpop.permute.xlu1 %3886  ;;  %v8161_v48 = vpop.permute.xlu0 %3780  ;;  %v3145_v23 = vsel %vm9458_vm13, %v9455_v8, %v7539_v0  ;;  %v3106_v4 = vadd.f32 %v3101_v32, %v3062_v15  ;;  %v3039_v21 = vadd.f32 %v3034_v22, %v2995_v28  ;;  %v3079_v37 = vsel %vm9462_vm9, %v9459_v62, %v7549_v27  ;;  %vm9469_vm15 = vmmov %vm9457_vm10  ;;  %v9480_v22 = vld [vmem:[#allocation59_spill] sm:$0xff]  ;;  %v9484_v43 = vld [vmem:[#allocation64_spill] sm:$0xff] }
 0x61f   :  { %vm9465_vm11 = vcmask 949248   ;;  %v3040_v50 = vadd.f32 %v3035_v10, %v2996_v20  ;;  %v3149_v11 = vadd.f32 %v3144_v1, %v3105_v26  ;;  %v3122_v35 = vsel %vm9469_vm15, %v9468_v2, %v9467_v34  ;;  %vm9470_vm14 = vmmov %vm9457_vm10  ;;  %v9483_v8 = vld [vmem:[#allocation63_spill] sm:$0xff]  ;;  %v9488_v62 = vld [vmem:[#allocation62_spill] sm:$0xff] }
 0x620   :  { %v3188_v17 = vsel %vm9465_vm11, %v9464_v57, %v9463_v53  ;;  %vm9466_vm12 = vmmov %vm9465_vm11  ;;  %v3150_v9 = vadd.f32 %v3145_v23, %v3106_v4  ;;  %v3083_v51 = vadd.f32 %v3078_v19, %v3039_v21  ;;  %v3123_v27 = vsel %vm9470_vm14, %v9467_v34, %v7557_v42  ;;  %v9487_v23 = vld [vmem:[#allocation67_spill] sm:$0xff]  ;;  %v9492_v57 = vld [vmem:[#allocation66_spill] sm:$0xff] }
 0x621   :  { %v3189_v0 = vsel %vm9466_vm12, %v9463_v53, %v7547_v60  ;;  %vm9473_vm10 = vcmask 941056   ;;  %v3084_v56 = vadd.f32 %v3079_v37, %v3040_v50  ;;  %v3193_v60 = vadd.f32 %v3188_v17, %v3149_v11  ;;  %vm9477_vm7 = vmmov %vm9465_vm11  ;;  %v9491_v53 = vld [vmem:[#allocation65_spill] sm:$0xff] }
 0x622   :  { %v8190_v47 = vpop.permute.xlu1 %3890  ;;  %v8192_v39 = vpop.permute.xlu0 %3888  ;;  %v3232_v3 = vsel %vm9473_vm10, %v9472_v58, %v9471_v38  ;;  %vm9474_vm13 = vmmov %vm9473_vm10  ;;  %v3166_v24 = vsel %vm9477_vm7, %v9476_v31, %v9475_v41  ;;  %v3194_v32 = vadd.f32 %v3189_v0, %v3150_v9  ;;  %v3127_v42 = vadd.f32 %v3122_v35, %v3083_v51  ;;  %v9495_v0 = vld [vmem:[#allocation70_spill] sm:$0xff]  ;;  %v9496_v34 = vld [vmem:[#allocation69_spill] sm:$0xff] }
 0x623   :  { %v3233_v6 = vsel %vm9474_vm13, %v9471_v38, %v7555_v52  ;;  %vm9478_vm9 = vmmov %vm9477_vm7  ;;  %vm9481_vm11 = vcmask 932864   ;;  %v3128_v28 = vadd.f32 %v3123_v27, %v3084_v56  ;;  %v3237_v10 = vadd.f32 %v3232_v3, %v3193_v60  ;;  %v9499_v51 = vld [vmem:[#allocation68_spill] sm:$0xff]  ;;  %v9500_v27 = vld [vmem:[#allocation73_spill] sm:$0xff] }
 0x624   :  { %v3167_v63 = vsel %vm9478_vm9, %v9475_v41, %v7565_v33  ;;  %v3276_v15 = vsel %vm9481_vm11, %v9480_v22, %v9479_v5  ;;  %vm9482_vm12 = vmmov %vm9481_vm11  ;;  %v3238_v20 = vadd.f32 %v3233_v6, %v3194_v32  ;;  %v3171_v26 = vadd.f32 %v3166_v24, %v3127_v42  ;;  %v9502_v56 = vld [vmem:[#allocation28_spill] sm:$0xff]  ;;  %v9505_v6 = vld [vmem:[#allocation71_spill] sm:$0xff] }
 0x625   :  { %v3277_v52 = vsel %vm9482_vm12, %v9479_v5, %v7563_v7  ;;  %vm9485_vm15 = vmmov %vm9473_vm10  ;;  %v3172_v21 = vadd.f32 %v3167_v63, %v3128_v28  ;;  %v3281_v7 = vadd.f32 %v3276_v15, %v3237_v10  ;;  %v9504_v60 = vld [vmem:[#allocation72_spill] sm:$0xff]  ;;  %v9507_v42 = vld [vmem:[#allocation75_spill] sm:$0xff]  ;;  %v3305_v28 = vadd.f32 %v9502_v56, %v8148_v46 }
 0x626   :  { %v8218_v45 = vpop.permute.xlu1 %3822  ;;  %v8220_v29 = vpop.permute.xlu0 %3820  ;;  %v3210_v1 = vsel %vm9485_vm15, %v9484_v43, %v9483_v8  ;;  %vm9486_vm14 = vmmov %vm9473_vm10  ;;  %vm9489_vm10 = vcmask 924672   ;;  %v3282_v50 = vadd.f32 %v3277_v52, %v3238_v20  ;;  %v9509_v5 = vld [vmem:[#allocation74_spill] sm:$0xff]  ;;  %v9510_v22 = vld [vmem:[#allocation76_spill] sm:$0xff]  ;;  %v3415_v20 = vadd.f32 %v9507_v42, %v8145_v18 }
 0x627   :  { %v3211_v33 = vsel %vm9486_vm14, %v9483_v8, %v7573_v61  ;;  %v3320_v54 = vsel %vm9489_vm10, %v9488_v62, %v9487_v23  ;;  %vm9490_vm13 = vmmov %vm9489_vm10  ;;  %v3215_v61 = vadd.f32 %v3210_v1, %v3171_v26  ;;  %v9512_v8 = vld [vmem:[#allocation79_spill] sm:$0xff] }
 0x628   :  { %v3321_v37 = vsel %vm9490_vm13, %v9487_v23, %v7571_v14  ;;  %vm9493_vm7 = vmmov %vm9481_vm11  ;;  %vm9497_vm11 = vcmask 916480   ;;  %v3216_v35 = vadd.f32 %v3211_v33, %v3172_v21  ;;  %v3325_v9 = vadd.f32 %v3320_v54, %v3281_v7  ;;  %v9514_v33 = vld [vmem:[#allocation78_spill] sm:$0xff]  ;;  %v9515_v23 = vld [vmem:[#allocation77_spill] sm:$0xff] }
 0x629   :  { %v3254_v17 = vsel %vm9493_vm7, %v9492_v57, %v9491_v53  ;;  %vm9494_vm9 = vmmov %vm9493_vm7  ;;  %v3364_v2 = vsel %vm9497_vm11, %v9496_v34, %v9495_v0  ;;  %v3326_v58 = vadd.f32 %v3321_v37, %v3282_v50  ;;  %v9517_v7 = vld [vmem:[#allocation81_spill] sm:$0xff]  ;;  %v9519_v37 = vld [vmem:[#allocation80_spill] sm:$0xff] }
 0x62a   :  { %v8246_v59 = vpop.permute.xlu1 %3930  ;;  %v8248_v12 = vpop.permute.xlu0 %3824  ;;  %v3255_v11 = vsel %vm9494_vm9, %v9491_v53, %v9426_v25  ;;  %vm9498_vm12 = vmmov %vm9497_vm11  ;;  %v3259_v3 = vadd.f32 %v3254_v17, %v3215_v61  ;;  %v9520_v53 = vld [vmem:[#allocation82_spill] sm:$0xff]  ;;  %v3349_v61 = vadd.f32 %v9512_v8, %v3305_v28  ;;  %v9524_v34 = vld [vmem:[#allocation84_spill] sm:$0xff] }
 0x62b   :  { %v3365_v14 = vsel %vm9498_vm12, %v9495_v0, %v9425_v49  ;;  %vm9501_vm15 = vmmov %vm9489_vm10  ;;  %v3260_v32 = vadd.f32 %v3255_v11, %v3216_v35  ;;  %v3369_v49 = vadd.f32 %v3364_v2, %v3325_v9  ;;  %v9522_v11 = vld [vmem:[#allocation85_spill] sm:$0xff]  ;;  %v9525_v2 = vld [vmem:[#allocation83_spill] sm:$0xff]  ;;  %v3459_v9 = vadd.f32 %v9517_v7, %v3415_v20 }
 0x62c   :  { %v3298_v38 = vsel %vm9501_vm15, %v9500_v27, %v9499_v51  ;;  %vm9503_vm14 = vmmov %vm9489_vm10  ;;  %vm9506_vm10 = vcmask 908288   ;;  %v3370_v10 = vadd.f32 %v3365_v14, %v3326_v58  ;;  %v9530_v58 = vld [vmem:[#allocation88_spill] sm:$0xff]  ;;  %v9540_v20 = vld [vmem:[#allocation94_spill] sm:$0xff] }
 0x62d   :  { %v3299_v25 = vsel %vm9503_vm14, %v9499_v51, %v9502_v56  ;;  %v3408_v41 = vsel %vm9506_vm10, %v9505_v6, %v9504_v60  ;;  %vm9508_vm13 = vmmov %vm9506_vm10  ;;  %v3303_v52 = vadd.f32 %v3298_v38, %v3259_v3  ;;  %v9527_v51 = vld [vmem:[#allocation87_spill] sm:$0xff]  ;;  %v9529_v38 = vld [vmem:[#allocation86_spill] sm:$0xff] }
 0x62e   :  { %v8274_v19 = vpop.permute.xlu1 %3934  ;;  %v8276_v4 = vpop.permute.xlu0 %3932  ;;  %v3409_v63 = vsel %vm9508_vm13, %v9504_v60, %v9507_v42  ;;  %vm9511_vm7 = vmmov %vm9497_vm11  ;;  %v3304_v1 = vadd.f32 %v3299_v25, %v3260_v32  ;;  %v3413_v26 = vadd.f32 %v3408_v41, %v3369_v49  ;;  %vm9516_vm11 = vcmask 900096   ;;  %v9532_v6 = vld [vmem:[#allocation91_spill] sm:$0xff] }
 0x62f   :  { %v3342_v15 = vsel %vm9511_vm7, %v9510_v22, %v9509_v5  ;;  %vm9513_vm9 = vmmov %vm9511_vm7  ;;  %v3452_v62 = vsel %vm9516_vm11, %v9515_v23, %v9514_v33  ;;  %v3414_v54 = vadd.f32 %v3409_v63, %v3370_v10  ;;  %v3393_v60 = vadd.f32 %v9522_v11, %v3349_v61  ;;  %v9534_v63 = vld [vmem:[#allocation90_spill] sm:$0xff] }
 0x630   :  { %v3343_v43 = vsel %vm9513_vm9, %v9509_v5, %v9512_v8  ;;  %v3347_v21 = vadd.f32 %v3342_v15, %v3303_v52  ;;  %vm9518_vm12 = vmmov %vm9516_vm11  ;;  %v3457_v14 = vadd.f32 %v3452_v62, %v3413_v26  ;;  %v3503_v49 = vadd.f32 %v9527_v51, %v3459_v9  ;;  %v9535_v5 = vld [vmem:[#allocation89_spill] sm:$0xff]  ;;  %v9549_v61 = vld [vmem:[#allocation98_spill] sm:$0xff] }
 0x631   :  { %v3453_v46 = vsel %vm9518_vm12, %v9514_v33, %v9517_v7  ;;  %vm9521_vm15 = vmmov %vm9506_vm10  ;;  %v3348_v18 = vadd.f32 %v3343_v43, %v3304_v1  ;;  %v9537_v8 = vld [vmem:[#allocation93_spill] sm:$0xff]  ;;  %v9539_v1 = vld [vmem:[#allocation92_spill] sm:$0xff]  ;;  %v3437_v23 = vadd.f32 %v9532_v6, %v3393_v60 }
 0x632   :  { %v8302_v31 = vpop.permute.xlu1 %3866  ;;  %v8304_v24 = vpop.permute.xlu0 %3864  ;;  %v3386_v57 = vsel %vm9521_vm15, %v9520_v53, %v9519_v37  ;;  %vm9523_vm14 = vmmov %vm9506_vm10  ;;  %vm9526_vm10 = vcmask 891904   ;;  %v3458_v56 = vadd.f32 %v3453_v46, %v3414_v54  ;;  %v3547_v62 = vadd.f32 %v9537_v8, %v3503_v49  ;;  %v9542_v54 = vld [vmem:[#allocation97_spill] sm:$0xff]  ;;  %v9544_v46 = vld [vmem:[#allocation96_spill] sm:$0xff] }
 0x633   :  { %v3387_v0 = vsel %vm9523_vm14, %v9519_v37, %v9522_v11  ;;  %v3496_v35 = vsel %vm9526_vm10, %v9525_v2, %v9524_v34  ;;  %vm9528_vm13 = vmmov %vm9526_vm10  ;;  %v3391_v25 = vadd.f32 %v3386_v57, %v3347_v21  ;;  %v9545_v37 = vld [vmem:[#allocation95_spill] sm:$0xff]  ;;  %v9550_v11 = vld [vmem:[#allocation100_spill] sm:$0xff] }
 0x634   :  { %v3497_v27 = vsel %vm9528_vm13, %v9524_v34, %v9527_v51  ;;  %vm9531_vm7 = vmmov %vm9516_vm11  ;;  %v3392_v32 = vadd.f32 %v3387_v0, %v3348_v18  ;;  %v3501_v42 = vadd.f32 %v3496_v35, %v3457_v14  ;;  %vm9536_vm11 = vcmask 883712   ;;  %v9547_v57 = vld [vmem:[#allocation99_spill] sm:$0xff]  ;;  %v9557_v60 = vld [vmem:[#allocation105_spill] sm:$0xff] }
 0x635   :  { %v3430_v3 = vsel %vm9531_vm7, %v9530_v58, %v9529_v38  ;;  %vm9533_vm9 = vmmov %vm9531_vm7  ;;  %v3540_v22 = vsel %vm9536_vm11, %v9535_v5, %v9534_v63  ;;  %v3502_v10 = vadd.f32 %v3497_v27, %v3458_v56  ;;  %v3481_v35 = vadd.f32 %v9542_v54, %v3437_v23  ;;  %v9552_v9 = vld [vmem:[#allocation103_spill] sm:$0xff]  ;;  %v9555_v56 = vld [vmem:[#allocation101_spill] sm:$0xff] }
 0x636   :  { %v8328_v17 = vpop.permute.xlu1 %3974  ;;  %v8330_v50 = vpop.permute.xlu0 %3868  ;;  %v3431_v41 = vsel %vm9533_vm9, %v9529_v38, %v9532_v6  ;;  %v3435_v52 = vadd.f32 %v3430_v3, %v3391_v25  ;;  %vm9538_vm12 = vmmov %vm9536_vm11  ;;  %v3545_v7 = vadd.f32 %v3540_v22, %v3501_v42  ;;  %v3591_v58 = vadd.f32 %v9547_v57, %v3547_v62  ;;  %v9554_v3 = vld [vmem:[#allocation102_spill] sm:$0xff]  ;;  %v9559_v42 = vld [vmem:[#allocation104_spill] sm:$0xff] }
 0x637   :  { %v3541_v43 = vsel %vm9538_vm12, %v9534_v63, %v9537_v8  ;;  %vm9541_vm15 = vmmov %vm9526_vm10  ;;  %v3436_v33 = vadd.f32 %v3431_v41, %v3392_v32  ;;  %v9560_v63 = vld [vmem:[#allocation106_spill] sm:$0xff]  ;;  %v9567_v62 = vld [vmem:[#allocation111_spill] sm:$0xff] }
 0x638   :  { %v3474_v26 = vsel %vm9541_vm15, %v9540_v20, %v9539_v1  ;;  %vm9543_vm14 = vmmov %vm9526_vm10  ;;  %vm9546_vm10 = vcmask 875520   ;;  %v3546_v34 = vadd.f32 %v3541_v43, %v3502_v10  ;;  %v3525_v10 = vadd.f32 %v9552_v9, %v3481_v35  ;;  %v9564_v43 = vld [vmem:[#allocation108_spill] sm:$0xff] }
 0x639   :  { %v3475_v21 = vsel %vm9543_vm14, %v9539_v1, %v9542_v54  ;;  %v3584_v53 = vsel %vm9546_vm10, %v9545_v37, %v9544_v46  ;;  %vm9548_vm13 = vmmov %vm9546_vm10  ;;  %v3479_v2 = vadd.f32 %v3474_v26, %v3435_v52  ;;  %v9562_v52 = vld [vmem:[#allocation109_spill] sm:$0xff]  ;;  %v9565_v1 = vld [vmem:[#allocation107_spill] sm:$0xff]  ;;  %v3635_v26 = vadd.f32 %v9557_v60, %v3591_v58 }
 0x63a   :  { %v8354_v15 = vpop.permute.xlu1 %3978  ;;  %v8356_v28 = vpop.permute.xlu0 %3976  ;;  %v3585_v18 = vsel %vm9548_vm13, %v9544_v46, %v9547_v57  ;;  %vm9551_vm7 = vmmov %vm9536_vm11  ;;  %v3480_v38 = vadd.f32 %v3475_v21, %v3436_v33  ;;  %vm9556_vm11 = vcmask 867328   ;;  %v3589_v41 = vadd.f32 %v3584_v53, %v3545_v7  ;;  %v9569_v53 = vld [vmem:[#allocation110_spill] sm:$0xff]  ;;  %v9570_v57 = vld [vmem:[#allocation112_spill] sm:$0xff] }
 0x63b   :  { %v3518_v0 = vsel %vm9551_vm7, %v9550_v11, %v9549_v61  ;;  %vm9553_vm9 = vmmov %vm9551_vm7  ;;  %v3628_v25 = vsel %vm9556_vm11, %v9555_v56, %v9554_v3  ;;  %v3590_v32 = vadd.f32 %v3585_v18, %v3546_v34  ;;  %v3569_v37 = vadd.f32 %v9562_v52, %v3525_v10  ;;  %v9574_v35 = vld [vmem:[#allocation116_spill] sm:$0xff]  ;;  %v9577_v58 = vld [vmem:[#allocation114_spill] sm:$0xff] }
 0x63c   :  { %v3519_v14 = vsel %vm9553_vm9, %v9549_v61, %v9552_v9  ;;  %vm9558_vm12 = vmmov %vm9556_vm11  ;;  %v3523_v49 = vadd.f32 %v3518_v0, %v3479_v2  ;;  %v3633_v33 = vadd.f32 %v3628_v25, %v3589_v41  ;;  %v9572_v61 = vld [vmem:[#allocation115_spill] sm:$0xff]  ;;  %v3679_v34 = vadd.f32 %v9567_v62, %v3635_v26  ;;  %v9575_v9 = vld [vmem:[#allocation113_spill] sm:$0xff] }
 0x63d   :  { %v3629_v6 = vsel %vm9558_vm12, %v9554_v3, %v9557_v60  ;;  %vm9561_vm15 = vmmov %vm9546_vm10  ;;  %v3524_v22 = vadd.f32 %v3519_v14, %v3480_v38  ;;  %v9579_v56 = vld [vmem:[#allocation18_spill] sm:$0xff]  ;;  %v9580_v25 = vld [vmem:[#allocation19_spill] sm:$0xff] }
 0x63e   :  { %v8382_v51 = vpop.permute.xlu1 %3910  ;;  %v8384_v27 = vpop.permute.xlu0 %3908  ;;  %v3562_v5 = vsel %vm9561_vm15, %v9560_v63, %v9559_v42  ;;  %vm9563_vm14 = vmmov %vm9546_vm10  ;;  %vm9566_vm10 = vcmask 859136   ;;  %v3634_v23 = vadd.f32 %v3629_v6, %v3590_v32  ;;  %v9582_v6 = vld [vmem:[#allocation27_spill] sm:$0xff]  ;;  %v3723_v63 = vadd.f32 %v9577_v58, %v3679_v34  ;;  %v9597_v34 = vld [vmem:[#allocation120_spill] sm:$0xff] }
 0x63f   :  { %v3563_v8 = vsel %vm9563_vm14, %v9559_v42, %v9562_v52  ;;  %v3672_v20 = vsel %vm9566_vm10, %v9565_v1, %v9564_v43  ;;  %vm9568_vm13 = vmmov %vm9566_vm10  ;;  %v3567_v46 = vadd.f32 %v3562_v5, %v3523_v49  ;;  %v3613_v42 = vadd.f32 %v9572_v61, %v3569_v37  ;;  %v9584_v52 = vld [vmem:[#allocation22_spill] sm:$0xff]  ;;  %v9587_v1 = vld [vmem:[#allocation24_spill] sm:$0xff] }
 0x640   :  { %v3673_v54 = vsel %vm9568_vm13, %v9564_v43, %v9567_v62  ;;  %vm9571_vm7 = vmmov %vm9556_vm11  ;;  %v3568_v0 = vadd.f32 %v3563_v8, %v3524_v22  ;;  %v3677_v2 = vadd.f32 %v3672_v20, %v3633_v33  ;;  %vm9576_vm11 = vcmask 850944   ;;  %v9585_v8 = vld [vmem:[#allocation20_spill] sm:$0xff]  ;;  %v9589_v26 = vld [vmem:[#allocation23_spill] sm:$0xff] }
 0x641   :  { %v3606_v18 = vsel %vm9571_vm7, %v9570_v57, %v9569_v53  ;;  %vm9573_vm9 = vmmov %vm9571_vm7  ;;  %v3716_v14 = vsel %vm9576_vm11, %v9575_v9, %v9574_v35  ;;  %v3678_v38 = vadd.f32 %v3673_v54, %v3634_v23  ;;  %v9590_v33 = vld [vmem:[#allocation117_spill] sm:$0xff]  ;;  %v3657_v37 = vadd.f32 %v9582_v6, %v3613_v42  ;;  %v9592_v57 = vld [vmem:[#allocation119_spill] sm:$0xff] }
 0x642   :  { %v8407_v21 = vpop.permute.xlu1 %4018  ;;  %v8409_v7 = vpop.permute.xlu0 %3912  ;;  %v3607_v11 = vsel %vm9573_vm9, %v9569_v53, %v9572_v61  ;;  %vm9578_vm12 = vmmov %vm9576_vm11  ;;  %v3611_v32 = vadd.f32 %v3606_v18, %v3567_v46  ;;  %v3721_v10 = vadd.f32 %v3716_v14, %v3677_v2  ;;  %v3767_v53 = vadd.f32 %v9587_v1, %v3723_v63  ;;  %v9594_v61 = vld [vmem:[#allocation121_spill] sm:$0xff] }
 0x643   :  { %v3717_v3 = vsel %vm9578_vm12, %v9574_v35, %v9577_v58  ;;  %vm9581_vm15 = vmmov %vm9566_vm10  ;;  %v3612_v49 = vadd.f32 %v3607_v11, %v3568_v0  ;;  %v9595_v11 = vld [vmem:[#allocation118_spill] sm:$0xff] }
 0x644   :  { %v3650_v60 = vsel %vm9581_vm15, %v9580_v25, %v9579_v56  ;;  %vm9583_vm14 = vmmov %vm9566_vm10  ;;  %vm9586_vm10 = vcmask 842752   ;;  %v3722_v62 = vadd.f32 %v3717_v3, %v3678_v38  ;;  %v3701_v38 = vadd.f32 %v9592_v57, %v3657_v37  ;;  %v9599_v25 = vld [vmem:[#allocation122_spill] sm:$0xff] }
 0x645   :  { %v3651_v41 = vsel %vm9583_vm14, %v9579_v56, %v9582_v6  ;;  %v3760_v43 = vsel %vm9586_vm10, %v9585_v8, %v9584_v52  ;;  %vm9588_vm13 = vmmov %vm9586_vm10  ;;  %v3655_v54 = vadd.f32 %v3650_v60, %v3611_v32  ;;  %v3811_v56 = vadd.f32 %v9597_v34, %v3767_v53  ;;  %v9600_v60 = vld [vmem:[#allocation123_spill] sm:$0xff] }
 0x646   :  { %v8433_v5 = vpop.permute.xlu1 %4022  ;;  %v4021_v22 = vpop.permute.xlu0 %4020  ;;  %v3761_v20 = vsel %vm9588_vm13, %v9584_v52, %v9587_v1  ;;  %vm9591_vm7 = vmmov %vm9576_vm11  ;;  %v3656_v46 = vadd.f32 %v3651_v41, %v3612_v49  ;;  %vm9596_vm11 = vcmask 834560   ;;  %v3765_v35 = vadd.f32 %v3760_v43, %v3721_v10 }
 0x647   :  { %v3694_v23 = vsel %vm9591_vm7, %v9590_v33, %v9589_v26  ;;  %vm9593_vm9 = vmmov %vm9591_vm7  ;;  %v3804_v0 = vsel %vm9596_vm11, %v9595_v11, %v9594_v61  ;;  %v3766_v9 = vadd.f32 %v3761_v20, %v3722_v62  ;;  %vm9602_vm14 = vcmask 826368  }
 0x648   :  { %v3695_v18 = vsel %vm9593_vm9, %v9589_v26, %v9592_v57  ;;  %vm9598_vm12 = vmmov %vm9596_vm11  ;;  %v3699_v14 = vadd.f32 %v3694_v23, %v3655_v54  ;;  %v3848_v41 = vsel %vm9602_vm14, %v8073_v40, %v8104_v16  ;;  %v3809_v42 = vadd.f32 %v3804_v0, %v3765_v35 }
 0x649   :  { %v3805_v2 = vsel %vm9598_vm12, %v9594_v61, %v9597_v34  ;;  %vm9601_vm15 = vmmov %vm9586_vm10  ;;  %v3700_v49 = vadd.f32 %v3695_v18, %v3656_v46  ;;  %v3739_v10 = vsel %vm9588_vm13, %v9599_v25, %v8075_v13  ;;  %v3855_v52 = vadd.f32 %v8102_v30, %v3811_v56 }
 0x64a   :  { %v8456_v58 = vpop.permute.xlu1 %3954  ;;  %v8458_v3 = vpop.permute.xlu0 %3952  ;;  %v3738_v6 = vsel %vm9601_vm15, %v9600_v60, %v9599_v25  ;;  %vm9603_vm10 = vmmov %vm9602_vm14  ;;  %v3810_v63 = vadd.f32 %v3805_v2, %v3766_v9  ;;  %vm9605_vm9 = vcmask 818176   ;;  %v3745_v1 = vadd.f32 %v8075_v13, %v3701_v38 }
 0x64b   :  { %v3849_v32 = vsel %vm9603_vm10, %v8104_v16, %v8102_v30  ;;  %vm9604_vm7 = vmmov %vm9596_vm11  ;;  %v3892_v40 = vsel %vm9605_vm9, %v8159_v36, %v8192_v39  ;;  %v3743_v43 = vadd.f32 %v3738_v6, %v3699_v14  ;;  %v3853_v20 = vadd.f32 %v3848_v41, %v3809_v42 }
 0x64c   :  { %v3782_v8 = vsel %vm9604_vm7, %v8132_v44, %v8130_v55  ;;  %vm9606_vm11 = vmmov %vm9605_vm9  ;;  %v3854_v26 = vadd.f32 %v3849_v32, %v3810_v63  ;;  %v3899_v44 = vadd.f32 %v8190_v47, %v3855_v52  ;;  %vm9608_vm15 = vcmask 809984  }
 0x64d   :  { %v3893_v16 = vsel %vm9606_vm11, %v8192_v39, %v8190_v47  ;;  %vm9607_vm12 = vmmov %vm9604_vm7  ;;  %v3936_v36 = vsel %vm9608_vm15, %v8246_v59, %v8276_v4  ;;  %v3744_v62 = vadd.f32 %v3739_v10, %v3700_v49  ;;  %v3787_v13 = vadd.f32 %v3782_v8, %v3743_v43 }
 0x64e   :  { %v4063_v33 = vpop.permute.xlu1 %4062  ;;  %v3957_v23 = vpop.permute.xlu0 %3956  ;;  %v3783_v30 = vsel %vm9607_vm12, %v8130_v55, %v8161_v48  ;;  %vm9609_vm14 = vmmov %vm9608_vm15  ;;  %v3897_v54 = vadd.f32 %v3892_v40, %v3853_v20  ;;  %v3898_v46 = vadd.f32 %v3893_v16, %v3854_v26  ;;  %v3789_v37 = vadd.f32 %v8161_v48, %v3745_v1 }
 0x64f   :  { %v3937_v39 = vsel %vm9609_vm14, %v8276_v4, %v8274_v19  ;;  %v3943_v53 = vadd.f32 %v8274_v19, %v3899_v44  ;;  %vm9610_vm10 = vcmask 801792   ;;  %v3788_v59 = vadd.f32 %v3783_v30, %v3744_v62 }
 0x650   :  { %v3980_v55 = vsel %vm9610_vm10, %v8328_v17, %v8356_v28  ;;  %vm9611_vm13 = vmmov %vm9610_vm10  ;;  %vm9612_vm7 = vcmask 826368   ;;  %v3941_v57 = vadd.f32 %v3936_v36, %v3897_v54  ;;  %v3942_v18 = vadd.f32 %v3937_v39, %v3898_v46 }
 0x651   :  { %v3981_v47 = vsel %vm9611_vm13, %v8356_v28, %v8354_v15  ;;  %v3826_v4 = vsel %vm9612_vm7, %v8220_v29, %v8218_v45  ;;  %vm9613_vm9 = vmmov %vm9612_vm7  ;;  %v3987_v19 = vadd.f32 %v8354_v15, %v3943_v53  ;;  %vm9614_vm11 = vcmask 793600  }
 0x652   :  { %v4067_v61 = vpop.permute.xlu1 %4066  ;;  %v4065_v11 = vpop.permute.xlu0 %4064  ;;  %v3827_v48 = vsel %vm9613_vm9, %v8218_v45, %v8248_v12  ;;  %v4024_v17 = vsel %vm9614_vm11, %v8407_v21, %v4021_v22  ;;  %vm9615_vm12 = vmmov %vm9614_vm11  ;;  %v3833_v0 = vadd.f32 %v8248_v12, %v3789_v37  ;;  %vm9616_vm15 = vcmask 818176  }
 0x653   :  { %v4025_v28 = vsel %vm9615_vm12, %v4021_v22, %v8433_v5  ;;  %v3870_v29 = vsel %vm9616_vm15, %v8304_v24, %v8302_v31  ;;  %v3985_v34 = vadd.f32 %v3980_v55, %v3941_v57  ;;  %v3986_v2 = vadd.f32 %v3981_v47, %v3942_v18  ;;  %vm9617_vm14 = vmmov %vm9616_vm15 }
 0x654   :  { %v3871_v45 = vsel %vm9617_vm14, %v8302_v31, %v8330_v50  ;;  %v4031_v15 = vadd.f32 %v8433_v5, %v3987_v19  ;;  %vm9618_vm10 = vcmask 785408   ;;  %v3831_v9 = vadd.f32 %v3826_v4, %v3787_v13 }
 0x655   :  { %v4068_v35 = vsel %vm9618_vm10, %v4063_v33, %v4065_v11  ;;  %vm9619_vm13 = vmmov %vm9618_vm10  ;;  %v3832_v22 = vadd.f32 %v3827_v48, %v3788_v59  ;;  %v4029_v14 = vadd.f32 %v4024_v17, %v3985_v34  ;;  %v4030_v12 = vadd.f32 %v4025_v28, %v3986_v2 }
 0x656   :  { %v4069_v21 = vsel %vm9619_vm13, %v4065_v11, %v4067_v61  ;;  %v3999_v38 = vpop.permute.xlu1 %3998  ;;  %v3997_v56 = vpop.permute.xlu0 %3996  ;;  %v3877_v24 = vadd.f32 %v8330_v50, %v3833_v0  ;;  %vm9620_vm7 = vcmask 809984   ;;  %v4075_v5 = vadd.f32 %v4067_v61, %v4031_v15  ;;  %vm9627_vm13 = vmmov %vm9618_vm10 }
 0x657   :  { %v3914_v25 = vsel %vm9620_vm7, %v8384_v27, %v8382_v51  ;;  %vm9621_vm9 = vmmov %vm9620_vm7  ;;  %v3875_v60 = vadd.f32 %v3870_v29, %v3831_v9  ;;  %v3876_v6 = vadd.f32 %v3871_v45, %v3832_v22  ;;  %v4073_v41 = vadd.f32 %v4068_v35, %v4029_v14 }
 0x658   :  { %v3915_v31 = vsel %vm9621_vm9, %v8382_v51, %v8409_v7  ;;  %v4074_v32 = vadd.f32 %v4069_v21, %v4030_v12  ;;  %v3921_v49 = vadd.f32 %v8409_v7, %v3877_v24  ;;  %vm9622_vm11 = vcmask 801792  }
 0x659   :  { %v3958_v42 = vsel %vm9622_vm11, %v8458_v3, %v8456_v58  ;;  %vm9623_vm12 = vmmov %vm9622_vm11  ;;  %v3919_v63 = vadd.f32 %v3914_v25, %v3875_v60  ;;  %v3920_v27 = vadd.f32 %v3915_v31, %v3876_v6  ;;  %v4078_v51 = vrot.slane %v4075_v5, 4 }
 0x65a   :  { %v3959_v50 = vsel %vm9623_vm12, %v8456_v58, %v3957_v23  ;;  %v4041_v10 = vpop.permute.xlu1 %4040  ;;  %v4001_v52 = vpop.permute.xlu0 %4000  ;;  %v3965_v8 = vadd.f32 %v3957_v23, %v3921_v49  ;;  %vm9624_vm15 = vcmask 793600   ;;  %v4076_v7 = vrot.slane %v4073_v41, 4  ;;  %v9626_v58 = vld [vmem:[#allocation17_spill] sm:$0xff] }
 0x65b   :  { %v4002_v40 = vsel %vm9624_vm15, %v3997_v56, %v3999_v38  ;;  %vm9625_vm14 = vmmov %vm9624_vm15  ;;  %v3963_v43 = vadd.f32 %v3958_v42, %v3919_v63  ;;  %v3964_v1 = vadd.f32 %v3959_v50, %v3920_v27  ;;  %v4077_v20 = vrot.slane %v4074_v32, 4 }
 0x65c   :  { %v4003_v16 = vsel %vm9625_vm14, %v3999_v38, %v4001_v52  ;;  %v4009_v26 = vadd.f32 %v4001_v52, %v3965_v8  ;;  %v4081_v36 = vmul.f32 %v4078_v51, %v9626_v58  ;;  %v4079_v13 = vmul.f32 %v4076_v7, %v9626_v58 }
 0x65d   :  { %v4007_v33 = vadd.f32 %v4002_v40, %v3963_v43  ;;  %v4008_v3 = vadd.f32 %v4003_v16, %v3964_v1  ;;  %v4080_v54 = vmul.f32 %v4077_v20, %v9626_v58  ;;  %vm4102_vm7 = vcmask 130048  }
 0x65e   :  { %v4045_v30 = vpop.permute.xlu1 %4044  ;;  %v4043_v44 = vpop.permute.xlu0 %4042  ;;  %v4114_v2 = vstv %s5116_s17  ;;  %v4134_v21 = vstv %s5117_s22  ;;  %v4154_v38 = vstv %s5118_s25  ;;  %v4174_v25 = vstv %s5119_s28 }
 0x65f   :  { %v4053_v39 = vadd.f32 %v4045_v30, %v4009_v26  ;;  %v4046_v62 = vsel %vm9618_vm10, %v4041_v10, %v4043_v44  ;;  %v4047_v23 = vsel %vm9627_vm13, %v4043_v44, %v4045_v30  ;;  %v4194_v41 = vstv %s5120_s30 }
 0x660   :  { %v4051_v46 = vadd.f32 %v4046_v62, %v4007_v33  ;;  %v4052_v37 = vadd.f32 %v4047_v23, %v4008_v3  ;;  %v4214_v42 = vstv %s5121_s19  ;;  %vm9636_vm11 = vcmask 949248  }
 0x661   :  { %v8543_v53 = vadd.f32 %v4081_v36, %v4053_v39  ;;  %vm9637_vm12 = vmmov %vm9636_vm11  ;;  %vm9638_vm15 = vcmask 941056   ;;  %vm9640_vm10 = vcmask 932864  }
 0x662   :  { %v8545_v55 = vadd.f32 %v4079_v13, %v4051_v46  ;;  %v8547_v47 = vadd.f32 %v4080_v54, %v4052_v37  ;;  %vm9639_vm14 = vmmov %vm9638_vm15 }
 0x663   :  { %v4087_v59 = vmul.f32 %v8543_v53, %v8543_v53  ;;  %vm9641_vm13 = vmmov %vm9640_vm10 }
 0x664   :  { %v4085_v4 = vmul.f32 %v8545_v55, %v8545_v55  ;;  %v4086_v57 = vmul.f32 %v8547_v47, %v8547_v47 }
 0x665   :  { %v4090_v18 = vrot.slane %v4087_v59, 4 }
 0x666   :  { %v4088_v61 = vrot.slane %v4085_v4, 4  ;;  %v4089_v11 = vrot.slane %v4086_v57, 4 }
 0x667   :  { %v4093_v48 = vadd.f32 %v4090_v18, %v4087_v59 }
 0x668   :  { %v4091_v19 = vadd.f32 %v4088_v61, %v4085_v4  ;;  %v4092_v17 = vadd.f32 %v4089_v11, %v4086_v57  ;;  %v4374_v11 = vstv %s5129_s29 }
 0x669   :  { %v4096_v28 = vrot.slane %v4093_v48, 6 }
 0x66a   :  { %v4094_v0 = vrot.slane %v4091_v19, 6  ;;  %v4095_v29 = vrot.slane %v4092_v17, 6 }
 0x66b   :  { %v4099_v34 = vadd.f32 %v4096_v28, %v4093_v48 }
 0x66c   :  { %v8555_v45 = vadd.f32 %v4094_v0, %v4091_v19  ;;  %v8557_v15 = vadd.f32 %v4095_v29, %v4092_v17 }
 0x66d   :  { %4103 = vst.msk [vmem:[#allocation3 + $0x10] sm:$0xff] %vm4102_vm7, %v4099_v34  ;;  %vm9642_vm7 = vcmask 924672  }
 0x66e   :  { %v4116_v35 = vmul.f32 %v4114_v2, %v8557_v15  ;;  %v4135_v9 = vmul.f32 %v4134_v21, %v8555_v45  ;;  %v4115_v56 = vmul.f32 %v4114_v2, %v8555_v45  ;;  %v4156_v24 = vmul.f32 %v4154_v38, %v8557_v15 }
 0x66f   :  { %v4136_v31 = vmul.f32 %v4134_v21, %v8557_v15  ;;  %v4175_v5 = vmul.f32 %v4174_v25, %v8555_v45  ;;  %v4155_v60 = vmul.f32 %v4154_v38, %v8555_v45  ;;  %v4196_v49 = vmul.f32 %v4194_v41, %v8557_v15 }
 0x670   :  { %4123 = vrot.lane.b32.xlu1 %v4116_v35, %s5302_s4  ;;  %v4176_v50 = vmul.f32 %v4174_v25, %v8557_v15  ;;  %v4215_v63 = vmul.f32 %v4214_v42, %v8555_v45  ;;  %v4195_v27 = vmul.f32 %v4194_v41, %v8555_v45  ;;  %v4216_v16 = vmul.f32 %v4214_v42, %v8557_v15 }
 0x671   :  { %v4375_v19 = vmul.f32 %v4374_v11, %v8555_v45  ;;  %v4376_v35 = vmul.f32 %v4374_v11, %v8557_v15 }
 0x674   :  { %v8562_v22 = vld [vmem:[#allocation3 + $0x10] sm:$0xff]  ;;  %4141 = vrot.lane.b32.xlu1 %v4135_v9, %s5303_s6 }
 0x675   :  { %v4117_v14 = vmul.f32 %v4114_v2, %v8562_v22  ;;  %v4137_v12 = vmul.f32 %v4134_v21, %v8562_v22  ;;  %v4177_v6 = vmul.f32 %v4174_v25, %v8562_v22  ;;  %v4157_v32 = vmul.f32 %v4154_v38, %v8562_v22 }
 0x676   :  { %v4217_v10 = vmul.f32 %v4214_v42, %v8562_v22  ;;  %v4197_v8 = vmul.f32 %v4194_v41, %v8562_v22  ;;  %v4377_v28 = vmul.f32 %v4374_v11, %v8562_v22 }
 0x677   :  { %4125 = vrot.lane.b32.xlu0 %v4117_v14, %s5302_s4 }
 0x678   :  { %4145 = vrot.lane.b32.xlu1 %v4137_v12, %s5303_s6 }
 0x67b   :  { %4121 = vrot.lane.b32.xlu0 %v4115_v56, %s5302_s4  ;;  %s5122_s4 = sld [smem:[#allocation10 + $0x18]] }
 0x67c   :  { %4163 = vrot.lane.b32.xlu1 %v4156_v24, %s5304_s9 }
 0x67f   :  { %4143 = vrot.lane.b32.xlu0 %v4136_v31, %s5303_s6  ;;  %s5123_s6 = sld [smem:[#allocation10 + $0x19]] }
 0x680   :  { %4181 = vrot.lane.b32.xlu1 %v4175_v5, %s5305_s12 }
 0x681   :  { %v4234_v52 = vstv %s5122_s4 }
 0x682   :  { %v4236_v51 = vmul.f32 %v4234_v52, %v8557_v15  ;;  %v4235_v1 = vmul.f32 %v4234_v52, %v8555_v45  ;;  %v4237_v26 = vmul.f32 %v4234_v52, %v8562_v22 }
 0x683   :  { %4161 = vrot.lane.b32.xlu0 %v4155_v60, %s5304_s9 }
 0x684   :  { %4185 = vrot.lane.b32.xlu1 %v4177_v6, %s5305_s12 }
 0x685   :  { %v4254_v40 = vstv %s5123_s6 }
 0x686   :  { %v4255_v43 = vmul.f32 %v4254_v40, %v8555_v45  ;;  %v4257_v7 = vmul.f32 %v4254_v40, %v8562_v22  ;;  %v4256_v30 = vmul.f32 %v4254_v40, %v8557_v15 }
 0x687   :  { %4165 = vrot.lane.b32.xlu0 %v4157_v32, %s5304_s9  ;;  %s5124_s9 = sld [smem:[#allocation10 + $0x1a]] }
 0x688   :  { %4203 = vrot.lane.b32.xlu1 %v4196_v49, %s5306_s14 }
 0x68b   :  { %4183 = vrot.lane.b32.xlu0 %v4176_v50, %s5305_s12  ;;  %s5125_s12 = sld [smem:[#allocation10 + $0x1b]] }
 0x68c   :  { %4221 = vrot.lane.b32.xlu1 %v4215_v63, %s9286_s8 }
 0x68d   :  { %v4274_v20 = vstv %s5124_s9 }
 0x68e   :  { %v4276_v33 = vmul.f32 %v4274_v20, %v8557_v15  ;;  %v4275_v36 = vmul.f32 %v4274_v20, %v8555_v45  ;;  %v4277_v23 = vmul.f32 %v4274_v20, %v8562_v22 }
 0x68f   :  { %4201 = vrot.lane.b32.xlu0 %v4195_v27, %s5306_s14 }
 0x690   :  { %4225 = vrot.lane.b32.xlu1 %v4217_v10, %s9286_s8 }
 0x691   :  { %v4294_v3 = vstv %s5125_s12 }
 0x692   :  { %v4295_v44 = vmul.f32 %v4294_v3, %v8555_v45  ;;  %v4297_v39 = vmul.f32 %v4294_v3, %v8562_v22  ;;  %v4296_v46 = vmul.f32 %v4294_v3, %v8557_v15 }
 0x693   :  { %4205 = vrot.lane.b32.xlu0 %v4197_v8, %s5306_s14  ;;  %s5126_s14 = sld [smem:[#allocation10 + $0x1c]] }
 0x694   :  { %4243 = vrot.lane.b32.xlu1 %v4236_v51, %s5308_s20 }
 0x697   :  { %4223 = vrot.lane.b32.xlu0 %v4216_v16, %s9286_s8  ;;  %s5127_s8 = sld [smem:[#allocation10 + $0x1d]] }
 0x698   :  { %4261 = vrot.lane.b32.xlu1 %v4255_v43, %s9287_s1 }
 0x699   :  { %v4314_v62 = vstv %s5126_s14 }
 0x69a   :  { %v4316_v13 = vmul.f32 %v4314_v62, %v8557_v15  ;;  %v4315_v59 = vmul.f32 %v4314_v62, %v8555_v45  ;;  %v4317_v18 = vmul.f32 %v4314_v62, %v8562_v22 }
 0x69b   :  { %4241 = vrot.lane.b32.xlu0 %v4235_v1, %s5308_s20 }
 0x69c   :  { %4265 = vrot.lane.b32.xlu1 %v4257_v7, %s9287_s1 }
 0x69d   :  { %v4334_v54 = vstv %s5127_s8 }
 0x69e   :  { %v4335_v37 = vmul.f32 %v4334_v54, %v8555_v45  ;;  %v4337_v4 = vmul.f32 %v4334_v54, %v8562_v22  ;;  %v4336_v48 = vmul.f32 %v4334_v54, %v8557_v15 }
 0x69f   :  { %4245 = vrot.lane.b32.xlu0 %v4237_v26, %s5308_s20  ;;  %s5128_s20 = sld [smem:[#allocation10 + $0x1e]] }
 0x6a0   :  { %4283 = vrot.lane.b32.xlu1 %v4276_v33, %s9288_s16 }
 0x6a3   :  { %4263 = vrot.lane.b32.xlu0 %v4256_v30, %s9287_s1 }
 0x6a4   :  { %4301 = vrot.lane.b32.xlu1 %v4295_v44, %s9289_s21 }
 0x6a5   :  { %v4354_v57 = vstv %s5128_s20 }
 0x6a6   :  { %v4356_v61 = vmul.f32 %v4354_v57, %v8557_v15  ;;  %v4355_v17 = vmul.f32 %v4354_v57, %v8555_v45  ;;  %v4357_v29 = vmul.f32 %v4354_v57, %v8562_v22 }
 0x6a7   :  { %4281 = vrot.lane.b32.xlu0 %v4275_v36, %s9288_s16 }
 0x6a8   :  { %4305 = vrot.lane.b32.xlu1 %v4297_v39, %s9289_s21 }
 0x6ab   :  { %4285 = vrot.lane.b32.xlu0 %v4277_v23, %s9288_s16  ;;  %s5130_s16 = sld [smem:[#allocation10 + $0x20]] }
 0x6ac   :  { %4323 = vrot.lane.b32.xlu1 %v4316_v13, %s9290_s27 }
 0x6af   :  { %4303 = vrot.lane.b32.xlu0 %v4296_v46, %s9289_s21  ;;  %s5131_s21 = sld [smem:[#allocation10 + $0x21]] }
 0x6b0   :  { %4341 = vrot.lane.b32.xlu1 %v4335_v37, %s9291_s10 }
 0x6b1   :  { %v4394_v0 = vstv %s5130_s16 }
 0x6b2   :  { %v4396_v34 = vmul.f32 %v4394_v0, %v8557_v15  ;;  %v4395_v9 = vmul.f32 %v4394_v0, %v8555_v45  ;;  %v4397_v12 = vmul.f32 %v4394_v0, %v8562_v22 }
 0x6b3   :  { %4321 = vrot.lane.b32.xlu0 %v4315_v59, %s9290_s27 }
 0x6b4   :  { %4345 = vrot.lane.b32.xlu1 %v4337_v4, %s9291_s10 }
 0x6b5   :  { %v4414_v2 = vstv %s5131_s21 }
 0x6b6   :  { %v4415_v21 = vmul.f32 %v4414_v2, %v8555_v45  ;;  %v4417_v14 = vmul.f32 %v4414_v2, %v8562_v22  ;;  %v4416_v38 = vmul.f32 %v4414_v2, %v8557_v15 }
 0x6b7   :  { %4325 = vrot.lane.b32.xlu0 %v4317_v18, %s9290_s27  ;;  %s8663_s27 = sld [smem:[#allocation10 + $0x11]] }
 0x6b8   :  { %4363 = vrot.lane.b32.xlu1 %v4356_v61, %s9292_s15 }
 0x6bb   :  { %4343 = vrot.lane.b32.xlu0 %v4336_v48, %s9291_s10  ;;  %s9654_s10 = smov 8  }
 0x6bc   :  { %4381 = vrot.lane.b32.xlu1 %v4375_v19, %s9293_s0 }
 0x6bd   :  { %v4107_v22 = vstv %s8663_s27 }
 0x6be   :  { %v4109_v31 = vmul.f32 %v4107_v22, %v8557_v15  ;;  %v4108_v57 = vmul.f32 %v4107_v22, %v8555_v45 }
 0x6bf   :  { %4361 = vrot.lane.b32.xlu0 %v4355_v17, %s9292_s15 }
 0x6c0   :  { %4385 = vrot.lane.b32.xlu1 %v4377_v28, %s9293_s0 }
 0x6c3   :  { %4365 = vrot.lane.b32.xlu0 %v4357_v29, %s9292_s15  ;;  %s5343_s15 = smov [#allocation11]  }
 0x6c4   :  { %4403 = vrot.lane.b32.xlu1 %v4396_v34, %s9294_s2 }
 0x6c7   :  { %4383 = vrot.lane.b32.xlu0 %v4376_v35, %s9293_s0  ;;  %s4919_s0 = sshll.u32 %s5343_s15, 4  ;;  %s4920_s0 = int_to_ptr.vmem [resolvable:$true] %s4919_s0 }
 0x6c8   :  { %4421 = vrot.lane.b32.xlu1 %v4415_v21, %s9295_s11  ;;  %p5274_p10 = scmp.lt.s32.totalorder %s4920_s0, %s4920_s0 }
 0x6cb   :  { %4401 = vrot.lane.b32.xlu0 %v4395_v9, %s9294_s2 }
 0x6cc   :  { %4425 = vrot.lane.b32.xlu1 %v4417_v14, %s9295_s11 }
 0x6cf   :  { %4405 = vrot.lane.b32.xlu0 %v4397_v12, %s9294_s2  ;;  %s5269_s2 = scalar_lea.vmem %s4920_s0, 256 }
 0x6d0   :  { %4867 = vrot.lane.b32.xlu1 %v8547_v47, %s9287_s1  ;;  %p5270_p9 = scmp.ne.s32.totalorder %s4920_s0, %s5269_s2  ;;  %p5275_p11 = scmp.lt.s32.totalorder %s5269_s2, %s5269_s2 }
 0x6d2   :  { %p5276_p12 = por %p5275_p11, %p5274_p10 }
 0x6d3   :  { %4423 = vrot.lane.b32.xlu0 %v4416_v38, %s9295_s11 }
 0x6d4   :  { %p5277_p13 = pnand %p5276_p12, %p5270_p9 }
 0x6d7   :  { %4865 = vrot.lane.b32.xlu0 %v8545_v55, %s9287_s1 }
 0x6db   :  { %4869 = vrot.lane.b32.xlu0 %v8543_v53, %s9287_s1 }
 0x6e2   :  { %v4124_v56 = vpop.permute.xlu1 %4123 }
 0x6e6   :  { %v4142_v24 = vpop.permute.xlu1 %4141 }
 0x6e9   :  { %v4126_v25 = vpop.permute.xlu0 %4125 }
 0x6ea   :  { %v4128_v5 = vsel %vm136_vm0, %v4124_v56, %v4126_v25  ;;  %v4146_v60 = vpop.permute.xlu1 %4145 }
 0x6eb   :  { %v4132_v6 = vadd.f32 %v4128_v5, %v4109_v31 }
 0x6ed   :  { %v4122_v41 = vpop.permute.xlu0 %4121 }
 0x6ee   :  { %v4164_v32 = vpop.permute.xlu1 %4163  ;;  %v4127_v59 = vsel %vm136_vm0, %v4122_v41, %v4124_v56  ;;  %vm9628_vm0 = vcmask 982016  }
 0x6ef   :  { %v4131_v61 = vadd.f32 %v4127_v59, %v4108_v57 }
 0x6f1   :  { %v4144_v49 = vpop.permute.xlu0 %4143 }
 0x6f2   :  { %v4148_v42 = vsel %vm181_vm1, %v4144_v49, %v4146_v60  ;;  %v4182_v50 = vpop.permute.xlu1 %4181  ;;  %v4147_v18 = vsel %vm181_vm1, %v4142_v24, %v4144_v49  ;;  %vm9629_vm1 = vmmov %vm9628_vm0 }
 0x6f3   :  { %v4152_v63 = vadd.f32 %v4148_v42, %v4132_v6  ;;  %v4151_v28 = vadd.f32 %v4147_v18, %v4131_v61 }
 0x6f5   :  { %v4162_v27 = vpop.permute.xlu0 %4161 }
 0x6f6   :  { %v4186_v10 = vpop.permute.xlu1 %4185  ;;  %v4167_v48 = vsel %vm226_vm2, %v4162_v27, %v4164_v32 }
 0x6f7   :  { %v4171_v34 = vadd.f32 %v4167_v48, %v4151_v28 }
 0x6f9   :  { %v4166_v52 = vpop.permute.xlu0 %4165 }
 0x6fa   :  { %v4204_v8 = vpop.permute.xlu1 %4203  ;;  %v4168_v19 = vsel %vm226_vm2, %v4164_v32, %v4166_v52  ;;  %vm9630_vm2 = vcmask 973824  }
 0x6fb   :  { %v4172_v2 = vadd.f32 %v4168_v19, %v4152_v63 }
 0x6fd   :  { %v4184_v51 = vpop.permute.xlu0 %4183 }
 0x6fe   :  { %v4222_v40 = vpop.permute.xlu1 %4221  ;;  %v4187_v0 = vsel %vm271_vm3, %v4182_v50, %v4184_v51  ;;  %v4188_v29 = vsel %vm271_vm3, %v4184_v51, %v4186_v10  ;;  %vm9631_vm3 = vmmov %vm9630_vm2 }
 0x6ff   :  { %v4191_v14 = vadd.f32 %v4187_v0, %v4171_v34  ;;  %v4192_v12 = vadd.f32 %v4188_v29, %v4172_v2 }
 0x701   :  { %v4202_v16 = vpop.permute.xlu0 %4201 }
 0x702   :  { %v4226_v43 = vpop.permute.xlu1 %4225  ;;  %v4207_v21 = vsel %vm316_vm4, %v4202_v16, %v4204_v8 }
 0x703   :  { %v4211_v22 = vadd.f32 %v4207_v21, %v4191_v14 }
 0x705   :  { %v4206_v15 = vpop.permute.xlu0 %4205 }
 0x706   :  { %v4244_v1 = vpop.permute.xlu1 %4243  ;;  %v4208_v45 = vsel %vm316_vm4, %v4204_v8, %v4206_v15  ;;  %vm9632_vm4 = vcmask 965632  }
 0x707   :  { %v4212_v24 = vadd.f32 %v4208_v45, %v4192_v12  ;;  %v9646_v45 = vld [vmem:[#allocation21_spill] sm:$0xff] }
 0x709   :  { %v4224_v7 = vpop.permute.xlu0 %4223 }
 0x70a   :  { %v4262_v20 = vpop.permute.xlu1 %4261  ;;  %v4227_v38 = vsel %vm361_vm5, %v4222_v40, %v4224_v7  ;;  %v4228_v56 = vsel %vm361_vm5, %v4224_v7, %v4226_v43  ;;  %vm9633_vm5 = vmmov %vm9632_vm4 }
 0x70b   :  { %v4231_v60 = vadd.f32 %v4227_v38, %v4211_v22  ;;  %v4232_v6 = vadd.f32 %v4228_v56, %v4212_v24 }
 0x70d   :  { %v4242_v26 = vpop.permute.xlu0 %4241 }
 0x70e   :  { %v4266_v33 = vpop.permute.xlu1 %4265  ;;  %v4247_v31 = vsel %vm406_vm6, %v4242_v26, %v4244_v1 }
 0x70f   :  { %v4251_v42 = vadd.f32 %v4247_v31, %v4231_v60 }
 0x711   :  { %v4246_v3 = vpop.permute.xlu0 %4245 }
 0x712   :  { %v4284_v30 = vpop.permute.xlu1 %4283  ;;  %v4248_v5 = vsel %vm406_vm6, %v4244_v1, %v4246_v3  ;;  %vm9634_vm6 = vcmask 957440  }
 0x713   :  { %v4252_v50 = vadd.f32 %v4248_v5, %v4232_v6  ;;  %vm9635_vm9 = vmmov %vm9634_vm6 }
 0x715   :  { %v4264_v44 = vpop.permute.xlu0 %4263 }
 0x716   :  { %v4302_v36 = vpop.permute.xlu1 %4301  ;;  %v4267_v32 = vsel %vm9628_vm0, %v4262_v20, %v4264_v44  ;;  %v4268_v49 = vsel %vm9629_vm1, %v4264_v44, %v4266_v33  ;;  %vm9643_vm0 = vmmov %vm9642_vm7  ;;  %vm9644_vm1 = vcmask 916480  }
 0x717   :  { %v4271_v52 = vadd.f32 %v4267_v32, %v4251_v42  ;;  %v4272_v8 = vadd.f32 %v4268_v49, %v4252_v50 }
 0x719   :  { %v4282_v39 = vpop.permute.xlu0 %4281 }
 0x71a   :  { %v4306_v62 = vpop.permute.xlu1 %4305  ;;  %v4287_v27 = vsel %vm9630_vm2, %v4282_v39, %v4284_v30  ;;  %vm9645_vm2 = vmmov %vm9644_vm1 }
 0x71b   :  { %v4291_v16 = vadd.f32 %v4287_v27, %v4271_v52 }
 0x71d   :  { %v4286_v23 = vpop.permute.xlu0 %4285 }
 0x71e   :  { %v4324_v13 = vpop.permute.xlu1 %4323  ;;  %v4288_v10 = vsel %vm9631_vm3, %v4284_v30, %v4286_v23 }
 0x71f   :  { %v4292_v43 = vadd.f32 %v4288_v10, %v4272_v8 }
 0x721   :  { %v4304_v54 = vpop.permute.xlu0 %4303 }
 0x722   :  { %v4342_v46 = vpop.permute.xlu1 %4341  ;;  %v4307_v51 = vsel %vm9632_vm4, %v4302_v36, %v4304_v54  ;;  %v4308_v40 = vsel %vm9633_vm5, %v4304_v54, %v4306_v62 }
 0x723   :  { %v4311_v26 = vadd.f32 %v4307_v51, %v4291_v16  ;;  %v4312_v33 = vadd.f32 %v4308_v40, %v4292_v43  ;;  %v9647_v16 = vmov 2102212464  }
 0x725   :  { %v4322_v37 = vpop.permute.xlu0 %4321 }
 0x726   :  { %v4346_v4 = vpop.permute.xlu1 %4345  ;;  %v4327_v7 = vsel %vm9634_vm6, %v4322_v37, %v4324_v13 }
 0x727   :  { %v4331_v44 = vadd.f32 %v4327_v7, %v4311_v26  ;;  %v9649_v26 = vmov 1326507024  }
 0x729   :  { %v4326_v11 = vpop.permute.xlu0 %4325 }
 0x72a   :  { %v4364_v17 = vpop.permute.xlu1 %4363  ;;  %v4328_v20 = vsel %vm9635_vm9, %v4324_v13, %v4326_v11 }
 0x72b   :  { %v4332_v39 = vadd.f32 %v4328_v20, %v4312_v33 }
 0x72d   :  { %v4344_v35 = vpop.permute.xlu0 %4343 }
 0x72e   :  { %v4382_v9 = vpop.permute.xlu1 %4381  ;;  %v4347_v3 = vsel %vm9636_vm11, %v4342_v46, %v4344_v35  ;;  %v4348_v30 = vsel %vm9637_vm12, %v4344_v35, %v4346_v4 }
 0x72f   :  { %v4351_v54 = vadd.f32 %v4347_v3, %v4331_v44  ;;  %v4352_v59 = vadd.f32 %v4348_v30, %v4332_v39 }
 0x731   :  { %v4362_v25 = vpop.permute.xlu0 %4361 }
 0x732   :  { %v4386_v41 = vpop.permute.xlu1 %4385  ;;  %v4367_v36 = vsel %vm9638_vm15, %v4362_v25, %v4364_v17 }
 0x733   :  { %v4371_v18 = vadd.f32 %v4367_v36, %v4351_v54 }
 0x735   :  { %v4366_v63 = vpop.permute.xlu0 %4365 }
 0x736   :  { %v4404_v1 = vpop.permute.xlu1 %4403  ;;  %v4368_v62 = vsel %vm9639_vm14, %v4364_v17, %v4366_v63 }
 0x737   :  { %v4372_v61 = vadd.f32 %v4368_v62, %v4352_v59  ;;  %v9651_v62 = vmov 2475754826  }
 0x739   :  { %v4384_v15 = vpop.permute.xlu0 %4383 }
 0x73a   :  { %v4422_v57 = vpop.permute.xlu1 %4421  ;;  %v4387_v37 = vsel %vm9640_vm10, %v4382_v9, %v4384_v15  ;;  %v4388_v13 = vsel %vm9641_vm13, %v4384_v15, %v4386_v41  ;;  %v9648_v15 = vmov 920167782  }
 0x73b   :  { %v4391_v48 = vadd.f32 %v4387_v37, %v4371_v18  ;;  %v4392_v19 = vadd.f32 %v4388_v13, %v4372_v61  ;;  %v9652_v13 = vmov 2131351028  }
 0x73d   :  { %v4402_v23 = vpop.permute.xlu0 %4401 }
 0x73e   :  { %v4407_v46 = vsel %vm9642_vm7, %v4402_v23, %v4404_v1  ;;  %v4426_v17 = vpop.permute.xlu1 %4425  ;;  %v9650_v23 = vmov 683565275  }
 0x73f   :  { %v4411_v28 = vadd.f32 %v4407_v46, %v4391_v48 }
 0x741   :  { %v4406_v11 = vpop.permute.xlu0 %4405 }
 0x742   :  { %v4408_v4 = vsel %vm9643_vm0, %v4404_v1, %v4406_v11 }
 0x743   :  { %v4412_v0 = vadd.f32 %v4408_v4, %v4392_v19 }
 0x745   :  { %v4424_v29 = vpop.permute.xlu0 %4423 }
 0x746   :  { %v4427_v34 = vsel %vm9644_vm1, %v4422_v57, %v4424_v29  ;;  %v4428_v2 = vsel %vm9645_vm2, %v4424_v29, %v4426_v17 }
 0x747   :  { %v4431_v35 = vadd.f32 %v4427_v34, %v4411_v28  ;;  %v4432_v21 = vadd.f32 %v4428_v2, %v4412_v0 }
 0x749   :  { %v8701_v9 = vmul.f32 %v4431_v35, %v9646_v45  ;;  %v8704_v14 = vmul.f32 %v4432_v21, %v9646_v45 }
 0x74b   :  { %v4438_v12 = vand.u32 2139095040, %v8701_v9  ;;  %v4541_v38 = vand.u32 2139095040, %v8704_v14  ;;  %v4435_v56 = vand.u32 2147483647, %v8701_v9  ;;  %v4538_v60 = vand.u32 2147483647, %v8704_v14 }
 0x74c   :  { %vm4437_vm2 = vcmp.lt.s32.totalorder %v8701_v9, 0 }
 0x74d   :  { %v4439_v22 = vshrl.u32 %v4438_v12, 23  ;;  %v4542_v24 = vshrl.u32 %v4541_v38, 23  ;;  %v4442_v5 = vand.u32 8388607, %v4435_v56  ;;  %v8714_v49 = vand.u32 8388607, %v4538_v60 }
 0x74f   :  { %v5132_v25 = vadd.s32 4294967169, %v4439_v22  ;;  %v5136_v31 = vadd.s32 4294967169, %v4542_v24  ;;  %v4443_v32 = vor.u32 8388608, %v4442_v5  ;;  %v4546_v40 = vor.u32 8388608, %v8714_v49 }
 0x751   :  { %v4445_v6 = vadd.s32 1, %v5132_v25  ;;  %v4548_v41 = vadd.s32 1, %v5136_v31  ;;  %v8718_v51 = vshll.u32 %v4443_v32, 8 }
 0x753   :  { %vm4446_vm3 = vcmp.gt.s32.totalorder %v4445_v6, 0  ;;  %vm4549_vm4 = vcmp.gt.s32.totalorder %v4548_v41, 0 }
 0x754   :  { %v4447_v42 = vsel %vm4446_vm3, %v4445_v6, 0  ;;  %v4550_v50 = vsel %vm4549_vm4, %v4548_v41, 0  ;;  %vm4436_vm3 = vcmp.le.f32.partialorder %v4435_v56, 0.7853982  ;;  %vm4540_vm4 = vcmp.lt.s32.totalorder %v8704_v14, 0 }
 0x755   :  { %v4448_v63 = vshrl.u32 %v4447_v42, 5  ;;  %v4449_v27 = vand.u32 31, %v4447_v42  ;;  %v4552_v10 = vand.u32 31, %v4550_v50  ;;  %v8716_v8 = vshrl.u32 %v4550_v50, 5 }
 0x757   :  { %v4450_v52 = vsub.s32 32, %v4449_v27  ;;  %v4461_v43 = vshll.u32 %v9647_v16, %v4449_v27  ;;  %v4464_v1 = vshll.u32 %v9648_v15, %v4449_v27  ;;  %vm4470_vm5 = vcmp.lt.s32.totalorder %v4448_v63, 4 }
 0x758   :  { %v4553_v7 = vsub.s32 32, %v4552_v10  ;;  %v4564_v3 = vshll.u32 %v9647_v16, %v4552_v10  ;;  %v4567_v30 = vshll.u32 %v9648_v15, %v4552_v10  ;;  %v4452_v36 = vshll.u32 %v9650_v23, %v4449_v27 }
 0x759   :  { %v4462_v20 = vshrl.u32 %v9648_v15, %v4450_v52  ;;  %v4465_v33 = vshrl.u32 %v9649_v26, %v4450_v52  ;;  %v4453_v54 = vshrl.u32 %v9651_v62, %v4450_v52  ;;  %v4455_v37 = vshll.u32 %v9651_v62, %v4449_v27 }
 0x75a   :  { %v4565_v44 = vshrl.u32 %v9648_v15, %v4553_v7  ;;  %v4568_v39 = vshrl.u32 %v9649_v26, %v4553_v7  ;;  %v4456_v18 = vshrl.u32 %v9652_v13, %v4450_v52  ;;  %vm4573_vm6 = vcmp.lt.s32.totalorder %v8716_v8, 4 }
 0x75b   :  { %v4463_v59 = vor.u32 %v4462_v20, %v4461_v43  ;;  %v4466_v57 = vor.u32 %v4465_v33, %v4464_v1  ;;  %v4454_v61 = vor.u32 %v4453_v54, %v4452_v36  ;;  %v4458_v11 = vshll.u32 %v9652_v13, %v4449_v27 }
 0x75c   :  { %v4459_v46 = vshrl.u32 %v9647_v16, %v4450_v52  ;;  %v4451_v19 = vshrl.u32 %v9650_v23, %v4450_v52  ;;  %v4457_v28 = vor.u32 %v4456_v18, %v4455_v37  ;;  %v4566_v0 = vor.u32 %v4565_v44, %v4564_v3 }
 0x75d   :  { %v4476_v4 = vsel %vm4470_vm5, %v4463_v59, 920167782  ;;  %v4480_v48 = vsel %vm4470_vm5, %v4466_v57, 1326507024  ;;  %v4569_v29 = vor.u32 %v4568_v39, %v4567_v30  ;;  %vm4467_vm9 = vcmp.lt.s32.totalorder %v4448_v63, 1 }
 0x75e   :  { %v4460_v17 = vor.u32 %v4459_v46, %v4458_v11  ;;  %vm4468_vm11 = vcmp.lt.s32.totalorder %v4448_v63, 2  ;;  %vm4469_vm12 = vcmp.lt.s32.totalorder %v4448_v63, 3  ;;  %v4471_v34 = vsel %vm4467_vm9, %v4451_v19, %v4454_v61 }
 0x75f   :  { %v4475_v2 = vsel %vm4467_vm9, %v4454_v61, %v4457_v28  ;;  %v4481_v12 = vsel %vm4469_vm12, %v4463_v59, %v4480_v48  ;;  %v4555_v25 = vshll.u32 %v9650_v23, %v4552_v10  ;;  %v4556_v41 = vshrl.u32 %v9651_v62, %v4553_v7 }
 0x760   :  { %v4472_v35 = vsel %vm4470_vm5, %v4460_v17, 2102212464  ;;  %v4477_v21 = vsel %vm4469_vm12, %v4460_v17, %v4476_v4  ;;  %v4479_v45 = vsel %vm4467_vm9, %v4457_v28, %v4460_v17  ;;  %v4583_v32 = vsel %vm4573_vm6, %v4569_v29, 1326507024 }
 0x761   :  { %v4473_v38 = vsel %vm4469_vm12, %v4457_v28, %v4472_v35  ;;  %v4478_v22 = vsel %vm4468_vm11, %v4475_v2, %v4477_v21  ;;  %v4482_v24 = vsel %vm4468_vm11, %v4479_v45, %v4481_v12  ;;  %v4558_v50 = vshll.u32 %v9651_v62, %v4552_v10 }
 0x762   :  { %v4474_v31 = vsel %vm4468_vm11, %v4471_v34, %v4473_v38  ;;  %v8742_v5 = vmul.u32.u64.low %v8718_v51, %v4482_v24  ;;  %v8743_v6 = vmul.u32.u64.high %v8718_v51, %v4482_v24, %v8742_v5  ;;  %v4557_v63 = vor.u32 %v4556_v41, %v4555_v25 }
 0x763   :  { %v8749_v49 = vmul.u32.u64.low %v8718_v51, %v4478_v22  ;;  %v8750_v42 = vmul.u32.u64.high %v8718_v51, %v4478_v22, %v8749_v49  ;;  %v4559_v27 = vshrl.u32 %v9652_v13, %v4553_v7  ;;  %v4561_v52 = vshll.u32 %v9652_v13, %v4552_v10 }
 0x764   :  { %v4562_v43 = vshrl.u32 %v9647_v16, %v4553_v7  ;;  %v4579_v15 = vsel %vm4573_vm6, %v4566_v0, 920167782  ;;  %v4490_v1 = vmul.u32 %v8718_v51, %v4474_v31  ;;  %v4554_v20 = vshrl.u32 %v9650_v23, %v4553_v7 }
 0x765   :  { %v4586_v26 = vshll.u32 %v4546_v40, 8  ;;  %vm4492_vm15 = vc.u32 %v8743_v6, %v8749_v49  ;;  %v4560_v33 = vor.u32 %v4559_v27, %v4558_v50  ;;  %vm4572_vm14 = vcmp.lt.s32.totalorder %v8716_v8, 3 }
 0x766   :  { %v4563_v3 = vor.u32 %v4562_v43, %v4561_v52  ;;  %v4493_v30 = vadd.s32 1, %v8750_v42  ;;  %vm4570_vm10 = vcmp.lt.s32.totalorder %v8716_v8, 1  ;;  %vm4571_vm13 = vcmp.lt.s32.totalorder %v8716_v8, 2 }
 0x767   :  { %v4584_v10 = vsel %vm4572_vm14, %v4566_v0, %v4583_v32  ;;  %v4578_v51 = vsel %vm4570_vm10, %v4557_v63, %v4560_v33  ;;  %v4574_v39 = vsel %vm4570_vm10, %v4554_v20, %v4557_v63  ;;  %v4491_v22 = vadd.s32 %v8749_v49, %v8743_v6 }
 0x768   :  { %v4575_v16 = vsel %vm4573_vm6, %v4563_v3, 2102212464  ;;  %v4580_v44 = vsel %vm4572_vm14, %v4563_v3, %v4579_v15  ;;  %v4582_v7 = vsel %vm4570_vm10, %v4560_v33, %v4563_v3  ;;  %v4494_v40 = vsel %vm4492_vm15, %v4493_v30, %v8750_v42 }
 0x769   :  { %v4581_v23 = vsel %vm4571_vm13, %v4578_v51, %v4580_v44  ;;  %v4585_v36 = vsel %vm4571_vm13, %v4582_v7, %v4584_v10  ;;  %v4495_v62 = vadd.s32 %v4494_v40, %v4490_v1  ;;  %v4576_v54 = vsel %vm4572_vm14, %v4560_v33, %v4575_v16 }
 0x76a   :  { %v8772_v59 = vmul.u32.u64.low %v4586_v26, %v4585_v36  ;;  %v8773_v57 = vmul.u32.u64.high %v4586_v26, %v4585_v36, %v8772_v59  ;;  %v8775_v37 = vmul.u32.u64.low %v4586_v26, %v4581_v23  ;;  %v8776_v13 = vmul.u32.u64.high %v4586_v26, %v4581_v23, %v8775_v37 }
 0x76b   :  { %v4496_v18 = vadd.s32 536870912, %v4495_v62  ;;  %v4577_v61 = vsel %vm4571_vm13, %v4574_v39, %v4576_v54  ;;  %vm4539_vm5 = vcmp.le.f32.partialorder %v4538_v60, 0.7853982  ;;  %vm9653_vm6 = vcmask 982016  }
 0x76c   :  { %vm4595_vm7 = vc.u32 %v8773_v57, %v8775_v37  ;;  %v4596_v46 = vadd.s32 1, %v8776_v13  ;;  %v4593_v48 = vmul.u32 %v4586_v26, %v4577_v61  ;;  %v4594_v20 = vadd.s32 %v8775_v37, %v8773_v57  ;;  %v4868_v61 = vpop.permute.xlu1 %4867 }
 0x76d   :  { %v4497_v11 = vshrl.u32 %v4496_v18, 30  ;;  %vm4527_vm13 = vweird.f32 %v8701_v9 }
 0x76e   :  { %v4597_v19 = vsel %vm4595_vm7, %v4596_v46, %v8776_v13  ;;  %v4866_v13 = vpop.permute.xlu0 %4865  ;;  %vm9655_vm7 = vmmov %vm9653_vm6 }
 0x76f   :  { %v4498_v4 = vshll.u32 %v4497_v11, 30  ;;  %v4598_v0 = vadd.s32 %v4597_v19, %v4593_v48  ;;  %v4521_v49 = vsub.s32 4, %v4497_v11  ;;  %v4871_v46 = vsel %vm9653_vm6, %v4866_v13, %v4868_v61 }
 0x770   :  { %vm4630_vm6 = vweird.f32 %v8704_v14 }
 0x771   :  { %v4499_v28 = vsub.s32 %v4495_v62, %v4498_v4  ;;  %v4599_v17 = vadd.s32 536870912, %v4598_v0  ;;  %v4522_v40 = vsel %vm4437_vm2, %v4521_v49, %v4497_v11 }
 0x772   :  { %v4524_v36 = vsel %vm4436_vm3, 0, %v4522_v40 }
 0x773   :  { %v4501_v29 = vsub.s32 0, %v4499_v28  ;;  %v4600_v2 = vshrl.u32 %v4599_v17, 30  ;;  %v4734_v37 = vadd.s32 3, %v4524_v36  ;;  %v4528_v4 = vand.u32 3, %v4524_v36 }
 0x774   :  { %v4875_v17 = vrot.slane %v4871_v46, 4 }
 0x775   :  { %v5133_v34 = vmin.u32 %v4501_v29, %v4499_v28  ;;  %v4601_v21 = vshll.u32 %v4600_v2, 30  ;;  %v4624_v57 = vsub.s32 4, %v4600_v2  ;;  %v4735_v48 = vand.u32 3, %v4734_v37 }
 0x776   :  { %vm4530_vm9 = vcmp.eq.s32.totalorder %v4528_v4, 0  ;;  %vm4533_vm11 = vcmp.eq.s32.totalorder %v4528_v4, 2  ;;  %vm4529_vm14 = vcmp.lt.s32.totalorder %v4528_v4, 2 }
 0x777   :  { %v4503_v35 = vclz %v5133_v34  ;;  %v4602_v8 = vsub.s32 %v4598_v0, %v4601_v21  ;;  %v4625_v11 = vsel %vm4540_vm4, %v4624_v57, %v4600_v2  ;;  %vm4740_vm12 = vcmp.eq.s32.totalorder %v4735_v48, 2 }
 0x778   :  { %v4627_v0 = vsel %vm4539_vm5, 0, %v4625_v11  ;;  %vm4737_vm15 = vcmp.eq.s32.totalorder %v4735_v48, 0  ;;  %vm4736_vm10 = vcmp.lt.s32.totalorder %v4735_v48, 2 }
 0x779   :  { %v5134_v45 = vadd.s32 4294967294, %v4503_v35  ;;  %v4604_v38 = vsub.s32 0, %v4602_v8  ;;  %v4838_v21 = vadd.s32 3, %v4627_v0 }
 0x77b   :  { %vm5135_vm0 = vcmp.lt.s32.totalorder %v5134_v45, 0  ;;  %v5137_v31 = vmin.u32 %v4604_v38, %v4602_v8 }
 0x77c   :  { %v4506_v12 = vsel %vm5135_vm0, 0, %v5134_v45 }
 0x77d   :  { %v4507_v24 = vsub.s32 32, %v4506_v12  ;;  %v4511_v25 = vsub.s32 4294967266, %v4506_v12  ;;  %v4508_v5 = vshll.u32 %v4499_v28, %v4506_v12  ;;  %v4606_v42 = vclz %v5137_v31  ;;  %v4870_v12 = vpop.permute.xlu0 %4869 }
 0x77e   :  { %v4877_v31 = vmul.f32 %v4875_v17, %v9626_v58 }
 0x77f   :  { %v4509_v41 = vshrl.u32 %v4491_v22, %v4507_v24  ;;  %v4512_v32 = vadd.s32 127, %v4511_v25  ;;  %v5138_v27 = vadd.s32 4294967294, %v4606_v42 }
 0x781   :  { %v4510_v50 = vor.u32 %v4509_v41, %v4508_v5  ;;  %v4513_v63 = vshll.u32 %v4512_v32, 23  ;;  %vm5139_vm1 = vcmp.lt.s32.totalorder %v5138_v27, 0  ;;  %v4631_v5 = vand.u32 3, %v4627_v0 }
 0x782   :  { %v4609_v1 = vsel %vm5139_vm1, 0, %v5138_v27  ;;  %v4839_v41 = vand.u32 3, %v4838_v21  ;;  %v4872_v32 = vsel %vm9655_vm7, %v4868_v61, %v4870_v12 }
 0x783   :  { %v4514_v52 = vor.u32 4788187, %v4513_v63  ;;  %v4517_v15 = vcvt.s32.f32 %v4510_v50  ;;  %v4610_v26 = vsub.s32 32, %v4609_v1  ;;  %v4614_v33 = vsub.s32 4294967266, %v4609_v1 }
 0x784   :  { %v4611_v3 = vshll.u32 %v4602_v8, %v4609_v1  ;;  %vm4636_vm0 = vcmp.eq.s32.totalorder %v4631_v5, 2  ;;  %vm4844_vm1 = vcmp.eq.s32.totalorder %v4839_v41, 2 }
 0x785   :  { %v4515_v43 = vand.u32 2147483647, %v4514_v52  ;;  %v4612_v30 = vshrl.u32 %v4594_v20, %v4610_v26  ;;  %v4615_v10 = vadd.s32 127, %v4614_v33  ;;  %v4876_v52 = vrot.slane %v4872_v32, 4 }
 0x787   :  { %v4518_v6 = vmul.f32 %v4517_v15, %v4515_v43  ;;  %v4613_v51 = vor.u32 %v4612_v30, %v4611_v3  ;;  %v4616_v44 = vshll.u32 %v4615_v10, 23  ;;  %v4878_v3 = vmul.f32 %v4876_v52, %v9626_v58 }
 0x789   :  { %v4519_v16 = vxor.u32 2147483648, %v4518_v6  ;;  %v4617_v23 = vor.u32 4788187, %v4616_v44  ;;  %v4620_v54 = vcvt.s32.f32 %v4613_v51 }
 0x78b   :  { %v4520_v7 = vsel %vm4437_vm2, %v4519_v16, %v4518_v6  ;;  %v4618_v62 = vand.u32 2147483647, %v4617_v23  ;;  %vm4633_vm2 = vcmp.eq.s32.totalorder %v4631_v5, 0 }
 0x78c   :  { %v4523_v39 = vsel %vm4436_vm3, %v8701_v9, %v4520_v7  ;;  %vm4841_vm3 = vcmp.eq.s32.totalorder %v4839_v41, 0 }
 0x78d   :  { %5227 = vcosq.f32 %v4523_v39  ;;  %v4621_v59 = vmul.f32 %v4620_v54, %v4618_v62 }
 0x78e   :  { %5229 = vsinq.f32 %v4523_v39 }
 0x78f   :  { %v4622_v18 = vxor.u32 2147483648, %v4621_v59 }
 0x791   :  { %v4623_v56 = vsel %vm4540_vm4, %v4622_v18, %v4621_v59  ;;  %vm4632_vm4 = vcmp.lt.s32.totalorder %v4631_v5, 2 }
 0x792   :  { %v4626_v19 = vsel %vm4539_vm5, %v8704_v14, %v4623_v56  ;;  %vm4840_vm5 = vcmp.lt.s32.totalorder %v4839_v41, 2 }
 0x793   :  { %5231 = vcosq.f32 %v4626_v19 }
 0x794   :  { %5233 = vsinq.f32 %v4626_v19 }
 0x797   :  { %v5228_v28 = vpop.eup %5227 }
 0x798   :  { %v5230_v29 = vpop.eup %5229  ;;  %v4534_v34 = vxor.u32 2147483648, %v5228_v28 }
 0x799   :  { %v4531_v35 = vxor.u32 2147483648, %v5230_v29 }
 0x79a   :  { %v4535_v60 = vsel %vm4533_vm11, %v4534_v34, %v5230_v29  ;;  %v4742_v2 = vsel %vm4740_vm12, %v4534_v34, %v5230_v29  ;;  %vm9657_vm11 = vmmov %vm9655_vm7 }
 0x79b   :  { %v4532_v45 = vsel %vm4530_vm9, %v5228_v28, %v4531_v35  ;;  %v4739_v8 = vsel %vm4737_vm15, %v5228_v28, %v4531_v35  ;;  %vm9656_vm9 = vmmov %vm9655_vm7 }
 0x79c   :  { %v4536_v38 = vsel %vm4529_vm14, %v4532_v45, %v4535_v60  ;;  %v4743_v22 = vsel %vm4736_vm10, %v4739_v8, %v4742_v2 }
 0x79d   :  { %v4537_v24 = vsel %vm4527_vm13, nan, %v4536_v38  ;;  %v4744_v25 = vsel %vm4527_vm13, nan, %v4743_v22  ;;  %v5232_v42 = vpop.eup %5231 }
 0x79e   :  { %4851 = vrot.lane.b32.xlu1 %v4537_v24, %s9654_s10  ;;  %v4879_v50 = vmul.f32 %v4877_v31, %v4744_v25  ;;  %v5234_v63 = vpop.eup %5233  ;;  %v4637_v27 = vxor.u32 2147483648, %v5232_v42 }
 0x79f   :  { %v4634_v43 = vxor.u32 2147483648, %v5234_v63 }
 0x7a0   :  { %v4638_v9 = vsel %vm4636_vm0, %v4637_v27, %v5234_v63  ;;  %v4846_v15 = vsel %vm4844_vm1, %v4637_v27, %v5234_v63 }
 0x7a1   :  { %v4635_v1 = vsel %vm4633_vm2, %v5232_v42, %v4634_v43  ;;  %v4843_v20 = vsel %vm4841_vm3, %v5232_v42, %v4634_v43 }
 0x7a2   :  { %4883 = vrot.lane.b32.xlu1 %v4879_v50, %s9654_s10  ;;  %v4639_v26 = vsel %vm4632_vm4, %v4635_v1, %v4638_v9  ;;  %v4847_v33 = vsel %vm4840_vm5, %v4843_v20, %v4846_v15 }
 0x7a3   :  { %v4640_v6 = vsel %vm4630_vm6, nan, %v4639_v26  ;;  %v4848_v49 = vsel %vm4630_vm6, nan, %v4847_v33 }
 0x7a4   :  { %4853 = vrot.lane.b32.xlu0 %v4640_v6, %s9654_s10  ;;  %v4880_v30 = vmul.f32 %v4878_v3, %v4848_v49 }
 0x7a8   :  { %4885 = vrot.lane.b32.xlu0 %v4880_v30, %s9654_s10 }
 0x810   :  { %v4852_v10 = vpop.permute.xlu1 %4851 }
 0x811   :  { %v4859_v16 = vmul.f32 %v4852_v10, %v8545_v55 }
 0x814   :  { %v4884_v51 = vpop.permute.xlu1 %4883 }
 0x815   :  { %v4891_v44 = vadd.f32 %v4884_v51, %v4859_v16 }
 0x816   :  { %v4854_v7 = vpop.permute.xlu0 %4853 }
 0x817   :  { %4897 = vrot.lane.b32.xlu1 %v4891_v44, %s9287_s1  ;;  %v4855_v14 = vsel %vm2588_vm8, %v4852_v10, %v4854_v7  ;;  %v4861_v40 = vmul.f32 %v4854_v7, %v8543_v53 }
 0x818   :  { %v4860_v39 = vmul.f32 %v4855_v14, %v8547_v47 }
 0x81a   :  { %v4886_v58 = vpop.permute.xlu0 %4885 }
 0x81b   :  { %v4887_v23 = vsel %vm2588_vm8, %v4884_v51, %v4886_v58  ;;  %v4893_v36 = vadd.f32 %v4886_v58, %v4861_v40 }
 0x81c   :  { %v4892_v62 = vadd.f32 %v4887_v23, %v4860_v39 }
 0x81d   :  { %4901 = vrot.lane.b32.xlu1 %v4893_v36, %s9287_s1 }
 0x81e   :  { %4899 = vrot.lane.b32.xlu0 %v4892_v62, %s9287_s1 }
 0x889   :  { %v4898_v55 = vpop.permute.xlu1 %4897 }
 0x88f   :  { %v4902_v54 = vpop.permute.xlu1 %4901 }
 0x890   :  { %v4900_v59 = vpop.permute.xlu0 %4899 }
 0x891   :  { %v4903_v57 = vsel %vm9656_vm9, %v4898_v55, %v4900_v59  ;;  %v4904_v53 = vsel %vm9657_vm11, %v4900_v59, %v4902_v54 }
 0x892   :  { %4907 = vst [vmem:[#allocation2] sm:$0xff] %v4903_v57  ;;  %4908 = vst [vmem:[#allocation2 + $0x8] sm:$0xff] %v4904_v53 }
 0x893   :  { %4911 = vst [vmem:[#allocation11] sm:$0xff] %v4903_v57  ;;  %4912 = vst [vmem:[#allocation11 + $0x8] sm:$0xff] %v4904_v53 }
 0x894   :  { %5280 = shalt.err (!%p5277_p13)
}
 0x895   :  { %s5281_s18 = scalar_lea.hbm %s8830_s5, 256 }
 0x896   :  { %p5282_p0 = scmp.ne.s32.totalorder %s8830_s5, %s5281_s18  ;;  %p5285_p1 = scmp.lt.u32.totalorder %s5281_s18, %s8830_s5 }
 0x898   :  { %p5287_p2 = pnand %p5285_p1, %p5282_p0 }
 0x89a   :  { %5290 = shalt.err (!%p5287_p2)
}
 0x89b   :  { %4922 = dma.vmem_to_hbm [thread:$0]  %s4920_s0, 256, %s8830_s5, [#allocation6]  }
 0x89c   :  { %5297 = dma.done.wait [#allocation6], 256  }
 0x89d   :  { %5298 = vsyncadd [#allocation6], 4294967040 }
 0x89e   :  { %4926 = vsyncpa [#allocation6], 1 }
 0x89f   :  { %4927 = vsyncpa [#allocation7], 1 }
 0x8a0   :  { %4928 = vsyncpa [#allocation9], 1 }
 0x8a1   :  { %4929 = vsyncmov [#allocation4] }
 0x8a4   :  { %s4930_s17 = vpop.sfrf %4929 }
 0x8a5   :  { %p5148_p3 = scmp.ne.s32.totalorder %s4930_s17, 0 }
 0x8a7   :  { %4934 = shalt.err (%p5148_p3)  }

</bundles_post_ra>
